<compile_context>
chip_gen: v7x
topology: tpu7x:2x2x1
jax: 0.10.0
libtpu: 0.0.40
codegen_flags: <defaults>
</compile_context>

<pallas_src>
import functools

import jax
import jax.numpy as jnp
from jax.experimental import pallas as pl
from jax.experimental.pallas import tpu as pltpu


# ----------------------------------------------------------------------------- kernel
def _lstm_kernel(x_ref, w_ih0_ref, w_ihr_ref, w_hh_ref, b_ref, w_fc_ref, b_fc_ref,
                 out_ref, seq_ref, proj_ref, *, batch, batch_padded, timesteps,
                 num_layers):
    """One LSTM layer per grid step (grid=(L,)), stacked via persistent scratch.

    x_ref    : (T*BP, DP)  bf16  time-major flattened input (row = t*BP + b)
    w_ih0_ref: (DP, G)     bf16  layer-0 input->gates weights (i|f|o|g, padded)
    w_ihr_ref: (HP, G)     bf16  this layer's input->gates weights (layers >= 1)
    w_hh_ref : (HP, G)     bf16  this layer's hidden->gates weights
    b_ref    : (1, G)      f32   this layer's b_ih + b_hh (reordered + padded)
    w_fc_ref : (HP, 1)     f32   final linear weight (pad rows zero)
    b_fc_ref : (1, 1)      f32   final linear bias
    out_ref  : (B, 1)      f32   sigmoid(fc(h_T)) -- written on the last layer only
    seq_ref  : (T*BP, HP)  f32   scratch: this layer's output sequence (carried)
    proj_ref : (T*BP, G)   f32   scratch: hoisted input projection (+ bias)
    """
    B, BP, T, L = batch, batch_padded, timesteps, num_layers
    HP, G = w_hh_ref.shape                      # G == 4 * HP
    layer = pl.program_id(0)

    # --- hoisted input projection: one big MXU pass per layer, bias folded in --
    @pl.when(layer == 0)
    def _():
        proj_ref[...] = (jnp.dot(x_ref[...], w_ih0_ref[...],
                                 preferred_element_type=jnp.float32)
                         + b_ref[...])

    @pl.when(layer > 0)
    def _():
        # seq_ref holds the previous layer's outputs (written last grid step).
        proj_ref[...] = (jnp.dot(seq_ref[...].astype(jnp.bfloat16), w_ihr_ref[...],
                                 preferred_element_type=jnp.float32)
                         + b_ref[...])

    h = jnp.zeros((BP, HP), jnp.float32)
    c = jnp.zeros((BP, HP), jnp.float32)

    for t in range(T):                          # static -> fully unrolled recurrence
        r0 = t * BP
        # TODO(synk): on v6e/v7x, keeping w_hh resident in MXU staging across the
        # 8 steps (pltpu.matmul_push_rhs / matmul_acc_lhs) would avoid re-streaming
        # the RHS every step; left as jnp.dot for robustness.
        gates = (proj_ref[pl.ds(r0, BP), :]
                 + jnp.dot(h.astype(jnp.bfloat16), w_hh_ref[...],
                           preferred_element_type=jnp.float32))   # (BP, G), i|f|o|g
        sg = jax.nn.sigmoid(gates[:, :3 * HP])  # one EUP slab for i, f, o
        i_g = sg[:, 0 * HP:1 * HP]
        f_g = sg[:, 1 * HP:2 * HP]
        o_g = sg[:, 2 * HP:3 * HP]
        g_g = jnp.tanh(gates[:, 3 * HP:])
        c = f_g * c + i_g * g_g
        h = o_g * jnp.tanh(c)
        seq_ref[pl.ds(r0, BP), :] = h           # whole-tile (8, HP) f32 store

    @pl.when(layer == L - 1)
    def _():
        logits = jnp.dot(h, w_fc_ref[...],
                         preferred_element_type=jnp.float32) + b_fc_ref[...]
        out_ref[...] = jax.nn.sigmoid(logits[:B, :])


# ----------------------------------------------------------------------------- wrapper
@jax.jit
def fall_detection_lstm(x, w_ih0, w_ihr, w_hh, b, w_fc, b_fc):
    """x: (B, T, D) batch-first like the PyTorch module. Returns (B, 1) f32."""
    B, T, D = x.shape
    L, HP, G = w_hh.shape
    DP = w_ih0.shape[0]
    BP = ((B + 7) // 8) * 8                     # pad batch rows to a full sublane tile

    # Time-major, flattened rows ordered (t, b); batch rows padded to BP with zeros
    # and feature dim padded to DP so all kernel accesses are tile-aligned.
    xt = jnp.transpose(x, (1, 0, 2)).astype(jnp.float32)            # (T, B, D)
    xt = jnp.pad(xt, ((0, 0), (0, BP - B), (0, DP - D)))
    x_flat = xt.reshape(T * BP, DP).astype(jnp.bfloat16)

    flops = int(2 * T * BP * DP * G                 # layer-0 input projection
                + 2 * (L - 1) * T * BP * HP * G     # other layers' input projections
                + 2 * L * T * BP * HP * G           # recurrent h @ W_hh
                + 2 * BP * HP)                      # fc head
    transcendentals = int(L * T * BP * 5 * HP + B)
    bytes_accessed = int(x_flat.size * 2 + w_ih0.size * 2 + w_ihr.size * 2
                         + w_hh.size * 2 + b.size * 4 + w_fc.size * 4
                         + b_fc.size * 4 + 4 * B)

    kernel = functools.partial(_lstm_kernel, batch=B, batch_padded=BP,
                               timesteps=T, num_layers=L)

    grid_spec = pltpu.PrefetchScalarGridSpec(
        num_scalar_prefetch=0,
        grid=(L,),
        in_specs=[
            pl.BlockSpec((T * BP, DP), lambda l: (0, 0)),                       # x
            pl.BlockSpec((DP, G), lambda l: (0, 0)),                            # w_ih0
            pl.BlockSpec((None, HP, G), lambda l: (jnp.maximum(l - 1, 0), 0, 0)),  # w_ihr
            pl.BlockSpec((None, HP, G), lambda l: (l, 0, 0)),                   # w_hh
            pl.BlockSpec((None, 1, G), lambda l: (l, 0, 0)),                    # b
            pl.BlockSpec((HP, 1), lambda l: (0, 0)),                            # w_fc
            pl.BlockSpec((1, 1), lambda l: (0, 0)),                             # b_fc
        ],
        out_specs=pl.BlockSpec((B, 1), lambda l: (0, 0)),
        scratch_shapes=[pltpu.VMEM((T * BP, HP), jnp.float32),                  # seq
                        pltpu.VMEM((T * BP, G), jnp.float32)],                  # proj
    )

    return pl.pallas_call(
        kernel,
        out_shape=jax.ShapeDtypeStruct((B, 1), jnp.float32),
        grid_spec=grid_spec,
        compiler_params=pltpu.CompilerParams(
            dimension_semantics=("arbitrary",),
            vmem_limit_bytes=16 * 1024 * 1024),
        cost_estimate=pl.CostEstimate(flops=flops,
                                      transcendentals=transcendentals,
                                      bytes_accessed=bytes_accessed),
    )(x_flat, w_ih0, w_ihr, w_hh, b, w_fc, b_fc)


# ----------------------------------------------------------------------------- params
def init_params(key, input_size, hidden_size, num_layers):
    """PyTorch-style LSTM params, U(-1/sqrt(H), 1/sqrt(H)), PyTorch gate order i|f|g|o."""
    H = hidden_size
    k = 1.0 / jnp.sqrt(jnp.float32(H))
    keys = jax.random.split(key, 4 * num_layers + 2)
    u = lambda kk, shape: jax.random.uniform(kk, shape, jnp.float32, -k, k)
    w_ih, w_hh, b_ih, b_hh = [], [], [], []
    for l in range(num_layers):
        in_dim = input_size if l == 0 else H
        w_ih.append(u(keys[4 * l + 0], (4 * H, in_dim)))
        w_hh.append(u(keys[4 * l + 1], (4 * H, H)))
        b_ih.append(u(keys[4 * l + 2], (4 * H,)))
        b_hh.append(u(keys[4 * l + 3], (4 * H,)))
    fc_w = u(keys[-2], (1, H))
    fc_b = u(keys[-1], (1,))
    return w_ih, w_hh, b_ih, b_hh, fc_w, fc_b


def prepare_params(w_ih, w_hh, b_ih, b_hh, fc_w, fc_b):
    """Repack PyTorch-style params into the kernel layout.

    Gate columns permuted i|f|g|o -> i|f|o|g, each gate block zero-padded from H
    to HP=round_up(H,128); input rows of W_ih / W_hh zero-padded to DP / HP.  The
    zero padding keeps padded hidden/cell columns exactly 0 through the whole
    recurrence.  Weight matrices are cast to bf16 (MXU-native, half the DMA);
    biases / fc stay f32.
    """
    L = len(w_ih)
    H = w_hh[0].shape[1]
    D = w_ih[0].shape[1]
    HP = max(128, ((H + 127) // 128) * 128)
    DP = max(128, ((D + 127) // 128) * 128)

    def reorder_pad_cols(w):                       # (..., 4H) -> (..., 4*HP), i|f|o|g
        i, f, g, o = jnp.split(w, 4, axis=-1)
        pad = [(0, 0)] * (w.ndim - 1) + [(0, HP - H)]
        p = lambda a: jnp.pad(a, pad)
        return jnp.concatenate([p(i), p(f), p(o), p(g)], axis=-1)

    def pad_rows(w, rows):                         # (r, G) -> (rows, G)
        return jnp.pad(w, ((0, rows - w.shape[0]), (0, 0)))

    w_ih0 = pad_rows(reorder_pad_cols(w_ih[0].T), DP).astype(jnp.bfloat16)       # (DP, 4HP)
    w_ihr = jnp.stack([pad_rows(reorder_pad_cols(w_ih[l].T), HP)
                       for l in range(1, L)]).astype(jnp.bfloat16)               # (L-1, HP, 4HP)
    w_hh_p = jnp.stack([pad_rows(reorder_pad_cols(w_hh[l].T), HP)
                        for l in range(L)]).astype(jnp.bfloat16)                 # (L, HP, 4HP)
    b_p = jnp.stack([reorder_pad_cols(b_ih[l] + b_hh[l])[None, :]
                     for l in range(L)]).astype(jnp.float32)                     # (L, 1, 4HP)
    w_fc_p = jnp.pad(fc_w.T, ((0, HP - H), (0, 0))).astype(jnp.float32)          # (HP, 1)
    b_fc_p = fc_b.reshape(1, 1).astype(jnp.float32)
    return w_ih0, w_ihr, w_hh_p, b_p, w_fc_p, b_fc_p


# ----------------------------------------------------------------------------- reference
def ref_forward(x, w_ih, w_hh, b_ih, b_hh, fc_w, fc_b):
    """Plain-JAX mirror of torch.nn.LSTM(batch_first=True) + fc + sigmoid."""
    B, T, _ = x.shape
    H = w_hh[0].shape[1]
    L = len(w_ih)
    seq = x.astype(jnp.float32)
    h = None
    for l in range(L):
        h = jnp.zeros((B, H), jnp.float32)
        c = jnp.zeros((B, H), jnp.float32)
        outs = []
        for t in range(T):
            g = seq[:, t, :] @ w_ih[l].T + h @ w_hh[l].T + b_ih[l] + b_hh[l]
            i_g = jax.nn.sigmoid(g[:, 0 * H:1 * H])
            f_g = jax.nn.sigmoid(g[:, 1 * H:2 * H])
            g_g = jnp.tanh(g[:, 2 * H:3 * H])
            o_g = jax.nn.sigmoid(g[:, 3 * H:4 * H])
            c = f_g * c + i_g * g_g
            h = o_g * jnp.tanh(c)
            outs.append(h)
        seq = jnp.stack(outs, axis=1)
    return jax.nn.sigmoid(h @ fc_w.T + fc_b)


# ----------------------------------------------------------------------------- main
if __name__ == "__main__":
    hidden_size = 132
    input_size = 132
    num_layers = 3
    B, T = 2, 8

    key = jax.random.PRNGKey(0)
    k_x, k_p = jax.random.split(key)
    x = jax.random.normal(k_x, (B, T, input_size), jnp.float32)

    params = init_params(k_p, input_size, hidden_size, num_layers)
    kernel_params = prepare_params(*params)

    out = fall_detection_lstm(x, *kernel_params)
    out = jax.block_until_ready(out)

    # Tight check: reference using the same bf16-rounded weights the kernel uses.
    w_ih, w_hh, b_ih, b_hh, fc_w, fc_b = params
    q = lambda w: w.astype(jnp.bfloat16).astype(jnp.float32)
    ref_q = ref_forward(x, [q(w) for w in w_ih], [q(w) for w in w_hh],
                        b_ih, b_hh, fc_w, fc_b)
    # Loose check: original f32 module semantics (bf16 weight storage tolerance).
    ref = ref_forward(x, *params)

    assert out.shape == (B, 1), out.shape
    assert jnp.allclose(out, ref_q, atol=5e-3), (out, ref_q)
    assert jnp.allclose(out, ref, atol=1.5e-2), (out, ref)

    print("KERNEL_OK")
</pallas_src>

<mosaic_0001>
module attributes {stable_mosaic.version = 11 : i64} {
  func.func @_lstm_kernel(%arg0: i32, %arg1: memref<64x256xbf16, #tpu.memory_space<vmem>>, %arg2: memref<256x1024xbf16, #tpu.memory_space<vmem>>, %arg3: memref<1x256x1024xbf16, #tpu.memory_space<vmem>>, %arg4: memref<1x256x1024xbf16, #tpu.memory_space<vmem>>, %arg5: memref<1x1x1024xf32, #tpu.memory_space<vmem>>, %arg6: memref<256x1xf32, #tpu.memory_space<vmem>>, %arg7: memref<1x1xf32, #tpu.memory_space<vmem>>, %arg8: memref<2x1xf32, #tpu.memory_space<vmem>>, %arg9: memref<64x256xf32, #tpu.memory_space<vmem>>, %arg10: memref<64x1024xf32, #tpu.memory_space<vmem>>) attributes {dimension_semantics = [#tpu.dimension_semantics<arbitrary>], iteration_bounds = array<i64: 3>, scalar_prefetch = 0 : i64, scratch_operands = 2 : i64, tpu.core_type = #tpu.core_type<tc>, window_params = [{pipeline_mode = #tpu.pipeline_mode<synchronous>, transform_indices = @transform_0, window_bounds = array<i64: 64, 256>}, {pipeline_mode = #tpu.pipeline_mode<synchronous>, transform_indices = @transform_1, window_bounds = array<i64: 256, 1024>}, {transform_indices = @transform_2, window_bounds = array<i64: 1, 256, 1024>}, {transform_indices = @transform_3, window_bounds = array<i64: 1, 256, 1024>}, {transform_indices = @transform_4, window_bounds = array<i64: 1, 1, 1024>}, {pipeline_mode = #tpu.pipeline_mode<synchronous>, transform_indices = @transform_5, window_bounds = array<i64: 256, 1>}, {pipeline_mode = #tpu.pipeline_mode<synchronous>, transform_indices = @transform_6, window_bounds = array<i64: 1, 1>}, {pipeline_mode = #tpu.pipeline_mode<synchronous>, transform_indices = @transform_7, window_bounds = array<i64: 2, 1>}]} {
    %c0_i32 = arith.constant 0 : i32
    %0 = arith.cmpi eq, %arg0, %c0_i32 : i32
    %1 = arith.extui %0 : i1 to i32
    %c0_i32_0 = arith.constant 0 : i32
    %2 = arith.cmpi ne, %1, %c0_i32_0 : i32
    scf.if %2 {
      %c0_69 = arith.constant 0 : index
      %c0_70 = arith.constant 0 : index
      %195 = vector.load %arg1[%c0_69, %c0_70] : memref<64x256xbf16, #tpu.memory_space<vmem>>, vector<64x256xbf16>
      %c0_71 = arith.constant 0 : index
      %c0_72 = arith.constant 0 : index
      %196 = vector.load %arg2[%c0_71, %c0_72] : memref<256x1024xbf16, #tpu.memory_space<vmem>>, vector<256x1024xbf16>
      %cst_73 = arith.constant dense<0.000000e+00> : vector<64x1024xf32>
      %197 = tpu.matmul %195, %196, %cst_73 {dimension_numbers = #tpu.dot_dimension_numbers<[1], [0], [0], [1], [0, 0, 1, 1], [], []>} : vector<64x256xbf16>, vector<256x1024xbf16>, vector<64x1024xf32> -> vector<64x1024xf32>
      %c0_74 = arith.constant 0 : index
      %c0_75 = arith.constant 0 : index
      %c0_76 = arith.constant 0 : index
      %198 = vector.load %arg5[%c0_74, %c0_75, %c0_76] : memref<1x1x1024xf32, #tpu.memory_space<vmem>>, vector<1x1x1024xf32>
      %199 = vector.shape_cast %198 : vector<1x1x1024xf32> to vector<1x1024xf32>
      %200 = vector.broadcast %199 : vector<1x1024xf32> to vector<64x1024xf32>
      %201 = arith.addf %197, %200 : vector<64x1024xf32>
      %c0_77 = arith.constant 0 : index
      %c0_78 = arith.constant 0 : index
      %202 = vector.load %arg10[%c0_77, %c0_78] : memref<64x1024xf32, #tpu.memory_space<vmem>>, vector<64x1024xf32>
      tpu.vector_store %arg10[%c0_77, %c0_78], %201 {strides = array<i32>} : memref<64x1024xf32, #tpu.memory_space<vmem>>, vector<64x1024xf32>,
    } else {
    }
    %c0_i32_1 = arith.constant 0 : i32
    %3 = arith.cmpi sgt, %arg0, %c0_i32_1 : i32
    %4 = arith.extui %3 : i1 to i32
    %c0_i32_2 = arith.constant 0 : i32
    %5 = arith.cmpi ne, %4, %c0_i32_2 : i32
    scf.if %5 {
      %c0_69 = arith.constant 0 : index
      %c0_70 = arith.constant 0 : index
      %195 = vector.load %arg9[%c0_69, %c0_70] : memref<64x256xf32, #tpu.memory_space<vmem>>, vector<64x256xf32>
      %196 = arith.truncf %195 : vector<64x256xf32> to vector<64x256xbf16>
      %c0_71 = arith.constant 0 : index
      %c0_72 = arith.constant 0 : index
      %c0_73 = arith.constant 0 : index
      %197 = vector.load %arg3[%c0_71, %c0_72, %c0_73] : memref<1x256x1024xbf16, #tpu.memory_space<vmem>>, vector<1x256x1024xbf16>
      %198 = vector.shape_cast %197 : vector<1x256x1024xbf16> to vector<256x1024xbf16>
      %cst_74 = arith.constant dense<0.000000e+00> : vector<64x1024xf32>
      %199 = tpu.matmul %196, %198, %cst_74 {dimension_numbers = #tpu.dot_dimension_numbers<[1], [0], [0], [1], [0, 0, 1, 1], [], []>} : vector<64x256xbf16>, vector<256x1024xbf16>, vector<64x1024xf32> -> vector<64x1024xf32>
      %c0_75 = arith.constant 0 : index
      %c0_76 = arith.constant 0 : index
      %c0_77 = arith.constant 0 : index
      %200 = vector.load %arg5[%c0_75, %c0_76, %c0_77] : memref<1x1x1024xf32, #tpu.memory_space<vmem>>, vector<1x1x1024xf32>
      %201 = vector.shape_cast %200 : vector<1x1x1024xf32> to vector<1x1024xf32>
      %202 = vector.broadcast %201 : vector<1x1024xf32> to vector<64x1024xf32>
      %203 = arith.addf %199, %202 : vector<64x1024xf32>
      %c0_78 = arith.constant 0 : index
      %c0_79 = arith.constant 0 : index
      %204 = vector.load %arg10[%c0_78, %c0_79] : memref<64x1024xf32, #tpu.memory_space<vmem>>, vector<64x1024xf32>
      tpu.vector_store %arg10[%c0_78, %c0_79], %203 {strides = array<i32>} : memref<64x1024xf32, #tpu.memory_space<vmem>>, vector<64x1024xf32>,
    } else {
    }
    %cst = arith.constant 0.000000e+00 : f32
    %6 = vector.broadcast %cst : f32 to vector<8x256xf32>
    %cst_3 = arith.constant 0.000000e+00 : f32
    %7 = vector.broadcast %cst_3 : f32 to vector<8x256xf32>
    %c0 = arith.constant 0 : index
    %c0_4 = arith.constant 0 : index
    %8 = vector.load %arg10[%c0, %c0_4] : memref<64x1024xf32, #tpu.memory_space<vmem>>, vector<8x1024xf32>
    %9 = arith.truncf %6 : vector<8x256xf32> to vector<8x256xbf16>
    %c0_5 = arith.constant 0 : index
    %c0_6 = arith.constant 0 : index
    %c0_7 = arith.constant 0 : index
    %10 = vector.load %arg4[%c0_5, %c0_6, %c0_7] : memref<1x256x1024xbf16, #tpu.memory_space<vmem>>, vector<1x256x1024xbf16>
    %11 = vector.shape_cast %10 : vector<1x256x1024xbf16> to vector<256x1024xbf16>
    %cst_8 = arith.constant dense<0.000000e+00> : vector<8x1024xf32>
    %12 = tpu.matmul %9, %11, %cst_8 {dimension_numbers = #tpu.dot_dimension_numbers<[1], [0], [0], [1], [0, 0, 1, 1], [], []>} : vector<8x256xbf16>, vector<256x1024xbf16>, vector<8x1024xf32> -> vector<8x1024xf32>
    %13 = arith.addf %8, %12 : vector<8x1024xf32>
    %14 = vector.extract_strided_slice %13 {offsets = [0, 0], sizes = [8, 768], strides = [1, 1]} : vector<8x1024xf32> to vector<8x768xf32>
    %15 = arith.negf %14 : vector<8x768xf32>
    %16 = math.exp %15 : vector<8x768xf32>
    %cst_9 = arith.constant 1.000000e+00 : f32
    %17 = vector.broadcast %cst_9 : f32 to vector<8x768xf32>
    %18 = arith.addf %17, %16 : vector<8x768xf32>
    %19 = arith.divf %17, %18 : vector<8x768xf32>
    %20 = vector.extract_strided_slice %19 {offsets = [0, 0], sizes = [8, 256], strides = [1, 1]} : vector<8x768xf32> to vector<8x256xf32>
    %21 = vector.extract_strided_slice %19 {offsets = [0, 256], sizes = [8, 256], strides = [1, 1]} : vector<8x768xf32> to vector<8x256xf32>
    %22 = vector.extract_strided_slice %19 {offsets = [0, 512], sizes = [8, 256], strides = [1, 1]} : vector<8x768xf32> to vector<8x256xf32>
    %23 = vector.extract_strided_slice %13 {offsets = [0, 768], sizes = [8, 256], strides = [1, 1]} : vector<8x1024xf32> to vector<8x256xf32>
    %24 = math.tanh %23 : vector<8x256xf32>
    %25 = arith.mulf %21, %7 : vector<8x256xf32>
    %26 = arith.mulf %20, %24 : vector<8x256xf32>
    %27 = arith.addf %25, %26 : vector<8x256xf32>
    %28 = math.tanh %27 : vector<8x256xf32>
    %29 = arith.mulf %22, %28 : vector<8x256xf32>
    %c0_10 = arith.constant 0 : index
    %c0_11 = arith.constant 0 : index
    %30 = vector.load %arg9[%c0_10, %c0_11] : memref<64x256xf32, #tpu.memory_space<vmem>>, vector<8x256xf32>
    tpu.vector_store %arg9[%c0_10, %c0_11], %29 {strides = array<i32>} : memref<64x256xf32, #tpu.memory_space<vmem>>, vector<8x256xf32>,
    %c8 = arith.constant 8 : index
    %c0_12 = arith.constant 0 : index
    %31 = vector.load %arg10[%c8, %c0_12] : memref<64x1024xf32, #tpu.memory_space<vmem>>, vector<8x1024xf32>
    %32 = arith.truncf %29 : vector<8x256xf32> to vector<8x256xbf16>
    %c0_13 = arith.constant 0 : index
    %c0_14 = arith.constant 0 : index
    %c0_15 = arith.constant 0 : index
    %33 = vector.load %arg4[%c0_13, %c0_14, %c0_15] : memref<1x256x1024xbf16, #tpu.memory_space<vmem>>, vector<1x256x1024xbf16>
    %34 = vector.shape_cast %33 : vector<1x256x1024xbf16> to vector<256x1024xbf16>
    %cst_16 = arith.constant dense<0.000000e+00> : vector<8x1024xf32>
    %35 = tpu.matmul %32, %34, %cst_16 {dimension_numbers = #tpu.dot_dimension_numbers<[1], [0], [0], [1], [0, 0, 1, 1], [], []>} : vector<8x256xbf16>, vector<256x1024xbf16>, vector<8x1024xf32> -> vector<8x1024xf32>
    %36 = arith.addf %31, %35 : vector<8x1024xf32>
    %37 = vector.extract_strided_slice %36 {offsets = [0, 0], sizes = [8, 768], strides = [1, 1]} : vector<8x1024xf32> to vector<8x768xf32>
    %38 = arith.negf %37 : vector<8x768xf32>
    %39 = math.exp %38 : vector<8x768xf32>
    %cst_17 = arith.constant 1.000000e+00 : f32
    %40 = vector.broadcast %cst_17 : f32 to vector<8x768xf32>
    %41 = arith.addf %40, %39 : vector<8x768xf32>
    %42 = arith.divf %40, %41 : vector<8x768xf32>
    %43 = vector.extract_strided_slice %42 {offsets = [0, 0], sizes = [8, 256], strides = [1, 1]} : vector<8x768xf32> to vector<8x256xf32>
    %44 = vector.extract_strided_slice %42 {offsets = [0, 256], sizes = [8, 256], strides = [1, 1]} : vector<8x768xf32> to vector<8x256xf32>
    %45 = vector.extract_strided_slice %42 {offsets = [0, 512], sizes = [8, 256], strides = [1, 1]} : vector<8x768xf32> to vector<8x256xf32>
    %46 = vector.extract_strided_slice %36 {offsets = [0, 768], sizes = [8, 256], strides = [1, 1]} : vector<8x1024xf32> to vector<8x256xf32>
    %47 = math.tanh %46 : vector<8x256xf32>
    %48 = arith.mulf %44, %27 : vector<8x256xf32>
    %49 = arith.mulf %43, %47 : vector<8x256xf32>
    %50 = arith.addf %48, %49 : vector<8x256xf32>
    %51 = math.tanh %50 : vector<8x256xf32>
    %52 = arith.mulf %45, %51 : vector<8x256xf32>
    %c8_18 = arith.constant 8 : index
    %c0_19 = arith.constant 0 : index
    %53 = vector.load %arg9[%c8_18, %c0_19] : memref<64x256xf32, #tpu.memory_space<vmem>>, vector<8x256xf32>
    tpu.vector_store %arg9[%c8_18, %c0_19], %52 {strides = array<i32>} : memref<64x256xf32, #tpu.memory_space<vmem>>, vector<8x256xf32>,
    %c16 = arith.constant 16 : index
    %c0_20 = arith.constant 0 : index
    %54 = vector.load %arg10[%c16, %c0_20] : memref<64x1024xf32, #tpu.memory_space<vmem>>, vector<8x1024xf32>
    %55 = arith.truncf %52 : vector<8x256xf32> to vector<8x256xbf16>
    %c0_21 = arith.constant 0 : index
    %c0_22 = arith.constant 0 : index
    %c0_23 = arith.constant 0 : index
    %56 = vector.load %arg4[%c0_21, %c0_22, %c0_23] : memref<1x256x1024xbf16, #tpu.memory_space<vmem>>, vector<1x256x1024xbf16>
    %57 = vector.shape_cast %56 : vector<1x256x1024xbf16> to vector<256x1024xbf16>
    %cst_24 = arith.constant dense<0.000000e+00> : vector<8x1024xf32>
    %58 = tpu.matmul %55, %57, %cst_24 {dimension_numbers = #tpu.dot_dimension_numbers<[1], [0], [0], [1], [0, 0, 1, 1], [], []>} : vector<8x256xbf16>, vector<256x1024xbf16>, vector<8x1024xf32> -> vector<8x1024xf32>
    %59 = arith.addf %54, %58 : vector<8x1024xf32>
    %60 = vector.extract_strided_slice %59 {offsets = [0, 0], sizes = [8, 768], strides = [1, 1]} : vector<8x1024xf32> to vector<8x768xf32>
    %61 = arith.negf %60 : vector<8x768xf32>
    %62 = math.exp %61 : vector<8x768xf32>
    %cst_25 = arith.constant 1.000000e+00 : f32
    %63 = vector.broadcast %cst_25 : f32 to vector<8x768xf32>
    %64 = arith.addf %63, %62 : vector<8x768xf32>
    %65 = arith.divf %63, %64 : vector<8x768xf32>
    %66 = vector.extract_strided_slice %65 {offsets = [0, 0], sizes = [8, 256], strides = [1, 1]} : vector<8x768xf32> to vector<8x256xf32>
    %67 = vector.extract_strided_slice %65 {offsets = [0, 256], sizes = [8, 256], strides = [1, 1]} : vector<8x768xf32> to vector<8x256xf32>
    %68 = vector.extract_strided_slice %65 {offsets = [0, 512], sizes = [8, 256], strides = [1, 1]} : vector<8x768xf32> to vector<8x256xf32>
    %69 = vector.extract_strided_slice %59 {offsets = [0, 768], sizes = [8, 256], strides = [1, 1]} : vector<8x1024xf32> to vector<8x256xf32>
    %70 = math.tanh %69 : vector<8x256xf32>
    %71 = arith.mulf %67, %50 : vector<8x256xf32>
    %72 = arith.mulf %66, %70 : vector<8x256xf32>
    %73 = arith.addf %71, %72 : vector<8x256xf32>
    %74 = math.tanh %73 : vector<8x256xf32>
    %75 = arith.mulf %68, %74 : vector<8x256xf32>
    %c16_26 = arith.constant 16 : index
    %c0_27 = arith.constant 0 : index
    %76 = vector.load %arg9[%c16_26, %c0_27] : memref<64x256xf32, #tpu.memory_space<vmem>>, vector<8x256xf32>
    tpu.vector_store %arg9[%c16_26, %c0_27], %75 {strides = array<i32>} : memref<64x256xf32, #tpu.memory_space<vmem>>, vector<8x256xf32>,
    %c24 = arith.constant 24 : index
    %c0_28 = arith.constant 0 : index
    %77 = vector.load %arg10[%c24, %c0_28] : memref<64x1024xf32, #tpu.memory_space<vmem>>, vector<8x1024xf32>
    %78 = arith.truncf %75 : vector<8x256xf32> to vector<8x256xbf16>
    %c0_29 = arith.constant 0 : index
    %c0_30 = arith.constant 0 : index
    %c0_31 = arith.constant 0 : index
    %79 = vector.load %arg4[%c0_29, %c0_30, %c0_31] : memref<1x256x1024xbf16, #tpu.memory_space<vmem>>, vector<1x256x1024xbf16>
    %80 = vector.shape_cast %79 : vector<1x256x1024xbf16> to vector<256x1024xbf16>
    %cst_32 = arith.constant dense<0.000000e+00> : vector<8x1024xf32>
    %81 = tpu.matmul %78, %80, %cst_32 {dimension_numbers = #tpu.dot_dimension_numbers<[1], [0], [0], [1], [0, 0, 1, 1], [], []>} : vector<8x256xbf16>, vector<256x1024xbf16>, vector<8x1024xf32> -> vector<8x1024xf32>
    %82 = arith.addf %77, %81 : vector<8x1024xf32>
    %83 = vector.extract_strided_slice %82 {offsets = [0, 0], sizes = [8, 768], strides = [1, 1]} : vector<8x1024xf32> to vector<8x768xf32>
    %84 = arith.negf %83 : vector<8x768xf32>
    %85 = math.exp %84 : vector<8x768xf32>
    %cst_33 = arith.constant 1.000000e+00 : f32
    %86 = vector.broadcast %cst_33 : f32 to vector<8x768xf32>
    %87 = arith.addf %86, %85 : vector<8x768xf32>
    %88 = arith.divf %86, %87 : vector<8x768xf32>
    %89 = vector.extract_strided_slice %88 {offsets = [0, 0], sizes = [8, 256], strides = [1, 1]} : vector<8x768xf32> to vector<8x256xf32>
    %90 = vector.extract_strided_slice %88 {offsets = [0, 256], sizes = [8, 256], strides = [1, 1]} : vector<8x768xf32> to vector<8x256xf32>
    %91 = vector.extract_strided_slice %88 {offsets = [0, 512], sizes = [8, 256], strides = [1, 1]} : vector<8x768xf32> to vector<8x256xf32>
    %92 = vector.extract_strided_slice %82 {offsets = [0, 768], sizes = [8, 256], strides = [1, 1]} : vector<8x1024xf32> to vector<8x256xf32>
    %93 = math.tanh %92 : vector<8x256xf32>
    %94 = arith.mulf %90, %73 : vector<8x256xf32>
    %95 = arith.mulf %89, %93 : vector<8x256xf32>
    %96 = arith.addf %94, %95 : vector<8x256xf32>
    %97 = math.tanh %96 : vector<8x256xf32>
    %98 = arith.mulf %91, %97 : vector<8x256xf32>
    %c24_34 = arith.constant 24 : index
    %c0_35 = arith.constant 0 : index
    %99 = vector.load %arg9[%c24_34, %c0_35] : memref<64x256xf32, #tpu.memory_space<vmem>>, vector<8x256xf32>
    tpu.vector_store %arg9[%c24_34, %c0_35], %98 {strides = array<i32>} : memref<64x256xf32, #tpu.memory_space<vmem>>, vector<8x256xf32>,
    %c32 = arith.constant 32 : index
    %c0_36 = arith.constant 0 : index
    %100 = vector.load %arg10[%c32, %c0_36] : memref<64x1024xf32, #tpu.memory_space<vmem>>, vector<8x1024xf32>
    %101 = arith.truncf %98 : vector<8x256xf32> to vector<8x256xbf16>
    %c0_37 = arith.constant 0 : index
    %c0_38 = arith.constant 0 : index
    %c0_39 = arith.constant 0 : index
    %102 = vector.load %arg4[%c0_37, %c0_38, %c0_39] : memref<1x256x1024xbf16, #tpu.memory_space<vmem>>, vector<1x256x1024xbf16>
    %103 = vector.shape_cast %102 : vector<1x256x1024xbf16> to vector<256x1024xbf16>
    %cst_40 = arith.constant dense<0.000000e+00> : vector<8x1024xf32>
    %104 = tpu.matmul %101, %103, %cst_40 {dimension_numbers = #tpu.dot_dimension_numbers<[1], [0], [0], [1], [0, 0, 1, 1], [], []>} : vector<8x256xbf16>, vector<256x1024xbf16>, vector<8x1024xf32> -> vector<8x1024xf32>
    %105 = arith.addf %100, %104 : vector<8x1024xf32>
    %106 = vector.extract_strided_slice %105 {offsets = [0, 0], sizes = [8, 768], strides = [1, 1]} : vector<8x1024xf32> to vector<8x768xf32>
    %107 = arith.negf %106 : vector<8x768xf32>
    %108 = math.exp %107 : vector<8x768xf32>
    %cst_41 = arith.constant 1.000000e+00 : f32
    %109 = vector.broadcast %cst_41 : f32 to vector<8x768xf32>
    %110 = arith.addf %109, %108 : vector<8x768xf32>
    %111 = arith.divf %109, %110 : vector<8x768xf32>
    %112 = vector.extract_strided_slice %111 {offsets = [0, 0], sizes = [8, 256], strides = [1, 1]} : vector<8x768xf32> to vector<8x256xf32>
    %113 = vector.extract_strided_slice %111 {offsets = [0, 256], sizes = [8, 256], strides = [1, 1]} : vector<8x768xf32> to vector<8x256xf32>
    %114 = vector.extract_strided_slice %111 {offsets = [0, 512], sizes = [8, 256], strides = [1, 1]} : vector<8x768xf32> to vector<8x256xf32>
    %115 = vector.extract_strided_slice %105 {offsets = [0, 768], sizes = [8, 256], strides = [1, 1]} : vector<8x1024xf32> to vector<8x256xf32>
    %116 = math.tanh %115 : vector<8x256xf32>
    %117 = arith.mulf %113, %96 : vector<8x256xf32>
    %118 = arith.mulf %112, %116 : vector<8x256xf32>
    %119 = arith.addf %117, %118 : vector<8x256xf32>
    %120 = math.tanh %119 : vector<8x256xf32>
    %121 = arith.mulf %114, %120 : vector<8x256xf32>
    %c32_42 = arith.constant 32 : index
    %c0_43 = arith.constant 0 : index
    %122 = vector.load %arg9[%c32_42, %c0_43] : memref<64x256xf32, #tpu.memory_space<vmem>>, vector<8x256xf32>
    tpu.vector_store %arg9[%c32_42, %c0_43], %121 {strides = array<i32>} : memref<64x256xf32, #tpu.memory_space<vmem>>, vector<8x256xf32>,
    %c40 = arith.constant 40 : index
    %c0_44 = arith.constant 0 : index
    %123 = vector.load %arg10[%c40, %c0_44] : memref<64x1024xf32, #tpu.memory_space<vmem>>, vector<8x1024xf32>
    %124 = arith.truncf %121 : vector<8x256xf32> to vector<8x256xbf16>
    %c0_45 = arith.constant 0 : index
    %c0_46 = arith.constant 0 : index
    %c0_47 = arith.constant 0 : index
    %125 = vector.load %arg4[%c0_45, %c0_46, %c0_47] : memref<1x256x1024xbf16, #tpu.memory_space<vmem>>, vector<1x256x1024xbf16>
    %126 = vector.shape_cast %125 : vector<1x256x1024xbf16> to vector<256x1024xbf16>
    %cst_48 = arith.constant dense<0.000000e+00> : vector<8x1024xf32>
    %127 = tpu.matmul %124, %126, %cst_48 {dimension_numbers = #tpu.dot_dimension_numbers<[1], [0], [0], [1], [0, 0, 1, 1], [], []>} : vector<8x256xbf16>, vector<256x1024xbf16>, vector<8x1024xf32> -> vector<8x1024xf32>
    %128 = arith.addf %123, %127 : vector<8x1024xf32>
    %129 = vector.extract_strided_slice %128 {offsets = [0, 0], sizes = [8, 768], strides = [1, 1]} : vector<8x1024xf32> to vector<8x768xf32>
    %130 = arith.negf %129 : vector<8x768xf32>
    %131 = math.exp %130 : vector<8x768xf32>
    %cst_49 = arith.constant 1.000000e+00 : f32
    %132 = vector.broadcast %cst_49 : f32 to vector<8x768xf32>
    %133 = arith.addf %132, %131 : vector<8x768xf32>
    %134 = arith.divf %132, %133 : vector<8x768xf32>
    %135 = vector.extract_strided_slice %134 {offsets = [0, 0], sizes = [8, 256], strides = [1, 1]} : vector<8x768xf32> to vector<8x256xf32>
    %136 = vector.extract_strided_slice %134 {offsets = [0, 256], sizes = [8, 256], strides = [1, 1]} : vector<8x768xf32> to vector<8x256xf32>
    %137 = vector.extract_strided_slice %134 {offsets = [0, 512], sizes = [8, 256], strides = [1, 1]} : vector<8x768xf32> to vector<8x256xf32>
    %138 = vector.extract_strided_slice %128 {offsets = [0, 768], sizes = [8, 256], strides = [1, 1]} : vector<8x1024xf32> to vector<8x256xf32>
    %139 = math.tanh %138 : vector<8x256xf32>
    %140 = arith.mulf %136, %119 : vector<8x256xf32>
    %141 = arith.mulf %135, %139 : vector<8x256xf32>
    %142 = arith.addf %140, %141 : vector<8x256xf32>
    %143 = math.tanh %142 : vector<8x256xf32>
    %144 = arith.mulf %137, %143 : vector<8x256xf32>
    %c40_50 = arith.constant 40 : index
    %c0_51 = arith.constant 0 : index
    %145 = vector.load %arg9[%c40_50, %c0_51] : memref<64x256xf32, #tpu.memory_space<vmem>>, vector<8x256xf32>
    tpu.vector_store %arg9[%c40_50, %c0_51], %144 {strides = array<i32>} : memref<64x256xf32, #tpu.memory_space<vmem>>, vector<8x256xf32>,
    %c48 = arith.constant 48 : index
    %c0_52 = arith.constant 0 : index
    %146 = vector.load %arg10[%c48, %c0_52] : memref<64x1024xf32, #tpu.memory_space<vmem>>, vector<8x1024xf32>
    %147 = arith.truncf %144 : vector<8x256xf32> to vector<8x256xbf16>
    %c0_53 = arith.constant 0 : index
    %c0_54 = arith.constant 0 : index
    %c0_55 = arith.constant 0 : index
    %148 = vector.load %arg4[%c0_53, %c0_54, %c0_55] : memref<1x256x1024xbf16, #tpu.memory_space<vmem>>, vector<1x256x1024xbf16>
    %149 = vector.shape_cast %148 : vector<1x256x1024xbf16> to vector<256x1024xbf16>
    %cst_56 = arith.constant dense<0.000000e+00> : vector<8x1024xf32>
    %150 = tpu.matmul %147, %149, %cst_56 {dimension_numbers = #tpu.dot_dimension_numbers<[1], [0], [0], [1], [0, 0, 1, 1], [], []>} : vector<8x256xbf16>, vector<256x1024xbf16>, vector<8x1024xf32> -> vector<8x1024xf32>
    %151 = arith.addf %146, %150 : vector<8x1024xf32>
    %152 = vector.extract_strided_slice %151 {offsets = [0, 0], sizes = [8, 768], strides = [1, 1]} : vector<8x1024xf32> to vector<8x768xf32>
    %153 = arith.negf %152 : vector<8x768xf32>
    %154 = math.exp %153 : vector<8x768xf32>
    %cst_57 = arith.constant 1.000000e+00 : f32
    %155 = vector.broadcast %cst_57 : f32 to vector<8x768xf32>
    %156 = arith.addf %155, %154 : vector<8x768xf32>
    %157 = arith.divf %155, %156 : vector<8x768xf32>
    %158 = vector.extract_strided_slice %157 {offsets = [0, 0], sizes = [8, 256], strides = [1, 1]} : vector<8x768xf32> to vector<8x256xf32>
    %159 = vector.extract_strided_slice %157 {offsets = [0, 256], sizes = [8, 256], strides = [1, 1]} : vector<8x768xf32> to vector<8x256xf32>
    %160 = vector.extract_strided_slice %157 {offsets = [0, 512], sizes = [8, 256], strides = [1, 1]} : vector<8x768xf32> to vector<8x256xf32>
    %161 = vector.extract_strided_slice %151 {offsets = [0, 768], sizes = [8, 256], strides = [1, 1]} : vector<8x1024xf32> to vector<8x256xf32>
    %162 = math.tanh %161 : vector<8x256xf32>
    %163 = arith.mulf %159, %142 : vector<8x256xf32>
    %164 = arith.mulf %158, %162 : vector<8x256xf32>
    %165 = arith.addf %163, %164 : vector<8x256xf32>
    %166 = math.tanh %165 : vector<8x256xf32>
    %167 = arith.mulf %160, %166 : vector<8x256xf32>
    %c48_58 = arith.constant 48 : index
    %c0_59 = arith.constant 0 : index
    %168 = vector.load %arg9[%c48_58, %c0_59] : memref<64x256xf32, #tpu.memory_space<vmem>>, vector<8x256xf32>
    tpu.vector_store %arg9[%c48_58, %c0_59], %167 {strides = array<i32>} : memref<64x256xf32, #tpu.memory_space<vmem>>, vector<8x256xf32>,
    %c56 = arith.constant 56 : index
    %c0_60 = arith.constant 0 : index
    %169 = vector.load %arg10[%c56, %c0_60] : memref<64x1024xf32, #tpu.memory_space<vmem>>, vector<8x1024xf32>
    %170 = arith.truncf %167 : vector<8x256xf32> to vector<8x256xbf16>
    %c0_61 = arith.constant 0 : index
    %c0_62 = arith.constant 0 : index
    %c0_63 = arith.constant 0 : index
    %171 = vector.load %arg4[%c0_61, %c0_62, %c0_63] : memref<1x256x1024xbf16, #tpu.memory_space<vmem>>, vector<1x256x1024xbf16>
    %172 = vector.shape_cast %171 : vector<1x256x1024xbf16> to vector<256x1024xbf16>
    %cst_64 = arith.constant dense<0.000000e+00> : vector<8x1024xf32>
    %173 = tpu.matmul %170, %172, %cst_64 {dimension_numbers = #tpu.dot_dimension_numbers<[1], [0], [0], [1], [0, 0, 1, 1], [], []>} : vector<8x256xbf16>, vector<256x1024xbf16>, vector<8x1024xf32> -> vector<8x1024xf32>
    %174 = arith.addf %169, %173 : vector<8x1024xf32>
    %175 = vector.extract_strided_slice %174 {offsets = [0, 0], sizes = [8, 768], strides = [1, 1]} : vector<8x1024xf32> to vector<8x768xf32>
    %176 = arith.negf %175 : vector<8x768xf32>
    %177 = math.exp %176 : vector<8x768xf32>
    %cst_65 = arith.constant 1.000000e+00 : f32
    %178 = vector.broadcast %cst_65 : f32 to vector<8x768xf32>
    %179 = arith.addf %178, %177 : vector<8x768xf32>
    %180 = arith.divf %178, %179 : vector<8x768xf32>
    %181 = vector.extract_strided_slice %180 {offsets = [0, 0], sizes = [8, 256], strides = [1, 1]} : vector<8x768xf32> to vector<8x256xf32>
    %182 = vector.extract_strided_slice %180 {offsets = [0, 256], sizes = [8, 256], strides = [1, 1]} : vector<8x768xf32> to vector<8x256xf32>
    %183 = vector.extract_strided_slice %180 {offsets = [0, 512], sizes = [8, 256], strides = [1, 1]} : vector<8x768xf32> to vector<8x256xf32>
    %184 = vector.extract_strided_slice %174 {offsets = [0, 768], sizes = [8, 256], strides = [1, 1]} : vector<8x1024xf32> to vector<8x256xf32>
    %185 = math.tanh %184 : vector<8x256xf32>
    %186 = arith.mulf %182, %165 : vector<8x256xf32>
    %187 = arith.mulf %181, %185 : vector<8x256xf32>
    %188 = arith.addf %186, %187 : vector<8x256xf32>
    %189 = math.tanh %188 : vector<8x256xf32>
    %190 = arith.mulf %183, %189 : vector<8x256xf32>
    %c56_66 = arith.constant 56 : index
    %c0_67 = arith.constant 0 : index
    %191 = vector.load %arg9[%c56_66, %c0_67] : memref<64x256xf32, #tpu.memory_space<vmem>>, vector<8x256xf32>
    tpu.vector_store %arg9[%c56_66, %c0_67], %190 {strides = array<i32>} : memref<64x256xf32, #tpu.memory_space<vmem>>, vector<8x256xf32>,
    %c2_i32 = arith.constant 2 : i32
    %192 = arith.cmpi eq, %arg0, %c2_i32 : i32
    %193 = arith.extui %192 : i1 to i32
    %c0_i32_68 = arith.constant 0 : i32
    %194 = arith.cmpi ne, %193, %c0_i32_68 : i32
    scf.if %194 {
      %c0_69 = arith.constant 0 : index
      %c0_70 = arith.constant 0 : index
      %195 = vector.load %arg6[%c0_69, %c0_70] : memref<256x1xf32, #tpu.memory_space<vmem>>, vector<256x1xf32>
      %cst_71 = arith.constant dense<0.000000e+00> : vector<8x1xf32>
      %196 = tpu.matmul %190, %195, %cst_71 {dimension_numbers = #tpu.dot_dimension_numbers<[1], [0], [0], [1], [0, 0, 1, 1], [], []>} : vector<8x256xf32>, vector<256x1xf32>, vector<8x1xf32> -> vector<8x1xf32>
      %c0_72 = arith.constant 0 : index
      %c0_73 = arith.constant 0 : index
      %197 = vector.load %arg7[%c0_72, %c0_73] : memref<1x1xf32, #tpu.memory_space<vmem>>, vector<1x1xf32>
      %198 = vector.broadcast %197 : vector<1x1xf32> to vector<8x1xf32>
      %199 = arith.addf %196, %198 : vector<8x1xf32>
      %200 = vector.extract_strided_slice %199 {offsets = [0, 0], sizes = [2, 1], strides = [1, 1]} : vector<8x1xf32> to vector<2x1xf32>
      %201 = arith.negf %200 : vector<2x1xf32>
      %202 = math.exp %201 : vector<2x1xf32>
      %cst_74 = arith.constant 1.000000e+00 : f32
      %203 = vector.broadcast %cst_74 : f32 to vector<2x1xf32>
      %204 = arith.addf %203, %202 : vector<2x1xf32>
      %205 = arith.divf %203, %204 : vector<2x1xf32>
      %c0_75 = arith.constant 0 : index
      %c0_76 = arith.constant 0 : index
      %206 = vector.load %arg8[%c0_75, %c0_76] : memref<2x1xf32, #tpu.memory_space<vmem>>, vector<2x1xf32>
      tpu.vector_store %arg8[%c0_75, %c0_76], %205 {strides = array<i32>} : memref<2x1xf32, #tpu.memory_space<vmem>>, vector<2x1xf32>,
    } else {
    }
    return
  }
  func.func @transform_0(%arg0: i32) -> (i32, i32) {
    %c0_i32 = arith.constant 0 : i32
    %c0_i32_0 = arith.constant 0 : i32
    %c0_i32_1 = arith.constant 0 : i32
    return %c0_i32, %c0_i32_0 : i32, i32
  }
  func.func @transform_1(%arg0: i32) -> (i32, i32) {
    %c0_i32 = arith.constant 0 : i32
    %c0_i32_0 = arith.constant 0 : i32
    %c0_i32_1 = arith.constant 0 : i32
    return %c0_i32, %c0_i32_0 : i32, i32
  }
  func.func @transform_2(%arg0: i32) -> (i32, i32, i32) {
    %c1_i32 = arith.constant 1 : i32
    %0 = arith.subi %arg0, %c1_i32 : i32
    %c0_i32 = arith.constant 0 : i32
    %1 = arith.maxsi %0, %c0_i32 : i32
    %c0_i32_0 = arith.constant 0 : i32
    %c0_i32_1 = arith.constant 0 : i32
    %c0_i32_2 = arith.constant 0 : i32
    return %1, %c0_i32_0, %c0_i32_1 : i32, i32, i32
  }
  func.func @transform_3(%arg0: i32) -> (i32, i32, i32) {
    %c0_i32 = arith.constant 0 : i32
    %c0_i32_0 = arith.constant 0 : i32
    %c0_i32_1 = arith.constant 0 : i32
    return %arg0, %c0_i32, %c0_i32_0 : i32, i32, i32
  }
  func.func @transform_4(%arg0: i32) -> (i32, i32, i32) {
    %c0_i32 = arith.constant 0 : i32
    %c0_i32_0 = arith.constant 0 : i32
    %c0_i32_1 = arith.constant 0 : i32
    return %arg0, %c0_i32, %c0_i32_0 : i32, i32, i32
  }
  func.func @transform_5(%arg0: i32) -> (i32, i32) {
    %c0_i32 = arith.constant 0 : i32
    %c0_i32_0 = arith.constant 0 : i32
    %c0_i32_1 = arith.constant 0 : i32
    return %c0_i32, %c0_i32_0 : i32, i32
  }
  func.func @transform_6(%arg0: i32) -> (i32, i32) {
    %c0_i32 = arith.constant 0 : i32
    %c0_i32_0 = arith.constant 0 : i32
    %c0_i32_1 = arith.constant 0 : i32
    return %c0_i32, %c0_i32_0 : i32, i32
  }
  func.func @transform_7(%arg0: i32) -> (i32, i32) {
    %c0_i32 = arith.constant 0 : i32
    %c0_i32_0 = arith.constant 0 : i32
    %c0_i32_1 = arith.constant 0 : i32
    return %c0_i32, %c0_i32_0 : i32, i32
  }
}

</mosaic_0001>

<bundles_post_ra>
// kernel: fall_detection_lstm.1
= control target key start
LH: loop header
LB: loop body
LE: loop exit
PB: predicated region body
PF: predicated region fallthrough
CT: control target
= control target key end

     0   :  { %s16569_s0 = inlined_call_operand.vmem [shape: bf16[64,256], index: 0, kind: input, shape index: {}]   ;;  %s16570_s1 = inlined_call_operand.hbm [shape: bf16[256,1024], index: 1, kind: input, shape index: {}]   ;;  %s16571_s2 = inlined_call_operand.hbm [shape: bf16[2,256,1024], index: 2, kind: input, shape index: {}]   ;;  %s16572_s3 = inlined_call_operand.hbm [shape: bf16[3,256,1024], index: 3, kind: input, shape index: {}]   ;;  %s16573_s4 = inlined_call_operand.hbm [shape: f32[3,1,1024], index: 4, kind: input, shape index: {}]   ;;  %s16574_s5 = inlined_call_operand.vmem [shape: f32[256,1], index: 5, kind: input, shape index: {}]   ;;  %s16575_s6 = inlined_call_operand.<no memory space> [shape: f32[1,1], index: 6, kind: input, shape index: {}]   ;;  %s16576_s7 = inlined_call_operand.vmem [shape: f32[2,1], index: 7, kind: output, shape index: {}]  }
   0x1   :  { %16886 = sst [smem:[#allocation92_spill]] %s16570_s1  ;;  %v12_v0 = vstv %s16575_s6 }
   0x2   :  { %16887 = sst [smem:[#allocation93_spill]] %s16571_s2  ;;  %13 = vst [vmem:[#allocation4] sm:$0x1] %v12_v0 }
   0x3   :  { %16888 = sst [smem:[#allocation94_spill]] %s16572_s3 }
   0x4   :  { %14 = vsyncpa [#allocation6], 0 }
   0x5   :  { %15 = vsyncpa [#allocation8], 0 }
   0x6   :  { %17 = vsyncpa [#allocation8 + $0x1], 0 }
   0x7   :  { %18 = vsyncpa [#allocation11], 0 }
   0x8   :  { %20 = vsyncpa [#allocation11 + $0x1], 0  ;;  %s13047_s26 = smov 0   ;;  %s13049_s27 = smov 0  }
   0x9   :  { %s13051_s28 = smov 0   ;;  %s13053_s29 = smov 0  }
   0xa   :  { %s13055_s30 = smov 0   ;;  %s13057_s8 = smov 0  }
   0xb   :  { %s13059_s9 = smov 0  }
   0xc LB: > { %s13083_s6 = sadd.s32 4294967295, %s12995_s9   ;;  %s13086_s10 = sadd.s32 1, %s12995_s9   ;;  %s12995_s9 = sphi %s13059_s9, %s17514_s9   ;;  %s12991_s8 = sphi %s13057_s8, %s17513_s8   ;;  %s12987_s30 = sphi %s13055_s30, %s17512_s30   ;;  %s12983_s29 = sphi %s13053_s29, %s17511_s29   ;;  %s12979_s28 = sphi %s13051_s28, %s17510_s28   ;;  %s12975_s27 = sphi %s13049_s27, %s17509_s27   ;;  %s12971_s26 = sphi %s13047_s26, %s17508_s26  }
   0xd   : > { %p73_p0 = scmp.gt.s32.totalorder %s13083_s6, 0  ;;  %s11016_s11 = sadd.s32 4294967295, %s13086_s10 }
   0xe   : > { %p76_p1 = scmp.gt.s32.totalorder %s11016_s11, 0  ;;  %s81_s12 = sadd.s32 1, %s12991_s8 }
   0xf   : > { %s74_s13 = scalar_select %p73_p0, %s13083_s6, 0 }
  0x10   : > { %s17516_s11 = smov (!%p76_p1, %s11016_s11), 0  ;;  %p88_p2 = scmp.ne.s32.totalorder %s12991_s8, %s12987_s30 }
  0x11   : > { %p16578_p3 = scmp.eq.s32.totalorder %s12995_s9, 0  ;;  %s78_s14 = ssub.s32 %s74_s13, %s17516_s11 }
  0x12   : > { %s104_s15 = ssub.s32 %s12995_s9, %s13086_s10  ;;  %p79_p4 = scmp.eq.s32.totalorder %s78_s14, 0 }
  0x13   : > { %p13099_p5 = por %p16578_p3, %p88_p2  ;;  %p13103_p6 = scmp.eq.s32.totalorder %s104_s15, 0 }
  0x14   : > { %s13109_s18 = scalar_select %p79_p4, %s12991_s8, %s81_s12  }
  0x15   : > { %p16577_p8 = scmp.lt.s32.totalorder %s12995_s9, 3  ;;  %s255_s19 = sand.u32 1, %s12995_s9  }
  0x16   : > { %16891 = sst [smem:[#allocation16_spill]] %s13109_s18  ;;  %s257_s20 = sand.u32 1, %s12991_s8  }
  0x17   : > { %s11020_s21 = sshll.u32 %s257_s20, 10  ;;  %s12378_s22 = sshll.u32 %s74_s13, 14 }
  0x18   : > { %s16892_s2 = sld [smem:[#allocation93_spill]]  ;;  %s259_s11 = scalar_lea.vmem [#allocation7], %s11020_s21 }
  0x19   : > { %s269_s14 = sshll.u32 %s259_s11, 4  ;;  %p13125_p9 = pnand %p16577_p8, %p13099_p5  ;;  %s13119_s14 = int_to_ptr.vmem [resolvable:$true] %s269_s14 }
  0x1a   : > { %s13129_s13 = scalar_lea.sflag [#allocation8], %s255_s19 }
  0x1b   : > { %p12809_p11 = pneg %p13125_p9 }
  0x1e   : > { %s13117_s25 = scalar_lea.hbm %s16892_s2, %s12378_s22  ;;  %s12812_s16 = scalar_lea.hbm %s16892_s2, 32768 }
  0x1f   : > { %s12807_s15 = scalar_lea.hbm %s13117_s25, 16384  ;;  %p12813_p0 = scmp.lt.u32.totalorder %s13117_s25, %s16892_s2 }
  0x20   : > { %p12808_p10 = scmp.ne.s32.totalorder %s13117_s25, %s12807_s15  ;;  %p12814_p1 = scmp.lt.u32.totalorder %s12812_s16, %s12807_s15 }
  0x21   : > { %p12816_p4 = scmp.lt.u32.totalorder %s12807_s15, %s13117_s25 }
  0x22   : > { %p12810_p12 = pnand %p12809_p11, %p12808_p10  ;;  %p12815_p2 = por %p12814_p1, %p12813_p0 }
  0x24   : > { %p12811_p13 = pneg %p12810_p12  ;;  %p12817_p5 = por %p12816_p4, %p12815_p2 }
  0x26   : > { %p12818_p7 = pnand %p12817_p5, %p12811_p13 }
  0x28   : > { %12821 = shalt.err (!%p12818_p7)
}
  0x29   : > { %s12822_s19 = scalar_lea.vmem %s13119_s14, 16384  ;;  %s12997_s24 = smov [#allocation7]  }
  0x2a   : > { %p12823_p10 = scmp.ne.s32.totalorder %s13119_s14, %s12822_s19  ;;  %s12827_s11 = sshll.u32 %s12997_s24, 4  ;;  %s12828_s11 = int_to_ptr.vmem [resolvable:$false] %s12827_s11 }
  0x2b   : > { %s12829_s20 = scalar_lea.vmem %s12828_s11, 32768  ;;  %p12830_p3 = scmp.lt.s32.totalorder %s13119_s14, %s12828_s11 }
  0x2c   : > { %p12825_p12 = pnand %p12823_p10, %p12809_p11  ;;  %p12831_p0 = scmp.lt.s32.totalorder %s12829_s20, %s12822_s19 }
  0x2e   : > { %p12826_p8 = pneg %p12825_p12  ;;  %p12832_p1 = por %p12831_p0, %p12830_p3 }
  0x30   : > { %p12833_p2 = pnand %p12832_p1, %p12826_p8 }
  0x32   : > { %12836 = shalt.err (!%p12833_p2)
}
  0x33   : > { %s16579_s15 = smov 512   ;;  %s16581_s21 = smov 32  }
  0x34   : > { %12465 = dma.hbm_to_vmem [thread:$0]  (!%p13125_p9), %s13117_s25, 16384, %s13119_s14, %s13129_s13, %s16579_s15, %s16579_s15, %s16581_s21  }
  0x35   : > { %p94_p3 = scmp.ne.s32.totalorder %s12987_s30, %s12983_s29  ;;  %p16583_p7 = scmp.eq.s32.totalorder %s13083_s6, 0 }
  0x36   : > { %p120_p8 = scmp.ne.s32.totalorder %s12975_s27, %s12971_s26  ;;  %p11017_p11 = scmp.ge.s32.totalorder %s12995_s9, 1 }
  0x37   : > { %p220_p13 = scmp.lt.s32.totalorder %s12995_s9, 4  ;;  %p13169_p4 = por %p16583_p7, %p94_p3 }
  0x38   : > { %p13175_p5 = por %p120_p8, %p16583_p7  ;;  %s13000_s29 = smov [#allocation5]  }
  0x39   : > { %s16894_s16 = scalar_select %p13169_p4, 1, 0 }
  0x3a   : > { %s16895_s12 = scalar_select %p13175_p5, 1, 0 }
  0x3b   : > { %p13179_p9 = pnand %p11017_p11, %p220_p13  ;;  %s235_s14 = sshll.u32 %s13000_s29, 4  ;;  %s236_s14 = int_to_ptr.vmem [resolvable:$true] %s235_s14 }
  0x3c   : > { %s12379_s26 = sshll.u32 %s12995_s9, 14  ;;  %s107_s23 = sadd.s32 1, %s12979_s28 }
  0x3d   : > { %s16896_s25 = scalar_select %p13179_p9, 1, 0 }
  0x3e   : > { %p12458_p10 = pneg %p13179_p9  ;;  %s16898_s1 = sld [smem:[#allocation92_spill]] }
  0x3f   : > { %s13196_s19 = scalar_select %p13103_p6, %s12979_s28, %s107_s23  }
  0x40   : > { %p13188_p12 = pnand %p12458_p10, %p16583_p7 }
  0x42   : > { %p12839_p2 = pneg %p13188_p12 }
  0x44   : > { %s12837_s20 = scalar_lea.hbm %s16898_s1, 16384 }
  0x45   : > { %p12838_p1 = scmp.ne.s32.totalorder %s16898_s1, %s12837_s20  ;;  %p12844_p11 = scmp.lt.u32.totalorder %s12837_s20, %s16898_s1 }
  0x47   : > { %p12840_p3 = pnand %p12839_p2, %p12838_p1 }
  0x49   : > { %p12841_p8 = pneg %p12840_p3 }
  0x4b   : > { %p12846_p13 = pnand %p12844_p11, %p12841_p8 }
  0x4d   : > { %12849 = shalt.err (!%p12846_p13)
}
  0x4e   : > { %s12850_s17 = scalar_lea.vmem %s236_s14, 16384  ;;  %p12858_p0 = scmp.lt.s32.totalorder %s236_s14, %s236_s14 }
  0x4f   : > { %p12851_p6 = scmp.ne.s32.totalorder %s236_s14, %s12850_s17  ;;  %p12859_p5 = scmp.lt.s32.totalorder %s12850_s17, %s12850_s17 }
  0x51   : > { %p12853_p10 = pnand %p12851_p6, %p12839_p2  ;;  %p12860_p4 = por %p12859_p5, %p12858_p0 }
  0x53   : > { %p12854_p7 = pneg %p12853_p10 }
  0x55   : > { %p12861_p9 = pnand %p12860_p4, %p12854_p7 }
  0x57   : > { %12864 = shalt.err (!%p12861_p9)
}
  0x58   : > { %s16899_s15 = smov 32   ;;  %s16900_s23 = smov 512  }
  0x59   : > { %12461 = dma.hbm_to_vmem [thread:$0]  (!%p13188_p12), %s16898_s1, 16384, %s236_s14, [#allocation6], %s16900_s23, %s16900_s23, %s16899_s15  }
  0x5a   : > { %p16901_p1 = scmp.eq.s32.totalorder %s12995_s9, 0  ;;  %p16902_p2 = scmp.ne.s32.totalorder %s12979_s28, %s12975_s27 }
  0x5b   : > { %s13225_s2 = sand.u32 1, %s12979_s28   ;;  %s16903_s3 = sld [smem:[#allocation94_spill]] }
  0x5c   : > { %p116_p3 = por %p16902_p2, %p16901_p1  ;;  %s11024_s21 = sshll.u32 %s13225_s2, 10 }
  0x5d   : > { %p16904_p7 = scmp.lt.s32.totalorder %s12995_s9, 3  ;;  %s283_s14 = scalar_lea.vmem [#allocation9], %s11024_s21 }
  0x5e   : > { %s290_s24 = sshll.u32 %s283_s14, 4  ;;  %s13239_s24 = int_to_ptr.vmem [resolvable:$true] %s290_s24 }
  0x5f   : > { %p13235_p4 = pnand %p16904_p7, %p116_p3 }
  0x61   : > { %s13231_s29 = scalar_lea.hbm %s16903_s3, %s12379_s26  ;;  %p12867_p9 = pneg %p13235_p4 }
  0x62   : > { %s12865_s11 = scalar_lea.hbm %s13231_s29, 16384  ;;  %s12870_s20 = scalar_lea.hbm %s16903_s3, 49152 }
  0x63   : > { %p12866_p5 = scmp.ne.s32.totalorder %s13231_s29, %s12865_s11  ;;  %p12871_p8 = scmp.lt.u32.totalorder %s13231_s29, %s16903_s3 }
  0x64   : > { %p12872_p11 = scmp.lt.u32.totalorder %s12870_s20, %s12865_s11  ;;  %p12874_p6 = scmp.lt.u32.totalorder %s12865_s11, %s13231_s29 }
  0x65   : > { %p12868_p12 = pnand %p12867_p9, %p12866_p5 }
  0x66   : > { %p12873_p13 = por %p12872_p11, %p12871_p8 }
  0x67   : > { %p12869_p0 = pneg %p12868_p12 }
  0x68   : > { %p12875_p10 = por %p12874_p6, %p12873_p13 }
  0x6a   : > { %p12876_p1 = pnand %p12875_p10, %p12869_p0 }
  0x6c   : > { %12879 = shalt.err (!%p12876_p1)
}
  0x6d   : > { %s12880_s21 = scalar_lea.vmem %s13239_s24, 16384  ;;  %s13001_s14 = smov [#allocation9]  }
  0x6e   : > { %p12881_p2 = scmp.ne.s32.totalorder %s13239_s24, %s12880_s21  ;;  %s12885_s26 = sshll.u32 %s13001_s14, 4  ;;  %s12886_s26 = int_to_ptr.vmem [resolvable:$false] %s12885_s26 }
  0x6f   : > { %s12887_s1 = scalar_lea.vmem %s12886_s26, 32768  ;;  %p12888_p5 = scmp.lt.s32.totalorder %s13239_s24, %s12886_s26 }
  0x70   : > { %p12883_p3 = pnand %p12881_p2, %p12867_p9  ;;  %p12889_p12 = scmp.lt.s32.totalorder %s12887_s1, %s12880_s21 }
  0x72   : > { %p12884_p7 = pneg %p12883_p3  ;;  %p12890_p8 = por %p12889_p12, %p12888_p5 }
  0x74   : > { %p12891_p11 = pnand %p12890_p8, %p12884_p7 }
  0x76   : > { %12894 = shalt.err (!%p12891_p11)
}
  0x77   : > { %12468 = dma.hbm_to_vmem [thread:$0]  (!%p13235_p4), %s13231_s29, 16384, %s13239_s24, %s13129_s13, %s16900_s23, %s16900_s23, %s16899_s15  }
  0x78   : > { %s11027_s18 = sshll.u32 %s13225_s2, 3  ;;  %s12380_s11 = sshll.u32 %s12995_s9, 7 }
  0x79   : > { %s13275_s21 = scalar_lea.hbm %s16573_s4, %s12380_s11  ;;  %s304_s14 = scalar_lea.vmem [#allocation10], %s11027_s18 }
  0x7a   : > { %s312_s26 = sshll.u32 %s304_s14, 4  ;;  %s301_s1 = scalar_lea.sflag [#allocation11], %s13225_s2  ;;  %s313_s26 = int_to_ptr.vmem [resolvable:$true] %s312_s26 }
  0x7b   : > { %s12895_s3 = scalar_lea.hbm %s13275_s21, 128  ;;  %s12900_s15 = scalar_lea.hbm %s16573_s4, 384 }
  0x7c   : > { %p12896_p0 = scmp.ne.s32.totalorder %s13275_s21, %s12895_s3  ;;  %p12901_p10 = scmp.lt.u32.totalorder %s13275_s21, %s16573_s4 }
  0x7d   : > { %p12902_p1 = scmp.lt.u32.totalorder %s12900_s15, %s12895_s3  ;;  %p12904_p3 = scmp.lt.u32.totalorder %s12895_s3, %s13275_s21 }
  0x7e   : > { %p12898_p13 = pnand %p12896_p0, %p12867_p9 }
  0x7f   : > { %p12903_p2 = por %p12902_p1, %p12901_p10 }
  0x80   : > { %p12899_p6 = pneg %p12898_p13 }
  0x81   : > { %p12905_p7 = por %p12904_p3, %p12903_p2 }
  0x83   : > { %p12906_p5 = pnand %p12905_p7, %p12899_p6 }
  0x85   : > { %12909 = shalt.err (!%p12906_p5)
}
  0x86   : > { %s12910_s2 = scalar_lea.vmem %s313_s26, 128  ;;  %s13002_s24 = smov [#allocation10]  }
  0x87   : > { %p12911_p12 = scmp.ne.s32.totalorder %s313_s26, %s12910_s2  ;;  %s12915_s18 = sshll.u32 %s13002_s24, 4  ;;  %s12916_s18 = int_to_ptr.vmem [resolvable:$false] %s12915_s18 }
  0x88   : > { %s12917_s11 = scalar_lea.vmem %s12916_s18, 256  ;;  %p12918_p0 = scmp.lt.s32.totalorder %s313_s26, %s12916_s18 }
  0x89   : > { %p12913_p8 = pnand %p12911_p12, %p12867_p9  ;;  %p12919_p13 = scmp.lt.s32.totalorder %s12917_s11, %s12910_s2 }
  0x8b   : > { %p12914_p11 = pneg %p12913_p8  ;;  %p12920_p1 = por %p12919_p13, %p12918_p0 }
  0x8d   : > { %p12921_p10 = pnand %p12920_p1, %p12914_p11 }
  0x8f   : > { %12924 = shalt.err (!%p12921_p10)
}
  0x90   : > { %12471 = dma.hbm_to_vmem [thread:$0]  (!%p13235_p4), %s13275_s21, 128, %s313_s26, %s301_s1  }
  0x91   : > { %p16906_p6 = scmp.ne.s32.totalorder %s16896_s25, 0 }
  0x93   : > { %321 = sbr.rel (%p16906_p6) target bundleno = 3726 (0xe8e), region = 48 }
  0x9a   : > { %p16907_p2 = scmp.eq.s32.totalorder %s13083_s6, 0 }
  0x9c   : > { %12954 = dma.done.wait (%p16907_p2), [#allocation6], 16384   ;;  %p16908_p9 = pmov %p16907_p2 }
  0x9d   : > { %s327_s3 = sand.u32 1, %s13083_s6   ;;  %s329_s22 = sand.u32 1, %s12987_s30  }
  0x9e   : > { %12956 = vsyncadd (%p16908_p9), [#allocation6], 4294950912  ;;  %s11032_s20 = sshll.u32 %s329_s22, 10  ;;  %s328_s14 = scalar_lea.sflag [#allocation8], %s327_s3 }
  0x9f   : > { %s13305_s9 = scalar_lea.vmem [#allocation7], %s11032_s20  ;;  %p16909_p3 = scmp.ne.s32.totalorder %s16894_s16, 0 }
  0xa1   : > { %12958 = dma.done.wait (%p16909_p3), %s328_s14, 16384  }
  0xa2   : > { %12960 = vsyncadd (%p16909_p3), %s328_s14, 4294950912  ;;  %s338_s25 = sand.u32 1, %s12975_s27   ;;  %p16910_p4 = scmp.ne.s32.totalorder %s16895_s12, 0 }
  0xa3   : > { %s11033_s17 = sshll.u32 %s338_s25, 10 }
  0xa4   : > { %s13312_s21 = scalar_lea.vmem [#allocation9], %s11033_s17 }
  0xa5   : > { %12962 = dma.done.wait (%p16910_p4), %s328_s14, 16384  }
  0xa6   : > { %12964 = vsyncadd (%p16910_p4), %s328_s14, 4294950912  ;;  %s11034_s26 = sshll.u32 %s338_s25, 3  ;;  %s346_s1 = scalar_lea.sflag [#allocation11], %s338_s25 }
  0xa7   : > { %s13318_s13 = scalar_lea.vmem [#allocation10], %s11034_s26 }
  0xa8   : > { %12966 = dma.done.wait (%p16910_p4), %s346_s1, 128  }
  0xa9   : > { %12968 = vsyncadd (%p16910_p4), %s346_s1, 4294967168  ;;  %p16911_p7 = scmp.ne.s32.totalorder %s13083_s6, 0 }
  0xaa   : > { %v401_v1 = vld [vmem:[#allocation5] sm:$0xff] (!%p16911_p7)  ;;  %v402_v3 = vld [vmem:[#allocation5 + $0x8] sm:$0xff] (!%p16911_p7) }
  0xab   : > { %392 = sbr.rel (%p16911_p7) target bundleno = 544 (0x220), region = 68  ;;  %v405_v2 = vld [vmem:[#allocation5 + $0x20] sm:$0xff] (!%p16911_p7)  ;;  %v406_v5 = vld [vmem:[#allocation5 + $0x28] sm:$0xff] (!%p16911_p7) }
  0xac   : > { %v11045_v4 = vcombine.high (!%p16911_p7), %v401_v1, %v405_v2  ;;  %v11044_v6 = vcombine.low (!%p16911_p7), %v401_v1, %v405_v2  ;;  %v409_v7 = vld [vmem:[#allocation5 + $0x40] sm:$0xff] (!%p16911_p7)  ;;  %v11047_v9 = vcombine.high (!%p16911_p7), %v402_v3, %v406_v5  ;;  %v11046_v10 = vcombine.low (!%p16911_p7), %v402_v3, %v406_v5  ;;  %v410_v12 = vld [vmem:[#allocation5 + $0x48] sm:$0xff] (!%p16911_p7) }
  0xad   : > { %v413_v8 = vld [vmem:[#allocation5 + $0x60] sm:$0xff] (!%p16911_p7)  ;;  %v414_v13 = vld [vmem:[#allocation5 + $0x68] sm:$0xff] (!%p16911_p7) }
  0xae   : > { %v11053_v11 = vcombine.high (!%p16911_p7), %v409_v7, %v413_v8  ;;  %v417_v14 = vld [vmem:[#allocation5 + $0x80] sm:$0xff] (!%p16911_p7)  ;;  %1251 = vmatprep.subr.bf16.mxu0 (!%p16911_p7), %v11045_v4  ;;  %v11055_v15 = vcombine.high (!%p16911_p7), %v410_v12, %v414_v13  ;;  %v418_v17 = vld [vmem:[#allocation5 + $0x88] sm:$0xff] (!%p16911_p7)  ;;  %1324 = vmatprep.subr.bf16.mxu1 (!%p16911_p7), %v11047_v9  ;;  %v11052_v19 = vcombine.low (!%p16911_p7), %v409_v7, %v413_v8 }
  0xaf   : > { %v421_v16 = vld [vmem:[#allocation5 + $0xa0] sm:$0xff] (!%p16911_p7)  ;;  %v422_v18 = vld [vmem:[#allocation5 + $0xa8] sm:$0xff] (!%p16911_p7)  ;;  %1252 = vmatpush1.bf16.msra.mxu0 (!%p16911_p7), %v11044_v6  ;;  %1325 = vmatpush1.bf16.msra.mxu1 (!%p16911_p7), %v11046_v10  ;;  %v11054_v20 = vcombine.low (!%p16911_p7), %v410_v12, %v414_v13 }
  0xb0   : > { %1253 = vmatprep.subr.bf16.mxu0 (!%p16911_p7), %v11053_v11  ;;  %v11061_v21 = vcombine.high (!%p16911_p7), %v417_v14, %v421_v16  ;;  %1326 = vmatprep.subr.bf16.mxu1 (!%p16911_p7), %v11055_v15  ;;  %v11063_v22 = vcombine.high (!%p16911_p7), %v418_v17, %v422_v18  ;;  %v425_v23 = vld [vmem:[#allocation5 + $0xc0] sm:$0xff] (!%p16911_p7)  ;;  %v426_v25 = vld [vmem:[#allocation5 + $0xc8] sm:$0xff] (!%p16911_p7)  ;;  %v11060_v27 = vcombine.low (!%p16911_p7), %v417_v14, %v421_v16 }
  0xb1   : > { %v429_v24 = vld [vmem:[#allocation5 + $0xe0] sm:$0xff] (!%p16911_p7)  ;;  %v430_v26 = vld [vmem:[#allocation5 + $0xe8] sm:$0xff] (!%p16911_p7)  ;;  %v11062_v28 = vcombine.low (!%p16911_p7), %v418_v17, %v422_v18 }
  0xb2   : > { %v11069_v29 = vcombine.high %v425_v23, %v429_v24  ;;  %v11071_v30 = vcombine.high %v426_v25, %v430_v26  ;;  %v433_v31 = vld [vmem:[#allocation5 + $0x100] sm:$0xff]  ;;  %v434_v33 = vld [vmem:[#allocation5 + $0x108] sm:$0xff]  ;;  %v11068_v35 = vcombine.low %v425_v23, %v429_v24  ;;  %v11070_v36 = vcombine.low %v426_v25, %v430_v26 }
  0xb3   : > { %1254 = vmatpush1.bf16.msra.mxu0 %v11052_v19  ;;  %1327 = vmatpush1.bf16.msra.mxu1 %v11054_v20  ;;  %v437_v32 = vld [vmem:[#allocation5 + $0x120] sm:$0xff]  ;;  %v438_v34 = vld [vmem:[#allocation5 + $0x128] sm:$0xff] }
  0xb4   : > { %1255 = vmatprep.subr.bf16.mxu0 %v11061_v21  ;;  %1328 = vmatprep.subr.bf16.mxu1 %v11063_v22  ;;  %v11077_v37 = vcombine.high %v433_v31, %v437_v32  ;;  %v11079_v38 = vcombine.high %v434_v33, %v438_v34  ;;  %v441_v39 = vld [vmem:[#allocation5 + $0x140] sm:$0xff]  ;;  %v442_v41 = vld [vmem:[#allocation5 + $0x148] sm:$0xff]  ;;  %v11076_v43 = vcombine.low %v433_v31, %v437_v32 }
  0xb5   : > { %v445_v40 = vld [vmem:[#allocation5 + $0x160] sm:$0xff]  ;;  %v446_v42 = vld [vmem:[#allocation5 + $0x168] sm:$0xff]  ;;  %v11078_v44 = vcombine.low %v434_v33, %v438_v34 }
  0xb6   : > { %v11085_v45 = vcombine.high %v441_v39, %v445_v40  ;;  %v11087_v46 = vcombine.high %v442_v41, %v446_v42  ;;  %v449_v47 = vld [vmem:[#allocation5 + $0x180] sm:$0xff]  ;;  %v450_v49 = vld [vmem:[#allocation5 + $0x188] sm:$0xff]  ;;  %v11084_v51 = vcombine.low %v441_v39, %v445_v40  ;;  %v11086_v52 = vcombine.low %v442_v41, %v446_v42 }
  0xb7   : > { %1256 = vmatpush1.bf16.msra.mxu0 %v11060_v27  ;;  %1329 = vmatpush1.bf16.msra.mxu1 %v11062_v28  ;;  %v453_v48 = vld [vmem:[#allocation5 + $0x1a0] sm:$0xff]  ;;  %v454_v50 = vld [vmem:[#allocation5 + $0x1a8] sm:$0xff] }
  0xb8   : > { %1257 = vmatprep.subr.bf16.mxu0 %v11069_v29  ;;  %1330 = vmatprep.subr.bf16.mxu1 %v11071_v30  ;;  %v11093_v53 = vcombine.high %v449_v47, %v453_v48  ;;  %v11095_v54 = vcombine.high %v450_v49, %v454_v50  ;;  %v457_v55 = vld [vmem:[#allocation5 + $0x1c0] sm:$0xff]  ;;  %v458_v58 = vld [vmem:[#allocation5 + $0x1c8] sm:$0xff]  ;;  %v11092_v60 = vcombine.low %v449_v47, %v453_v48 }
  0xb9   : > { %v461_v56 = vld [vmem:[#allocation5 + $0x1e0] sm:$0xff]  ;;  %v462_v59 = vld [vmem:[#allocation5 + $0x1e8] sm:$0xff]  ;;  %v11094_v61 = vcombine.low %v450_v49, %v454_v50 }
  0xba   : > { %v13329_v57 = vld [vmem:[%s16569_s0 + $0x4] ss:$8 sps:$4 sm:$0xff]   ;;  %v11101_v62 = vcombine.high %v457_v55, %v461_v56  ;;  %v11103_v63 = vcombine.high %v458_v58, %v462_v59  ;;  %v11100_v4 = vcombine.low %v457_v55, %v461_v56  ;;  %v11102_v5 = vcombine.low %v458_v58, %v462_v59 }
  0xbb   : > { %1258 = vmatpush1.bf16.msra.mxu0 %v11068_v35  ;;  %1331 = vmatpush1.bf16.msra.mxu1 %v11070_v36  ;;  %v465_v0 = vld [vmem:[#allocation5 + $0x200] sm:$0xff]  ;;  %v466_v2 = vld [vmem:[#allocation5 + $0x208] sm:$0xff] }
  0xbc   : > { %1259 = vmatprep.subr.bf16.mxu0 %v11077_v37  ;;  %1332 = vmatprep.subr.bf16.mxu1 %v11079_v38  ;;  %v469_v1 = vld [vmem:[#allocation5 + $0x220] sm:$0xff]  ;;  %v470_v3 = vld [vmem:[#allocation5 + $0x228] sm:$0xff] }
  0xbd   : > { %1283 = vmatprep.mubr.bf16.mxu0 %v13329_v57  ;;  %1356 = vmatprep.mubr.bf16.mxu1 %v13329_v57  ;;  %v11109_v6 = vcombine.high %v465_v0, %v469_v1  ;;  %v11111_v7 = vcombine.high %v466_v2, %v470_v3  ;;  %v473_v8 = vld [vmem:[#allocation5 + $0x240] sm:$0xff]  ;;  %v474_v10 = vld [vmem:[#allocation5 + $0x248] sm:$0xff]  ;;  %v11108_v12 = vcombine.low %v465_v0, %v469_v1  ;;  %v403_v1 = vld [vmem:[#allocation5 + $0x10] sm:$0xff] }
  0xbe   : > { %v477_v9 = vld [vmem:[#allocation5 + $0x260] sm:$0xff]  ;;  %v478_v11 = vld [vmem:[#allocation5 + $0x268] sm:$0xff]  ;;  %v11110_v13 = vcombine.low %v466_v2, %v470_v3  ;;  %v407_v2 = vld [vmem:[#allocation5 + $0x30] sm:$0xff] }
  0xbf   : > { %1260 = vmatpush1.bf16.msra.mxu0 %v11076_v43  ;;  %1333 = vmatpush1.bf16.msra.mxu1 %v11078_v44  ;;  %v11117_v14 = vcombine.high %v473_v8, %v477_v9  ;;  %v11119_v15 = vcombine.high %v474_v10, %v478_v11  ;;  %v481_v16 = vld [vmem:[#allocation5 + $0x280] sm:$0xff]  ;;  %v482_v18 = vld [vmem:[#allocation5 + $0x288] sm:$0xff]  ;;  %v11116_v20 = vcombine.low %v473_v8, %v477_v9  ;;  %v404_v3 = vld [vmem:[#allocation5 + $0x18] sm:$0xff] }
  0xc0   : > { %1261 = vmatprep.subr.bf16.mxu0 %v11085_v45  ;;  %1334 = vmatprep.subr.bf16.mxu1 %v11087_v46  ;;  %v485_v17 = vld [vmem:[#allocation5 + $0x2a0] sm:$0xff]  ;;  %v486_v19 = vld [vmem:[#allocation5 + $0x2a8] sm:$0xff]  ;;  %v11118_v21 = vcombine.low %v474_v10, %v478_v11  ;;  %v411_v9 = vld [vmem:[#allocation5 + $0x50] sm:$0xff] }
  0xc1   : > { %v11125_v22 = vcombine.high %v481_v16, %v485_v17  ;;  %v11127_v23 = vcombine.high %v482_v18, %v486_v19  ;;  %v489_v24 = vld [vmem:[#allocation5 + $0x2c0] sm:$0xff]  ;;  %v490_v26 = vld [vmem:[#allocation5 + $0x2c8] sm:$0xff]  ;;  %v11124_v28 = vcombine.low %v481_v16, %v485_v17  ;;  %v11126_v29 = vcombine.low %v482_v18, %v486_v19  ;;  %v415_v10 = vld [vmem:[#allocation5 + $0x70] sm:$0xff] }
  0xc2   : > { %v493_v25 = vld [vmem:[#allocation5 + $0x2e0] sm:$0xff]  ;;  %v494_v27 = vld [vmem:[#allocation5 + $0x2e8] sm:$0xff]  ;;  %v11057_v16 = vcombine.high %v411_v9, %v415_v10  ;;  %v419_v18 = vld [vmem:[#allocation5 + $0x90] sm:$0xff] }
  0xc3   : > { %1262 = vmatpush1.bf16.msra.mxu0 %v11084_v51  ;;  %1335 = vmatpush1.bf16.msra.mxu1 %v11086_v52  ;;  %v11133_v30 = vcombine.high %v489_v24, %v493_v25  ;;  %v11135_v31 = vcombine.high %v490_v26, %v494_v27  ;;  %v497_v32 = vld [vmem:[#allocation5 + $0x300] sm:$0xff]  ;;  %v498_v34 = vld [vmem:[#allocation5 + $0x308] sm:$0xff]  ;;  %v11132_v36 = vcombine.low %v489_v24, %v493_v25  ;;  %v423_v19 = vld [vmem:[#allocation5 + $0xb0] sm:$0xff] }
  0xc4   : > { %1263 = vmatprep.subr.bf16.mxu0 %v11093_v53  ;;  %1336 = vmatprep.subr.bf16.mxu1 %v11095_v54  ;;  %v501_v33 = vld [vmem:[#allocation5 + $0x320] sm:$0xff]  ;;  %v502_v35 = vld [vmem:[#allocation5 + $0x328] sm:$0xff]  ;;  %v11134_v37 = vcombine.low %v490_v26, %v494_v27  ;;  %v11065_v25 = vcombine.high %v419_v18, %v423_v19  ;;  %v427_v27 = vld [vmem:[#allocation5 + $0xd0] sm:$0xff] }
  0xc5   : > { %v11141_v38 = vcombine.high %v497_v32, %v501_v33  ;;  %v11143_v39 = vcombine.high %v498_v34, %v502_v35  ;;  %v505_v40 = vld [vmem:[#allocation5 + $0x340] sm:$0xff]  ;;  %v506_v42 = vld [vmem:[#allocation5 + $0x348] sm:$0xff]  ;;  %v11140_v44 = vcombine.low %v497_v32, %v501_v33  ;;  %v11142_v45 = vcombine.low %v498_v34, %v502_v35 }
  0xc6   : > { %v509_v41 = vld [vmem:[#allocation5 + $0x360] sm:$0xff]  ;;  %v510_v43 = vld [vmem:[#allocation5 + $0x368] sm:$0xff]  ;;  %v11064_v32 = vcombine.low %v419_v18, %v423_v19  ;;  %v475_v18 = vld [vmem:[#allocation5 + $0x250] sm:$0xff] }
  0xc7   : > { %1264 = vmatpush1.bf16.msra.mxu0 %v11092_v60  ;;  %1337 = vmatpush1.bf16.msra.mxu1 %v11094_v61  ;;  %v11149_v46 = vcombine.high %v505_v40, %v509_v41  ;;  %v11151_v47 = vcombine.high %v506_v42, %v510_v43  ;;  %v513_v48 = vld [vmem:[#allocation5 + $0x380] sm:$0xff]  ;;  %v514_v50 = vld [vmem:[#allocation5 + $0x388] sm:$0xff]  ;;  %v11148_v52 = vcombine.low %v505_v40, %v509_v41  ;;  %v440_v40 = vld [vmem:[#allocation5 + $0x138] sm:$0xff] }
  0xc8   : > { %1265 = vmatprep.subr.bf16.mxu0 %v11101_v62  ;;  %1338 = vmatprep.subr.bf16.mxu1 %v11103_v63  ;;  %v517_v49 = vld [vmem:[#allocation5 + $0x3a0] sm:$0xff]  ;;  %v518_v51 = vld [vmem:[#allocation5 + $0x3a8] sm:$0xff]  ;;  %v11150_v53 = vcombine.low %v506_v42, %v510_v43  ;;  %v479_v19 = vld [vmem:[#allocation5 + $0x270] sm:$0xff] }
  0xc9   : > { %v11157_v54 = vcombine.high %v513_v48, %v517_v49  ;;  %v11159_v55 = vcombine.high %v514_v50, %v518_v51  ;;  %v521_v56 = vld [vmem:[#allocation5 + $0x3c0] sm:$0xff]  ;;  %v522_v59 = vld [vmem:[#allocation5 + $0x3c8] sm:$0xff]  ;;  %v11156_v61 = vcombine.low %v513_v48, %v517_v49  ;;  %v11158_v62 = vcombine.low %v514_v50, %v518_v51  ;;  %v448_v48 = vld [vmem:[#allocation5 + $0x178] sm:$0xff] }
  0xca   : > { %v525_v58 = vld [vmem:[#allocation5 + $0x3e0] sm:$0xff]  ;;  %v526_v60 = vld [vmem:[#allocation5 + $0x3e8] sm:$0xff] }
  0xcb   : > { %1266 = vmatpush1.bf16.msra.mxu0 %v11100_v4  ;;  %1339 = vmatpush1.bf16.msra.mxu1 %v11102_v5  ;;  %v11165_v63 = vcombine.high %v521_v56, %v525_v58  ;;  %v11167_v0 = vcombine.high %v522_v59, %v526_v60  ;;  %v408_v4 = vld [vmem:[#allocation5 + $0x38] sm:$0xff]  ;;  %v11164_v5 = vcombine.low %v521_v56, %v525_v58 }
  0xcc   : > { %1267 = vmatprep.subr.bf16.mxu0 %v11109_v6  ;;  %1340 = vmatprep.subr.bf16.mxu1 %v11111_v7  ;;  %v11166_v6 = vcombine.low %v522_v59, %v526_v60  ;;  %v11049_v7 = vcombine.high %v403_v1, %v407_v2  ;;  %v11051_v8 = vcombine.high %v404_v3, %v408_v4  ;;  %v13336_v11 = vld [vmem:[%s16569_s0] ss:$8 sps:$4 sm:$0xff]   ;;  %v13369_v56 = vld [vmem:[%s16569_s0 + $0x34] ss:$8 sps:$4 sm:$0xff]  }
  0xcd   : > { %v13364_v49 = vld [vmem:[%s16569_s0 + $0x20] ss:$8 sps:$4 sm:$0xff]  }
  0xce   : > { %v452_v58 = vld [vmem:[#allocation5 + $0x198] sm:$0xff] }
  0xcf   : > { %1268 = vmatpush1.bf16.msra.mxu0 %v11108_v12  ;;  %1341 = vmatpush1.bf16.msra.mxu1 %v11110_v13  ;;  %v412_v12 = vld [vmem:[#allocation5 + $0x58] sm:$0xff] }
  0xd0   : > { %1269 = vmatprep.subr.bf16.mxu0 %v11117_v14  ;;  %1342 = vmatprep.subr.bf16.mxu1 %v11119_v15  ;;  %v416_v13 = vld [vmem:[#allocation5 + $0x78] sm:$0xff]  ;;  %v11048_v14 = vcombine.low %v403_v1, %v407_v2  ;;  %v11050_v15 = vcombine.low %v404_v3, %v408_v4  ;;  %v463_v1 = vld [vmem:[#allocation5 + $0x1f0] sm:$0xff] }
  0xd1   : > { %v11059_v17 = vcombine.high %v412_v12, %v416_v13  ;;  %v11058_v24 = vcombine.low %v412_v12, %v416_v13  ;;  %v456_v59 = vld [vmem:[#allocation5 + $0x1b8] sm:$0xff] }
  0xd2   : > { %v460_v2 = vld [vmem:[#allocation5 + $0x1d8] sm:$0xff] }
  0xd3   : > { %1270 = vmatpush1.bf16.msra.mxu0 %v11116_v20  ;;  %1343 = vmatpush1.bf16.msra.mxu1 %v11118_v21  ;;  %v13341_v20 = vld [vmem:[%s16569_s0 + $0x14] ss:$8 sps:$4 sm:$0xff]   ;;  %v13378_v4 = vld [vmem:[%s16569_s0 + $0x30] ss:$8 sps:$4 sm:$0xff]  }
  0xd4   : > { %1271 = vmatprep.subr.bf16.mxu0 %v11125_v22  ;;  %1344 = vmatprep.subr.bf16.mxu1 %v11127_v23  ;;  %v420_v21 = vld [vmem:[#allocation5 + $0x98] sm:$0xff]  ;;  %v11056_v23 = vcombine.low %v411_v9, %v415_v10  ;;  %v467_v9 = vld [vmem:[#allocation5 + $0x210] sm:$0xff] }
  0xd5   : > { %v424_v22 = vld [vmem:[#allocation5 + $0xb8] sm:$0xff]  ;;  %v471_v10 = vld [vmem:[#allocation5 + $0x230] sm:$0xff] }
  0xd6   : > { %v11067_v26 = vcombine.high %v420_v21, %v424_v22  ;;  %v11066_v33 = vcombine.low %v420_v21, %v424_v22  ;;  %v464_v3 = vld [vmem:[#allocation5 + $0x1f8] sm:$0xff] }
  0xd7   : > { %1272 = vmatpush1.bf16.msra.mxu0 %v11124_v28  ;;  %1345 = vmatpush1.bf16.msra.mxu1 %v11126_v29  ;;  %v431_v28 = vld [vmem:[#allocation5 + $0xf0] sm:$0xff]  ;;  %v428_v29 = vld [vmem:[#allocation5 + $0xd8] sm:$0xff] }
  0xd8   : > { %1273 = vmatprep.subr.bf16.mxu0 %v11133_v30  ;;  %1346 = vmatprep.subr.bf16.mxu1 %v11135_v31  ;;  %v432_v30 = vld [vmem:[#allocation5 + $0xf8] sm:$0xff]  ;;  %v11073_v34 = vcombine.high %v427_v27, %v431_v28  ;;  %v11072_v41 = vcombine.low %v427_v27, %v431_v28  ;;  %v483_v27 = vld [vmem:[#allocation5 + $0x290] sm:$0xff] }
  0xd9   : > { %v13350_v31 = vld [vmem:[%s16569_s0 + $0x10] ss:$8 sps:$4 sm:$0xff]   ;;  %v11075_v35 = vcombine.high %v428_v29, %v432_v30  ;;  %v11074_v42 = vcombine.low %v428_v29, %v432_v30 }
  0xda   : > { %v468_v12 = vld [vmem:[#allocation5 + $0x218] sm:$0xff]  ;;  %v487_v28 = vld [vmem:[#allocation5 + $0x2b0] sm:$0xff] }
  0xdb   : > { %1274 = vmatpush1.bf16.msra.mxu0 %v11132_v36  ;;  %1347 = vmatpush1.bf16.msra.mxu1 %v11134_v37  ;;  %v435_v36 = vld [vmem:[#allocation5 + $0x110] sm:$0xff]  ;;  %v472_v13 = vld [vmem:[#allocation5 + $0x238] sm:$0xff] }
  0xdc   : > { %1275 = vmatprep.subr.bf16.mxu0 %v11141_v38  ;;  %1348 = vmatprep.subr.bf16.mxu1 %v11143_v39  ;;  %v439_v37 = vld [vmem:[#allocation5 + $0x130] sm:$0xff]  ;;  %v13355_v38 = vld [vmem:[%s16569_s0 + $0x24] ss:$8 sps:$4 sm:$0xff]   ;;  %v436_v39 = vld [vmem:[#allocation5 + $0x118] sm:$0xff] }
  0xdd   : > { %v11081_v43 = vcombine.high %v435_v36, %v439_v37  ;;  %v11080_v50 = vcombine.low %v435_v36, %v439_v37  ;;  %v11082_v51 = vcombine.low %v436_v39, %v440_v40  ;;  %v476_v21 = vld [vmem:[#allocation5 + $0x258] sm:$0xff]  ;;  %v495_v36 = vld [vmem:[#allocation5 + $0x2f0] sm:$0xff] }
  0xde   : > { %v480_v22 = vld [vmem:[#allocation5 + $0x278] sm:$0xff] }
  0xdf   : > { %1276 = vmatpush1.bf16.msra.mxu0 %v11140_v44  ;;  %1349 = vmatpush1.bf16.msra.mxu1 %v11142_v45  ;;  %v11083_v44 = vcombine.high %v436_v39, %v440_v40  ;;  %v443_v45 = vld [vmem:[#allocation5 + $0x150] sm:$0xff]  ;;  %v484_v29 = vld [vmem:[#allocation5 + $0x298] sm:$0xff]  ;;  %v11128_v40 = vcombine.low %v483_v27, %v487_v28 }
  0xe0   : > { %1277 = vmatprep.subr.bf16.mxu0 %v11149_v46  ;;  %1350 = vmatprep.subr.bf16.mxu1 %v11151_v47  ;;  %v447_v46 = vld [vmem:[#allocation5 + $0x170] sm:$0xff]  ;;  %v444_v47 = vld [vmem:[#allocation5 + $0x158] sm:$0xff] }
  0xe1   : > { %v11088_v60 = vcombine.low %v443_v45, %v447_v46  ;;  %v488_v30 = vld [vmem:[#allocation5 + $0x2b8] sm:$0xff] }
  0xe2   : > { %v492_v37 = vld [vmem:[#allocation5 + $0x2d8] sm:$0xff] }
  0xe3   : > { %1278 = vmatpush1.bf16.msra.mxu0 %v11148_v52  ;;  %1351 = vmatpush1.bf16.msra.mxu1 %v11150_v53  ;;  %v11089_v52 = vcombine.high %v443_v45, %v447_v46  ;;  %v11091_v53 = vcombine.high %v444_v47, %v448_v48  ;;  %v496_v39 = vld [vmem:[#allocation5 + $0x2f8] sm:$0xff]  ;;  %v503_v45 = vld [vmem:[#allocation5 + $0x330] sm:$0xff] }
  0xe4   : > { %1279 = vmatprep.subr.bf16.mxu0 %v11157_v54  ;;  %1352 = vmatprep.subr.bf16.mxu1 %v11159_v55  ;;  %v451_v54 = vld [vmem:[#allocation5 + $0x190] sm:$0xff]  ;;  %v500_v46 = vld [vmem:[#allocation5 + $0x318] sm:$0xff] }
  0xe5   : > { %v455_v55 = vld [vmem:[#allocation5 + $0x1b0] sm:$0xff] }
  0xe7   : > { %1280 = vmatpush1.bf16.msra.mxu0 %v11156_v61  ;;  %1353 = vmatpush1.bf16.msra.mxu1 %v11158_v62  ;;  %v11090_v61 = vcombine.low %v444_v47, %v448_v48  ;;  %v11097_v62 = vcombine.high %v451_v54, %v455_v55  ;;  %v504_v47 = vld [vmem:[#allocation5 + $0x338] sm:$0xff] }
  0xe8   : > { %1281 = vmatprep.subr.bf16.mxu0 %v11165_v63  ;;  %1354 = vmatprep.subr.bf16.mxu1 %v11167_v0  ;;  %v11099_v63 = vcombine.high %v452_v58, %v456_v59  ;;  %v459_v0 = vld [vmem:[#allocation5 + $0x1d0] sm:$0xff] }
  0xeb   : > { %1282 = vmatpush1.bf16.msra.mxu0 %v11164_v5  ;;  %1355 = vmatpush1.bf16.msra.mxu1 %v11166_v6  ;;  %v11096_v5 = vcombine.low %v451_v54, %v455_v55  ;;  %v11098_v6 = vcombine.low %v452_v58, %v456_v59  ;;  %v511_v54 = vld [vmem:[#allocation5 + $0x370] sm:$0xff]  ;;  %v508_v55 = vld [vmem:[#allocation5 + $0x358] sm:$0xff] }
  0xec   : > { %1397 = vmatprep.subr.bf16.mxu0 %v11049_v7  ;;  %1470 = vmatprep.subr.bf16.mxu1 %v11051_v8  ;;  %v11105_v7 = vcombine.high %v459_v0, %v463_v1  ;;  %v11107_v8 = vcombine.high %v460_v2, %v464_v3  ;;  %v512_v58 = vld [vmem:[#allocation5 + $0x378] sm:$0xff] }
  0xee   : > { %1284 = vmatmul.mubr.bf16.vlgmr.msra.gmra.mrb[0].mxu0 %v13336_v11  ;;  %1357 = vmatmul.mubr.bf16.vlgmr.msra.gmra.mrb[0].mxu1 %v13336_v11 }
  0xef   : > { %1398 = vmatpush1.bf16.msra.mxu0 %v11048_v14  ;;  %1471 = vmatpush1.bf16.msra.mxu1 %v11050_v15  ;;  %v11104_v14 = vcombine.low %v459_v0, %v463_v1  ;;  %v11106_v15 = vcombine.low %v460_v2, %v464_v3  ;;  %v519_v0 = vld [vmem:[#allocation5 + $0x3b0] sm:$0xff]  ;;  %v516_v1 = vld [vmem:[#allocation5 + $0x398] sm:$0xff] }
  0xf0   : > { %1399 = vmatprep.subr.bf16.mxu0 %v11057_v16  ;;  %1472 = vmatprep.subr.bf16.mxu1 %v11059_v17  ;;  %v11113_v16 = vcombine.high %v467_v9, %v471_v10  ;;  %v11115_v17 = vcombine.high %v468_v12, %v472_v13  ;;  %v520_v2 = vld [vmem:[#allocation5 + $0x3b8] sm:$0xff] }
  0xf1   : > { %1293 = vmatprep.mubr.bf16.mxu0 %v13341_v20  ;;  %1366 = vmatprep.mubr.bf16.mxu1 %v13341_v20 }
  0xf3   : > { %1400 = vmatpush1.bf16.msra.mxu0 %v11056_v23  ;;  %1473 = vmatpush1.bf16.msra.mxu1 %v11058_v24  ;;  %v11112_v23 = vcombine.low %v467_v9, %v471_v10  ;;  %v11114_v24 = vcombine.low %v468_v12, %v472_v13  ;;  %v527_v9 = vld [vmem:[#allocation5 + $0x3f0] sm:$0xff]  ;;  %v524_v10 = vld [vmem:[#allocation5 + $0x3d8] sm:$0xff] }
  0xf4   : > { %1401 = vmatprep.subr.bf16.mxu0 %v11065_v25  ;;  %1474 = vmatprep.subr.bf16.mxu1 %v11067_v26  ;;  %v11121_v25 = vcombine.high %v475_v18, %v479_v19  ;;  %v11123_v26 = vcombine.high %v476_v21, %v480_v22  ;;  %v528_v12 = vld [vmem:[#allocation5 + $0x3f8] sm:$0xff] }
  0xf6   : > { %1294 = vmatmul.mubr.bf16.gmra.mrb[4].mxu0 %v13350_v31  ;;  %1367 = vmatmul.mubr.bf16.gmra.mrb[4].mxu1 %v13350_v31 }
  0xf7   : > { %1402 = vmatpush1.bf16.msra.mxu0 %v11064_v32  ;;  %1475 = vmatpush1.bf16.msra.mxu1 %v11066_v33  ;;  %v11120_v32 = vcombine.low %v475_v18, %v479_v19  ;;  %v11122_v33 = vcombine.low %v476_v21, %v480_v22  ;;  %v11170_v18 = vcombine.low %v524_v10, %v528_v12  ;;  %v13402_v19 = vld [vmem:[%s13318_s13] sm:$0xff] }
  0xf8   : > { %1403 = vmatprep.subr.bf16.mxu0 %v11073_v34  ;;  %1476 = vmatprep.subr.bf16.mxu1 %v11075_v35  ;;  %v11129_v34 = vcombine.high %v483_v27, %v487_v28  ;;  %v491_v35 = vld [vmem:[#allocation5 + $0x2d0] sm:$0xff] }
  0xf9   : > { %1303 = vmatprep.mubr.bf16.mxu0 %v13355_v38  ;;  %1376 = vmatprep.mubr.bf16.mxu1 %v13355_v38  ;;  %v11136_v48 = vcombine.low %v491_v35, %v495_v36 }
  0xfb   : > { %1404 = vmatpush1.bf16.msra.mxu0 %v11072_v41  ;;  %1477 = vmatpush1.bf16.msra.mxu1 %v11074_v42  ;;  %v11130_v41 = vcombine.low %v484_v29, %v488_v30  ;;  %v11137_v42 = vcombine.high %v491_v35, %v495_v36 }
  0xfc   : > { %1405 = vmatprep.subr.bf16.mxu0 %v11081_v43  ;;  %1478 = vmatprep.subr.bf16.mxu1 %v11083_v44  ;;  %v11139_v43 = vcombine.high %v492_v37, %v496_v39  ;;  %v499_v44 = vld [vmem:[#allocation5 + $0x310] sm:$0xff] }
  0xfd   : > { %v11144_v59 = vcombine.low %v499_v44, %v503_v45 }
  0xfe   : > { %1304 = vmatmul.mubr.bf16.gmra.mrb[8].mxu0 %v13364_v49  ;;  %1377 = vmatmul.mubr.bf16.gmra.mrb[8].mxu1 %v13364_v49 }
  0xff   : > { %1406 = vmatpush1.bf16.msra.mxu0 %v11080_v50  ;;  %1479 = vmatpush1.bf16.msra.mxu1 %v11082_v51  ;;  %v11138_v50 = vcombine.low %v492_v37, %v496_v39  ;;  %v11145_v51 = vcombine.high %v499_v44, %v503_v45 }
 0x100   : > { %1407 = vmatprep.subr.bf16.mxu0 %v11089_v52  ;;  %1480 = vmatprep.subr.bf16.mxu1 %v11091_v53  ;;  %v11147_v52 = vcombine.high %v500_v46, %v504_v47  ;;  %v507_v53 = vld [vmem:[#allocation5 + $0x350] sm:$0xff] }
 0x101   : > { %1313 = vmatprep.mubr.bf16.mxu0 %v13369_v56  ;;  %1386 = vmatprep.mubr.bf16.mxu1 %v13369_v56  ;;  %v11152_v3 = vcombine.low %v507_v53, %v511_v54 }
 0x103   : > { %1408 = vmatpush1.bf16.msra.mxu0 %v11088_v60  ;;  %1481 = vmatpush1.bf16.msra.mxu1 %v11090_v61  ;;  %v11146_v60 = vcombine.low %v500_v46, %v504_v47  ;;  %v11153_v61 = vcombine.high %v507_v53, %v511_v54 }
 0x104   : > { %1409 = vmatprep.subr.bf16.mxu0 %v11097_v62  ;;  %1482 = vmatprep.subr.bf16.mxu1 %v11099_v63  ;;  %v11155_v62 = vcombine.high %v508_v55, %v512_v58  ;;  %v515_v63 = vld [vmem:[#allocation5 + $0x390] sm:$0xff] }
 0x105   : > { %v11160_v13 = vcombine.low %v515_v63, %v519_v0 }
 0x106   : > { %1314 = vmatmul.mubr.bf16.gmra.mrb[12].mxu0 %v13378_v4  ;;  %1387 = vmatmul.mubr.bf16.gmra.mrb[12].mxu1 %v13378_v4 }
 0x107   : > { %1410 = vmatpush1.bf16.msra.mxu0 %v11096_v5  ;;  %1483 = vmatpush1.bf16.msra.mxu1 %v11098_v6  ;;  %v11154_v5 = vcombine.low %v508_v55, %v512_v58  ;;  %v11161_v6 = vcombine.high %v515_v63, %v519_v0 }
 0x108   : > { %1411 = vmatprep.subr.bf16.mxu0 %v11105_v7  ;;  %1484 = vmatprep.subr.bf16.mxu1 %v11107_v8  ;;  %v11163_v7 = vcombine.high %v516_v1, %v520_v2  ;;  %v523_v8 = vld [vmem:[#allocation5 + $0x3d0] sm:$0xff] }
 0x109   : > { %1429 = vmatprep.mubr.bf16.mxu0 %v13329_v57  ;;  %1502 = vmatprep.mubr.bf16.mxu1 %v13329_v57  ;;  %v11131_v57 = vcombine.high %v484_v29, %v488_v30 }
 0x10b   : > { %1412 = vmatpush1.bf16.msra.mxu0 %v11104_v14  ;;  %1485 = vmatpush1.bf16.msra.mxu1 %v11106_v15  ;;  %v11162_v14 = vcombine.low %v516_v1, %v520_v2  ;;  %v11169_v15 = vcombine.high %v523_v8, %v527_v9 }
 0x10c   : > { %1413 = vmatprep.subr.bf16.mxu0 %v11113_v16  ;;  %1486 = vmatprep.subr.bf16.mxu1 %v11115_v17  ;;  %v11171_v16 = vcombine.high %v524_v10, %v528_v12  ;;  %v11168_v17 = vcombine.low %v523_v8, %v527_v9 }
 0x10f   : > { %1414 = vmatpush1.bf16.msra.mxu0 %v11112_v23  ;;  %1487 = vmatpush1.bf16.msra.mxu1 %v11114_v24 }
 0x110   : > { %1415 = vmatprep.subr.bf16.mxu0 %v11121_v25  ;;  %1488 = vmatprep.subr.bf16.mxu1 %v11123_v26 }
 0x113   : > { %1416 = vmatpush1.bf16.msra.mxu0 %v11120_v32  ;;  %1489 = vmatpush1.bf16.msra.mxu1 %v11122_v33 }
 0x114   : > { %1417 = vmatprep.subr.bf16.mxu0 %v11129_v34  ;;  %1490 = vmatprep.subr.bf16.mxu1 %v11131_v57 }
 0x117   : > { %1418 = vmatpush1.bf16.msra.mxu0 %v11128_v40  ;;  %1491 = vmatpush1.bf16.msra.mxu1 %v11130_v41 }
 0x118   : > { %1419 = vmatprep.subr.bf16.mxu0 %v11137_v42  ;;  %1492 = vmatprep.subr.bf16.mxu1 %v11139_v43 }
 0x11b   : > { %1420 = vmatpush1.bf16.msra.mxu0 %v11136_v48  ;;  %1493 = vmatpush1.bf16.msra.mxu1 %v11138_v50 }
 0x11c   : > { %1421 = vmatprep.subr.bf16.mxu0 %v11145_v51  ;;  %1494 = vmatprep.subr.bf16.mxu1 %v11147_v52 }
 0x11f   : > { %1422 = vmatpush1.bf16.msra.mxu0 %v11144_v59  ;;  %1495 = vmatpush1.bf16.msra.mxu1 %v11146_v60 }
 0x120   : > { %1423 = vmatprep.subr.bf16.mxu0 %v11153_v61  ;;  %1496 = vmatprep.subr.bf16.mxu1 %v11155_v62 }
 0x123   : > { %1424 = vmatpush1.bf16.msra.mxu0 %v11152_v3  ;;  %1497 = vmatpush1.bf16.msra.mxu1 %v11154_v5 }
 0x124   : > { %1425 = vmatprep.subr.bf16.mxu0 %v11161_v6  ;;  %1498 = vmatprep.subr.bf16.mxu1 %v11163_v7 }
 0x127   : > { %1426 = vmatpush1.bf16.msra.mxu0 %v11160_v13  ;;  %1499 = vmatpush1.bf16.msra.mxu1 %v11162_v14 }
 0x128   : > { %1427 = vmatprep.subr.bf16.mxu0 %v11169_v15  ;;  %1500 = vmatprep.subr.bf16.mxu1 %v11171_v16 }
 0x12b   : > { %1428 = vmatpush1.bf16.msra.mxu0 %v11168_v17  ;;  %1501 = vmatpush1.bf16.msra.mxu1 %v11170_v18 }
 0x12e   : > { %1430 = vmatmul.mubr.bf16.vlgmr.msra.gmra.mrb[16].mxu0 %v13336_v11  ;;  %1503 = vmatmul.mubr.bf16.vlgmr.msra.gmra.mrb[16].mxu1 %v13336_v11  ;;  %v531_v11 = vlaneseq }
 0x12f   : > { %1439 = vmatprep.mubr.bf16.mxu0 %v13341_v20  ;;  %1512 = vmatprep.mubr.bf16.mxu1 %v13341_v20 }
 0x130   : > { %v13398_v20 = vshrl.u32 %v531_v11, 7 }
 0x132   : > { %v537_v21 = vsub.s32 1, %v13398_v20 }
 0x136   : > { %1440 = vmatmul.mubr.bf16.gmra.mrb[20].mxu0 %v13350_v31  ;;  %1513 = vmatmul.mubr.bf16.gmra.mrb[20].mxu1 %v13350_v31  ;;  %v533_v31 = vsub.s32 0, %v13398_v20 }
 0x137   : > { %1449 = vmatprep.mubr.bf16.mxu0 %v13355_v38  ;;  %1522 = vmatprep.mubr.bf16.mxu1 %v13355_v38  ;;  %v541_v38 = vsub.s32 2, %v13398_v20 }
 0x138   : > { %v13408_v22 = vrot.slane %v13402_v19, %v533_v31 }
 0x13e   : > { %1450 = vmatmul.mubr.bf16.gmra.mrb[24].mxu0 %v13364_v49  ;;  %1523 = vmatmul.mubr.bf16.gmra.mrb[24].mxu1 %v13364_v49  ;;  %v545_v49 = vsub.s32 3, %v13398_v20 }
 0x13f   : > { %1459 = vmatprep.mubr.bf16.mxu0 %v13369_v56  ;;  %1532 = vmatprep.mubr.bf16.mxu1 %v13369_v56  ;;  %v13411_v56 = vrot.slane %v13402_v19, %v541_v38 }
 0x140   : > { %v13417_v23 = vrot.slane %v13402_v19, %v545_v49 }
 0x146   : > { %1460 = vmatmul.mubr.bf16.gmra.mrb[28].mxu0 %v13378_v4  ;;  %1533 = vmatmul.mubr.bf16.gmra.mrb[28].mxu1 %v13378_v4  ;;  %v13414_v4 = vrot.slane %v13402_v19, %v537_v21 }
 0x1c1   : > { %v1285_v24 = vpop.f32.mrb[0].mxu0  ;;  %v1358_v26 = vpop.f32.mrb[0].mxu1 }
 0x1c2   : > { %v1286_v25 = vadd.f32 %v1285_v24, %v13408_v22  ;;  %v1287_v27 = vpop.f32.mrb[1].mxu0  ;;  %v1359_v28 = vadd.f32 %v1358_v26, %v13411_v56  ;;  %v1360_v30 = vpop.f32.mrb[1].mxu1 }
 0x1c3   : > { %v1288_v29 = vadd.f32 %v1287_v27, %v13414_v4  ;;  %v1289_v32 = vpop.f32.mrb[2].mxu0  ;;  %v1361_v33 = vadd.f32 %v1360_v30, %v13417_v23  ;;  %v1362_v57 = vpop.f32.mrb[2].mxu1  ;;  %v549_v30 = vsub.s32 4, %v13398_v20 }
 0x1c4   : > { %1543 = vst [vmem:[#allocation3] sm:$0xff] %v1286_v25  ;;  %v1290_v34 = vadd.f32 %v1289_v32, %v13408_v22  ;;  %v1291_v35 = vpop.f32.mrb[3].mxu0  ;;  %1545 = vst [vmem:[#allocation3 + $0x10] sm:$0xff] %v1359_v28  ;;  %v1363_v36 = vadd.f32 %v1362_v57, %v13411_v56  ;;  %v1364_v39 = vpop.f32.mrb[3].mxu1  ;;  %v553_v32 = vsub.s32 5, %v13398_v20 }
 0x1c5   : > { %1544 = vst [vmem:[#allocation3 + $0x8] sm:$0xff] %v1288_v29  ;;  %v1292_v37 = vadd.f32 %v1291_v35, %v13414_v4  ;;  %1546 = vst [vmem:[#allocation3 + $0x18] sm:$0xff] %v1361_v33  ;;  %v1365_v40 = vadd.f32 %v1364_v39, %v13417_v23  ;;  %v561_v33 = vsub.s32 7, %v13398_v20 }
 0x1c6   : > { %1551 = vst [vmem:[#allocation3 + $0x40] sm:$0xff] %v1290_v34  ;;  %1553 = vst [vmem:[#allocation3 + $0x50] sm:$0xff] %v1363_v36  ;;  %v13462_v34 = vrot.slane %v13402_v19, %v553_v32 }
 0x1c7   : > { %1552 = vst [vmem:[#allocation3 + $0x48] sm:$0xff] %v1292_v37  ;;  %1554 = vst [vmem:[#allocation3 + $0x58] sm:$0xff] %v1365_v40 }
 0x1c9   : > { %v1295_v41 = vpop.f32.mrb[4].mxu0  ;;  %v1368_v43 = vpop.f32.mrb[4].mxu1 }
 0x1ca   : > { %v1296_v42 = vadd.f32 %v1295_v41, %v13408_v22  ;;  %v1297_v44 = vpop.f32.mrb[5].mxu0  ;;  %v1369_v45 = vadd.f32 %v1368_v43, %v13411_v56  ;;  %v1370_v47 = vpop.f32.mrb[5].mxu1 }
 0x1cb   : > { %v1298_v46 = vadd.f32 %v1297_v44, %v13414_v4  ;;  %v1299_v48 = vpop.f32.mrb[6].mxu0  ;;  %v1371_v50 = vadd.f32 %v1370_v47, %v13417_v23  ;;  %v1372_v52 = vpop.f32.mrb[6].mxu1 }
 0x1cc   : > { %1559 = vst [vmem:[#allocation3 + $0x80] sm:$0xff] %v1296_v42  ;;  %v1300_v51 = vadd.f32 %v1299_v48, %v13408_v22  ;;  %v1301_v53 = vpop.f32.mrb[7].mxu0  ;;  %1561 = vst [vmem:[#allocation3 + $0x90] sm:$0xff] %v1369_v45  ;;  %v1373_v54 = vadd.f32 %v1372_v52, %v13411_v56  ;;  %v1374_v58 = vpop.f32.mrb[7].mxu1 }
 0x1cd   : > { %1560 = vst [vmem:[#allocation3 + $0x88] sm:$0xff] %v1298_v46  ;;  %v1302_v55 = vadd.f32 %v1301_v53, %v13414_v4  ;;  %1562 = vst [vmem:[#allocation3 + $0x98] sm:$0xff] %v1371_v50  ;;  %v1375_v59 = vadd.f32 %v1374_v58, %v13417_v23 }
 0x1ce   : > { %1567 = vst [vmem:[#allocation3 + $0xc0] sm:$0xff] %v1300_v51  ;;  %1569 = vst [vmem:[#allocation3 + $0xd0] sm:$0xff] %v1373_v54 }
 0x1cf   : > { %1568 = vst [vmem:[#allocation3 + $0xc8] sm:$0xff] %v1302_v55  ;;  %1570 = vst [vmem:[#allocation3 + $0xd8] sm:$0xff] %v1375_v59 }
 0x1d1   : > { %v1305_v60 = vpop.f32.mrb[8].mxu0  ;;  %v1378_v62 = vpop.f32.mrb[8].mxu1 }
 0x1d2   : > { %v1306_v61 = vadd.f32 %v1305_v60, %v13408_v22  ;;  %v1307_v63 = vpop.f32.mrb[9].mxu0  ;;  %v1379_v0 = vadd.f32 %v1378_v62, %v13411_v56  ;;  %v1380_v2 = vpop.f32.mrb[9].mxu1 }
 0x1d3   : > { %v1308_v1 = vadd.f32 %v1307_v63, %v13414_v4  ;;  %v1309_v3 = vpop.f32.mrb[10].mxu0  ;;  %v1381_v5 = vadd.f32 %v1380_v2, %v13417_v23  ;;  %v1382_v7 = vpop.f32.mrb[10].mxu1 }
 0x1d4   : > { %1575 = vst [vmem:[#allocation3 + $0x100] sm:$0xff] %v1306_v61  ;;  %v1310_v6 = vadd.f32 %v1309_v3, %v13408_v22  ;;  %v1311_v8 = vpop.f32.mrb[11].mxu0  ;;  %1577 = vst [vmem:[#allocation3 + $0x110] sm:$0xff] %v1379_v0  ;;  %v1383_v9 = vadd.f32 %v1382_v7, %v13411_v56  ;;  %v1384_v12 = vpop.f32.mrb[11].mxu1 }
 0x1d5   : > { %1576 = vst [vmem:[#allocation3 + $0x108] sm:$0xff] %v1308_v1  ;;  %v1312_v10 = vadd.f32 %v1311_v8, %v13414_v4  ;;  %1578 = vst [vmem:[#allocation3 + $0x118] sm:$0xff] %v1381_v5  ;;  %v1385_v13 = vadd.f32 %v1384_v12, %v13417_v23 }
 0x1d6   : > { %1583 = vst [vmem:[#allocation3 + $0x140] sm:$0xff] %v1310_v6  ;;  %1585 = vst [vmem:[#allocation3 + $0x150] sm:$0xff] %v1383_v9 }
 0x1d7   : > { %1584 = vst [vmem:[#allocation3 + $0x148] sm:$0xff] %v1312_v10  ;;  %1586 = vst [vmem:[#allocation3 + $0x158] sm:$0xff] %v1385_v13 }
 0x1d9   : > { %v1315_v14 = vpop.f32.mrb[12].mxu0  ;;  %v1388_v16 = vpop.f32.mrb[12].mxu1 }
 0x1da   : > { %v1316_v15 = vadd.f32 %v1315_v14, %v13408_v22  ;;  %v1317_v17 = vpop.f32.mrb[13].mxu0  ;;  %v1389_v18 = vadd.f32 %v1388_v16, %v13411_v56  ;;  %v1390_v31 = vpop.f32.mrb[13].mxu1 }
 0x1db   : > { %v1318_v11 = vadd.f32 %v1317_v17, %v13414_v4  ;;  %v1319_v38 = vpop.f32.mrb[14].mxu0  ;;  %v1391_v21 = vadd.f32 %v1390_v31, %v13417_v23  ;;  %v1392_v24 = vpop.f32.mrb[14].mxu1 }
 0x1dc   : > { %1591 = vst [vmem:[#allocation3 + $0x180] sm:$0xff] %v1316_v15  ;;  %v1320_v49 = vadd.f32 %v1319_v38, %v13408_v22  ;;  %v1321_v25 = vpop.f32.mrb[15].mxu0  ;;  %1593 = vst [vmem:[#allocation3 + $0x190] sm:$0xff] %v1389_v18  ;;  %v1393_v26 = vadd.f32 %v1392_v24, %v13411_v56  ;;  %v1394_v28 = vpop.f32.mrb[15].mxu1  ;;  %v557_v22 = vsub.s32 6, %v13398_v20  ;;  %v13456_v56 = vrot.slane %v13402_v19, %v549_v30 }
 0x1dd   : > { %1592 = vst [vmem:[#allocation3 + $0x188] sm:$0xff] %v1318_v11  ;;  %v1322_v27 = vadd.f32 %v1321_v25, %v13414_v4  ;;  %1594 = vst [vmem:[#allocation3 + $0x198] sm:$0xff] %v1391_v21  ;;  %v1395_v29 = vadd.f32 %v1394_v28, %v13417_v23  ;;  %v13465_v23 = vrot.slane %v13402_v19, %v561_v33 }
 0x1de   : > { %1599 = vst [vmem:[#allocation3 + $0x1c0] sm:$0xff] %v1320_v49  ;;  %1601 = vst [vmem:[#allocation3 + $0x1d0] sm:$0xff] %v1393_v26  ;;  %v13459_v4 = vrot.slane %v13402_v19, %v557_v22 }
 0x1df   : > { %1600 = vst [vmem:[#allocation3 + $0x1c8] sm:$0xff] %v1322_v27  ;;  %1602 = vst [vmem:[#allocation3 + $0x1d8] sm:$0xff] %v1395_v29 }
 0x201   : > { %v1431_v57 = vpop.f32.mrb[16].mxu0  ;;  %v1504_v36 = vpop.f32.mrb[16].mxu1 }
 0x202   : > { %v1432_v35 = vadd.f32 %v1431_v57, %v13456_v56  ;;  %v1433_v37 = vpop.f32.mrb[17].mxu0  ;;  %v1505_v39 = vadd.f32 %v1504_v36, %v13459_v4  ;;  %v1506_v40 = vpop.f32.mrb[17].mxu1 }
 0x203   : > { %v1434_v20 = vadd.f32 %v1433_v37, %v13462_v34  ;;  %v1435_v41 = vpop.f32.mrb[18].mxu0  ;;  %v1507_v42 = vadd.f32 %v1506_v40, %v13465_v23  ;;  %v1508_v44 = vpop.f32.mrb[18].mxu1 }
 0x204   : > { %1547 = vst [vmem:[#allocation3 + $0x20] sm:$0xff] %v1432_v35  ;;  %v1436_v43 = vadd.f32 %v1435_v41, %v13456_v56  ;;  %v1437_v45 = vpop.f32.mrb[19].mxu0  ;;  %1549 = vst [vmem:[#allocation3 + $0x30] sm:$0xff] %v1505_v39  ;;  %v1509_v19 = vadd.f32 %v1508_v44, %v13459_v4  ;;  %v1510_v47 = vpop.f32.mrb[19].mxu1 }
 0x205   : > { %1548 = vst [vmem:[#allocation3 + $0x28] sm:$0xff] %v1434_v20  ;;  %v1438_v46 = vadd.f32 %v1437_v45, %v13462_v34  ;;  %1550 = vst [vmem:[#allocation3 + $0x38] sm:$0xff] %v1507_v42  ;;  %v1511_v48 = vadd.f32 %v1510_v47, %v13465_v23 }
 0x206   : > { %1555 = vst [vmem:[#allocation3 + $0x60] sm:$0xff] %v1436_v43  ;;  %1557 = vst [vmem:[#allocation3 + $0x70] sm:$0xff] %v1509_v19 }
 0x207   : > { %1556 = vst [vmem:[#allocation3 + $0x68] sm:$0xff] %v1438_v46  ;;  %1558 = vst [vmem:[#allocation3 + $0x78] sm:$0xff] %v1511_v48 }
 0x209   : > { %v1441_v50 = vpop.f32.mrb[20].mxu0  ;;  %v1514_v52 = vpop.f32.mrb[20].mxu1 }
 0x20a   : > { %v1442_v51 = vadd.f32 %v1441_v50, %v13456_v56  ;;  %v1443_v53 = vpop.f32.mrb[21].mxu0  ;;  %v1515_v54 = vadd.f32 %v1514_v52, %v13459_v4  ;;  %v1516_v58 = vpop.f32.mrb[21].mxu1 }
 0x20b   : > { %v1444_v55 = vadd.f32 %v1443_v53, %v13462_v34  ;;  %v1445_v59 = vpop.f32.mrb[22].mxu0  ;;  %v1517_v60 = vadd.f32 %v1516_v58, %v13465_v23  ;;  %v1518_v62 = vpop.f32.mrb[22].mxu1 }
 0x20c   : > { %1563 = vst [vmem:[#allocation3 + $0xa0] sm:$0xff] %v1442_v51  ;;  %v1446_v61 = vadd.f32 %v1445_v59, %v13456_v56  ;;  %v1447_v63 = vpop.f32.mrb[23].mxu0  ;;  %1565 = vst [vmem:[#allocation3 + $0xb0] sm:$0xff] %v1515_v54  ;;  %v1519_v0 = vadd.f32 %v1518_v62, %v13459_v4  ;;  %v1520_v2 = vpop.f32.mrb[23].mxu1 }
 0x20d   : > { %1564 = vst [vmem:[#allocation3 + $0xa8] sm:$0xff] %v1444_v55  ;;  %v1448_v1 = vadd.f32 %v1447_v63, %v13462_v34  ;;  %1566 = vst [vmem:[#allocation3 + $0xb8] sm:$0xff] %v1517_v60  ;;  %v1521_v3 = vadd.f32 %v1520_v2, %v13465_v23 }
 0x20e   : > { %1571 = vst [vmem:[#allocation3 + $0xe0] sm:$0xff] %v1446_v61  ;;  %1573 = vst [vmem:[#allocation3 + $0xf0] sm:$0xff] %v1519_v0 }
 0x20f   : > { %1572 = vst [vmem:[#allocation3 + $0xe8] sm:$0xff] %v1448_v1  ;;  %1574 = vst [vmem:[#allocation3 + $0xf8] sm:$0xff] %v1521_v3 }
 0x211   : > { %v1451_v5 = vpop.f32.mrb[24].mxu0  ;;  %v1524_v7 = vpop.f32.mrb[24].mxu1 }
 0x212   : > { %v1452_v6 = vadd.f32 %v1451_v5, %v13456_v56  ;;  %v1453_v8 = vpop.f32.mrb[25].mxu0  ;;  %v1525_v9 = vadd.f32 %v1524_v7, %v13459_v4  ;;  %v1526_v12 = vpop.f32.mrb[25].mxu1 }
 0x213   : > { %v1454_v10 = vadd.f32 %v1453_v8, %v13462_v34  ;;  %v1455_v13 = vpop.f32.mrb[26].mxu0  ;;  %v1527_v14 = vadd.f32 %v1526_v12, %v13465_v23  ;;  %v1528_v16 = vpop.f32.mrb[26].mxu1 }
 0x214   : > { %1579 = vst [vmem:[#allocation3 + $0x120] sm:$0xff] %v1452_v6  ;;  %v1456_v15 = vadd.f32 %v1455_v13, %v13456_v56  ;;  %v1457_v17 = vpop.f32.mrb[27].mxu0  ;;  %1581 = vst [vmem:[#allocation3 + $0x130] sm:$0xff] %v1525_v9  ;;  %v1529_v18 = vadd.f32 %v1528_v16, %v13459_v4  ;;  %v1530_v31 = vpop.f32.mrb[27].mxu1 }
 0x215   : > { %1580 = vst [vmem:[#allocation3 + $0x128] sm:$0xff] %v1454_v10  ;;  %v1458_v11 = vadd.f32 %v1457_v17, %v13462_v34  ;;  %1582 = vst [vmem:[#allocation3 + $0x138] sm:$0xff] %v1527_v14  ;;  %v1531_v38 = vadd.f32 %v1530_v31, %v13465_v23 }
 0x216   : > { %1587 = vst [vmem:[#allocation3 + $0x160] sm:$0xff] %v1456_v15  ;;  %1589 = vst [vmem:[#allocation3 + $0x170] sm:$0xff] %v1529_v18 }
 0x217   : > { %1588 = vst [vmem:[#allocation3 + $0x168] sm:$0xff] %v1458_v11  ;;  %1590 = vst [vmem:[#allocation3 + $0x178] sm:$0xff] %v1531_v38 }
 0x219   : > { %v1461_v21 = vpop.f32.mrb[28].mxu0  ;;  %v1534_v24 = vpop.f32.mrb[28].mxu1 }
 0x21a   : > { %v1462_v49 = vadd.f32 %v1461_v21, %v13456_v56  ;;  %v1463_v25 = vpop.f32.mrb[29].mxu0  ;;  %v1535_v26 = vadd.f32 %v1534_v24, %v13459_v4  ;;  %v1536_v28 = vpop.f32.mrb[29].mxu1 }
 0x21b   : > { %v1464_v27 = vadd.f32 %v1463_v25, %v13462_v34  ;;  %v1465_v29 = vpop.f32.mrb[30].mxu0  ;;  %v1537_v30 = vadd.f32 %v1536_v28, %v13465_v23  ;;  %v1538_v32 = vpop.f32.mrb[30].mxu1 }
 0x21c   : > { %1595 = vst [vmem:[#allocation3 + $0x1a0] sm:$0xff] %v1462_v49  ;;  %v1466_v22 = vadd.f32 %v1465_v29, %v13456_v56  ;;  %v1467_v33 = vpop.f32.mrb[31].mxu0  ;;  %1597 = vst [vmem:[#allocation3 + $0x1b0] sm:$0xff] %v1535_v26  ;;  %v1539_v57 = vadd.f32 %v1538_v32, %v13459_v4  ;;  %v1540_v36 = vpop.f32.mrb[31].mxu1 }
 0x21d   : > { %1596 = vst [vmem:[#allocation3 + $0x1a8] sm:$0xff] %v1464_v27  ;;  %v1468_v35 = vadd.f32 %v1467_v33, %v13462_v34  ;;  %1598 = vst [vmem:[#allocation3 + $0x1b8] sm:$0xff] %v1537_v30  ;;  %v1541_v37 = vadd.f32 %v1540_v36, %v13465_v23 }
 0x21e   : > { %1603 = vst [vmem:[#allocation3 + $0x1e0] sm:$0xff] %v1466_v22  ;;  %1605 = vst [vmem:[#allocation3 + $0x1f0] sm:$0xff] %v1539_v57 }
 0x21f   : > { %1604 = vst [vmem:[#allocation3 + $0x1e8] sm:$0xff] %v1468_v35  ;;  %1606 = vst [vmem:[#allocation3 + $0x1f8] sm:$0xff] %v1541_v37 }
 0x220 PF: > { %p11172_p5 = scmp.le.s32.totalorder %s13083_s6, 0 }
 0x221   : > { %v1635_v56 = vld [vmem:[%s13305_s9] sm:$0xff] (!%p11172_p5)  ;;  %v1636_v34 = vld [vmem:[%s13305_s9 + $0x8] sm:$0xff] (!%p11172_p5)  ;;  %v1614_v28 = vld [vmem:[#allocation2 + $0x18] sm:$0xff] (!%p11172_p5) }
 0x222   : > { %1610 = sbr.rel (%p11172_p5) target bundleno = 919 (0x397), region = 72  ;;  %v1639_v4 = vld [vmem:[%s13305_s9 + $0x20] sm:$0xff] (!%p11172_p5)  ;;  %v1640_v39 = vld [vmem:[%s13305_s9 + $0x28] sm:$0xff] (!%p11172_p5) }
 0x223   : > { %v11174_v23 = vcombine.high (!%p11172_p5), %v1635_v56, %v1639_v4  ;;  %v11173_v20 = vcombine.low (!%p11172_p5), %v1635_v56, %v1639_v4  ;;  %v1643_v40 = vld [vmem:[%s13305_s9 + $0x40] sm:$0xff] (!%p11172_p5)  ;;  %v11176_v42 = vcombine.high (!%p11172_p5), %v1636_v34, %v1640_v39  ;;  %v11175_v43 = vcombine.low (!%p11172_p5), %v1636_v34, %v1640_v39  ;;  %v1644_v45 = vld [vmem:[%s13305_s9 + $0x48] sm:$0xff] (!%p11172_p5) }
 0x224   : > { %v1647_v41 = vld [vmem:[%s13305_s9 + $0x60] sm:$0xff] (!%p11172_p5)  ;;  %v1648_v19 = vld [vmem:[%s13305_s9 + $0x68] sm:$0xff] (!%p11172_p5) }
 0x225   : > { %v11182_v44 = vcombine.high (!%p11172_p5), %v1643_v40, %v1647_v41  ;;  %v1651_v46 = vld [vmem:[%s13305_s9 + $0x80] sm:$0xff] (!%p11172_p5)  ;;  %2445 = vmatprep.subr.bf16.mxu0 (!%p11172_p5), %v11174_v23  ;;  %v11184_v47 = vcombine.high (!%p11172_p5), %v1644_v45, %v1648_v19  ;;  %v1652_v50 = vld [vmem:[%s13305_s9 + $0x88] sm:$0xff] (!%p11172_p5)  ;;  %2518 = vmatprep.subr.bf16.mxu1 (!%p11172_p5), %v11176_v42  ;;  %v11181_v52 = vcombine.low (!%p11172_p5), %v1643_v40, %v1647_v41 }
 0x226   : > { %v1655_v48 = vld [vmem:[%s13305_s9 + $0xa0] sm:$0xff] (!%p11172_p5)  ;;  %v1656_v51 = vld [vmem:[%s13305_s9 + $0xa8] sm:$0xff] (!%p11172_p5)  ;;  %2446 = vmatpush1.bf16.msra.mxu0 (!%p11172_p5), %v11173_v20  ;;  %2519 = vmatpush1.bf16.msra.mxu1 (!%p11172_p5), %v11175_v43  ;;  %v11183_v53 = vcombine.low (!%p11172_p5), %v1644_v45, %v1648_v19 }
 0x227   : > { %2447 = vmatprep.subr.bf16.mxu0 (!%p11172_p5), %v11182_v44  ;;  %v11190_v54 = vcombine.high (!%p11172_p5), %v1651_v46, %v1655_v48  ;;  %2520 = vmatprep.subr.bf16.mxu1 (!%p11172_p5), %v11184_v47  ;;  %v11192_v55 = vcombine.high (!%p11172_p5), %v1652_v50, %v1656_v51  ;;  %v1659_v58 = vld [vmem:[%s13305_s9 + $0xc0] sm:$0xff] (!%p11172_p5)  ;;  %v1660_v60 = vld [vmem:[%s13305_s9 + $0xc8] sm:$0xff] (!%p11172_p5)  ;;  %v11189_v62 = vcombine.low (!%p11172_p5), %v1651_v46, %v1655_v48 }
 0x228   : > { %v1663_v59 = vld [vmem:[%s13305_s9 + $0xe0] sm:$0xff] (!%p11172_p5)  ;;  %v1664_v61 = vld [vmem:[%s13305_s9 + $0xe8] sm:$0xff] (!%p11172_p5)  ;;  %v11191_v63 = vcombine.low (!%p11172_p5), %v1652_v50, %v1656_v51 }
 0x229   : > { %v11198_v0 = vcombine.high %v1659_v58, %v1663_v59  ;;  %v11200_v1 = vcombine.high %v1660_v60, %v1664_v61  ;;  %v1667_v2 = vld [vmem:[%s13305_s9 + $0x100] sm:$0xff]  ;;  %v1668_v5 = vld [vmem:[%s13305_s9 + $0x108] sm:$0xff]  ;;  %v11197_v7 = vcombine.low %v1659_v58, %v1663_v59  ;;  %v11199_v8 = vcombine.low %v1660_v60, %v1664_v61 }
 0x22a   : > { %2448 = vmatpush1.bf16.msra.mxu0 %v11181_v52  ;;  %2521 = vmatpush1.bf16.msra.mxu1 %v11183_v53  ;;  %v1671_v3 = vld [vmem:[%s13305_s9 + $0x120] sm:$0xff]  ;;  %v1672_v6 = vld [vmem:[%s13305_s9 + $0x128] sm:$0xff] }
 0x22b   : > { %2449 = vmatprep.subr.bf16.mxu0 %v11190_v54  ;;  %2522 = vmatprep.subr.bf16.mxu1 %v11192_v55  ;;  %v11206_v9 = vcombine.high %v1667_v2, %v1671_v3  ;;  %v11208_v10 = vcombine.high %v1668_v5, %v1672_v6  ;;  %v1675_v12 = vld [vmem:[%s13305_s9 + $0x140] sm:$0xff]  ;;  %v1676_v14 = vld [vmem:[%s13305_s9 + $0x148] sm:$0xff]  ;;  %v11205_v16 = vcombine.low %v1667_v2, %v1671_v3 }
 0x22c   : > { %v1679_v13 = vld [vmem:[%s13305_s9 + $0x160] sm:$0xff]  ;;  %v1680_v15 = vld [vmem:[%s13305_s9 + $0x168] sm:$0xff]  ;;  %v11207_v17 = vcombine.low %v1668_v5, %v1672_v6 }
 0x22d   : > { %v11214_v18 = vcombine.high %v1675_v12, %v1679_v13  ;;  %v11216_v11 = vcombine.high %v1676_v14, %v1680_v15  ;;  %v1683_v31 = vld [vmem:[%s13305_s9 + $0x180] sm:$0xff]  ;;  %v1684_v21 = vld [vmem:[%s13305_s9 + $0x188] sm:$0xff]  ;;  %v11213_v24 = vcombine.low %v1675_v12, %v1679_v13  ;;  %v11215_v25 = vcombine.low %v1676_v14, %v1680_v15 }
 0x22e   : > { %2450 = vmatpush1.bf16.msra.mxu0 %v11189_v62  ;;  %2523 = vmatpush1.bf16.msra.mxu1 %v11191_v63  ;;  %v1687_v38 = vld [vmem:[%s13305_s9 + $0x1a0] sm:$0xff]  ;;  %v1688_v49 = vld [vmem:[%s13305_s9 + $0x1a8] sm:$0xff] }
 0x22f   : > { %2451 = vmatprep.subr.bf16.mxu0 %v11198_v0  ;;  %2524 = vmatprep.subr.bf16.mxu1 %v11200_v1  ;;  %v11222_v26 = vcombine.high %v1683_v31, %v1687_v38  ;;  %v1612_v27 = vld [vmem:[#allocation2 + $0x8] sm:$0xff]  ;;  %v11224_v29 = vcombine.high %v1684_v21, %v1688_v49  ;;  %v11221_v35 = vcombine.low %v1683_v31, %v1687_v38 }
 0x230   : > { %v1691_v30 = vld [vmem:[%s13305_s9 + $0x1c0] sm:$0xff]  ;;  %v13530_v32 = vpack.c.bf16 %v1614_v28, %v1612_v27  ;;  %v1692_v33 = vld [vmem:[%s13305_s9 + $0x1c8] sm:$0xff]  ;;  %v11223_v36 = vcombine.low %v1684_v21, %v1688_v49 }
 0x231   : > { %v1695_v22 = vld [vmem:[%s13305_s9 + $0x1e0] sm:$0xff]  ;;  %v1696_v57 = vld [vmem:[%s13305_s9 + $0x1e8] sm:$0xff] }
 0x232   : > { %2452 = vmatpush1.bf16.msra.mxu0 %v11197_v7  ;;  %2525 = vmatpush1.bf16.msra.mxu1 %v11199_v8  ;;  %v11230_v37 = vcombine.high %v1691_v30, %v1695_v22  ;;  %v11232_v56 = vcombine.high %v1692_v33, %v1696_v57  ;;  %v1699_v4 = vld [vmem:[%s13305_s9 + $0x200] sm:$0xff]  ;;  %v1700_v23 = vld [vmem:[%s13305_s9 + $0x208] sm:$0xff]  ;;  %v11229_v20 = vcombine.low %v1691_v30, %v1695_v22 }
 0x233   : > { %2453 = vmatprep.subr.bf16.mxu0 %v11206_v9  ;;  %2526 = vmatprep.subr.bf16.mxu1 %v11208_v10  ;;  %v1703_v34 = vld [vmem:[%s13305_s9 + $0x220] sm:$0xff]  ;;  %v1704_v39 = vld [vmem:[%s13305_s9 + $0x228] sm:$0xff]  ;;  %v11231_v40 = vcombine.low %v1692_v33, %v1696_v57 }
 0x234   : > { %2477 = vmatprep.mubr.bf16.mxu0 %v13530_v32  ;;  %2550 = vmatprep.mubr.bf16.mxu1 %v13530_v32  ;;  %v11238_v41 = vcombine.high %v1699_v4, %v1703_v34  ;;  %v11240_v42 = vcombine.high %v1700_v23, %v1704_v39  ;;  %v1707_v43 = vld [vmem:[%s13305_s9 + $0x240] sm:$0xff]  ;;  %v1708_v45 = vld [vmem:[%s13305_s9 + $0x248] sm:$0xff]  ;;  %v11237_v46 = vcombine.low %v1699_v4, %v1703_v34  ;;  %v1637_v34 = vld [vmem:[%s13305_s9 + $0x10] sm:$0xff] }
 0x235   : > { %v1711_v44 = vld [vmem:[%s13305_s9 + $0x260] sm:$0xff]  ;;  %v1712_v19 = vld [vmem:[%s13305_s9 + $0x268] sm:$0xff]  ;;  %v11239_v47 = vcombine.low %v1700_v23, %v1704_v39  ;;  %v1641_v23 = vld [vmem:[%s13305_s9 + $0x30] sm:$0xff] }
 0x236   : > { %2454 = vmatpush1.bf16.msra.mxu0 %v11205_v16  ;;  %2527 = vmatpush1.bf16.msra.mxu1 %v11207_v17  ;;  %v11246_v48 = vcombine.high %v1707_v43, %v1711_v44  ;;  %v11248_v50 = vcombine.high %v1708_v45, %v1712_v19  ;;  %v1715_v51 = vld [vmem:[%s13305_s9 + $0x280] sm:$0xff]  ;;  %v1716_v53 = vld [vmem:[%s13305_s9 + $0x288] sm:$0xff]  ;;  %v11245_v55 = vcombine.low %v1707_v43, %v1711_v44  ;;  %v1638_v39 = vld [vmem:[%s13305_s9 + $0x18] sm:$0xff] }
 0x237   : > { %2455 = vmatprep.subr.bf16.mxu0 %v11214_v18  ;;  %2528 = vmatprep.subr.bf16.mxu1 %v11216_v11  ;;  %v1719_v52 = vld [vmem:[%s13305_s9 + $0x2a0] sm:$0xff]  ;;  %v1720_v54 = vld [vmem:[%s13305_s9 + $0x2a8] sm:$0xff]  ;;  %v11247_v58 = vcombine.low %v1708_v45, %v1712_v19  ;;  %v11178_v44 = vcombine.high %v1637_v34, %v1641_v23  ;;  %v1645_v19 = vld [vmem:[%s13305_s9 + $0x50] sm:$0xff] }
 0x238   : > { %v11254_v59 = vcombine.high %v1715_v51, %v1719_v52  ;;  %v11256_v60 = vcombine.high %v1716_v53, %v1720_v54  ;;  %v1723_v61 = vld [vmem:[%s13305_s9 + $0x2c0] sm:$0xff]  ;;  %v1724_v63 = vld [vmem:[%s13305_s9 + $0x2c8] sm:$0xff]  ;;  %v11253_v1 = vcombine.low %v1715_v51, %v1719_v52  ;;  %v11255_v2 = vcombine.low %v1716_v53, %v1720_v54  ;;  %v1618_v52 = vld [vmem:[#allocation2 + $0x38] sm:$0xff] }
 0x239   : > { %v1727_v62 = vld [vmem:[%s13305_s9 + $0x2e0] sm:$0xff]  ;;  %v1728_v0 = vld [vmem:[%s13305_s9 + $0x2e8] sm:$0xff]  ;;  %v11177_v53 = vcombine.low %v1637_v34, %v1641_v23 }
 0x23a   : > { %2456 = vmatpush1.bf16.msra.mxu0 %v11213_v24  ;;  %2529 = vmatpush1.bf16.msra.mxu1 %v11215_v25  ;;  %v11262_v3 = vcombine.high %v1723_v61, %v1727_v62  ;;  %v11264_v5 = vcombine.high %v1724_v63, %v1728_v0  ;;  %v1731_v6 = vld [vmem:[%s13305_s9 + $0x300] sm:$0xff]  ;;  %v1732_v8 = vld [vmem:[%s13305_s9 + $0x308] sm:$0xff]  ;;  %v11261_v10 = vcombine.low %v1723_v61, %v1727_v62  ;;  %v1654_v62 = vld [vmem:[%s13305_s9 + $0x98] sm:$0xff] }
 0x23b   : > { %2457 = vmatprep.subr.bf16.mxu0 %v11222_v26  ;;  %2530 = vmatprep.subr.bf16.mxu1 %v11224_v29  ;;  %v1735_v7 = vld [vmem:[%s13305_s9 + $0x320] sm:$0xff]  ;;  %v1736_v9 = vld [vmem:[%s13305_s9 + $0x328] sm:$0xff]  ;;  %v11263_v12 = vcombine.low %v1724_v63, %v1728_v0  ;;  %v1658_v63 = vld [vmem:[%s13305_s9 + $0xb8] sm:$0xff] }
 0x23c   : > { %v11270_v13 = vcombine.high %v1731_v6, %v1735_v7  ;;  %v11272_v14 = vcombine.high %v1732_v8, %v1736_v9  ;;  %v1739_v15 = vld [vmem:[%s13305_s9 + $0x340] sm:$0xff]  ;;  %v1740_v17 = vld [vmem:[%s13305_s9 + $0x348] sm:$0xff]  ;;  %v11269_v11 = vcombine.low %v1731_v6, %v1735_v7  ;;  %v11271_v31 = vcombine.low %v1732_v8, %v1736_v9  ;;  %v1661_v7 = vld [vmem:[%s13305_s9 + $0xd0] sm:$0xff] }
 0x23d   : > { %v1743_v16 = vld [vmem:[%s13305_s9 + $0x360] sm:$0xff]  ;;  %v1744_v18 = vld [vmem:[%s13305_s9 + $0x368] sm:$0xff]  ;;  %v11196_v6 = vcombine.high %v1654_v62, %v1658_v63  ;;  %v1665_v8 = vld [vmem:[%s13305_s9 + $0xf0] sm:$0xff] }
 0x23e   : > { %2458 = vmatpush1.bf16.msra.mxu0 %v11221_v35  ;;  %2531 = vmatpush1.bf16.msra.mxu1 %v11223_v36  ;;  %v11278_v38 = vcombine.high %v1739_v15, %v1743_v16  ;;  %v11280_v21 = vcombine.high %v1740_v17, %v1744_v18  ;;  %v1747_v49 = vld [vmem:[%s13305_s9 + $0x380] sm:$0xff]  ;;  %v1748_v25 = vld [vmem:[%s13305_s9 + $0x388] sm:$0xff]  ;;  %v11277_v27 = vcombine.low %v1739_v15, %v1743_v16  ;;  %v1662_v9 = vld [vmem:[%s13305_s9 + $0xd8] sm:$0xff] }
 0x23f   : > { %2459 = vmatprep.subr.bf16.mxu0 %v11230_v37  ;;  %2532 = vmatprep.subr.bf16.mxu1 %v11232_v56  ;;  %v1751_v24 = vld [vmem:[%s13305_s9 + $0x3a0] sm:$0xff]  ;;  %v1752_v26 = vld [vmem:[%s13305_s9 + $0x3a8] sm:$0xff]  ;;  %v11279_v28 = vcombine.low %v1740_v17, %v1744_v18  ;;  %v11195_v16 = vcombine.low %v1654_v62, %v1658_v63  ;;  %v11202_v17 = vcombine.high %v1661_v7, %v1665_v8  ;;  %v1701_v62 = vld [vmem:[%s13305_s9 + $0x210] sm:$0xff] }
 0x240   : > { %v11286_v29 = vcombine.high %v1747_v49, %v1751_v24  ;;  %v11288_v30 = vcombine.high %v1748_v25, %v1752_v26  ;;  %v1755_v22 = vld [vmem:[%s13305_s9 + $0x3c0] sm:$0xff]  ;;  %v1756_v57 = vld [vmem:[%s13305_s9 + $0x3c8] sm:$0xff]  ;;  %v11285_v36 = vcombine.low %v1747_v49, %v1751_v24  ;;  %v11287_v37 = vcombine.low %v1748_v25, %v1752_v26  ;;  %v1674_v49 = vld [vmem:[%s13305_s9 + $0x138] sm:$0xff] }
 0x241   : > { %v1759_v33 = vld [vmem:[%s13305_s9 + $0x3e0] sm:$0xff]  ;;  %v1760_v35 = vld [vmem:[%s13305_s9 + $0x3e8] sm:$0xff]  ;;  %v11201_v24 = vcombine.low %v1661_v7, %v1665_v8  ;;  %v1705_v63 = vld [vmem:[%s13305_s9 + $0x230] sm:$0xff] }
 0x242   : > { %2460 = vmatpush1.bf16.msra.mxu0 %v11229_v20  ;;  %2533 = vmatpush1.bf16.msra.mxu1 %v11231_v40  ;;  %v11294_v56 = vcombine.high %v1755_v22, %v1759_v33  ;;  %v11296_v4 = vcombine.high %v1756_v57, %v1760_v35  ;;  %v1642_v20 = vld [vmem:[%s13305_s9 + $0x38] sm:$0xff]  ;;  %v11293_v40 = vcombine.low %v1755_v22, %v1759_v33  ;;  %v1616_v51 = vld [vmem:[#allocation2 + $0x28] sm:$0xff]  ;;  %v1621_v26 = vld [vmem:[#allocation2 + $0x50] sm:$0xff] }
 0x243   : > { %2461 = vmatprep.subr.bf16.mxu0 %v11238_v41  ;;  %2534 = vmatprep.subr.bf16.mxu1 %v11240_v42  ;;  %v1611_v41 = vld [vmem:[#allocation2] sm:$0xff]  ;;  %v1613_v42 = vld [vmem:[#allocation2 + $0x10] sm:$0xff]  ;;  %v11295_v43 = vcombine.low %v1756_v57, %v1760_v35  ;;  %v11180_v45 = vcombine.high %v1638_v39, %v1642_v20  ;;  %v11179_v54 = vcombine.low %v1638_v39, %v1642_v20 }
 0x244   : > { %v13580_v61 = vpack.c.bf16 %v1618_v52, %v1616_v51  ;;  %v1619_v25 = vld [vmem:[#allocation2 + $0x40] sm:$0xff]  ;;  %v1681_v22 = vld [vmem:[%s13305_s9 + $0x170] sm:$0xff] }
 0x245   : > { %v1678_v33 = vld [vmem:[%s13305_s9 + $0x158] sm:$0xff]  ;;  %v13608_v35 = vpack.c.bf16 %v1621_v26, %v1619_v25  ;;  %v1685_v39 = vld [vmem:[%s13305_s9 + $0x190] sm:$0xff] }
 0x246   : > { %2462 = vmatpush1.bf16.msra.mxu0 %v11237_v46  ;;  %2535 = vmatpush1.bf16.msra.mxu1 %v11239_v47  ;;  %v1649_v46 = vld [vmem:[%s13305_s9 + $0x70] sm:$0xff]  ;;  %v1646_v47 = vld [vmem:[%s13305_s9 + $0x58] sm:$0xff] }
 0x247   : > { %2463 = vmatprep.subr.bf16.mxu0 %v11246_v48  ;;  %2536 = vmatprep.subr.bf16.mxu1 %v11248_v50  ;;  %v13575_v48 = vpack.c.bf16 %v1613_v42, %v1611_v41  ;;  %v1650_v50 = vld [vmem:[%s13305_s9 + $0x78] sm:$0xff]  ;;  %v11185_v0 = vcombine.low %v1645_v19, %v1649_v46  ;;  %v1689_v20 = vld [vmem:[%s13305_s9 + $0x1b0] sm:$0xff] }
 0x248   : > { %v1682_v57 = vld [vmem:[%s13305_s9 + $0x178] sm:$0xff]  ;;  %v1697_v51 = vld [vmem:[%s13305_s9 + $0x1f0] sm:$0xff] }
 0x249   : > { %v11220_v23 = vcombine.high %v1678_v33, %v1682_v57  ;;  %v1686_v41 = vld [vmem:[%s13305_s9 + $0x198] sm:$0xff]  ;;  %v1709_v7 = vld [vmem:[%s13305_s9 + $0x250] sm:$0xff] }
 0x24a   : > { %2464 = vmatpush1.bf16.msra.mxu0 %v11245_v55  ;;  %2537 = vmatpush1.bf16.msra.mxu1 %v11247_v58  ;;  %v11186_v55 = vcombine.high %v1645_v19, %v1649_v46  ;;  %v11188_v58 = vcombine.high %v1646_v47, %v1650_v50  ;;  %v1690_v42 = vld [vmem:[%s13305_s9 + $0x1b8] sm:$0xff]  ;;  %v11219_v19 = vcombine.low %v1678_v33, %v1682_v57  ;;  %v1713_v8 = vld [vmem:[%s13305_s9 + $0x270] sm:$0xff] }
 0x24b   : > { %2465 = vmatprep.subr.bf16.mxu0 %v11254_v59  ;;  %2538 = vmatprep.subr.bf16.mxu1 %v11256_v60  ;;  %v1653_v59 = vld [vmem:[%s13305_s9 + $0x90] sm:$0xff]  ;;  %v11226_v46 = vcombine.high %v1685_v39, %v1689_v20  ;;  %v1694_v52 = vld [vmem:[%s13305_s9 + $0x1d8] sm:$0xff] }
 0x24c   : > { %v1657_v60 = vld [vmem:[%s13305_s9 + $0xb0] sm:$0xff] }
 0x24d   : > { %v11193_v15 = vcombine.low %v1653_v59, %v1657_v60  ;;  %v1725_v25 = vld [vmem:[%s13305_s9 + $0x2d0] sm:$0xff] }
 0x24e   : > { %2466 = vmatpush1.bf16.msra.mxu0 %v11253_v1  ;;  %2539 = vmatpush1.bf16.msra.mxu1 %v11255_v2  ;;  %v1615_v1 = vld [vmem:[#allocation2 + $0x20] sm:$0xff]  ;;  %v1617_v2 = vld [vmem:[#allocation2 + $0x30] sm:$0xff] }
 0x24f   : > { %2467 = vmatprep.subr.bf16.mxu0 %v11262_v3  ;;  %2540 = vmatprep.subr.bf16.mxu1 %v11264_v5  ;;  %v11187_v3 = vcombine.low %v1646_v47, %v1650_v50  ;;  %v11194_v5 = vcombine.high %v1653_v59, %v1657_v60  ;;  %v11228_v47 = vcombine.high %v1686_v41, %v1690_v42  ;;  %v1693_v50 = vld [vmem:[%s13305_s9 + $0x1d0] sm:$0xff] }
 0x250   : > { %v11234_v59 = vcombine.high %v1693_v50, %v1697_v51  ;;  %v1729_v26 = vld [vmem:[%s13305_s9 + $0x2f0] sm:$0xff] }
 0x251   : > { %v1733_v57 = vld [vmem:[%s13305_s9 + $0x310] sm:$0xff] }
 0x252   : > { %2468 = vmatpush1.bf16.msra.mxu0 %v11261_v10  ;;  %2541 = vmatpush1.bf16.msra.mxu1 %v11263_v12  ;;  %v1666_v10 = vld [vmem:[%s13305_s9 + $0xf8] sm:$0xff]  ;;  %v13592_v12 = vpack.c.bf16 %v1617_v2, %v1615_v1  ;;  %v11233_v2 = vcombine.low %v1693_v50, %v1697_v51  ;;  %v1753_v50 = vld [vmem:[%s13305_s9 + $0x3b0] sm:$0xff] }
 0x253   : > { %2469 = vmatprep.subr.bf16.mxu0 %v11270_v13  ;;  %2542 = vmatprep.subr.bf16.mxu1 %v11272_v14  ;;  %v1620_v13 = vld [vmem:[#allocation2 + $0x48] sm:$0xff]  ;;  %v1622_v14 = vld [vmem:[#allocation2 + $0x58] sm:$0xff]  ;;  %v11204_v18 = vcombine.high %v1662_v9, %v1666_v10 }
 0x254   : > { %v1706_v1 = vld [vmem:[%s13305_s9 + $0x238] sm:$0xff] }
 0x255   : > { %v1750_v51 = vld [vmem:[%s13305_s9 + $0x398] sm:$0xff] }
 0x256   : > { %2470 = vmatpush1.bf16.msra.mxu0 %v11269_v11  ;;  %2543 = vmatpush1.bf16.msra.mxu1 %v11271_v31  ;;  %v1669_v11 = vld [vmem:[%s13305_s9 + $0x110] sm:$0xff] }
 0x257   : > { %2471 = vmatprep.subr.bf16.mxu0 %v11278_v38  ;;  %2544 = vmatprep.subr.bf16.mxu1 %v11280_v21  ;;  %v1673_v31 = vld [vmem:[%s13305_s9 + $0x130] sm:$0xff]  ;;  %v13596_v38 = vpack.c.bf16 %v1622_v14, %v1620_v13  ;;  %v1670_v21 = vld [vmem:[%s13305_s9 + $0x118] sm:$0xff]  ;;  %v11241_v13 = vcombine.low %v1701_v62, %v1705_v63 }
 0x25a   : > { %2472 = vmatpush1.bf16.msra.mxu0 %v11277_v27  ;;  %2545 = vmatpush1.bf16.msra.mxu1 %v11279_v28  ;;  %v11203_v27 = vcombine.low %v1662_v9, %v1666_v10  ;;  %v11210_v28 = vcombine.high %v1669_v11, %v1673_v31  ;;  %v1710_v9 = vld [vmem:[%s13305_s9 + $0x258] sm:$0xff] }
 0x25b   : > { %2473 = vmatprep.subr.bf16.mxu0 %v11286_v29  ;;  %2546 = vmatprep.subr.bf16.mxu1 %v11288_v30  ;;  %v11212_v29 = vcombine.high %v1670_v21, %v1674_v49  ;;  %v1677_v30 = vld [vmem:[%s13305_s9 + $0x150] sm:$0xff]  ;;  %v1714_v10 = vld [vmem:[%s13305_s9 + $0x278] sm:$0xff] }
 0x25c   : > { %v11218_v34 = vcombine.high %v1677_v30, %v1681_v22 }
 0x25e   : > { %2474 = vmatpush1.bf16.msra.mxu0 %v11285_v36  ;;  %2547 = vmatpush1.bf16.msra.mxu1 %v11287_v37  ;;  %v1624_v36 = vld [vmem:[#allocation2 + $0x68] sm:$0xff]  ;;  %v1626_v37 = vld [vmem:[#allocation2 + $0x78] sm:$0xff] }
 0x25f   : > { %2475 = vmatprep.subr.bf16.mxu0 %v11294_v56  ;;  %2548 = vmatprep.subr.bf16.mxu1 %v11296_v4  ;;  %v11209_v56 = vcombine.low %v1669_v11, %v1673_v31  ;;  %v11211_v4 = vcombine.low %v1670_v21, %v1674_v49  ;;  %v1718_v11 = vld [vmem:[%s13305_s9 + $0x298] sm:$0xff]  ;;  %v11249_v21 = vcombine.low %v1709_v7, %v1713_v8 }
 0x260   : > { %v1722_v31 = vld [vmem:[%s13305_s9 + $0x2b8] sm:$0xff] }
 0x262   : > { %2476 = vmatpush1.bf16.msra.mxu0 %v11293_v40  ;;  %2549 = vmatpush1.bf16.msra.mxu1 %v11295_v43  ;;  %v13612_v40 = vpack.c.bf16 %v1626_v37, %v1624_v36  ;;  %v11217_v43 = vcombine.low %v1677_v30, %v1681_v22  ;;  %v11259_v30 = vcombine.low %v1718_v11, %v1722_v31  ;;  %v1737_v36 = vld [vmem:[%s13305_s9 + $0x330] sm:$0xff]  ;;  %v1734_v37 = vld [vmem:[%s13305_s9 + $0x318] sm:$0xff] }
 0x263   : > { %2591 = vmatprep.subr.bf16.mxu0 %v11178_v44  ;;  %2664 = vmatprep.subr.bf16.mxu1 %v11180_v45  ;;  %v1623_v44 = vld [vmem:[#allocation2 + $0x60] sm:$0xff]  ;;  %v1625_v45 = vld [vmem:[#allocation2 + $0x70] sm:$0xff]  ;;  %v11266_v22 = vcombine.high %v1725_v25, %v1729_v26 }
 0x265   : > { %2478 = vmatmul.mubr.bf16.vlgmr.msra.gmra.mrb[0].mxu0 %v13575_v48  ;;  %2551 = vmatmul.mubr.bf16.vlgmr.msra.gmra.mrb[0].mxu1 %v13575_v48 }
 0x266   : > { %2592 = vmatpush1.bf16.msra.mxu0 %v11177_v53  ;;  %2665 = vmatpush1.bf16.msra.mxu1 %v11179_v54  ;;  %v1698_v53 = vld [vmem:[%s13305_s9 + $0x1f8] sm:$0xff]  ;;  %v13624_v54 = vpack.c.bf16 %v1625_v45, %v1623_v44  ;;  %v11273_v44 = vcombine.low %v1733_v57, %v1737_v36 }
 0x267   : > { %2593 = vmatprep.subr.bf16.mxu0 %v11186_v55  ;;  %2666 = vmatprep.subr.bf16.mxu1 %v11188_v58  ;;  %v11225_v55 = vcombine.low %v1685_v39, %v1689_v20  ;;  %v11227_v58 = vcombine.low %v1686_v41, %v1690_v42  ;;  %v11236_v60 = vcombine.high %v1694_v52, %v1698_v53  ;;  %v1741_v20 = vld [vmem:[%s13305_s9 + $0x350] sm:$0xff]  ;;  %v1742_v42 = vld [vmem:[%s13305_s9 + $0x358] sm:$0xff] }
 0x268   : > { %2487 = vmatprep.mubr.bf16.mxu0 %v13580_v61  ;;  %2560 = vmatprep.mubr.bf16.mxu1 %v13580_v61  ;;  %v1745_v41 = vld [vmem:[%s13305_s9 + $0x370] sm:$0xff] }
 0x26a   : > { %2594 = vmatpush1.bf16.msra.mxu0 %v11185_v0  ;;  %2667 = vmatpush1.bf16.msra.mxu1 %v11187_v3  ;;  %v1702_v0 = vld [vmem:[%s13305_s9 + $0x218] sm:$0xff]  ;;  %v11235_v3 = vcombine.low %v1694_v52, %v1698_v53  ;;  %v11281_v53 = vcombine.low %v1741_v20, %v1745_v41 }
 0x26b   : > { %2595 = vmatprep.subr.bf16.mxu0 %v11194_v5  ;;  %2668 = vmatprep.subr.bf16.mxu1 %v11196_v6  ;;  %v11242_v5 = vcombine.high %v1701_v62, %v1705_v63  ;;  %v11244_v6 = vcombine.high %v1702_v0, %v1706_v1  ;;  %v11243_v14 = vcombine.low %v1702_v0, %v1706_v1  ;;  %v1754_v52 = vld [vmem:[%s13305_s9 + $0x3b8] sm:$0xff]  ;;  %v1761_v62 = vld [vmem:[%s13305_s9 + $0x3f0] sm:$0xff] }
 0x26c   : > { %v1758_v63 = vld [vmem:[%s13305_s9 + $0x3d8] sm:$0xff] }
 0x26d   : > { %2488 = vmatmul.mubr.bf16.gmra.mrb[4].mxu0 %v13592_v12  ;;  %2561 = vmatmul.mubr.bf16.gmra.mrb[4].mxu1 %v13592_v12  ;;  %v1762_v0 = vld [vmem:[%s13305_s9 + $0x3f8] sm:$0xff] }
 0x26e   : > { %2596 = vmatpush1.bf16.msra.mxu0 %v11193_v15  ;;  %2669 = vmatpush1.bf16.msra.mxu1 %v11195_v16  ;;  %v11250_v15 = vcombine.high %v1709_v7, %v1713_v8  ;;  %v11252_v16 = vcombine.high %v1710_v9, %v1714_v10  ;;  %v11299_v7 = vcombine.low %v1758_v63, %v1762_v0  ;;  %v13680_v8 = vld [vmem:[%s13318_s13] sm:$0xff] }
 0x26f   : > { %2597 = vmatprep.subr.bf16.mxu0 %v11202_v17  ;;  %2670 = vmatprep.subr.bf16.mxu1 %v11204_v18  ;;  %v1717_v17 = vld [vmem:[%s13305_s9 + $0x290] sm:$0xff] }
 0x270   : > { %2497 = vmatprep.mubr.bf16.mxu0 %v13596_v38  ;;  %2570 = vmatprep.mubr.bf16.mxu1 %v13596_v38  ;;  %v1721_v18 = vld [vmem:[%s13305_s9 + $0x2b0] sm:$0xff] }
 0x271   : > { %v11258_v49 = vcombine.high %v1717_v17, %v1721_v18 }
 0x272   : > { %2598 = vmatpush1.bf16.msra.mxu0 %v11201_v24  ;;  %2671 = vmatpush1.bf16.msra.mxu1 %v11203_v27  ;;  %v11260_v24 = vcombine.high %v1718_v11, %v1722_v31  ;;  %v1726_v27 = vld [vmem:[%s13305_s9 + $0x2d8] sm:$0xff] }
 0x273   : > { %2599 = vmatprep.subr.bf16.mxu0 %v11210_v28  ;;  %2672 = vmatprep.subr.bf16.mxu1 %v11212_v29  ;;  %v1730_v28 = vld [vmem:[%s13305_s9 + $0x2f8] sm:$0xff]  ;;  %v11257_v29 = vcombine.low %v1717_v17, %v1721_v18 }
 0x274   : > { %v11268_v33 = vcombine.high %v1726_v27, %v1730_v28 }
 0x275   : > { %2498 = vmatmul.mubr.bf16.gmra.mrb[8].mxu0 %v13608_v35  ;;  %2571 = vmatmul.mubr.bf16.gmra.mrb[8].mxu1 %v13608_v35 }
 0x276   : > { %2600 = vmatpush1.bf16.msra.mxu0 %v11209_v56  ;;  %2673 = vmatpush1.bf16.msra.mxu1 %v11211_v4  ;;  %v1738_v56 = vld [vmem:[%s13305_s9 + $0x338] sm:$0xff]  ;;  %v11265_v4 = vcombine.low %v1725_v25, %v1729_v26 }
 0x277   : > { %2601 = vmatprep.subr.bf16.mxu0 %v11218_v34  ;;  %2674 = vmatprep.subr.bf16.mxu1 %v11220_v23  ;;  %v11267_v34 = vcombine.low %v1726_v27, %v1730_v28  ;;  %v11274_v23 = vcombine.high %v1733_v57, %v1737_v36  ;;  %v11276_v39 = vcombine.high %v1734_v37, %v1738_v56 }
 0x278   : > { %2507 = vmatprep.mubr.bf16.mxu0 %v13612_v40  ;;  %2580 = vmatprep.mubr.bf16.mxu1 %v13612_v40  ;;  %v11275_v45 = vcombine.low %v1734_v37, %v1738_v56 }
 0x27a   : > { %2602 = vmatpush1.bf16.msra.mxu0 %v11217_v43  ;;  %2675 = vmatpush1.bf16.msra.mxu1 %v11219_v19  ;;  %v1746_v43 = vld [vmem:[%s13305_s9 + $0x378] sm:$0xff]  ;;  %v11282_v19 = vcombine.high %v1741_v20, %v1745_v41 }
 0x27b   : > { %2603 = vmatprep.subr.bf16.mxu0 %v11226_v46  ;;  %2676 = vmatprep.subr.bf16.mxu1 %v11228_v47  ;;  %v11284_v46 = vcombine.high %v1742_v42, %v1746_v43  ;;  %v1749_v47 = vld [vmem:[%s13305_s9 + $0x390] sm:$0xff] }
 0x27c   : > { %v11289_v1 = vcombine.low %v1749_v47, %v1753_v50 }
 0x27d   : > { %2508 = vmatmul.mubr.bf16.gmra.mrb[12].mxu0 %v13624_v54  ;;  %2581 = vmatmul.mubr.bf16.gmra.mrb[12].mxu1 %v13624_v54 }
 0x27e   : > { %2604 = vmatpush1.bf16.msra.mxu0 %v11225_v55  ;;  %2677 = vmatpush1.bf16.msra.mxu1 %v11227_v58  ;;  %v11283_v55 = vcombine.low %v1742_v42, %v1746_v43  ;;  %v11290_v58 = vcombine.high %v1749_v47, %v1753_v50 }
 0x27f   : > { %2605 = vmatprep.subr.bf16.mxu0 %v11234_v59  ;;  %2678 = vmatprep.subr.bf16.mxu1 %v11236_v60  ;;  %v11292_v59 = vcombine.high %v1750_v51, %v1754_v52  ;;  %v1757_v60 = vld [vmem:[%s13305_s9 + $0x3d0] sm:$0xff] }
 0x280   : > { %2623 = vmatprep.mubr.bf16.mxu0 %v13530_v32  ;;  %2696 = vmatprep.mubr.bf16.mxu1 %v13530_v32  ;;  %v11251_v32 = vcombine.low %v1710_v9, %v1714_v10 }
 0x282   : > { %2606 = vmatpush1.bf16.msra.mxu0 %v11233_v2  ;;  %2679 = vmatpush1.bf16.msra.mxu1 %v11235_v3  ;;  %v11291_v2 = vcombine.low %v1750_v51, %v1754_v52  ;;  %v11298_v3 = vcombine.high %v1757_v60, %v1761_v62 }
 0x283   : > { %2607 = vmatprep.subr.bf16.mxu0 %v11242_v5  ;;  %2680 = vmatprep.subr.bf16.mxu1 %v11244_v6  ;;  %v11300_v5 = vcombine.high %v1758_v63, %v1762_v0  ;;  %v11297_v6 = vcombine.low %v1757_v60, %v1761_v62 }
 0x286   : > { %2608 = vmatpush1.bf16.msra.mxu0 %v11241_v13  ;;  %2681 = vmatpush1.bf16.msra.mxu1 %v11243_v14 }
 0x287   : > { %2609 = vmatprep.subr.bf16.mxu0 %v11250_v15  ;;  %2682 = vmatprep.subr.bf16.mxu1 %v11252_v16 }
 0x28a   : > { %2610 = vmatpush1.bf16.msra.mxu0 %v11249_v21  ;;  %2683 = vmatpush1.bf16.msra.mxu1 %v11251_v32 }
 0x28b   : > { %2611 = vmatprep.subr.bf16.mxu0 %v11258_v49  ;;  %2684 = vmatprep.subr.bf16.mxu1 %v11260_v24 }
 0x28e   : > { %2612 = vmatpush1.bf16.msra.mxu0 %v11257_v29  ;;  %2685 = vmatpush1.bf16.msra.mxu1 %v11259_v30 }
 0x28f   : > { %2613 = vmatprep.subr.bf16.mxu0 %v11266_v22  ;;  %2686 = vmatprep.subr.bf16.mxu1 %v11268_v33 }
 0x292   : > { %2614 = vmatpush1.bf16.msra.mxu0 %v11265_v4  ;;  %2687 = vmatpush1.bf16.msra.mxu1 %v11267_v34 }
 0x293   : > { %2615 = vmatprep.subr.bf16.mxu0 %v11274_v23  ;;  %2688 = vmatprep.subr.bf16.mxu1 %v11276_v39 }
 0x296   : > { %2616 = vmatpush1.bf16.msra.mxu0 %v11273_v44  ;;  %2689 = vmatpush1.bf16.msra.mxu1 %v11275_v45 }
 0x297   : > { %2617 = vmatprep.subr.bf16.mxu0 %v11282_v19  ;;  %2690 = vmatprep.subr.bf16.mxu1 %v11284_v46 }
 0x29a   : > { %2618 = vmatpush1.bf16.msra.mxu0 %v11281_v53  ;;  %2691 = vmatpush1.bf16.msra.mxu1 %v11283_v55 }
 0x29b   : > { %2619 = vmatprep.subr.bf16.mxu0 %v11290_v58  ;;  %2692 = vmatprep.subr.bf16.mxu1 %v11292_v59 }
 0x29e   : > { %2620 = vmatpush1.bf16.msra.mxu0 %v11289_v1  ;;  %2693 = vmatpush1.bf16.msra.mxu1 %v11291_v2 }
 0x29f   : > { %2621 = vmatprep.subr.bf16.mxu0 %v11298_v3  ;;  %2694 = vmatprep.subr.bf16.mxu1 %v11300_v5 }
 0x2a2   : > { %2622 = vmatpush1.bf16.msra.mxu0 %v11297_v6  ;;  %2695 = vmatpush1.bf16.msra.mxu1 %v11299_v7 }
 0x2a5   : > { %2624 = vmatmul.mubr.bf16.vlgmr.msra.gmra.mrb[16].mxu0 %v13575_v48  ;;  %2697 = vmatmul.mubr.bf16.vlgmr.msra.gmra.mrb[16].mxu1 %v13575_v48  ;;  %v1765_v48 = vlaneseq }
 0x2a6   : > { %2633 = vmatprep.mubr.bf16.mxu0 %v13580_v61  ;;  %2706 = vmatprep.mubr.bf16.mxu1 %v13580_v61 }
 0x2a7   : > { %v13676_v61 = vshrl.u32 %v1765_v48, 7 }
 0x2a9   : > { %v1771_v9 = vsub.s32 1, %v13676_v61 }
 0x2ad   : > { %2634 = vmatmul.mubr.bf16.gmra.mrb[20].mxu0 %v13592_v12  ;;  %2707 = vmatmul.mubr.bf16.gmra.mrb[20].mxu1 %v13592_v12  ;;  %v1767_v12 = vsub.s32 0, %v13676_v61 }
 0x2ae   : > { %2643 = vmatprep.mubr.bf16.mxu0 %v13596_v38  ;;  %2716 = vmatprep.mubr.bf16.mxu1 %v13596_v38  ;;  %v1775_v38 = vsub.s32 2, %v13676_v61 }
 0x2af   : > { %v13686_v10 = vrot.slane %v13680_v8, %v1767_v12 }
 0x2b5   : > { %2644 = vmatmul.mubr.bf16.gmra.mrb[24].mxu0 %v13608_v35  ;;  %2717 = vmatmul.mubr.bf16.gmra.mrb[24].mxu1 %v13608_v35  ;;  %v1779_v35 = vsub.s32 3, %v13676_v61 }
 0x2b6   : > { %2653 = vmatprep.mubr.bf16.mxu0 %v13612_v40  ;;  %2726 = vmatprep.mubr.bf16.mxu1 %v13612_v40  ;;  %v13689_v40 = vrot.slane %v13680_v8, %v1775_v38 }
 0x2b7   : > { %v13695_v13 = vrot.slane %v13680_v8, %v1779_v35 }
 0x2bd   : > { %2654 = vmatmul.mubr.bf16.gmra.mrb[28].mxu0 %v13624_v54  ;;  %2727 = vmatmul.mubr.bf16.gmra.mrb[28].mxu1 %v13624_v54  ;;  %v13692_v54 = vrot.slane %v13680_v8, %v1771_v9 }
 0x338   : > { %v2479_v14 = vpop.f32.mrb[0].mxu0  ;;  %v2552_v16 = vpop.f32.mrb[0].mxu1 }
 0x339   : > { %v2480_v15 = vadd.f32 %v2479_v14, %v13686_v10  ;;  %v2481_v17 = vpop.f32.mrb[1].mxu0  ;;  %v2553_v18 = vadd.f32 %v2552_v16, %v13689_v40  ;;  %v2554_v31 = vpop.f32.mrb[1].mxu1 }
 0x33a   : > { %v2482_v11 = vadd.f32 %v2481_v17, %v13692_v54  ;;  %v2483_v21 = vpop.f32.mrb[2].mxu0  ;;  %v2555_v32 = vadd.f32 %v2554_v31, %v13695_v13  ;;  %v2556_v24 = vpop.f32.mrb[2].mxu1  ;;  %v1783_v31 = vsub.s32 4, %v13676_v61 }
 0x33b   : > { %2737 = vst [vmem:[#allocation3] sm:$0xff] %v2480_v15  ;;  %v2484_v49 = vadd.f32 %v2483_v21, %v13686_v10  ;;  %v2485_v25 = vpop.f32.mrb[3].mxu0  ;;  %2739 = vst [vmem:[#allocation3 + $0x10] sm:$0xff] %v2553_v18  ;;  %v2557_v26 = vadd.f32 %v2556_v24, %v13689_v40  ;;  %v2558_v28 = vpop.f32.mrb[3].mxu1  ;;  %v1787_v21 = vsub.s32 5, %v13676_v61 }
 0x33c   : > { %2738 = vst [vmem:[#allocation3 + $0x8] sm:$0xff] %v2482_v11  ;;  %v2486_v27 = vadd.f32 %v2485_v25, %v13692_v54  ;;  %2740 = vst [vmem:[#allocation3 + $0x18] sm:$0xff] %v2555_v32  ;;  %v2559_v29 = vadd.f32 %v2558_v28, %v13695_v13  ;;  %v1795_v32 = vsub.s32 7, %v13676_v61 }
 0x33d   : > { %2745 = vst [vmem:[#allocation3 + $0x40] sm:$0xff] %v2484_v49  ;;  %2747 = vst [vmem:[#allocation3 + $0x50] sm:$0xff] %v2557_v26  ;;  %v13740_v49 = vrot.slane %v13680_v8, %v1787_v21 }
 0x33e   : > { %2746 = vst [vmem:[#allocation3 + $0x48] sm:$0xff] %v2486_v27  ;;  %2748 = vst [vmem:[#allocation3 + $0x58] sm:$0xff] %v2559_v29 }
 0x340   : > { %v2489_v30 = vpop.f32.mrb[4].mxu0  ;;  %v2562_v33 = vpop.f32.mrb[4].mxu1 }
 0x341   : > { %v2490_v22 = vadd.f32 %v2489_v30, %v13686_v10  ;;  %v2491_v57 = vpop.f32.mrb[5].mxu0  ;;  %v2563_v36 = vadd.f32 %v2562_v33, %v13689_v40  ;;  %v2564_v56 = vpop.f32.mrb[5].mxu1 }
 0x342   : > { %v2492_v37 = vadd.f32 %v2491_v57, %v13692_v54  ;;  %v2493_v4 = vpop.f32.mrb[6].mxu0  ;;  %v2565_v34 = vadd.f32 %v2564_v56, %v13695_v13  ;;  %v2566_v39 = vpop.f32.mrb[6].mxu1 }
 0x343   : > { %2753 = vst [vmem:[#allocation3 + $0x80] sm:$0xff] %v2490_v22  ;;  %v2494_v23 = vadd.f32 %v2493_v4, %v13686_v10  ;;  %v2495_v20 = vpop.f32.mrb[7].mxu0  ;;  %2755 = vst [vmem:[#allocation3 + $0x90] sm:$0xff] %v2563_v36  ;;  %v2567_v41 = vadd.f32 %v2566_v39, %v13689_v40  ;;  %v2568_v43 = vpop.f32.mrb[7].mxu1 }
 0x344   : > { %2754 = vst [vmem:[#allocation3 + $0x88] sm:$0xff] %v2492_v37  ;;  %v2496_v42 = vadd.f32 %v2495_v20, %v13692_v54  ;;  %2756 = vst [vmem:[#allocation3 + $0x98] sm:$0xff] %v2565_v34  ;;  %v2569_v44 = vadd.f32 %v2568_v43, %v13695_v13 }
 0x345   : > { %2761 = vst [vmem:[#allocation3 + $0xc0] sm:$0xff] %v2494_v23  ;;  %2763 = vst [vmem:[#allocation3 + $0xd0] sm:$0xff] %v2567_v41 }
 0x346   : > { %2762 = vst [vmem:[#allocation3 + $0xc8] sm:$0xff] %v2496_v42  ;;  %2764 = vst [vmem:[#allocation3 + $0xd8] sm:$0xff] %v2569_v44 }
 0x348   : > { %v2499_v45 = vpop.f32.mrb[8].mxu0  ;;  %v2572_v46 = vpop.f32.mrb[8].mxu1 }
 0x349   : > { %v2500_v19 = vadd.f32 %v2499_v45, %v13686_v10  ;;  %v2501_v47 = vpop.f32.mrb[9].mxu0  ;;  %v2573_v50 = vadd.f32 %v2572_v46, %v13689_v40  ;;  %v2574_v52 = vpop.f32.mrb[9].mxu1 }
 0x34a   : > { %v2502_v51 = vadd.f32 %v2501_v47, %v13692_v54  ;;  %v2503_v53 = vpop.f32.mrb[10].mxu0  ;;  %v2575_v55 = vadd.f32 %v2574_v52, %v13695_v13  ;;  %v2576_v59 = vpop.f32.mrb[10].mxu1 }
 0x34b   : > { %2769 = vst [vmem:[#allocation3 + $0x100] sm:$0xff] %v2500_v19  ;;  %v2504_v58 = vadd.f32 %v2503_v53, %v13686_v10  ;;  %v2505_v60 = vpop.f32.mrb[11].mxu0  ;;  %2771 = vst [vmem:[#allocation3 + $0x110] sm:$0xff] %v2573_v50  ;;  %v2577_v62 = vadd.f32 %v2576_v59, %v13689_v40  ;;  %v2578_v0 = vpop.f32.mrb[11].mxu1 }
 0x34c   : > { %2770 = vst [vmem:[#allocation3 + $0x108] sm:$0xff] %v2502_v51  ;;  %v2506_v63 = vadd.f32 %v2505_v60, %v13692_v54  ;;  %2772 = vst [vmem:[#allocation3 + $0x118] sm:$0xff] %v2575_v55  ;;  %v2579_v1 = vadd.f32 %v2578_v0, %v13695_v13 }
 0x34d   : > { %2777 = vst [vmem:[#allocation3 + $0x140] sm:$0xff] %v2504_v58  ;;  %2779 = vst [vmem:[#allocation3 + $0x150] sm:$0xff] %v2577_v62 }
 0x34e   : > { %2778 = vst [vmem:[#allocation3 + $0x148] sm:$0xff] %v2506_v63  ;;  %2780 = vst [vmem:[#allocation3 + $0x158] sm:$0xff] %v2579_v1 }
 0x350   : > { %v2509_v2 = vpop.f32.mrb[12].mxu0  ;;  %v2582_v5 = vpop.f32.mrb[12].mxu1 }
 0x351   : > { %v2510_v3 = vadd.f32 %v2509_v2, %v13686_v10  ;;  %v2511_v6 = vpop.f32.mrb[13].mxu0  ;;  %v2583_v7 = vadd.f32 %v2582_v5, %v13689_v40  ;;  %v2584_v12 = vpop.f32.mrb[13].mxu1 }
 0x352   : > { %v2512_v48 = vadd.f32 %v2511_v6, %v13692_v54  ;;  %v2513_v38 = vpop.f32.mrb[14].mxu0  ;;  %v2585_v9 = vadd.f32 %v2584_v12, %v13695_v13  ;;  %v2586_v14 = vpop.f32.mrb[14].mxu1 }
 0x353   : > { %2785 = vst [vmem:[#allocation3 + $0x180] sm:$0xff] %v2510_v3  ;;  %v2514_v35 = vadd.f32 %v2513_v38, %v13686_v10  ;;  %v2515_v15 = vpop.f32.mrb[15].mxu0  ;;  %2787 = vst [vmem:[#allocation3 + $0x190] sm:$0xff] %v2583_v7  ;;  %v2587_v16 = vadd.f32 %v2586_v14, %v13689_v40  ;;  %v2588_v18 = vpop.f32.mrb[15].mxu1  ;;  %v1791_v10 = vsub.s32 6, %v13676_v61  ;;  %v13734_v40 = vrot.slane %v13680_v8, %v1783_v31 }
 0x354   : > { %2786 = vst [vmem:[#allocation3 + $0x188] sm:$0xff] %v2512_v48  ;;  %v2516_v17 = vadd.f32 %v2515_v15, %v13692_v54  ;;  %2788 = vst [vmem:[#allocation3 + $0x198] sm:$0xff] %v2585_v9  ;;  %v2589_v11 = vadd.f32 %v2588_v18, %v13695_v13  ;;  %v13743_v13 = vrot.slane %v13680_v8, %v1795_v32 }
 0x355   : > { %2793 = vst [vmem:[#allocation3 + $0x1c0] sm:$0xff] %v2514_v35  ;;  %2795 = vst [vmem:[#allocation3 + $0x1d0] sm:$0xff] %v2587_v16  ;;  %v13737_v54 = vrot.slane %v13680_v8, %v1791_v10 }
 0x356   : > { %2794 = vst [vmem:[#allocation3 + $0x1c8] sm:$0xff] %v2516_v17  ;;  %2796 = vst [vmem:[#allocation3 + $0x1d8] sm:$0xff] %v2589_v11 }
 0x378   : > { %v2625_v24 = vpop.f32.mrb[16].mxu0  ;;  %v2698_v26 = vpop.f32.mrb[16].mxu1 }
 0x379   : > { %v2626_v25 = vadd.f32 %v2625_v24, %v13734_v40  ;;  %v2627_v27 = vpop.f32.mrb[17].mxu0  ;;  %v2699_v28 = vadd.f32 %v2698_v26, %v13737_v54  ;;  %v2700_v29 = vpop.f32.mrb[17].mxu1 }
 0x37a   : > { %v2628_v61 = vadd.f32 %v2627_v27, %v13740_v49  ;;  %v2629_v30 = vpop.f32.mrb[18].mxu0  ;;  %v2701_v22 = vadd.f32 %v2700_v29, %v13743_v13  ;;  %v2702_v57 = vpop.f32.mrb[18].mxu1 }
 0x37b   : > { %2741 = vst [vmem:[#allocation3 + $0x20] sm:$0xff] %v2626_v25  ;;  %v2630_v33 = vadd.f32 %v2629_v30, %v13734_v40  ;;  %v2631_v36 = vpop.f32.mrb[19].mxu0  ;;  %2743 = vst [vmem:[#allocation3 + $0x30] sm:$0xff] %v2699_v28  ;;  %v2703_v8 = vadd.f32 %v2702_v57, %v13737_v54  ;;  %v2704_v56 = vpop.f32.mrb[19].mxu1 }
 0x37c   : > { %2742 = vst [vmem:[#allocation3 + $0x28] sm:$0xff] %v2628_v61  ;;  %v2632_v37 = vadd.f32 %v2631_v36, %v13740_v49  ;;  %2744 = vst [vmem:[#allocation3 + $0x38] sm:$0xff] %v2701_v22  ;;  %v2705_v4 = vadd.f32 %v2704_v56, %v13743_v13 }
 0x37d   : > { %2749 = vst [vmem:[#allocation3 + $0x60] sm:$0xff] %v2630_v33  ;;  %2751 = vst [vmem:[#allocation3 + $0x70] sm:$0xff] %v2703_v8 }
 0x37e   : > { %2750 = vst [vmem:[#allocation3 + $0x68] sm:$0xff] %v2632_v37  ;;  %2752 = vst [vmem:[#allocation3 + $0x78] sm:$0xff] %v2705_v4 }
 0x380   : > { %v2635_v34 = vpop.f32.mrb[20].mxu0  ;;  %v2708_v39 = vpop.f32.mrb[20].mxu1 }
 0x381   : > { %v2636_v23 = vadd.f32 %v2635_v34, %v13734_v40  ;;  %v2637_v20 = vpop.f32.mrb[21].mxu0  ;;  %v2709_v41 = vadd.f32 %v2708_v39, %v13737_v54  ;;  %v2710_v43 = vpop.f32.mrb[21].mxu1 }
 0x382   : > { %v2638_v42 = vadd.f32 %v2637_v20, %v13740_v49  ;;  %v2639_v44 = vpop.f32.mrb[22].mxu0  ;;  %v2711_v45 = vadd.f32 %v2710_v43, %v13743_v13  ;;  %v2712_v46 = vpop.f32.mrb[22].mxu1 }
 0x383   : > { %2757 = vst [vmem:[#allocation3 + $0xa0] sm:$0xff] %v2636_v23  ;;  %v2640_v19 = vadd.f32 %v2639_v44, %v13734_v40  ;;  %v2641_v47 = vpop.f32.mrb[23].mxu0  ;;  %2759 = vst [vmem:[#allocation3 + $0xb0] sm:$0xff] %v2709_v41  ;;  %v2713_v50 = vadd.f32 %v2712_v46, %v13737_v54  ;;  %v2714_v52 = vpop.f32.mrb[23].mxu1 }
 0x384   : > { %2758 = vst [vmem:[#allocation3 + $0xa8] sm:$0xff] %v2638_v42  ;;  %v2642_v51 = vadd.f32 %v2641_v47, %v13740_v49  ;;  %2760 = vst [vmem:[#allocation3 + $0xb8] sm:$0xff] %v2711_v45  ;;  %v2715_v53 = vadd.f32 %v2714_v52, %v13743_v13 }
 0x385   : > { %2765 = vst [vmem:[#allocation3 + $0xe0] sm:$0xff] %v2640_v19  ;;  %2767 = vst [vmem:[#allocation3 + $0xf0] sm:$0xff] %v2713_v50 }
 0x386   : > { %2766 = vst [vmem:[#allocation3 + $0xe8] sm:$0xff] %v2642_v51  ;;  %2768 = vst [vmem:[#allocation3 + $0xf8] sm:$0xff] %v2715_v53 }
 0x388   : > { %v2645_v55 = vpop.f32.mrb[24].mxu0  ;;  %v2718_v59 = vpop.f32.mrb[24].mxu1 }
 0x389   : > { %v2646_v58 = vadd.f32 %v2645_v55, %v13734_v40  ;;  %v2647_v60 = vpop.f32.mrb[25].mxu0  ;;  %v2719_v62 = vadd.f32 %v2718_v59, %v13737_v54  ;;  %v2720_v0 = vpop.f32.mrb[25].mxu1 }
 0x38a   : > { %v2648_v63 = vadd.f32 %v2647_v60, %v13740_v49  ;;  %v2649_v1 = vpop.f32.mrb[26].mxu0  ;;  %v2721_v2 = vadd.f32 %v2720_v0, %v13743_v13  ;;  %v2722_v5 = vpop.f32.mrb[26].mxu1 }
 0x38b   : > { %2773 = vst [vmem:[#allocation3 + $0x120] sm:$0xff] %v2646_v58  ;;  %v2650_v3 = vadd.f32 %v2649_v1, %v13734_v40  ;;  %v2651_v6 = vpop.f32.mrb[27].mxu0  ;;  %2775 = vst [vmem:[#allocation3 + $0x130] sm:$0xff] %v2719_v62  ;;  %v2723_v7 = vadd.f32 %v2722_v5, %v13737_v54  ;;  %v2724_v12 = vpop.f32.mrb[27].mxu1 }
 0x38c   : > { %2774 = vst [vmem:[#allocation3 + $0x128] sm:$0xff] %v2648_v63  ;;  %v2652_v48 = vadd.f32 %v2651_v6, %v13740_v49  ;;  %2776 = vst [vmem:[#allocation3 + $0x138] sm:$0xff] %v2721_v2  ;;  %v2725_v38 = vadd.f32 %v2724_v12, %v13743_v13 }
 0x38d   : > { %2781 = vst [vmem:[#allocation3 + $0x160] sm:$0xff] %v2650_v3  ;;  %2783 = vst [vmem:[#allocation3 + $0x170] sm:$0xff] %v2723_v7 }
 0x38e   : > { %2782 = vst [vmem:[#allocation3 + $0x168] sm:$0xff] %v2652_v48  ;;  %2784 = vst [vmem:[#allocation3 + $0x178] sm:$0xff] %v2725_v38 }
 0x390   : > { %v2655_v9 = vpop.f32.mrb[28].mxu0  ;;  %v2728_v14 = vpop.f32.mrb[28].mxu1 }
 0x391   : > { %v2656_v35 = vadd.f32 %v2655_v9, %v13734_v40  ;;  %v2657_v15 = vpop.f32.mrb[29].mxu0  ;;  %v2729_v16 = vadd.f32 %v2728_v14, %v13737_v54  ;;  %v2730_v18 = vpop.f32.mrb[29].mxu1 }
 0x392   : > { %v2658_v17 = vadd.f32 %v2657_v15, %v13740_v49  ;;  %v2659_v11 = vpop.f32.mrb[30].mxu0  ;;  %v2731_v31 = vadd.f32 %v2730_v18, %v13743_v13  ;;  %v2732_v21 = vpop.f32.mrb[30].mxu1 }
 0x393   : > { %2789 = vst [vmem:[#allocation3 + $0x1a0] sm:$0xff] %v2656_v35  ;;  %v2660_v10 = vadd.f32 %v2659_v11, %v13734_v40  ;;  %v2661_v32 = vpop.f32.mrb[31].mxu0  ;;  %2791 = vst [vmem:[#allocation3 + $0x1b0] sm:$0xff] %v2729_v16  ;;  %v2733_v24 = vadd.f32 %v2732_v21, %v13737_v54  ;;  %v2734_v26 = vpop.f32.mrb[31].mxu1 }
 0x394   : > { %2790 = vst [vmem:[#allocation3 + $0x1a8] sm:$0xff] %v2658_v17  ;;  %v2662_v25 = vadd.f32 %v2661_v32, %v13740_v49  ;;  %2792 = vst [vmem:[#allocation3 + $0x1b8] sm:$0xff] %v2731_v31  ;;  %v2735_v27 = vadd.f32 %v2734_v26, %v13743_v13 }
 0x395   : > { %2797 = vst [vmem:[#allocation3 + $0x1e0] sm:$0xff] %v2660_v10  ;;  %2799 = vst [vmem:[#allocation3 + $0x1f0] sm:$0xff] %v2733_v24 }
 0x396   : > { %2798 = vst [vmem:[#allocation3 + $0x1e8] sm:$0xff] %v2662_v25  ;;  %2800 = vst [vmem:[#allocation3 + $0x1f8] sm:$0xff] %v2735_v27 }
 0x397 PF: > { %v2809_v40 = vld [vmem:[%s13312_s21] sm:$0xff]  ;;  %v2810_v49 = vld [vmem:[%s13312_s21 + $0x8] sm:$0xff]  ;;  %v16587_v22 = vmov 0   ;;  %p12373_p12 = scmp.ne.s32.totalorder %s13083_s6, 2 }
 0x398   : > { %v2813_v54 = vld [vmem:[%s13312_s21 + $0x20] sm:$0xff]  ;;  %v2814_v13 = vld [vmem:[%s13312_s21 + $0x28] sm:$0xff]  ;;  %3609 = vmatprep.mubr.bf16.mxu0 %v16587_v22  ;;  %3650 = vmatprep.mubr.bf16.mxu1 %v16587_v22  ;;  %vm10918_vm0 = vcmask (!%p12373_p12), 1024  }
 0x399   : > { %v13780_v28 = vcombine.high %v2809_v40, %v2813_v54  ;;  %v13783_v61 = vcombine.low %v2809_v40, %v2813_v54  ;;  %v2817_v29 = vld [vmem:[%s13312_s21 + $0x40] sm:$0xff]  ;;  %v13789_v33 = vcombine.high %v2810_v49, %v2814_v13  ;;  %v13791_v57 = vcombine.low %v2810_v49, %v2814_v13  ;;  %v2818_v8 = vld [vmem:[%s13312_s21 + $0x48] sm:$0xff] }
 0x39a   : > { %v2821_v30 = vld [vmem:[%s13312_s21 + $0x60] sm:$0xff]  ;;  %v2822_v37 = vld [vmem:[%s13312_s21 + $0x68] sm:$0xff] }
 0x39b   : > { %v13793_v36 = vcombine.high %v2817_v29, %v2821_v30  ;;  %v2825_v56 = vld [vmem:[%s13312_s21 + $0x80] sm:$0xff]  ;;  %3577 = vmatprep.subr.bf16.mxu0 %v13780_v28  ;;  %v13799_v4 = vcombine.high %v2818_v8, %v2822_v37  ;;  %v2826_v23 = vld [vmem:[%s13312_s21 + $0x88] sm:$0xff]  ;;  %3618 = vmatprep.subr.bf16.mxu1 %v13789_v33  ;;  %v13806_v20 = vcombine.low %v2817_v29, %v2821_v30 }
 0x39c   : > { %v2829_v34 = vld [vmem:[%s13312_s21 + $0xa0] sm:$0xff]  ;;  %v2830_v39 = vld [vmem:[%s13312_s21 + $0xa8] sm:$0xff]  ;;  %3578 = vmatpush1.bf16.msra.mxu0 %v13783_v61  ;;  %3619 = vmatpush1.bf16.msra.mxu1 %v13791_v57  ;;  %v13810_v41 = vcombine.low %v2818_v8, %v2822_v37 }
 0x39d   : > { %3579 = vmatprep.subr.bf16.mxu0 %v13793_v36  ;;  %v13812_v42 = vcombine.high %v2825_v56, %v2829_v34  ;;  %3620 = vmatprep.subr.bf16.mxu1 %v13799_v4  ;;  %v13815_v43 = vcombine.high %v2826_v23, %v2830_v39  ;;  %v2833_v44 = vld [vmem:[%s13312_s21 + $0xc0] sm:$0xff]  ;;  %v2834_v19 = vld [vmem:[%s13312_s21 + $0xc8] sm:$0xff]  ;;  %v13822_v47 = vcombine.low %v2825_v56, %v2829_v34 }
 0x39e   : > { %v2837_v45 = vld [vmem:[%s13312_s21 + $0xe0] sm:$0xff]  ;;  %v2838_v46 = vld [vmem:[%s13312_s21 + $0xe8] sm:$0xff]  ;;  %v13826_v50 = vcombine.low %v2826_v23, %v2830_v39 }
 0x39f   : > { %v13828_v51 = vcombine.high %v2833_v44, %v2837_v45  ;;  %v13831_v52 = vcombine.high %v2834_v19, %v2838_v46  ;;  %v2841_v53 = vld [vmem:[%s13312_s21 + $0x100] sm:$0xff]  ;;  %v2842_v58 = vld [vmem:[%s13312_s21 + $0x108] sm:$0xff]  ;;  %v13838_v60 = vcombine.low %v2833_v44, %v2837_v45  ;;  %v13842_v62 = vcombine.low %v2834_v19, %v2838_v46 }
 0x3a0   : > { %3580 = vmatpush1.bf16.msra.mxu0 %v13806_v20  ;;  %3621 = vmatpush1.bf16.msra.mxu1 %v13810_v41  ;;  %v2845_v55 = vld [vmem:[%s13312_s21 + $0x120] sm:$0xff]  ;;  %v2846_v59 = vld [vmem:[%s13312_s21 + $0x128] sm:$0xff] }
 0x3a1   : > { %3581 = vmatprep.subr.bf16.mxu0 %v13812_v42  ;;  %3622 = vmatprep.subr.bf16.mxu1 %v13815_v43  ;;  %v13844_v63 = vcombine.high %v2841_v53, %v2845_v55  ;;  %v13847_v0 = vcombine.high %v2842_v58, %v2846_v59  ;;  %v2849_v1 = vld [vmem:[%s13312_s21 + $0x140] sm:$0xff]  ;;  %v2850_v3 = vld [vmem:[%s13312_s21 + $0x148] sm:$0xff]  ;;  %v13854_v6 = vcombine.low %v2841_v53, %v2845_v55 }
 0x3a2   : > { %v2853_v2 = vld [vmem:[%s13312_s21 + $0x160] sm:$0xff]  ;;  %v2854_v5 = vld [vmem:[%s13312_s21 + $0x168] sm:$0xff]  ;;  %v13858_v7 = vcombine.low %v2842_v58, %v2846_v59 }
 0x3a3   : > { %v13860_v48 = vcombine.high %v2849_v1, %v2853_v2  ;;  %v13863_v12 = vcombine.high %v2850_v3, %v2854_v5  ;;  %v2857_v38 = vld [vmem:[%s13312_s21 + $0x180] sm:$0xff]  ;;  %v2858_v35 = vld [vmem:[%s13312_s21 + $0x188] sm:$0xff]  ;;  %v13870_v15 = vcombine.low %v2849_v1, %v2853_v2  ;;  %v13874_v16 = vcombine.low %v2850_v3, %v2854_v5 }
 0x3a4   : > { %3582 = vmatpush1.bf16.msra.mxu0 %v13822_v47  ;;  %3623 = vmatpush1.bf16.msra.mxu1 %v13826_v50  ;;  %v2861_v9 = vld [vmem:[%s13312_s21 + $0x1a0] sm:$0xff]  ;;  %v2862_v14 = vld [vmem:[%s13312_s21 + $0x1a8] sm:$0xff] }
 0x3a5   : > { %3583 = vmatprep.subr.bf16.mxu0 %v13828_v51  ;;  %3624 = vmatprep.subr.bf16.mxu1 %v13831_v52  ;;  %v13876_v17 = vcombine.high %v2857_v38, %v2861_v9  ;;  %v13879_v18 = vcombine.high %v2858_v35, %v2862_v14  ;;  %v2865_v11 = vld [vmem:[%s13312_s21 + $0x1c0] sm:$0xff]  ;;  %v2866_v10 = vld [vmem:[%s13312_s21 + $0x1c8] sm:$0xff]  ;;  %v13886_v32 = vcombine.low %v2857_v38, %v2861_v9 }
 0x3a6   : > { %v2869_v31 = vld [vmem:[%s13312_s21 + $0x1e0] sm:$0xff]  ;;  %v2870_v21 = vld [vmem:[%s13312_s21 + $0x1e8] sm:$0xff]  ;;  %v13890_v24 = vcombine.low %v2858_v35, %v2862_v14 }
 0x3a7   : > { %v13892_v25 = vcombine.high %v2865_v11, %v2869_v31  ;;  %v13895_v26 = vcombine.high %v2866_v10, %v2870_v21  ;;  %v2873_v27 = vld [vmem:[%s13312_s21 + $0x200] sm:$0xff]  ;;  %v2874_v54 = vld [vmem:[%s13312_s21 + $0x208] sm:$0xff]  ;;  %v13902_v13 = vcombine.low %v2865_v11, %v2869_v31  ;;  %v13906_v29 = vcombine.low %v2866_v10, %v2870_v21 }
 0x3a8   : > { %3584 = vmatpush1.bf16.msra.mxu0 %v13838_v60  ;;  %3625 = vmatpush1.bf16.msra.mxu1 %v13842_v62  ;;  %v2877_v40 = vld [vmem:[%s13312_s21 + $0x220] sm:$0xff]  ;;  %v2878_v49 = vld [vmem:[%s13312_s21 + $0x228] sm:$0xff] }
 0x3a9   : > { %3585 = vmatprep.subr.bf16.mxu0 %v13844_v63  ;;  %3626 = vmatprep.subr.bf16.mxu1 %v13847_v0  ;;  %v13908_v30 = vcombine.high %v2873_v27, %v2877_v40  ;;  %v13911_v8 = vcombine.high %v2874_v54, %v2878_v49  ;;  %v2881_v37 = vld [vmem:[%s13312_s21 + $0x240] sm:$0xff]  ;;  %v2882_v34 = vld [vmem:[%s13312_s21 + $0x248] sm:$0xff]  ;;  %v13918_v39 = vcombine.low %v2873_v27, %v2877_v40 }
 0x3aa   : > { %v2885_v56 = vld [vmem:[%s13312_s21 + $0x260] sm:$0xff]  ;;  %v2886_v23 = vld [vmem:[%s13312_s21 + $0x268] sm:$0xff]  ;;  %v13922_v44 = vcombine.low %v2874_v54, %v2878_v49 }
 0x3ab   : > { %v13924_v45 = vcombine.high %v2881_v37, %v2885_v56  ;;  %v13927_v19 = vcombine.high %v2882_v34, %v2886_v23  ;;  %v2889_v46 = vld [vmem:[%s13312_s21 + $0x280] sm:$0xff]  ;;  %v2890_v55 = vld [vmem:[%s13312_s21 + $0x288] sm:$0xff]  ;;  %v13934_v59 = vcombine.low %v2881_v37, %v2885_v56  ;;  %v13938_v1 = vcombine.low %v2882_v34, %v2886_v23 }
 0x3ac   : > { %3586 = vmatpush1.bf16.msra.mxu0 %v13854_v6  ;;  %3627 = vmatpush1.bf16.msra.mxu1 %v13858_v7  ;;  %v2893_v53 = vld [vmem:[%s13312_s21 + $0x2a0] sm:$0xff]  ;;  %v2894_v58 = vld [vmem:[%s13312_s21 + $0x2a8] sm:$0xff] }
 0x3ad   : > { %3587 = vmatprep.subr.bf16.mxu0 %v13860_v48  ;;  %3628 = vmatprep.subr.bf16.mxu1 %v13863_v12  ;;  %v13940_v2 = vcombine.high %v2889_v46, %v2893_v53  ;;  %v13943_v3 = vcombine.high %v2890_v55, %v2894_v58  ;;  %v2897_v5 = vld [vmem:[%s13312_s21 + $0x2c0] sm:$0xff]  ;;  %v2898_v9 = vld [vmem:[%s13312_s21 + $0x2c8] sm:$0xff]  ;;  %v13950_v14 = vcombine.low %v2889_v46, %v2893_v53 }
 0x3ae   : > { %v2901_v38 = vld [vmem:[%s13312_s21 + $0x2e0] sm:$0xff]  ;;  %v2902_v35 = vld [vmem:[%s13312_s21 + $0x2e8] sm:$0xff]  ;;  %v13954_v11 = vcombine.low %v2890_v55, %v2894_v58 }
 0x3af   : > { %v13956_v31 = vcombine.high %v2897_v5, %v2901_v38  ;;  %v13959_v10 = vcombine.high %v2898_v9, %v2902_v35  ;;  %v2905_v21 = vld [vmem:[%s13312_s21 + $0x300] sm:$0xff]  ;;  %v2906_v40 = vld [vmem:[%s13312_s21 + $0x308] sm:$0xff]  ;;  %v13966_v49 = vcombine.low %v2897_v5, %v2901_v38  ;;  %v13970_v37 = vcombine.low %v2898_v9, %v2902_v35 }
 0x3b0   : > { %3588 = vmatpush1.bf16.msra.mxu0 %v13870_v15  ;;  %3629 = vmatpush1.bf16.msra.mxu1 %v13874_v16  ;;  %16912 = vst [vmem:[#allocation17_spill] sm:$0xff] %v13954_v11  ;;  %v2909_v27 = vld [vmem:[%s13312_s21 + $0x320] sm:$0xff]  ;;  %v2910_v54 = vld [vmem:[%s13312_s21 + $0x328] sm:$0xff] }
 0x3b1   : > { %3589 = vmatprep.subr.bf16.mxu0 %v13876_v17  ;;  %3630 = vmatprep.subr.bf16.mxu1 %v13879_v18  ;;  %16913 = vst [vmem:[#allocation18_spill] sm:$0xff] %v13956_v31  ;;  %16914 = vst [vmem:[#allocation19_spill] sm:$0xff] %v13959_v10  ;;  %v13972_v56 = vcombine.high %v2905_v21, %v2909_v27  ;;  %v13975_v34 = vcombine.high %v2906_v40, %v2910_v54  ;;  %v2913_v23 = vld [vmem:[%s13312_s21 + $0x340] sm:$0xff]  ;;  %v2914_v53 = vld [vmem:[%s13312_s21 + $0x348] sm:$0xff] }
 0x3b2   : > { %16915 = vst [vmem:[#allocation20_spill] sm:$0xff] %v13966_v49  ;;  %16916 = vst [vmem:[#allocation21_spill] sm:$0xff] %v13970_v37  ;;  %v2917_v46 = vld [vmem:[%s13312_s21 + $0x360] sm:$0xff]  ;;  %v2918_v55 = vld [vmem:[%s13312_s21 + $0x368] sm:$0xff]  ;;  %v13982_v58 = vcombine.low %v2905_v21, %v2909_v27  ;;  %v13986_v5 = vcombine.low %v2906_v40, %v2910_v54 }
 0x3b3   : > { %16917 = vst [vmem:[#allocation22_spill] sm:$0xff] %v13972_v56  ;;  %16918 = vst [vmem:[#allocation23_spill] sm:$0xff] %v13975_v34  ;;  %v13988_v38 = vcombine.high %v2913_v23, %v2917_v46  ;;  %v13991_v9 = vcombine.high %v2914_v53, %v2918_v55  ;;  %v2921_v35 = vld [vmem:[%s13312_s21 + $0x380] sm:$0xff]  ;;  %v2922_v21 = vld [vmem:[%s13312_s21 + $0x388] sm:$0xff]  ;;  %v14002_v40 = vcombine.low %v2914_v53, %v2918_v55 }
 0x3b4   : > { %3590 = vmatpush1.bf16.msra.mxu0 %v13886_v32  ;;  %3631 = vmatpush1.bf16.msra.mxu1 %v13890_v24  ;;  %16919 = vst [vmem:[#allocation24_spill] sm:$0xff] %v13982_v58  ;;  %16920 = vst [vmem:[#allocation25_spill] sm:$0xff] %v13986_v5  ;;  %v2925_v22 = vld [vmem:[%s13312_s21 + $0x3a0] sm:$0xff]  ;;  %v2926_v27 = vld [vmem:[%s13312_s21 + $0x3a8] sm:$0xff] }
 0x3b5   : > { %3591 = vmatprep.subr.bf16.mxu0 %v13892_v25  ;;  %3632 = vmatprep.subr.bf16.mxu1 %v13895_v26  ;;  %16921 = vst [vmem:[#allocation26_spill] sm:$0xff] %v13988_v38  ;;  %16922 = vst [vmem:[#allocation27_spill] sm:$0xff] %v13991_v9  ;;  %v14004_v54 = vcombine.high %v2921_v35, %v2925_v22  ;;  %v14018_v53 = vcombine.low %v2922_v21, %v2926_v27 }
 0x3b6   : > { %16924 = vst [vmem:[#allocation29_spill] sm:$0xff] %v14002_v40 }
 0x3b7   : > { %16925 = vst [vmem:[#allocation30_spill] sm:$0xff] %v14004_v54  ;;  %16928 = vst [vmem:[#allocation33_spill] sm:$0xff] %v14018_v53 }
 0x3b8   : > { %3592 = vmatpush1.bf16.msra.mxu0 %v13902_v13  ;;  %3633 = vmatpush1.bf16.msra.mxu1 %v13906_v29 }
 0x3b9   : > { %3593 = vmatprep.subr.bf16.mxu0 %v13908_v30  ;;  %3634 = vmatprep.subr.bf16.mxu1 %v13911_v8 }
 0x3bc   : > { %3594 = vmatpush1.bf16.msra.mxu0 %v13918_v39  ;;  %3635 = vmatpush1.bf16.msra.mxu1 %v13922_v44 }
 0x3bd   : > { %3595 = vmatprep.subr.bf16.mxu0 %v13924_v45  ;;  %3636 = vmatprep.subr.bf16.mxu1 %v13927_v19 }
 0x3c0   : > { %3596 = vmatpush1.bf16.msra.mxu0 %v13934_v59  ;;  %3637 = vmatpush1.bf16.msra.mxu1 %v13938_v1 }
 0x3c1   : > { %3597 = vmatprep.subr.bf16.mxu0 %v13940_v2  ;;  %3638 = vmatprep.subr.bf16.mxu1 %v13943_v3 }
 0x3c4   : > { %3598 = vmatpush1.bf16.msra.mxu0 %v13950_v14  ;;  %3639 = vmatpush1.bf16.msra.mxu1 %v13954_v11  ;;  %v2936_v11 = vld [vmem:[%s13312_s21 + $0x3f8] sm:$0xff] }
 0x3c5   : > { %3599 = vmatprep.subr.bf16.mxu0 %v13956_v31  ;;  %3640 = vmatprep.subr.bf16.mxu1 %v13959_v10  ;;  %v16939_v10 = vmov 0   ;;  %v2932_v31 = vld [vmem:[%s13312_s21 + $0x3d8] sm:$0xff] }
 0x3c8   : > { %3600 = vmatpush1.bf16.msra.mxu0 %v13966_v49  ;;  %3641 = vmatpush1.bf16.msra.mxu1 %v13970_v37  ;;  %v13998_v37 = vcombine.low %v2913_v23, %v2917_v46  ;;  %v2930_v23 = vld [vmem:[%s13312_s21 + $0x3c8] sm:$0xff]  ;;  %v2831_v49 = vld [vmem:[%s13312_s21 + $0xb0] sm:$0xff] }
 0x3c9   : > { %3601 = vmatprep.subr.bf16.mxu0 %v13972_v56  ;;  %3642 = vmatprep.subr.bf16.mxu1 %v13975_v34  ;;  %v14007_v34 = vcombine.high %v2922_v21, %v2926_v27  ;;  %v2929_v56 = vld [vmem:[%s13312_s21 + $0x3c0] sm:$0xff]  ;;  %v2934_v46 = vld [vmem:[%s13312_s21 + $0x3e8] sm:$0xff] }
 0x3ca   : > { %16923 = vst [vmem:[#allocation28_spill] sm:$0xff] %v13998_v37  ;;  %v14034_v21 = vcombine.low %v2930_v23, %v2934_v46 }
 0x3cb   : > { %16926 = vst [vmem:[#allocation31_spill] sm:$0xff] %v14007_v34 }
 0x3cc   : > { %3602 = vmatpush1.bf16.msra.mxu0 %v13982_v58  ;;  %3643 = vmatpush1.bf16.msra.mxu1 %v13986_v5  ;;  %v2933_v58 = vld [vmem:[%s13312_s21 + $0x3e0] sm:$0xff]  ;;  %v14014_v5 = vcombine.low %v2921_v35, %v2925_v22  ;;  %v2812_v22 = vld [vmem:[%s13312_s21 + $0x18] sm:$0xff]  ;;  %16932 = vst [vmem:[#allocation37_spill] sm:$0xff] %v14034_v21 }
 0x3cd   : > { %3603 = vmatprep.subr.bf16.mxu0 %v13988_v38  ;;  %3644 = vmatprep.subr.bf16.mxu1 %v13991_v9  ;;  %v14020_v55 = vcombine.high %v2929_v56, %v2933_v58  ;;  %v14023_v9 = vcombine.high %v2930_v23, %v2934_v46  ;;  %v2811_v38 = vld [vmem:[%s13312_s21 + $0x10] sm:$0xff]  ;;  %v2816_v35 = vld [vmem:[%s13312_s21 + $0x38] sm:$0xff] }
 0x3ce   : > { %16927 = vst [vmem:[#allocation32_spill] sm:$0xff] %v14014_v5  ;;  %v14050_v23 = vcombine.low %v2812_v22, %v2816_v35 }
 0x3cf   : > { %16929 = vst [vmem:[#allocation34_spill] sm:$0xff] %v14020_v55  ;;  %16930 = vst [vmem:[#allocation35_spill] sm:$0xff] %v14023_v9 }
 0x3d0   : > { %3604 = vmatpush1.bf16.msra.mxu0 %v13998_v37  ;;  %3645 = vmatpush1.bf16.msra.mxu1 %v14002_v40  ;;  %v2815_v37 = vld [vmem:[%s13312_s21 + $0x30] sm:$0xff]  ;;  %v14030_v40 = vcombine.low %v2929_v56, %v2933_v58  ;;  %v2820_v56 = vld [vmem:[%s13312_s21 + $0x58] sm:$0xff]  ;;  %16936 = vst [vmem:[#allocation41_spill] sm:$0xff] %v14050_v23 }
 0x3d1   : > { %3605 = vmatprep.subr.bf16.mxu0 %v14004_v54  ;;  %3646 = vmatprep.subr.bf16.mxu1 %v14007_v34  ;;  %v14036_v27 = vcombine.high %v2811_v38, %v2815_v37  ;;  %v14039_v34 = vcombine.high %v2812_v22, %v2816_v35  ;;  %v2819_v54 = vld [vmem:[%s13312_s21 + $0x50] sm:$0xff]  ;;  %v2824_v58 = vld [vmem:[%s13312_s21 + $0x78] sm:$0xff] }
 0x3d2   : > { %16931 = vst [vmem:[#allocation36_spill] sm:$0xff] %v14030_v40  ;;  %v14068_v35 = vcombine.low %v2820_v56, %v2824_v58 }
 0x3d3   : > { %16933 = vst [vmem:[#allocation38_spill] sm:$0xff] %v14036_v27  ;;  %16934 = vst [vmem:[#allocation39_spill] sm:$0xff] %v14039_v34 }
 0x3d4   : > { %3606 = vmatpush1.bf16.msra.mxu0 %v14014_v5  ;;  %3647 = vmatpush1.bf16.msra.mxu1 %v14018_v53  ;;  %v2823_v5 = vld [vmem:[%s13312_s21 + $0x70] sm:$0xff]  ;;  %v14046_v53 = vcombine.low %v2811_v38, %v2815_v37  ;;  %v2828_v37 = vld [vmem:[%s13312_s21 + $0x98] sm:$0xff]  ;;  %16941 = vst [vmem:[#allocation45_spill] sm:$0xff] %v14068_v35 }
 0x3d5   : > { %3607 = vmatprep.subr.bf16.mxu0 %v14020_v55  ;;  %3648 = vmatprep.subr.bf16.mxu1 %v14023_v9  ;;  %v14052_v46 = vcombine.high %v2819_v54, %v2823_v5  ;;  %v14055_v9 = vcombine.high %v2820_v56, %v2824_v58  ;;  %v2827_v55 = vld [vmem:[%s13312_s21 + $0x90] sm:$0xff]  ;;  %v2832_v38 = vld [vmem:[%s13312_s21 + $0xb8] sm:$0xff]  ;;  %v14064_v22 = vcombine.low %v2819_v54, %v2823_v5 }
 0x3d6   : > { %16935 = vst [vmem:[#allocation40_spill] sm:$0xff] %v14046_v53  ;;  %v2836_v5 = vld [vmem:[%s13312_s21 + $0xd8] sm:$0xff]  ;;  %v14082_v56 = vcombine.low %v2827_v55, %v2831_v49  ;;  %v14086_v58 = vcombine.low %v2828_v37, %v2832_v38 }
 0x3d7   : > { %16937 = vst [vmem:[#allocation42_spill] sm:$0xff] %v14052_v46  ;;  %16938 = vst [vmem:[#allocation43_spill] sm:$0xff] %v14055_v9  ;;  %v2840_v54 = vld [vmem:[%s13312_s21 + $0xf8] sm:$0xff] }
 0x3d8   : > { %3608 = vmatpush1.bf16.msra.mxu0 %v14030_v40  ;;  %3649 = vmatpush1.bf16.msra.mxu1 %v14034_v21  ;;  %16940 = vst [vmem:[#allocation44_spill] sm:$0xff] %v14064_v22  ;;  %v2835_v21 = vld [vmem:[%s13312_s21 + $0xd0] sm:$0xff]  ;;  %16944 = vst [vmem:[#allocation48_spill] sm:$0xff] %v14082_v56 }
 0x3d9   : > { %3659 = vmatprep.subr.bf16.mxu0 %v14036_v27  ;;  %3700 = vmatprep.subr.bf16.mxu1 %v14039_v34  ;;  %v14070_v34 = vcombine.high %v2827_v55, %v2831_v49  ;;  %v14073_v27 = vcombine.high %v2828_v37, %v2832_v38  ;;  %v2839_v40 = vld [vmem:[%s13312_s21 + $0xf0] sm:$0xff]  ;;  %16945 = vst [vmem:[#allocation49_spill] sm:$0xff] %v14086_v58  ;;  %v2844_v49 = vld [vmem:[%s13312_s21 + $0x118] sm:$0xff] }
 0x3da   : > { %v2848_v55 = vld [vmem:[%s13312_s21 + $0x138] sm:$0xff]  ;;  %v14102_v37 = vcombine.low %v2836_v5, %v2840_v54 }
 0x3db   : > { %3610 = vmatmul.mubr.bf16.vlgmr.msra.gmra.mrb[0].mxu0 %v16939_v10  ;;  %3651 = vmatmul.mubr.bf16.vlgmr.msra.gmra.mrb[0].mxu1 %v16939_v10  ;;  %16942 = vst [vmem:[#allocation46_spill] sm:$0xff] %v14070_v34  ;;  %16943 = vst [vmem:[#allocation47_spill] sm:$0xff] %v14073_v27 }
 0x3dc   : > { %3660 = vmatpush1.bf16.msra.mxu0 %v14046_v53  ;;  %3701 = vmatpush1.bf16.msra.mxu1 %v14050_v23  ;;  %v2843_v23 = vld [vmem:[%s13312_s21 + $0x110] sm:$0xff]  ;;  %16949 = vst [vmem:[#allocation53_spill] sm:$0xff] %v14102_v37 }
 0x3dd   : > { %3661 = vmatprep.subr.bf16.mxu0 %v14052_v46  ;;  %3702 = vmatprep.subr.bf16.mxu1 %v14055_v9  ;;  %v14088_v9 = vcombine.high %v2835_v21, %v2839_v40  ;;  %v14091_v46 = vcombine.high %v2836_v5, %v2840_v54  ;;  %v14118_v5 = vcombine.low %v2844_v49, %v2848_v55  ;;  %v2935_v53 = vld [vmem:[%s13312_s21 + $0x3f0] sm:$0xff] }
 0x3de   : > { %3691 = vmatprep.mubr.bf16.mxu0 %v16939_v10  ;;  %3732 = vmatprep.mubr.bf16.mxu1 %v16939_v10 }
 0x3df   : > { %16946 = vst [vmem:[#allocation50_spill] sm:$0xff] %v14088_v9  ;;  %16947 = vst [vmem:[#allocation51_spill] sm:$0xff] %v14091_v46 }
 0x3e0   : > { %3662 = vmatpush1.bf16.msra.mxu0 %v14064_v22  ;;  %3703 = vmatpush1.bf16.msra.mxu1 %v14068_v35  ;;  %v2847_v22 = vld [vmem:[%s13312_s21 + $0x130] sm:$0xff]  ;;  %v14098_v35 = vcombine.low %v2835_v21, %v2839_v40  ;;  %v2852_v40 = vld [vmem:[%s13312_s21 + $0x158] sm:$0xff]  ;;  %16953 = vst [vmem:[#allocation57_spill] sm:$0xff] %v14118_v5 }
 0x3e1   : > { %3663 = vmatprep.subr.bf16.mxu0 %v14070_v34  ;;  %3704 = vmatprep.subr.bf16.mxu1 %v14073_v27  ;;  %v14104_v38 = vcombine.high %v2843_v23, %v2847_v22  ;;  %v14107_v27 = vcombine.high %v2844_v49, %v2848_v55  ;;  %v2851_v34 = vld [vmem:[%s13312_s21 + $0x150] sm:$0xff]  ;;  %v2856_v21 = vld [vmem:[%s13312_s21 + $0x178] sm:$0xff] }
 0x3e2   : > { %16948 = vst [vmem:[#allocation52_spill] sm:$0xff] %v14098_v35  ;;  %v14134_v49 = vcombine.low %v2852_v40, %v2856_v21 }
 0x3e3   : > { %16950 = vst [vmem:[#allocation54_spill] sm:$0xff] %v14104_v38  ;;  %16951 = vst [vmem:[#allocation55_spill] sm:$0xff] %v14107_v27 }
 0x3e4   : > { %3664 = vmatpush1.bf16.msra.mxu0 %v14082_v56  ;;  %3705 = vmatpush1.bf16.msra.mxu1 %v14086_v58  ;;  %v2855_v56 = vld [vmem:[%s13312_s21 + $0x170] sm:$0xff]  ;;  %v14114_v58 = vcombine.low %v2843_v23, %v2847_v22  ;;  %v2860_v23 = vld [vmem:[%s13312_s21 + $0x198] sm:$0xff]  ;;  %16957 = vst [vmem:[#allocation61_spill] sm:$0xff] %v14134_v49 }
 0x3e5   : > { %3665 = vmatprep.subr.bf16.mxu0 %v14088_v9  ;;  %3706 = vmatprep.subr.bf16.mxu1 %v14091_v46  ;;  %v14120_v54 = vcombine.high %v2851_v34, %v2855_v56  ;;  %v14123_v46 = vcombine.high %v2852_v40, %v2856_v21  ;;  %v2859_v9 = vld [vmem:[%s13312_s21 + $0x190] sm:$0xff]  ;;  %v2864_v22 = vld [vmem:[%s13312_s21 + $0x1b8] sm:$0xff] }
 0x3e6   : > { %16952 = vst [vmem:[#allocation56_spill] sm:$0xff] %v14114_v58  ;;  %v14150_v40 = vcombine.low %v2860_v23, %v2864_v22 }
 0x3e7   : > { %16954 = vst [vmem:[#allocation58_spill] sm:$0xff] %v14120_v54  ;;  %16955 = vst [vmem:[#allocation59_spill] sm:$0xff] %v14123_v46 }
 0x3e8   : > { %3666 = vmatpush1.bf16.msra.mxu0 %v14098_v35  ;;  %3707 = vmatpush1.bf16.msra.mxu1 %v14102_v37  ;;  %v2863_v35 = vld [vmem:[%s13312_s21 + $0x1b0] sm:$0xff]  ;;  %v14130_v37 = vcombine.low %v2851_v34, %v2855_v56  ;;  %v2868_v34 = vld [vmem:[%s13312_s21 + $0x1d8] sm:$0xff]  ;;  %16961 = vst [vmem:[#allocation65_spill] sm:$0xff] %v14150_v40 }
 0x3e9   : > { %3667 = vmatprep.subr.bf16.mxu0 %v14104_v38  ;;  %3708 = vmatprep.subr.bf16.mxu1 %v14107_v27  ;;  %v14136_v55 = vcombine.high %v2859_v9, %v2863_v35  ;;  %v14139_v27 = vcombine.high %v2860_v23, %v2864_v22  ;;  %v2867_v38 = vld [vmem:[%s13312_s21 + $0x1d0] sm:$0xff]  ;;  %v2872_v56 = vld [vmem:[%s13312_s21 + $0x1f8] sm:$0xff] }
 0x3ea   : > { %16956 = vst [vmem:[#allocation60_spill] sm:$0xff] %v14130_v37  ;;  %v14166_v23 = vcombine.low %v2868_v34, %v2872_v56 }
 0x3eb   : > { %16958 = vst [vmem:[#allocation62_spill] sm:$0xff] %v14136_v55  ;;  %16959 = vst [vmem:[#allocation63_spill] sm:$0xff] %v14139_v27 }
 0x3ec   : > { %3668 = vmatpush1.bf16.msra.mxu0 %v14114_v58  ;;  %3709 = vmatpush1.bf16.msra.mxu1 %v14118_v5  ;;  %v2871_v58 = vld [vmem:[%s13312_s21 + $0x1f0] sm:$0xff]  ;;  %v14146_v5 = vcombine.low %v2859_v9, %v2863_v35  ;;  %v2876_v9 = vld [vmem:[%s13312_s21 + $0x218] sm:$0xff]  ;;  %16965 = vst [vmem:[#allocation69_spill] sm:$0xff] %v14166_v23 }
 0x3ed   : > { %3669 = vmatprep.subr.bf16.mxu0 %v14120_v54  ;;  %3710 = vmatprep.subr.bf16.mxu1 %v14123_v46  ;;  %v14152_v21 = vcombine.high %v2867_v38, %v2871_v58  ;;  %v14155_v46 = vcombine.high %v2868_v34, %v2872_v56  ;;  %v2875_v54 = vld [vmem:[%s13312_s21 + $0x210] sm:$0xff]  ;;  %v2880_v35 = vld [vmem:[%s13312_s21 + $0x238] sm:$0xff] }
 0x3ee   : > { %16960 = vst [vmem:[#allocation64_spill] sm:$0xff] %v14146_v5  ;;  %v14182_v34 = vcombine.low %v2876_v9, %v2880_v35 }
 0x3ef   : > { %16962 = vst [vmem:[#allocation66_spill] sm:$0xff] %v14152_v21  ;;  %16963 = vst [vmem:[#allocation67_spill] sm:$0xff] %v14155_v46 }
 0x3f0   : > { %3670 = vmatpush1.bf16.msra.mxu0 %v14130_v37  ;;  %3711 = vmatpush1.bf16.msra.mxu1 %v14134_v49  ;;  %v2879_v37 = vld [vmem:[%s13312_s21 + $0x230] sm:$0xff]  ;;  %v14162_v49 = vcombine.low %v2867_v38, %v2871_v58  ;;  %v2884_v58 = vld [vmem:[%s13312_s21 + $0x258] sm:$0xff]  ;;  %16969 = vst [vmem:[#allocation73_spill] sm:$0xff] %v14182_v34 }
 0x3f1   : > { %3671 = vmatprep.subr.bf16.mxu0 %v14136_v55  ;;  %3712 = vmatprep.subr.bf16.mxu1 %v14139_v27  ;;  %v14168_v22 = vcombine.high %v2875_v54, %v2879_v37  ;;  %v14171_v27 = vcombine.high %v2876_v9, %v2880_v35  ;;  %v2883_v55 = vld [vmem:[%s13312_s21 + $0x250] sm:$0xff]  ;;  %v2888_v38 = vld [vmem:[%s13312_s21 + $0x278] sm:$0xff] }
 0x3f2   : > { %16964 = vst [vmem:[#allocation68_spill] sm:$0xff] %v14162_v49  ;;  %v14198_v9 = vcombine.low %v2884_v58, %v2888_v38 }
 0x3f3   : > { %16966 = vst [vmem:[#allocation70_spill] sm:$0xff] %v14168_v22  ;;  %16967 = vst [vmem:[#allocation71_spill] sm:$0xff] %v14171_v27 }
 0x3f4   : > { %3672 = vmatpush1.bf16.msra.mxu0 %v14146_v5  ;;  %3713 = vmatpush1.bf16.msra.mxu1 %v14150_v40  ;;  %v2887_v5 = vld [vmem:[%s13312_s21 + $0x270] sm:$0xff]  ;;  %v14178_v40 = vcombine.low %v2875_v54, %v2879_v37  ;;  %v2892_v37 = vld [vmem:[%s13312_s21 + $0x298] sm:$0xff]  ;;  %16973 = vst [vmem:[#allocation77_spill] sm:$0xff] %v14198_v9 }
 0x3f5   : > { %3673 = vmatprep.subr.bf16.mxu0 %v14152_v21  ;;  %3714 = vmatprep.subr.bf16.mxu1 %v14155_v46  ;;  %v14184_v56 = vcombine.high %v2883_v55, %v2887_v5  ;;  %v14187_v46 = vcombine.high %v2884_v58, %v2888_v38  ;;  %v2891_v21 = vld [vmem:[%s13312_s21 + $0x290] sm:$0xff]  ;;  %v2896_v54 = vld [vmem:[%s13312_s21 + $0x2b8] sm:$0xff] }
 0x3f6   : > { %16968 = vst [vmem:[#allocation72_spill] sm:$0xff] %v14178_v40  ;;  %v14214_v58 = vcombine.low %v2892_v37, %v2896_v54 }
 0x3f7   : > { %16970 = vst [vmem:[#allocation74_spill] sm:$0xff] %v14184_v56  ;;  %16971 = vst [vmem:[#allocation75_spill] sm:$0xff] %v14187_v46 }
 0x3f8   : > { %3674 = vmatpush1.bf16.msra.mxu0 %v14162_v49  ;;  %3715 = vmatpush1.bf16.msra.mxu1 %v14166_v23  ;;  %v2895_v49 = vld [vmem:[%s13312_s21 + $0x2b0] sm:$0xff]  ;;  %v14194_v23 = vcombine.low %v2883_v55, %v2887_v5  ;;  %v2900_v5 = vld [vmem:[%s13312_s21 + $0x2d8] sm:$0xff]  ;;  %16977 = vst [vmem:[#allocation81_spill] sm:$0xff] %v14214_v58 }
 0x3f9   : > { %3675 = vmatprep.subr.bf16.mxu0 %v14168_v22  ;;  %3716 = vmatprep.subr.bf16.mxu1 %v14171_v27  ;;  %v14200_v35 = vcombine.high %v2891_v21, %v2895_v49  ;;  %v14203_v27 = vcombine.high %v2892_v37, %v2896_v54  ;;  %v2899_v22 = vld [vmem:[%s13312_s21 + $0x2d0] sm:$0xff]  ;;  %v2904_v55 = vld [vmem:[%s13312_s21 + $0x2f8] sm:$0xff] }
 0x3fa   : > { %16972 = vst [vmem:[#allocation76_spill] sm:$0xff] %v14194_v23  ;;  %v14230_v37 = vcombine.low %v2900_v5, %v2904_v55 }
 0x3fb   : > { %16974 = vst [vmem:[#allocation78_spill] sm:$0xff] %v14200_v35  ;;  %16975 = vst [vmem:[#allocation79_spill] sm:$0xff] %v14203_v27 }
 0x3fc   : > { %3676 = vmatpush1.bf16.msra.mxu0 %v14178_v40  ;;  %3717 = vmatpush1.bf16.msra.mxu1 %v14182_v34  ;;  %v2903_v40 = vld [vmem:[%s13312_s21 + $0x2f0] sm:$0xff]  ;;  %v14210_v34 = vcombine.low %v2891_v21, %v2895_v49  ;;  %v2908_v49 = vld [vmem:[%s13312_s21 + $0x318] sm:$0xff]  ;;  %16981 = vst [vmem:[#allocation85_spill] sm:$0xff] %v14230_v37 }
 0x3fd   : > { %3677 = vmatprep.subr.bf16.mxu0 %v14184_v56  ;;  %3718 = vmatprep.subr.bf16.mxu1 %v14187_v46  ;;  %v14216_v38 = vcombine.high %v2899_v22, %v2903_v40  ;;  %v14219_v46 = vcombine.high %v2900_v5, %v2904_v55  ;;  %v2907_v56 = vld [vmem:[%s13312_s21 + $0x310] sm:$0xff]  ;;  %v2912_v21 = vld [vmem:[%s13312_s21 + $0x338] sm:$0xff] }
 0x3fe   : > { %16976 = vst [vmem:[#allocation80_spill] sm:$0xff] %v14210_v34  ;;  %v14246_v5 = vcombine.low %v2908_v49, %v2912_v21 }
 0x3ff   : > { %16978 = vst [vmem:[#allocation82_spill] sm:$0xff] %v14216_v38  ;;  %16979 = vst [vmem:[#allocation83_spill] sm:$0xff] %v14219_v46 }
 0x400   : > { %3678 = vmatpush1.bf16.msra.mxu0 %v14194_v23  ;;  %3719 = vmatpush1.bf16.msra.mxu1 %v14198_v9  ;;  %v2911_v23 = vld [vmem:[%s13312_s21 + $0x330] sm:$0xff]  ;;  %v14226_v9 = vcombine.low %v2899_v22, %v2903_v40  ;;  %v2916_v40 = vld [vmem:[%s13312_s21 + $0x358] sm:$0xff] }
 0x401   : > { %3679 = vmatprep.subr.bf16.mxu0 %v14200_v35  ;;  %3720 = vmatprep.subr.bf16.mxu1 %v14203_v27  ;;  %v14232_v54 = vcombine.high %v2907_v56, %v2911_v23  ;;  %v14235_v27 = vcombine.high %v2908_v49, %v2912_v21  ;;  %v2915_v35 = vld [vmem:[%s13312_s21 + $0x350] sm:$0xff]  ;;  %v2920_v22 = vld [vmem:[%s13312_s21 + $0x378] sm:$0xff] }
 0x402   : > { %16980 = vst [vmem:[#allocation84_spill] sm:$0xff] %v14226_v9  ;;  %v14262_v49 = vcombine.low %v2916_v40, %v2920_v22 }
 0x403   : > { %16982 = vst [vmem:[#allocation86_spill] sm:$0xff] %v14232_v54  ;;  %16983 = vst [vmem:[#allocation87_spill] sm:$0xff] %v14235_v27 }
 0x404   : > { %3680 = vmatpush1.bf16.msra.mxu0 %v14210_v34  ;;  %3721 = vmatpush1.bf16.msra.mxu1 %v14214_v58  ;;  %v2919_v34 = vld [vmem:[%s13312_s21 + $0x370] sm:$0xff]  ;;  %v14242_v58 = vcombine.low %v2907_v56, %v2911_v23  ;;  %v2924_v23 = vld [vmem:[%s13312_s21 + $0x398] sm:$0xff] }
 0x405   : > { %3681 = vmatprep.subr.bf16.mxu0 %v14216_v38  ;;  %3722 = vmatprep.subr.bf16.mxu1 %v14219_v46  ;;  %v14248_v55 = vcombine.high %v2915_v35, %v2919_v34  ;;  %v14251_v46 = vcombine.high %v2916_v40, %v2920_v22  ;;  %v2923_v38 = vld [vmem:[%s13312_s21 + $0x390] sm:$0xff]  ;;  %v2928_v56 = vld [vmem:[%s13312_s21 + $0x3b8] sm:$0xff]  ;;  %v14283_v22 = vcombine.high %v2932_v31, %v2936_v11 }
 0x407   : > { %16984 = vst [vmem:[#allocation88_spill] sm:$0xff] %v14251_v46 }
 0x408   : > { %3682 = vmatpush1.bf16.msra.mxu0 %v14226_v9  ;;  %3723 = vmatpush1.bf16.msra.mxu1 %v14230_v37  ;;  %v2927_v9 = vld [vmem:[%s13312_s21 + $0x3b0] sm:$0xff]  ;;  %v14258_v37 = vcombine.low %v2915_v35, %v2919_v34  ;;  %v14278_v35 = vcombine.low %v2924_v23, %v2928_v56 }
 0x409   : > { %3683 = vmatprep.subr.bf16.mxu0 %v14232_v54  ;;  %3724 = vmatprep.subr.bf16.mxu1 %v14235_v27  ;;  %v14264_v21 = vcombine.high %v2923_v38, %v2927_v9  ;;  %v14267_v27 = vcombine.high %v2924_v23, %v2928_v56  ;;  %v2931_v54 = vld [vmem:[%s13312_s21 + $0x3d0] sm:$0xff]  ;;  %v14274_v34 = vcombine.low %v2923_v38, %v2927_v9  ;;  %v2805_v56 = vld [vmem:[#allocation3 + $0x20] sm:$0xff] }
 0x40a   : > { %v14280_v40 = vcombine.high %v2931_v54, %v2935_v53  ;;  %v14290_v9 = vcombine.low %v2932_v31, %v2936_v11 }
 0x40c   : > { %3684 = vmatpush1.bf16.msra.mxu0 %v14242_v58  ;;  %3725 = vmatpush1.bf16.msra.mxu1 %v14246_v5 }
 0x40d   : > { %3685 = vmatprep.subr.bf16.mxu0 %v14248_v55  ;;  %3726 = vmatprep.subr.bf16.mxu1 %v14251_v46  ;;  %v14286_v46 = vcombine.low %v2931_v54, %v2935_v53 }
 0x410   : > { %3686 = vmatpush1.bf16.msra.mxu0 %v14258_v37  ;;  %3727 = vmatpush1.bf16.msra.mxu1 %v14262_v49 }
 0x411   : > { %3687 = vmatprep.subr.bf16.mxu0 %v14264_v21  ;;  %3728 = vmatprep.subr.bf16.mxu1 %v14267_v27 }
 0x414   : > { %3688 = vmatpush1.bf16.msra.mxu0 %v14274_v34  ;;  %3729 = vmatpush1.bf16.msra.mxu1 %v14278_v35 }
 0x415   : > { %3689 = vmatprep.subr.bf16.mxu0 %v14280_v40  ;;  %3730 = vmatprep.subr.bf16.mxu1 %v14283_v22 }
 0x418   : > { %3690 = vmatpush1.bf16.msra.mxu0 %v14286_v46  ;;  %3731 = vmatpush1.bf16.msra.mxu1 %v14290_v9 }
 0x419   : > { %4577 = vmatprep.subr.bf16.mxu0 %v13780_v28  ;;  %4618 = vmatprep.subr.bf16.mxu1 %v13789_v33  ;;  %v16985_v28 = vld [vmem:[#allocation17_spill] sm:$0xff]  ;;  %v16987_v33 = vld [vmem:[#allocation19_spill] sm:$0xff] }
 0x41b   : > { %3692 = vmatmul.mubr.bf16.vlgmr.msra.gmra.mrb[4].mxu0 %v16939_v10  ;;  %3733 = vmatmul.mubr.bf16.vlgmr.msra.gmra.mrb[4].mxu1 %v16939_v10 }
 0x41c   : > { %4578 = vmatpush1.bf16.msra.mxu0 %v13783_v61  ;;  %4619 = vmatpush1.bf16.msra.mxu1 %v13791_v57  ;;  %v16986_v61 = vld [vmem:[#allocation18_spill] sm:$0xff]  ;;  %v16988_v57 = vld [vmem:[#allocation20_spill] sm:$0xff] }
 0x41d   : > { %4579 = vmatprep.subr.bf16.mxu0 %v13793_v36  ;;  %4620 = vmatprep.subr.bf16.mxu1 %v13799_v4  ;;  %v16989_v36 = vld [vmem:[#allocation21_spill] sm:$0xff]  ;;  %v16990_v4 = vld [vmem:[#allocation22_spill] sm:$0xff] }
 0x420   : > { %4580 = vmatpush1.bf16.msra.mxu0 %v13806_v20  ;;  %4621 = vmatpush1.bf16.msra.mxu1 %v13810_v41  ;;  %v16991_v20 = vld [vmem:[#allocation23_spill] sm:$0xff]  ;;  %v16992_v41 = vld [vmem:[#allocation24_spill] sm:$0xff] }
 0x421   : > { %4581 = vmatprep.subr.bf16.mxu0 %v13812_v42  ;;  %4622 = vmatprep.subr.bf16.mxu1 %v13815_v43  ;;  %v16993_v42 = vld [vmem:[#allocation25_spill] sm:$0xff]  ;;  %v16994_v43 = vld [vmem:[#allocation26_spill] sm:$0xff] }
 0x424   : > { %4582 = vmatpush1.bf16.msra.mxu0 %v13822_v47  ;;  %4623 = vmatpush1.bf16.msra.mxu1 %v13826_v50  ;;  %v16995_v47 = vld [vmem:[#allocation27_spill] sm:$0xff]  ;;  %v16996_v50 = vld [vmem:[#allocation28_spill] sm:$0xff] }
 0x425   : > { %4583 = vmatprep.subr.bf16.mxu0 %v13828_v51  ;;  %4624 = vmatprep.subr.bf16.mxu1 %v13831_v52  ;;  %v16997_v51 = vld [vmem:[#allocation29_spill] sm:$0xff]  ;;  %v16998_v52 = vld [vmem:[#allocation30_spill] sm:$0xff] }
 0x428   : > { %4584 = vmatpush1.bf16.msra.mxu0 %v13838_v60  ;;  %4625 = vmatpush1.bf16.msra.mxu1 %v13842_v62  ;;  %v16999_v60 = vld [vmem:[#allocation31_spill] sm:$0xff]  ;;  %v17000_v62 = vld [vmem:[#allocation32_spill] sm:$0xff] }
 0x429   : > { %4585 = vmatprep.subr.bf16.mxu0 %v13844_v63  ;;  %4626 = vmatprep.subr.bf16.mxu1 %v13847_v0  ;;  %v17001_v63 = vld [vmem:[#allocation33_spill] sm:$0xff]  ;;  %v17002_v0 = vld [vmem:[#allocation34_spill] sm:$0xff] }
 0x42c   : > { %4586 = vmatpush1.bf16.msra.mxu0 %v13854_v6  ;;  %4627 = vmatpush1.bf16.msra.mxu1 %v13858_v7  ;;  %v17003_v6 = vld [vmem:[#allocation35_spill] sm:$0xff]  ;;  %v17004_v7 = vld [vmem:[#allocation36_spill] sm:$0xff] }
 0x42d   : > { %4587 = vmatprep.subr.bf16.mxu0 %v13860_v48  ;;  %4628 = vmatprep.subr.bf16.mxu1 %v13863_v12  ;;  %v17005_v48 = vld [vmem:[#allocation37_spill] sm:$0xff]  ;;  %v17006_v12 = vld [vmem:[#allocation38_spill] sm:$0xff] }
 0x430   : > { %4588 = vmatpush1.bf16.msra.mxu0 %v13870_v15  ;;  %4629 = vmatpush1.bf16.msra.mxu1 %v13874_v16  ;;  %v17007_v15 = vld [vmem:[#allocation39_spill] sm:$0xff] }
 0x431   : > { %4589 = vmatprep.subr.bf16.mxu0 %v13876_v17  ;;  %4630 = vmatprep.subr.bf16.mxu1 %v13879_v18 }
 0x434   : > { %4590 = vmatpush1.bf16.msra.mxu0 %v13886_v32  ;;  %4631 = vmatpush1.bf16.msra.mxu1 %v13890_v24 }
 0x435   : > { %4591 = vmatprep.subr.bf16.mxu0 %v13892_v25  ;;  %4632 = vmatprep.subr.bf16.mxu1 %v13895_v26 }
 0x438   : > { %4592 = vmatpush1.bf16.msra.mxu0 %v13902_v13  ;;  %4633 = vmatpush1.bf16.msra.mxu1 %v13906_v29  ;;  %v2801_v29 = vld [vmem:[#allocation3] sm:$0xff] }
 0x439   : > { %4593 = vmatprep.subr.bf16.mxu0 %v13908_v30  ;;  %4634 = vmatprep.subr.bf16.mxu1 %v13911_v8  ;;  %v2803_v30 = vld [vmem:[#allocation3 + $0x10] sm:$0xff]  ;;  %v2802_v8 = vld [vmem:[#allocation3 + $0x8] sm:$0xff] }
 0x43c   : > { %4594 = vmatpush1.bf16.msra.mxu0 %v13918_v39  ;;  %4635 = vmatpush1.bf16.msra.mxu1 %v13922_v44  ;;  %v2804_v44 = vld [vmem:[#allocation3 + $0x18] sm:$0xff] }
 0x43d   : > { %4595 = vmatprep.subr.bf16.mxu0 %v13924_v45  ;;  %4636 = vmatprep.subr.bf16.mxu1 %v13927_v19 }
 0x440   : > { %4596 = vmatpush1.bf16.msra.mxu0 %v13934_v59  ;;  %4637 = vmatpush1.bf16.msra.mxu1 %v13938_v1 }
 0x441   : > { %4597 = vmatprep.subr.bf16.mxu0 %v13940_v2  ;;  %4638 = vmatprep.subr.bf16.mxu1 %v13943_v3 }
 0x444   : > { %4598 = vmatpush1.bf16.msra.mxu0 %v13950_v14  ;;  %4639 = vmatpush1.bf16.msra.mxu1 %v16985_v28 }
 0x445   : > { %4599 = vmatprep.subr.bf16.mxu0 %v16986_v61  ;;  %4640 = vmatprep.subr.bf16.mxu1 %v16987_v33  ;;  %v2807_v61 = vld [vmem:[#allocation3 + $0x30] sm:$0xff]  ;;  %v2806_v33 = vld [vmem:[#allocation3 + $0x28] sm:$0xff] }
 0x448   : > { %4600 = vmatpush1.bf16.msra.mxu0 %v16988_v57  ;;  %4641 = vmatpush1.bf16.msra.mxu1 %v16989_v36  ;;  %v2808_v36 = vld [vmem:[#allocation3 + $0x38] sm:$0xff] }
 0x449   : > { %4601 = vmatprep.subr.bf16.mxu0 %v16990_v4  ;;  %4642 = vmatprep.subr.bf16.mxu1 %v16991_v20 }
 0x44c   : > { %4602 = vmatpush1.bf16.msra.mxu0 %v16992_v41  ;;  %4643 = vmatpush1.bf16.msra.mxu1 %v16993_v42 }
 0x44d   : > { %4603 = vmatprep.subr.bf16.mxu0 %v16994_v43  ;;  %4644 = vmatprep.subr.bf16.mxu1 %v16995_v47 }
 0x450   : > { %4604 = vmatpush1.bf16.msra.mxu0 %v16996_v50  ;;  %4645 = vmatpush1.bf16.msra.mxu1 %v16997_v51 }
 0x451   : > { %4605 = vmatprep.subr.bf16.mxu0 %v16998_v52  ;;  %4646 = vmatprep.subr.bf16.mxu1 %v16999_v60 }
 0x454   : > { %4606 = vmatpush1.bf16.msra.mxu0 %v17000_v62  ;;  %4647 = vmatpush1.bf16.msra.mxu1 %v17001_v63 }
 0x455   : > { %4607 = vmatprep.subr.bf16.mxu0 %v17002_v0  ;;  %4648 = vmatprep.subr.bf16.mxu1 %v17003_v6 }
 0x458   : > { %4608 = vmatpush1.bf16.msra.mxu0 %v17004_v7  ;;  %4649 = vmatpush1.bf16.msra.mxu1 %v17005_v48 }
 0x459   : > { %4659 = vmatprep.subr.bf16.mxu0 %v17006_v12  ;;  %4700 = vmatprep.subr.bf16.mxu1 %v17007_v15 }
 0x4ae   : > { %v3611_v16 = vpop.f32.mrb[0].mxu0  ;;  %v3652_v17 = vpop.f32.mrb[0].mxu1 }
 0x4af   : > { %v3613_v18 = vpop.f32.mrb[1].mxu0  ;;  %v3654_v32 = vpop.f32.mrb[1].mxu1  ;;  %v3741_v39 = vadd.f32 %v3611_v16, %v2801_v29  ;;  %v3743_v45 = vadd.f32 %v3652_v17, %v2803_v30 }
 0x4b0   : > { %v3615_v24 = vpop.f32.mrb[2].mxu0  ;;  %v3656_v25 = vpop.f32.mrb[2].mxu1  ;;  %v3742_v19 = vadd.f32 %v3613_v18, %v2802_v8  ;;  %v3744_v59 = vadd.f32 %v3654_v32, %v2804_v44 }
 0x4b1   : > { %v3616_v26 = vpop.f32.mrb[3].mxu0  ;;  %v3657_v13 = vpop.f32.mrb[3].mxu1  ;;  %v11429_v1 = vmul.f32 -1.442695, %v3741_v39  ;;  %v11431_v2 = vmul.f32 -1.442695, %v3743_v45 }
 0x4b2   : > { %v11430_v3 = vmul.f32 -1.442695, %v3742_v19  ;;  %v11432_v14 = vmul.f32 -1.442695, %v3744_v59 }
 0x4b3   : > { %12547 = vpow2.f32 %v11429_v1 }
 0x4b4   : > { %12549 = vpow2.f32 %v11431_v2 }
 0x4b5   : > { %12551 = vpow2.f32 %v11430_v3 }
 0x4b6   : > { %12553 = vpow2.f32 %v11432_v14  ;;  %v17008_v14 = vld [vmem:[#allocation40_spill] sm:$0xff] }
 0x4bd   : > { %v12548_v11 = vpop.eup %12547 }
 0x4be   : > { %v12550_v31 = vpop.eup %12549  ;;  %v3767_v38 = vadd.f32 1.0, %v12548_v11  ;;  %v17009_v11 = vld [vmem:[#allocation41_spill] sm:$0xff] }
 0x4bf   : > { %v12552_v10 = vpop.eup %12551  ;;  %v3769_v54 = vadd.f32 1.0, %v12550_v31  ;;  %v17010_v31 = vld [vmem:[#allocation42_spill] sm:$0xff] }
 0x4c0   : > { %v12554_v53 = vpop.eup %12553  ;;  %v3768_v23 = vadd.f32 1.0, %v12552_v10  ;;  %12555 = vrcp.f32 %v3767_v38  ;;  %v17011_v10 = vld [vmem:[#allocation43_spill] sm:$0xff]  ;;  %v17013_v38 = vld [vmem:[#allocation45_spill] sm:$0xff] }
 0x4c1   : > { %v3770_v28 = vadd.f32 1.0, %v12554_v53  ;;  %12557 = vrcp.f32 %v3769_v54  ;;  %v17012_v53 = vld [vmem:[#allocation44_spill] sm:$0xff]  ;;  %v17014_v54 = vld [vmem:[#allocation46_spill] sm:$0xff] }
 0x4c2   : > { %12559 = vrcp.f32 %v3768_v23  ;;  %v17015_v23 = vld [vmem:[#allocation47_spill] sm:$0xff] }
 0x4c3   : > { %12561 = vrcp.f32 %v3770_v28  ;;  %v17017_v28 = vld [vmem:[#allocation49_spill] sm:$0xff] }
 0x4ca   : > { %v12556_v6 = vpop.eup %12555 }
 0x4cb   : > { %v12558_v7 = vpop.eup %12557 }
 0x4cc   : > { %v12560_v48 = vpop.eup %12559  ;;  %v3787_v17 = vmul.f32 0.0, %v12558_v7  ;;  %v17036_v7 = vld [vmem:[#allocation68_spill] sm:$0xff] }
 0x4cd   : > { %v12562_v12 = vpop.eup %12561 }
 0x4ce   : > { %v3788_v29 = vmul.f32 0.0, %v12562_v12  ;;  %v17038_v12 = vld [vmem:[#allocation70_spill] sm:$0xff] }
 0x4ee   : > { %v3693_v57 = vpop.f32.mrb[4].mxu0  ;;  %v3734_v20 = vpop.f32.mrb[4].mxu1 }
 0x4ef   : > { %v3745_v4 = vadd.f32 %v3693_v57, %v2805_v56  ;;  %v3695_v41 = vpop.f32.mrb[5].mxu0  ;;  %v3747_v42 = vadd.f32 %v3734_v20, %v2807_v61  ;;  %v3736_v47 = vpop.f32.mrb[5].mxu1  ;;  %v17016_v56 = vld [vmem:[#allocation48_spill] sm:$0xff]  ;;  %v17018_v61 = vld [vmem:[#allocation50_spill] sm:$0xff]  ;;  %v17023_v20 = vld [vmem:[#allocation55_spill] sm:$0xff] }
 0x4f0   : > { %v3746_v43 = vadd.f32 %v3695_v41, %v2806_v33  ;;  %v3697_v50 = vpop.f32.mrb[6].mxu0  ;;  %v3748_v52 = vadd.f32 %v3736_v47, %v2808_v36  ;;  %v3738_v60 = vpop.f32.mrb[6].mxu1  ;;  %v17019_v33 = vld [vmem:[#allocation51_spill] sm:$0xff]  ;;  %v17020_v57 = vld [vmem:[#allocation52_spill] sm:$0xff]  ;;  %v17021_v36 = vld [vmem:[#allocation53_spill] sm:$0xff] }
 0x4f1   : > { %v11433_v51 = vmul.f32 -1.442695, %v3745_v4  ;;  %v3698_v62 = vpop.f32.mrb[7].mxu0  ;;  %12563 = vtanh.f32 %v3747_v42  ;;  %v3739_v0 = vpop.f32.mrb[7].mxu1  ;;  %v17022_v4 = vld [vmem:[#allocation54_spill] sm:$0xff]  ;;  %v17024_v41 = vld [vmem:[#allocation56_spill] sm:$0xff] }
 0x4f2   : > { %v11434_v63 = vmul.f32 -1.442695, %v3746_v43  ;;  %v17025_v42 = vld [vmem:[#allocation57_spill] sm:$0xff]  ;;  %v17026_v43 = vld [vmem:[#allocation58_spill] sm:$0xff]  ;;  %v17027_v47 = vld [vmem:[#allocation59_spill] sm:$0xff] }
 0x4f3   : > { %12565 = vpow2.f32 %v11433_v51  ;;  %v17028_v50 = vld [vmem:[#allocation60_spill] sm:$0xff]  ;;  %v17029_v51 = vld [vmem:[#allocation61_spill] sm:$0xff]  ;;  %v17031_v60 = vld [vmem:[#allocation63_spill] sm:$0xff] }
 0x4f4   : > { %12567 = vpow2.f32 %v11434_v63  ;;  %v17032_v62 = vld [vmem:[#allocation64_spill] sm:$0xff]  ;;  %v17033_v63 = vld [vmem:[#allocation65_spill] sm:$0xff]  ;;  %v17034_v0 = vld [vmem:[#allocation66_spill] sm:$0xff] }
 0x4f5   : > { %12569 = vtanh.f32 %v3748_v52  ;;  %v17030_v52 = vld [vmem:[#allocation62_spill] sm:$0xff] }
 0x4fb   : > { %v12564_v15 = vpop.eup %12563 }
 0x4fc   : > { %v3789_v18 = vmul.f32 %v12564_v15, %v12556_v6  ;;  %v17035_v6 = vld [vmem:[#allocation67_spill] sm:$0xff] }
 0x4fd   : > { %v12566_v16 = vpop.eup %12565  ;;  %v17039_v15 = vld [vmem:[#allocation71_spill] sm:$0xff] }
 0x4fe   : > { %v12568_v32 = vpop.eup %12567  ;;  %v3771_v24 = vadd.f32 1.0, %v12566_v16  ;;  %v14363_v26 = vadd.f32 %v3789_v18, %v3787_v17  ;;  %v17040_v16 = vld [vmem:[#allocation72_spill] sm:$0xff]  ;;  %v17041_v17 = vld [vmem:[#allocation73_spill] sm:$0xff]  ;;  %v17042_v18 = vld [vmem:[#allocation74_spill] sm:$0xff] }
 0x4ff   : > { %v12570_v25 = vpop.eup %12569  ;;  %v3772_v13 = vadd.f32 1.0, %v12568_v32  ;;  %v17043_v32 = vld [vmem:[#allocation75_spill] sm:$0xff] }
 0x500   : > { %12571 = vrcp.f32 %v3771_v24  ;;  %v3790_v30 = vmul.f32 %v12570_v25, %v12560_v48  ;;  %v17037_v48 = vld [vmem:[#allocation69_spill] sm:$0xff]  ;;  %v17044_v24 = vld [vmem:[#allocation76_spill] sm:$0xff] }
 0x501   : > { %12573 = vtanh.f32 %v14363_v26  ;;  %v17045_v25 = vld [vmem:[#allocation77_spill] sm:$0xff] }
 0x502   : > { %12575 = vrcp.f32 %v3772_v13  ;;  %v14366_v8 = vadd.f32 %v3790_v30, %v3788_v29  ;;  %v17046_v13 = vld [vmem:[#allocation78_spill] sm:$0xff]  ;;  %v17047_v29 = vld [vmem:[#allocation79_spill] sm:$0xff]  ;;  %v17048_v30 = vld [vmem:[#allocation80_spill] sm:$0xff] }
 0x504   : > { %12577 = vtanh.f32 %v14366_v8 }
 0x50a   : > { %v12572_v39 = vpop.eup %12571 }
 0x50b   : > { %v12574_v44 = vpop.eup %12573 }
 0x50c   : > { %v12576_v45 = vpop.eup %12575  ;;  %v3795_v19 = vmul.f32 %v12574_v44, %v12572_v39  ;;  %v17049_v39 = vld [vmem:[#allocation81_spill] sm:$0xff]  ;;  %v17050_v44 = vld [vmem:[#allocation82_spill] sm:$0xff] }
 0x50e   : > { %v12578_v59 = vpop.eup %12577  ;;  %3797 = vst [vmem:[#allocation2] sm:$0xff] %v3795_v19  ;;  %v14369_v3 = vpack.c.bf16 %v3795_v19, %v3795_v19  ;;  %v17052_v19 = vld [vmem:[#allocation84_spill] sm:$0xff] }
 0x50f   : > { %v3796_v1 = vmul.f32 %v12578_v59, %v12576_v45  ;;  %v17051_v45 = vld [vmem:[#allocation83_spill] sm:$0xff]  ;;  %v17053_v59 = vld [vmem:[#allocation85_spill] sm:$0xff] }
 0x511   : > { %3798 = vst [vmem:[#allocation2 + $0x8] sm:$0xff] %v3796_v1  ;;  %v3808_v2 = vpack.c.bf16 %v3796_v1, %v3796_v1  ;;  %v17054_v1 = vld [vmem:[#allocation86_spill] sm:$0xff] }
 0x513   : > { %4609 = vmatprep.mubr.bf16.mxu0 %v3808_v2  ;;  %4650 = vmatprep.mubr.bf16.mxu1 %v3808_v2 }
 0x514   : > { %4610 = vmatmul.mubr.bf16.vlgmr.msra.gmra.mrb[8].mxu0 %v14369_v3  ;;  %4651 = vmatmul.mubr.bf16.vlgmr.msra.gmra.mrb[8].mxu1 %v14369_v3 }
 0x515   : > { %4660 = vmatpush1.bf16.msra.mxu0 %v17008_v14  ;;  %4701 = vmatpush1.bf16.msra.mxu1 %v17009_v11  ;;  %v17056_v14 = vld [vmem:[#allocation88_spill] sm:$0xff] }
 0x516   : > { %4691 = vmatprep.mubr.bf16.mxu0 %v3808_v2  ;;  %4732 = vmatprep.mubr.bf16.mxu1 %v3808_v2  ;;  %v17055_v2 = vld [vmem:[#allocation87_spill] sm:$0xff] }
 0x517   : > { %4661 = vmatprep.subr.bf16.mxu0 %v17010_v31  ;;  %4702 = vmatprep.subr.bf16.mxu1 %v17011_v10  ;;  %v4829_v31 = vld [vmem:[%s13312_s21 + $0xa0] sm:$0xff]  ;;  %v4826_v10 = vld [vmem:[%s13312_s21 + $0x88] sm:$0xff] }
 0x519   : > { %4662 = vmatpush1.bf16.msra.mxu0 %v17012_v53  ;;  %4703 = vmatpush1.bf16.msra.mxu1 %v17013_v38  ;;  %v4830_v53 = vld [vmem:[%s13312_s21 + $0xa8] sm:$0xff] }
 0x51a   : > { %4663 = vmatprep.subr.bf16.mxu0 %v17014_v54  ;;  %4704 = vmatprep.subr.bf16.mxu1 %v17015_v23 }
 0x51d   : > { %4664 = vmatpush1.bf16.msra.mxu0 %v17016_v56  ;;  %4705 = vmatpush1.bf16.msra.mxu1 %v17017_v28  ;;  %v14473_v56 = vcombine.high %v4826_v10, %v4830_v53  ;;  %v4833_v28 = vld [vmem:[%s13312_s21 + $0xc0] sm:$0xff] }
 0x51e   : > { %4665 = vmatprep.subr.bf16.mxu0 %v17018_v61  ;;  %4706 = vmatprep.subr.bf16.mxu1 %v17019_v33  ;;  %v4837_v61 = vld [vmem:[%s13312_s21 + $0xe0] sm:$0xff]  ;;  %v4834_v33 = vld [vmem:[%s13312_s21 + $0xc8] sm:$0xff] }
 0x521   : > { %4666 = vmatpush1.bf16.msra.mxu0 %v17020_v57  ;;  %4707 = vmatpush1.bf16.msra.mxu1 %v17021_v36  ;;  %v4838_v57 = vld [vmem:[%s13312_s21 + $0xe8] sm:$0xff] }
 0x522   : > { %4667 = vmatprep.subr.bf16.mxu0 %v17022_v4  ;;  %4708 = vmatprep.subr.bf16.mxu1 %v17023_v20  ;;  %v14484_v4 = vcombine.low %v4826_v10, %v4830_v53  ;;  %v14486_v20 = vcombine.high %v4833_v28, %v4837_v61  ;;  %v4881_v10 = vld [vmem:[%s13312_s21 + $0x240] sm:$0xff] }
 0x523   : > { %v4885_v53 = vld [vmem:[%s13312_s21 + $0x260] sm:$0xff] }
 0x525   : > { %4668 = vmatpush1.bf16.msra.mxu0 %v17024_v41  ;;  %4709 = vmatpush1.bf16.msra.mxu1 %v17025_v42  ;;  %v14489_v41 = vcombine.high %v4834_v33, %v4838_v57  ;;  %v4841_v42 = vld [vmem:[%s13312_s21 + $0x100] sm:$0xff] }
 0x526   : > { %4669 = vmatprep.subr.bf16.mxu0 %v17026_v43  ;;  %4710 = vmatprep.subr.bf16.mxu1 %v17027_v47  ;;  %v4845_v43 = vld [vmem:[%s13312_s21 + $0x120] sm:$0xff]  ;;  %v4842_v47 = vld [vmem:[%s13312_s21 + $0x108] sm:$0xff] }
 0x529   : > { %4670 = vmatpush1.bf16.msra.mxu0 %v17028_v50  ;;  %4711 = vmatpush1.bf16.msra.mxu1 %v17029_v51  ;;  %v4846_v50 = vld [vmem:[%s13312_s21 + $0x128] sm:$0xff]  ;;  %v14496_v51 = vcombine.low %v4833_v28, %v4837_v61  ;;  %v14583_v61 = vcombine.high %v4881_v10, %v4885_v53 }
 0x52a   : > { %4671 = vmatprep.subr.bf16.mxu0 %v17030_v52  ;;  %4712 = vmatprep.subr.bf16.mxu1 %v17031_v60  ;;  %v14500_v52 = vcombine.low %v4834_v33, %v4838_v57  ;;  %v14502_v60 = vcombine.high %v4841_v42, %v4845_v43  ;;  %v4882_v28 = vld [vmem:[%s13312_s21 + $0x248] sm:$0xff]  ;;  %v14587_v57 = vcombine.low %v4881_v10, %v4885_v53 }
 0x52b   : > { %v4886_v33 = vld [vmem:[%s13312_s21 + $0x268] sm:$0xff] }
 0x52c   : > { %17057 = vst [vmem:[#allocation17_spill] sm:$0xff] %v14587_v57  ;;  %v4906_v10 = vld [vmem:[%s13312_s21 + $0x308] sm:$0xff] }
 0x52d   : > { %4672 = vmatpush1.bf16.msra.mxu0 %v17032_v62  ;;  %4713 = vmatpush1.bf16.msra.mxu1 %v17033_v63  ;;  %v14505_v62 = vcombine.high %v4842_v47, %v4846_v50  ;;  %v4849_v63 = vld [vmem:[%s13312_s21 + $0x140] sm:$0xff] }
 0x52e   : > { %4673 = vmatprep.subr.bf16.mxu0 %v17034_v0  ;;  %4714 = vmatprep.subr.bf16.mxu1 %v17035_v6  ;;  %v4853_v0 = vld [vmem:[%s13312_s21 + $0x160] sm:$0xff]  ;;  %v4850_v6 = vld [vmem:[%s13312_s21 + $0x148] sm:$0xff] }
 0x531   : > { %4674 = vmatpush1.bf16.msra.mxu0 %v17036_v7  ;;  %4715 = vmatpush1.bf16.msra.mxu1 %v17037_v48  ;;  %v4854_v7 = vld [vmem:[%s13312_s21 + $0x168] sm:$0xff]  ;;  %v14512_v48 = vcombine.low %v4841_v42, %v4845_v43  ;;  %v14589_v42 = vcombine.low %v4882_v28, %v4886_v33  ;;  %v14591_v43 = vcombine.high %v4882_v28, %v4886_v33 }
 0x532   : > { %4675 = vmatprep.subr.bf16.mxu0 %v17038_v12  ;;  %4716 = vmatprep.subr.bf16.mxu1 %v17039_v15  ;;  %v14516_v12 = vcombine.low %v4842_v47, %v4846_v50  ;;  %v14518_v15 = vcombine.high %v4849_v63, %v4853_v0  ;;  %v4889_v47 = vld [vmem:[%s13312_s21 + $0x280] sm:$0xff]  ;;  %v4910_v28 = vld [vmem:[%s13312_s21 + $0x328] sm:$0xff] }
 0x533   : > { %17058 = vst [vmem:[#allocation18_spill] sm:$0xff] %v14589_v42  ;;  %17059 = vst [vmem:[#allocation19_spill] sm:$0xff] %v14591_v43  ;;  %v4893_v50 = vld [vmem:[%s13312_s21 + $0x2a0] sm:$0xff] }
 0x535   : > { %4676 = vmatpush1.bf16.msra.mxu0 %v17040_v16  ;;  %4717 = vmatpush1.bf16.msra.mxu1 %v17041_v17  ;;  %v14521_v16 = vcombine.high %v4850_v6, %v4854_v7  ;;  %v4857_v17 = vld [vmem:[%s13312_s21 + $0x180] sm:$0xff] }
 0x536   : > { %4677 = vmatprep.subr.bf16.mxu0 %v17042_v18  ;;  %4718 = vmatprep.subr.bf16.mxu1 %v17043_v32  ;;  %v4861_v18 = vld [vmem:[%s13312_s21 + $0x1a0] sm:$0xff]  ;;  %v4858_v32 = vld [vmem:[%s13312_s21 + $0x188] sm:$0xff] }
 0x539   : > { %4678 = vmatpush1.bf16.msra.mxu0 %v17044_v24  ;;  %4719 = vmatpush1.bf16.msra.mxu1 %v17045_v25  ;;  %v4862_v24 = vld [vmem:[%s13312_s21 + $0x1a8] sm:$0xff]  ;;  %v14528_v25 = vcombine.low %v4849_v63, %v4853_v0  ;;  %v14599_v0 = vcombine.high %v4889_v47, %v4893_v50 }
 0x53a   : > { %4679 = vmatprep.subr.bf16.mxu0 %v17046_v13  ;;  %4720 = vmatprep.subr.bf16.mxu1 %v17047_v29  ;;  %v14532_v13 = vcombine.low %v4850_v6, %v4854_v7  ;;  %v14534_v29 = vcombine.high %v4857_v17, %v4861_v18  ;;  %v4890_v63 = vld [vmem:[%s13312_s21 + $0x288] sm:$0xff]  ;;  %v14603_v7 = vcombine.low %v4889_v47, %v4893_v50 }
 0x53b   : > { %17060 = vst [vmem:[#allocation20_spill] sm:$0xff] %v14599_v0  ;;  %v4894_v6 = vld [vmem:[%s13312_s21 + $0x2a8] sm:$0xff]  ;;  %v14637_v47 = vcombine.low %v4906_v10, %v4910_v28  ;;  %v14639_v50 = vcombine.high %v4906_v10, %v4910_v28 }
 0x53c   : > { %17061 = vst [vmem:[#allocation21_spill] sm:$0xff] %v14603_v7 }
 0x53d   : > { %4680 = vmatpush1.bf16.msra.mxu0 %v17048_v30  ;;  %4721 = vmatpush1.bf16.msra.mxu1 %v17049_v39  ;;  %v14537_v30 = vcombine.high %v4858_v32, %v4862_v24  ;;  %v4865_v39 = vld [vmem:[%s13312_s21 + $0x1c0] sm:$0xff]  ;;  %17070 = vst [vmem:[#allocation30_spill] sm:$0xff] %v14637_v47  ;;  %17071 = vst [vmem:[#allocation31_spill] sm:$0xff] %v14639_v50 }
 0x53e   : > { %4681 = vmatprep.subr.bf16.mxu0 %v17050_v44  ;;  %4722 = vmatprep.subr.bf16.mxu1 %v17051_v45  ;;  %v4869_v44 = vld [vmem:[%s13312_s21 + $0x1e0] sm:$0xff]  ;;  %v4866_v45 = vld [vmem:[%s13312_s21 + $0x1c8] sm:$0xff] }
 0x541   : > { %4682 = vmatpush1.bf16.msra.mxu0 %v17052_v19  ;;  %4723 = vmatpush1.bf16.msra.mxu1 %v17053_v59  ;;  %v4870_v19 = vld [vmem:[%s13312_s21 + $0x1e8] sm:$0xff]  ;;  %v14544_v59 = vcombine.low %v4857_v17, %v4861_v18  ;;  %v14605_v17 = vcombine.low %v4890_v63, %v4894_v6  ;;  %v14607_v18 = vcombine.high %v4890_v63, %v4894_v6  ;;  %v4913_v63 = vld [vmem:[%s13312_s21 + $0x340] sm:$0xff] }
 0x542   : > { %4683 = vmatprep.subr.bf16.mxu0 %v17054_v1  ;;  %4724 = vmatprep.subr.bf16.mxu1 %v17055_v2  ;;  %v14548_v1 = vcombine.low %v4858_v32, %v4862_v24  ;;  %v14550_v2 = vcombine.high %v4865_v39, %v4869_v44  ;;  %v4897_v32 = vld [vmem:[%s13312_s21 + $0x2c0] sm:$0xff] }
 0x543   : > { %17062 = vst [vmem:[#allocation22_spill] sm:$0xff] %v14605_v17  ;;  %17063 = vst [vmem:[#allocation23_spill] sm:$0xff] %v14607_v18  ;;  %v4901_v24 = vld [vmem:[%s13312_s21 + $0x2e0] sm:$0xff] }
 0x544   : > { %v4917_v6 = vld [vmem:[%s13312_s21 + $0x360] sm:$0xff] }
 0x545   : > { %4684 = vmatpush1.bf16.msra.mxu0 %v14242_v58  ;;  %4725 = vmatpush1.bf16.msra.mxu1 %v14246_v5  ;;  %v4813_v58 = vld [vmem:[%s13312_s21 + $0x20] sm:$0xff] }
 0x546   : > { %4685 = vmatprep.subr.bf16.mxu0 %v14248_v55  ;;  %4726 = vmatprep.subr.bf16.mxu1 %v17056_v14  ;;  %v14553_v14 = vcombine.high %v4866_v45, %v4870_v19 }
 0x549   : > { %4686 = vmatpush1.bf16.msra.mxu0 %v14258_v37  ;;  %4727 = vmatpush1.bf16.msra.mxu1 %v14262_v49  ;;  %v4810_v37 = vld [vmem:[%s13312_s21 + $0x8] sm:$0xff] }
 0x54a   : > { %4687 = vmatprep.subr.bf16.mxu0 %v14264_v21  ;;  %4728 = vmatprep.subr.bf16.mxu1 %v14267_v27  ;;  %v4809_v27 = vld [vmem:[%s13312_s21] sm:$0xff]  ;;  %v4814_v49 = vld [vmem:[%s13312_s21 + $0x28] sm:$0xff] }
 0x54b   : > { %v14440_v5 = vcombine.low %v4809_v27, %v4813_v58  ;;  %v14442_v55 = vcombine.high %v4809_v27, %v4813_v58  ;;  %v4821_v21 = vld [vmem:[%s13312_s21 + $0x60] sm:$0xff]  ;;  %v14556_v27 = vcombine.low %v4865_v39, %v4869_v44  ;;  %v14560_v58 = vcombine.low %v4866_v45, %v4870_v19  ;;  %v4898_v39 = vld [vmem:[%s13312_s21 + $0x2c8] sm:$0xff] }
 0x54c   : > { %v14615_v44 = vcombine.high %v4897_v32, %v4901_v24  ;;  %v4902_v45 = vld [vmem:[%s13312_s21 + $0x2e8] sm:$0xff]  ;;  %v14619_v19 = vcombine.low %v4897_v32, %v4901_v24  ;;  %v14647_v24 = vcombine.low %v4913_v63, %v4917_v6 }
 0x54d   : > { %4688 = vmatpush1.bf16.msra.mxu0 %v14274_v34  ;;  %4729 = vmatpush1.bf16.msra.mxu1 %v14278_v35  ;;  %v14447_v34 = vcombine.low %v4810_v37, %v4814_v49  ;;  %v14449_v35 = vcombine.high %v4810_v37, %v4814_v49  ;;  %v4873_v37 = vld [vmem:[%s13312_s21 + $0x200] sm:$0xff]  ;;  %v4914_v32 = vld [vmem:[%s13312_s21 + $0x348] sm:$0xff] }
 0x54e   : > { %4689 = vmatprep.subr.bf16.mxu0 %v14280_v40  ;;  %4730 = vmatprep.subr.bf16.mxu1 %v14283_v22  ;;  %v4818_v22 = vld [vmem:[%s13312_s21 + $0x48] sm:$0xff]  ;;  %v4877_v49 = vld [vmem:[%s13312_s21 + $0x220] sm:$0xff]  ;;  %17064 = vst [vmem:[#allocation24_spill] sm:$0xff] %v14615_v44  ;;  %17065 = vst [vmem:[#allocation25_spill] sm:$0xff] %v14619_v19 }
 0x54f   : > { %17072 = vst [vmem:[#allocation32_spill] sm:$0xff] %v14647_v24 }
 0x551   : > { %4690 = vmatpush1.bf16.msra.mxu0 %v14286_v46  ;;  %4731 = vmatpush1.bf16.msra.mxu1 %v14290_v9  ;;  %v4817_v46 = vld [vmem:[%s13312_s21 + $0x40] sm:$0xff]  ;;  %v4822_v9 = vld [vmem:[%s13312_s21 + $0x68] sm:$0xff] }
 0x552   : > { %v14451_v40 = vcombine.high %v4817_v46, %v4821_v21  ;;  %5577 = vmatprep.subr.bf16.mxu0 %v14442_v55  ;;  %v14457_v11 = vcombine.high %v4818_v22, %v4822_v9  ;;  %5618 = vmatprep.subr.bf16.mxu1 %v14449_v35  ;;  %v14464_v38 = vcombine.low %v4817_v46, %v4821_v21  ;;  %v4874_v21 = vld [vmem:[%s13312_s21 + $0x208] sm:$0xff] }
 0x553   : > { %v14468_v54 = vcombine.low %v4818_v22, %v4822_v9  ;;  %v14567_v46 = vcombine.high %v4873_v37, %v4877_v49  ;;  %v14570_v22 = vcombine.low %v4873_v37, %v4877_v49  ;;  %v4878_v9 = vld [vmem:[%s13312_s21 + $0x228] sm:$0xff]  ;;  %v14621_v37 = vcombine.low %v4898_v39, %v4902_v45 }
 0x554   : > { %4692 = vmatmul.mubr.bf16.vlgmr.msra.gmra.mrb[12].mxu0 %v14369_v3  ;;  %4733 = vmatmul.mubr.bf16.vlgmr.msra.gmra.mrb[12].mxu1 %v14369_v3  ;;  %v4825_v3 = vld [vmem:[%s13312_s21 + $0x80] sm:$0xff]  ;;  %v14623_v49 = vcombine.high %v4898_v39, %v4902_v45  ;;  %v14649_v39 = vcombine.high %v4913_v63, %v4917_v6  ;;  %v4918_v45 = vld [vmem:[%s13312_s21 + $0x368] sm:$0xff] }
 0x555   : > { %5578 = vmatpush1.bf16.msra.mxu0 %v14440_v5  ;;  %5619 = vmatpush1.bf16.msra.mxu1 %v14447_v34  ;;  %v14470_v23 = vcombine.high %v4825_v3, %v4829_v31  ;;  %v14480_v36 = vcombine.low %v4825_v3, %v4829_v31  ;;  %v14574_v3 = vcombine.low %v4874_v21, %v4878_v9  ;;  %v4933_v6 = vld [vmem:[%s13312_s21 + $0x3e0] sm:$0xff] }
 0x556   : > { %5579 = vmatprep.subr.bf16.mxu0 %v14451_v40  ;;  %5620 = vmatprep.subr.bf16.mxu1 %v14457_v11  ;;  %v14576_v31 = vcombine.high %v4874_v21, %v4878_v9  ;;  %17066 = vst [vmem:[#allocation26_spill] sm:$0xff] %v14621_v37  ;;  %17067 = vst [vmem:[#allocation27_spill] sm:$0xff] %v14623_v49  ;;  %v4905_v21 = vld [vmem:[%s13312_s21 + $0x300] sm:$0xff]  ;;  %v14655_v10 = vcombine.low %v4914_v32, %v4918_v45 }
 0x557   : > { %v4909_v9 = vld [vmem:[%s13312_s21 + $0x320] sm:$0xff]  ;;  %17073 = vst [vmem:[#allocation33_spill] sm:$0xff] %v14649_v39  ;;  %v14657_v28 = vcombine.high %v4914_v32, %v4918_v45  ;;  %v4934_v32 = vld [vmem:[%s13312_s21 + $0x3e8] sm:$0xff] }
 0x558   : > { %v14631_v53 = vcombine.high %v4905_v21, %v4909_v9  ;;  %v14635_v33 = vcombine.low %v4905_v21, %v4909_v9  ;;  %v4921_v21 = vld [vmem:[%s13312_s21 + $0x380] sm:$0xff]  ;;  %17074 = vst [vmem:[#allocation34_spill] sm:$0xff] %v14655_v10 }
 0x559   : > { %5580 = vmatpush1.bf16.msra.mxu0 %v14464_v38  ;;  %5621 = vmatpush1.bf16.msra.mxu1 %v14468_v54  ;;  %v4925_v9 = vld [vmem:[%s13312_s21 + $0x3a0] sm:$0xff]  ;;  %17075 = vst [vmem:[#allocation35_spill] sm:$0xff] %v14657_v28 }
 0x55a   : > { %5581 = vmatprep.subr.bf16.mxu0 %v14470_v23  ;;  %5622 = vmatprep.subr.bf16.mxu1 %v14473_v56  ;;  %17068 = vst [vmem:[#allocation28_spill] sm:$0xff] %v14631_v53  ;;  %17069 = vst [vmem:[#allocation29_spill] sm:$0xff] %v14635_v33 }
 0x55d   : > { %5582 = vmatpush1.bf16.msra.mxu0 %v14480_v36  ;;  %5623 = vmatpush1.bf16.msra.mxu1 %v14484_v4 }
 0x55e   : > { %5583 = vmatprep.subr.bf16.mxu0 %v14486_v20  ;;  %5624 = vmatprep.subr.bf16.mxu1 %v14489_v41 }
 0x561   : > { %5584 = vmatpush1.bf16.msra.mxu0 %v14496_v51  ;;  %5625 = vmatpush1.bf16.msra.mxu1 %v14500_v52 }
 0x562   : > { %5585 = vmatprep.subr.bf16.mxu0 %v14502_v60  ;;  %5626 = vmatprep.subr.bf16.mxu1 %v14505_v62 }
 0x565   : > { %5586 = vmatpush1.bf16.msra.mxu0 %v14512_v48  ;;  %5627 = vmatpush1.bf16.msra.mxu1 %v14516_v12 }
 0x566   : > { %5587 = vmatprep.subr.bf16.mxu0 %v14518_v15  ;;  %5628 = vmatprep.subr.bf16.mxu1 %v14521_v16 }
 0x569   : > { %5588 = vmatpush1.bf16.msra.mxu0 %v14528_v25  ;;  %5629 = vmatpush1.bf16.msra.mxu1 %v14532_v13 }
 0x56a   : > { %5589 = vmatprep.subr.bf16.mxu0 %v14534_v29  ;;  %5630 = vmatprep.subr.bf16.mxu1 %v14537_v30 }
 0x56d   : > { %5590 = vmatpush1.bf16.msra.mxu0 %v14544_v59  ;;  %5631 = vmatpush1.bf16.msra.mxu1 %v14548_v1 }
 0x56e   : > { %5591 = vmatprep.subr.bf16.mxu0 %v14550_v2  ;;  %5632 = vmatprep.subr.bf16.mxu1 %v14553_v14 }
 0x571   : > { %5592 = vmatpush1.bf16.msra.mxu0 %v14556_v27  ;;  %5633 = vmatpush1.bf16.msra.mxu1 %v14560_v58 }
 0x572   : > { %5593 = vmatprep.subr.bf16.mxu0 %v14567_v46  ;;  %5634 = vmatprep.subr.bf16.mxu1 %v14576_v31 }
 0x575   : > { %5594 = vmatpush1.bf16.msra.mxu0 %v14570_v22  ;;  %5635 = vmatpush1.bf16.msra.mxu1 %v14574_v3 }
 0x576   : > { %5595 = vmatprep.subr.bf16.mxu0 %v14583_v61  ;;  %5636 = vmatprep.subr.bf16.mxu1 %v14591_v43 }
 0x579   : > { %5596 = vmatpush1.bf16.msra.mxu0 %v14587_v57  ;;  %5637 = vmatpush1.bf16.msra.mxu1 %v14589_v42 }
 0x57a   : > { %5597 = vmatprep.subr.bf16.mxu0 %v14599_v0  ;;  %5638 = vmatprep.subr.bf16.mxu1 %v14607_v18 }
 0x57d   : > { %5598 = vmatpush1.bf16.msra.mxu0 %v14603_v7  ;;  %5639 = vmatpush1.bf16.msra.mxu1 %v14605_v17  ;;  %v3802_v17 = vld [vmem:[#allocation3 + $0x58] sm:$0xff] }
 0x57e   : > { %5599 = vmatprep.subr.bf16.mxu0 %v14615_v44  ;;  %5640 = vmatprep.subr.bf16.mxu1 %v14623_v49  ;;  %v3799_v44 = vld [vmem:[#allocation3 + $0x40] sm:$0xff] }
 0x581   : > { %5600 = vmatpush1.bf16.msra.mxu0 %v14619_v19  ;;  %5641 = vmatpush1.bf16.msra.mxu1 %v14621_v37  ;;  %v4929_v37 = vld [vmem:[%s13312_s21 + $0x3c0] sm:$0xff]  ;;  %v14670_v19 = vcombine.low %v4921_v21, %v4925_v9 }
 0x582   : > { %5601 = vmatprep.subr.bf16.mxu0 %v14631_v53  ;;  %5642 = vmatprep.subr.bf16.mxu1 %v14639_v50  ;;  %v4922_v50 = vld [vmem:[%s13312_s21 + $0x388] sm:$0xff]  ;;  %v14675_v45 = vcombine.high %v4929_v37, %v4933_v6 }
 0x583   : > { %v4926_v53 = vld [vmem:[%s13312_s21 + $0x3a8] sm:$0xff]  ;;  %17078 = vst [vmem:[#allocation38_spill] sm:$0xff] %v14670_v19 }
 0x584   : > { %v14665_v63 = vcombine.high %v4922_v50, %v4926_v53  ;;  %17079 = vst [vmem:[#allocation39_spill] sm:$0xff] %v14675_v45 }
 0x585   : > { %5602 = vmatpush1.bf16.msra.mxu0 %v14635_v33  ;;  %5643 = vmatpush1.bf16.msra.mxu1 %v14637_v47  ;;  %v14659_v33 = vcombine.high %v4921_v21, %v4925_v9  ;;  %v4930_v47 = vld [vmem:[%s13312_s21 + $0x3c8] sm:$0xff]  ;;  %v14684_v21 = vcombine.low %v4929_v37, %v4933_v6 }
 0x586   : > { %5603 = vmatprep.subr.bf16.mxu0 %v14649_v39  ;;  %17077 = vst [vmem:[#allocation37_spill] sm:$0xff] %v14665_v63  ;;  %5644 = vmatprep.subr.bf16.mxu1 %v14657_v28  ;;  %v14678_v39 = vcombine.low %v4922_v50, %v4926_v53  ;;  %v14681_v28 = vcombine.high %v4930_v47, %v4934_v32  ;;  %v4811_v53 = vld [vmem:[%s13312_s21 + $0x10] sm:$0xff] }
 0x587   : > { %17076 = vst [vmem:[#allocation36_spill] sm:$0xff] %v14659_v33  ;;  %17082 = vst [vmem:[#allocation42_spill] sm:$0xff] %v14684_v21  ;;  %v14688_v9 = vcombine.low %v4930_v47, %v4934_v32  ;;  %v4815_v50 = vld [vmem:[%s13312_s21 + $0x30] sm:$0xff] }
 0x588   : > { %17080 = vst [vmem:[#allocation40_spill] sm:$0xff] %v14678_v39  ;;  %17081 = vst [vmem:[#allocation41_spill] sm:$0xff] %v14681_v28  ;;  %v14699_v37 = vcombine.low %v4811_v53, %v4815_v50 }
 0x589   : > { %5604 = vmatpush1.bf16.msra.mxu0 %v14647_v24  ;;  %5645 = vmatpush1.bf16.msra.mxu1 %v14655_v10  ;;  %17083 = vst [vmem:[#allocation43_spill] sm:$0xff] %v14688_v9  ;;  %v4816_v10 = vld [vmem:[%s13312_s21 + $0x38] sm:$0xff] }
 0x58a   : > { %5605 = vmatprep.subr.bf16.mxu0 %v14659_v33  ;;  %5646 = vmatprep.subr.bf16.mxu1 %v14665_v63  ;;  %v4812_v33 = vld [vmem:[%s13312_s21 + $0x18] sm:$0xff]  ;;  %v14695_v63 = vcombine.high %v4811_v53, %v4815_v50  ;;  %v3800_v53 = vld [vmem:[#allocation3 + $0x48] sm:$0xff] }
 0x58b   : > { %v14701_v6 = vcombine.low %v4812_v33, %v4816_v10 }
 0x58c   : > { %17084 = vst [vmem:[#allocation44_spill] sm:$0xff] %v14695_v63 }
 0x58d   : > { %5606 = vmatpush1.bf16.msra.mxu0 %v14670_v19  ;;  %5647 = vmatpush1.bf16.msra.mxu1 %v14678_v39 }
 0x58e   : > { %5607 = vmatprep.subr.bf16.mxu0 %v14675_v45  ;;  %5648 = vmatprep.subr.bf16.mxu1 %v14681_v28  ;;  %v14703_v45 = vcombine.high %v4812_v33, %v4816_v10 }
 0x590   : > { %17085 = vst [vmem:[#allocation45_spill] sm:$0xff] %v14703_v45 }
 0x591   : > { %5608 = vmatpush1.bf16.msra.mxu0 %v14684_v21  ;;  %5649 = vmatpush1.bf16.msra.mxu1 %v14688_v9  ;;  %v3801_v9 = vld [vmem:[#allocation3 + $0x50] sm:$0xff] }
 0x592   : > { %5659 = vmatprep.subr.bf16.mxu0 %v14695_v63  ;;  %5700 = vmatprep.subr.bf16.mxu1 %v14703_v45 }
 0x5e7   : > { %v4611_v47 = vpop.f32.mrb[8].mxu0  ;;  %v4652_v32 = vpop.f32.mrb[8].mxu1 }
 0x5e8   : > { %v4613_v21 = vpop.f32.mrb[9].mxu0  ;;  %v4654_v28 = vpop.f32.mrb[9].mxu1  ;;  %v4741_v50 = vadd.f32 %v4611_v47, %v3799_v44  ;;  %v4743_v7 = vadd.f32 %v4652_v32, %v3801_v9  ;;  %v3803_v47 = vld [vmem:[#allocation3 + $0x60] sm:$0xff]  ;;  %v3805_v9 = vld [vmem:[#allocation3 + $0x70] sm:$0xff] }
 0x5e9   : > { %v4615_v39 = vpop.f32.mrb[10].mxu0  ;;  %v4656_v19 = vpop.f32.mrb[10].mxu1  ;;  %v4742_v33 = vadd.f32 %v4613_v21, %v3800_v53  ;;  %v4744_v10 = vadd.f32 %v4654_v28, %v3802_v17  ;;  %v3804_v17 = vld [vmem:[#allocation3 + $0x68] sm:$0xff]  ;;  %v3806_v28 = vld [vmem:[#allocation3 + $0x78] sm:$0xff] }
 0x5ea   : > { %v4616_v24 = vpop.f32.mrb[11].mxu0  ;;  %v4657_v49 = vpop.f32.mrb[11].mxu1  ;;  %v11563_v18 = vmul.f32 -1.442695, %v4741_v50  ;;  %v11565_v63 = vmul.f32 -1.442695, %v4743_v7 }
 0x5eb   : > { %v11564_v0 = vmul.f32 -1.442695, %v4742_v33  ;;  %v11566_v45 = vmul.f32 -1.442695, %v4744_v10 }
 0x5ec   : > { %12579 = vpow2.f32 %v11563_v18 }
 0x5ed   : > { %12581 = vpow2.f32 %v11565_v63 }
 0x5ee   : > { %12583 = vpow2.f32 %v11564_v0 }
 0x5ef   : > { %12585 = vpow2.f32 %v11566_v45 }
 0x5f6   : > { %v12580_v39 = vpop.eup %12579 }
 0x5f7   : > { %v12582_v19 = vpop.eup %12581  ;;  %v4767_v42 = vadd.f32 1.0, %v12580_v39 }
 0x5f8   : > { %v12584_v24 = vpop.eup %12583  ;;  %v4769_v57 = vadd.f32 1.0, %v12582_v19 }
 0x5f9   : > { %v12586_v49 = vpop.eup %12585  ;;  %v4768_v43 = vadd.f32 1.0, %v12584_v24  ;;  %12587 = vrcp.f32 %v4767_v42 }
 0x5fa   : > { %v4770_v44 = vadd.f32 1.0, %v12586_v49  ;;  %12589 = vrcp.f32 %v4769_v57 }
 0x5fb   : > { %12591 = vrcp.f32 %v4768_v43 }
 0x5fc   : > { %12593 = vrcp.f32 %v4770_v44 }
 0x603   : > { %v12588_v57 = vpop.eup %12587 }
 0x604   : > { %v12590_v24 = vpop.eup %12589 }
 0x605   : > { %v12592_v43 = vpop.eup %12591  ;;  %v4787_v44 = vmul.f32 %v12590_v24, %v14363_v26 }
 0x606   : > { %v12594_v49 = vpop.eup %12593 }
 0x627   : > { %v4693_v7 = vpop.f32.mrb[12].mxu0  ;;  %v4734_v21 = vpop.f32.mrb[12].mxu1 }
 0x628   : > { %v4745_v18 = vadd.f32 %v4693_v7, %v3803_v47  ;;  %v4747_v0 = vadd.f32 %v4734_v21, %v3805_v9  ;;  %v4695_v63 = vpop.f32.mrb[13].mxu0  ;;  %v4736_v45 = vpop.f32.mrb[13].mxu1  ;;  %v4788_v7 = vmul.f32 %v12594_v49, %v14366_v8  ;;  %v4827_v49 = vld [vmem:[%s13312_s21 + $0x90] sm:$0xff] }
 0x629   : > { %v4746_v32 = vadd.f32 %v4695_v63, %v3804_v17  ;;  %v4748_v53 = vadd.f32 %v4736_v45, %v3806_v28  ;;  %v4697_v50 = vpop.f32.mrb[14].mxu0  ;;  %v4738_v33 = vpop.f32.mrb[14].mxu1 }
 0x62a   : > { %v11567_v10 = vmul.f32 -1.442695, %v4745_v18  ;;  %12595 = vtanh.f32 %v4747_v0  ;;  %v4698_v39 = vpop.f32.mrb[15].mxu0  ;;  %v4739_v19 = vpop.f32.mrb[15].mxu1 }
 0x62b   : > { %v11568_v42 = vmul.f32 -1.442695, %v4746_v32  ;;  %12597 = vtanh.f32 %v4748_v53  ;;  %v4819_v39 = vld [vmem:[%s13312_s21 + $0x50] sm:$0xff] }
 0x62c   : > { %12599 = vpow2.f32 %v11567_v10  ;;  %v4823_v19 = vld [vmem:[%s13312_s21 + $0x70] sm:$0xff] }
 0x62d   : > { %12601 = vpow2.f32 %v11568_v42  ;;  %v4820_v42 = vld [vmem:[%s13312_s21 + $0x58] sm:$0xff] }
 0x634   : > { %v12596_v47 = vpop.eup %12595 }
 0x635   : > { %v12598_v9 = vpop.eup %12597  ;;  %v4789_v17 = vmul.f32 %v12596_v47, %v12588_v57  ;;  %v4824_v57 = vld [vmem:[%s13312_s21 + $0x78] sm:$0xff]  ;;  %v14722_v47 = vcombine.high %v4819_v39, %v4823_v19 }
 0x636   : > { %v12600_v28 = vpop.eup %12599  ;;  %v4790_v21 = vmul.f32 %v12598_v9, %v12592_v43  ;;  %v14724_v9 = vcombine.high %v4820_v42, %v4824_v57 }
 0x637   : > { %v12602_v18 = vpop.eup %12601  ;;  %v4771_v0 = vadd.f32 1.0, %v12600_v28  ;;  %v14709_v63 = vadd.f32 %v4789_v17, %v4787_v44  ;;  %v4831_v44 = vld [vmem:[%s13312_s21 + $0xb0] sm:$0xff]  ;;  %v4828_v17 = vld [vmem:[%s13312_s21 + $0x98] sm:$0xff] }
 0x638   : > { %v4772_v45 = vadd.f32 1.0, %v12602_v18  ;;  %v14711_v32 = vadd.f32 %v4790_v21, %v4788_v7  ;;  %v4832_v28 = vld [vmem:[%s13312_s21 + $0xb8] sm:$0xff]  ;;  %v14733_v7 = vcombine.low %v4819_v39, %v4823_v19  ;;  %v14735_v21 = vcombine.low %v4820_v42, %v4824_v57  ;;  %v4843_v19 = vld [vmem:[%s13312_s21 + $0x110] sm:$0xff] }
 0x639   : > { %12603 = vrcp.f32 %v4771_v0  ;;  %v14737_v18 = vcombine.high %v4827_v49, %v4831_v44  ;;  %v14739_v0 = vcombine.high %v4828_v17, %v4832_v28  ;;  %v4847_v42 = vld [vmem:[%s13312_s21 + $0x130] sm:$0xff]  ;;  %v4844_v57 = vld [vmem:[%s13312_s21 + $0x118] sm:$0xff] }
 0x63a   : > { %12605 = vtanh.f32 %v14709_v63  ;;  %17086 = vst [vmem:[#allocation46_spill] sm:$0xff] %v14733_v7  ;;  %17087 = vst [vmem:[#allocation47_spill] sm:$0xff] %v14735_v21 }
 0x63b   : > { %12607 = vrcp.f32 %v4772_v45  ;;  %17088 = vst [vmem:[#allocation48_spill] sm:$0xff] %v14737_v18  ;;  %17089 = vst [vmem:[#allocation49_spill] sm:$0xff] %v14739_v0  ;;  %v4835_v45 = vld [vmem:[%s13312_s21 + $0xd0] sm:$0xff] }
 0x63c   : > { %12609 = vtanh.f32 %v14711_v32 }
 0x643   : > { %v12604_v26 = vpop.eup %12603 }
 0x644   : > { %v12606_v8 = vpop.eup %12605 }
 0x645   : > { %v12608_v53 = vpop.eup %12607  ;;  %v4795_v50 = vmul.f32 %v12606_v8, %v12604_v26  ;;  %v4839_v26 = vld [vmem:[%s13312_s21 + $0xf0] sm:$0xff]  ;;  %v4836_v8 = vld [vmem:[%s13312_s21 + $0xd8] sm:$0xff] }
 0x646   : > { %v12610_v33 = vpop.eup %12609 }
 0x647   : > { %v4796_v10 = vmul.f32 %v12610_v33, %v12608_v53  ;;  %4797 = vst [vmem:[#allocation2 + $0x10] sm:$0xff] %v4795_v50  ;;  %v14719_v43 = vpack.c.bf16 %v4795_v50, %v4795_v50  ;;  %v4840_v53 = vld [vmem:[%s13312_s21 + $0xf8] sm:$0xff]  ;;  %v14749_v50 = vcombine.low %v4827_v49, %v4831_v44  ;;  %v14751_v33 = vcombine.low %v4828_v17, %v4832_v28 }
 0x648   : > { %v14757_v39 = vcombine.high %v4836_v8, %v4840_v53  ;;  %v14765_v49 = vcombine.low %v4835_v45, %v4839_v26  ;;  %v14767_v44 = vcombine.low %v4836_v8, %v4840_v53  ;;  %v14771_v17 = vcombine.high %v4843_v19, %v4847_v42 }
 0x649   : > { %4798 = vst [vmem:[#allocation2 + $0x18] sm:$0xff] %v4796_v10  ;;  %v4808_v24 = vpack.c.bf16 %v4796_v10, %v4796_v10  ;;  %17090 = vst [vmem:[#allocation50_spill] sm:$0xff] %v14749_v50  ;;  %v14755_v10 = vcombine.high %v4835_v45, %v4839_v26  ;;  %v14781_v45 = vcombine.low %v4843_v19, %v4847_v42 }
 0x64a   : > { %17091 = vst [vmem:[#allocation51_spill] sm:$0xff] %v14751_v33  ;;  %17093 = vst [vmem:[#allocation53_spill] sm:$0xff] %v14757_v39 }
 0x64b   : > { %5609 = vmatprep.mubr.bf16.mxu0 %v4808_v24  ;;  %5650 = vmatprep.mubr.bf16.mxu1 %v4808_v24  ;;  %17092 = vst [vmem:[#allocation52_spill] sm:$0xff] %v14755_v10  ;;  %17094 = vst [vmem:[#allocation54_spill] sm:$0xff] %v14765_v49 }
 0x64c   : > { %5610 = vmatmul.mubr.bf16.vlgmr.msra.gmra.mrb[16].mxu0 %v14719_v43  ;;  %5651 = vmatmul.mubr.bf16.vlgmr.msra.gmra.mrb[16].mxu1 %v14719_v43  ;;  %17095 = vst [vmem:[#allocation55_spill] sm:$0xff] %v14767_v44  ;;  %17096 = vst [vmem:[#allocation56_spill] sm:$0xff] %v14771_v17 }
 0x64d   : > { %5660 = vmatpush1.bf16.msra.mxu0 %v14699_v37  ;;  %5701 = vmatpush1.bf16.msra.mxu1 %v14701_v6  ;;  %17098 = vst [vmem:[#allocation58_spill] sm:$0xff] %v14781_v45 }
 0x64e   : > { %5691 = vmatprep.mubr.bf16.mxu0 %v4808_v24  ;;  %5732 = vmatprep.mubr.bf16.mxu1 %v4808_v24  ;;  %v4848_v24 = vld [vmem:[%s13312_s21 + $0x138] sm:$0xff] }
 0x64f   : > { %5661 = vmatprep.subr.bf16.mxu0 %v14722_v47  ;;  %5702 = vmatprep.subr.bf16.mxu1 %v14724_v9  ;;  %v14773_v28 = vcombine.high %v4844_v57, %v4848_v24  ;;  %v14783_v26 = vcombine.low %v4844_v57, %v4848_v24 }
 0x651   : > { %5662 = vmatpush1.bf16.msra.mxu0 %v14733_v7  ;;  %5703 = vmatpush1.bf16.msra.mxu1 %v14735_v21  ;;  %17097 = vst [vmem:[#allocation57_spill] sm:$0xff] %v14773_v28  ;;  %17099 = vst [vmem:[#allocation59_spill] sm:$0xff] %v14783_v26  ;;  %v4932_v21 = vld [vmem:[%s13312_s21 + $0x3d8] sm:$0xff] }
 0x652   : > { %5663 = vmatprep.subr.bf16.mxu0 %v14737_v18  ;;  %5704 = vmatprep.subr.bf16.mxu1 %v14739_v0  ;;  %v4851_v0 = vld [vmem:[%s13312_s21 + $0x150] sm:$0xff]  ;;  %v4852_v18 = vld [vmem:[%s13312_s21 + $0x158] sm:$0xff] }
 0x653   : > { %v4936_v7 = vld [vmem:[%s13312_s21 + $0x3f8] sm:$0xff] }
 0x655   : > { %5664 = vmatpush1.bf16.msra.mxu0 %v14749_v50  ;;  %5705 = vmatpush1.bf16.msra.mxu1 %v14751_v33  ;;  %v4855_v50 = vld [vmem:[%s13312_s21 + $0x170] sm:$0xff]  ;;  %v4856_v33 = vld [vmem:[%s13312_s21 + $0x178] sm:$0xff] }
 0x656   : > { %5665 = vmatprep.subr.bf16.mxu0 %v14755_v10  ;;  %5706 = vmatprep.subr.bf16.mxu1 %v14757_v39  ;;  %v14787_v8 = vcombine.high %v4851_v0, %v4855_v50  ;;  %v14789_v53 = vcombine.high %v4852_v18, %v4856_v33  ;;  %v4859_v39 = vld [vmem:[%s13312_s21 + $0x190] sm:$0xff]  ;;  %v4860_v10 = vld [vmem:[%s13312_s21 + $0x198] sm:$0xff]  ;;  %v14797_v19 = vcombine.low %v4851_v0, %v4855_v50 }
 0x657   : > { %v14799_v42 = vcombine.low %v4852_v18, %v4856_v33 }
 0x658   : > { %17100 = vst [vmem:[#allocation60_spill] sm:$0xff] %v14787_v8  ;;  %17101 = vst [vmem:[#allocation61_spill] sm:$0xff] %v14789_v53 }
 0x659   : > { %5666 = vmatpush1.bf16.msra.mxu0 %v14765_v49  ;;  %5707 = vmatpush1.bf16.msra.mxu1 %v14767_v44  ;;  %v4863_v49 = vld [vmem:[%s13312_s21 + $0x1b0] sm:$0xff]  ;;  %v4864_v44 = vld [vmem:[%s13312_s21 + $0x1b8] sm:$0xff]  ;;  %17102 = vst [vmem:[#allocation62_spill] sm:$0xff] %v14797_v19  ;;  %17103 = vst [vmem:[#allocation63_spill] sm:$0xff] %v14799_v42 }
 0x65a   : > { %5667 = vmatprep.subr.bf16.mxu0 %v14771_v17  ;;  %5708 = vmatprep.subr.bf16.mxu1 %v14773_v28  ;;  %v14803_v57 = vcombine.high %v4859_v39, %v4863_v49  ;;  %v14805_v24 = vcombine.high %v4860_v10, %v4864_v44  ;;  %v4867_v28 = vld [vmem:[%s13312_s21 + $0x1d0] sm:$0xff]  ;;  %v4868_v17 = vld [vmem:[%s13312_s21 + $0x1d8] sm:$0xff]  ;;  %v14813_v18 = vcombine.low %v4859_v39, %v4863_v49 }
 0x65b   : > { %v14815_v0 = vcombine.low %v4860_v10, %v4864_v44 }
 0x65c   : > { %17104 = vst [vmem:[#allocation64_spill] sm:$0xff] %v14803_v57  ;;  %17105 = vst [vmem:[#allocation65_spill] sm:$0xff] %v14805_v24 }
 0x65d   : > { %5668 = vmatpush1.bf16.msra.mxu0 %v14781_v45  ;;  %5709 = vmatpush1.bf16.msra.mxu1 %v14783_v26  ;;  %v4871_v45 = vld [vmem:[%s13312_s21 + $0x1f0] sm:$0xff]  ;;  %v4872_v26 = vld [vmem:[%s13312_s21 + $0x1f8] sm:$0xff]  ;;  %17106 = vst [vmem:[#allocation66_spill] sm:$0xff] %v14813_v18  ;;  %17107 = vst [vmem:[#allocation67_spill] sm:$0xff] %v14815_v0 }
 0x65e   : > { %5669 = vmatprep.subr.bf16.mxu0 %v14787_v8  ;;  %5710 = vmatprep.subr.bf16.mxu1 %v14789_v53  ;;  %v14819_v50 = vcombine.high %v4867_v28, %v4871_v45  ;;  %v14821_v33 = vcombine.high %v4868_v17, %v4872_v26  ;;  %v4875_v53 = vld [vmem:[%s13312_s21 + $0x210] sm:$0xff]  ;;  %v4876_v8 = vld [vmem:[%s13312_s21 + $0x218] sm:$0xff]  ;;  %v14829_v10 = vcombine.low %v4867_v28, %v4871_v45 }
 0x65f   : > { %v14831_v39 = vcombine.low %v4868_v17, %v4872_v26 }
 0x660   : > { %17108 = vst [vmem:[#allocation68_spill] sm:$0xff] %v14819_v50  ;;  %17109 = vst [vmem:[#allocation69_spill] sm:$0xff] %v14821_v33 }
 0x661   : > { %5670 = vmatpush1.bf16.msra.mxu0 %v14797_v19  ;;  %5711 = vmatpush1.bf16.msra.mxu1 %v14799_v42  ;;  %v4879_v19 = vld [vmem:[%s13312_s21 + $0x230] sm:$0xff]  ;;  %v4880_v42 = vld [vmem:[%s13312_s21 + $0x238] sm:$0xff]  ;;  %17110 = vst [vmem:[#allocation70_spill] sm:$0xff] %v14829_v10  ;;  %17111 = vst [vmem:[#allocation71_spill] sm:$0xff] %v14831_v39 }
 0x662   : > { %5671 = vmatprep.subr.bf16.mxu0 %v14803_v57  ;;  %5712 = vmatprep.subr.bf16.mxu1 %v14805_v24  ;;  %v14835_v49 = vcombine.high %v4875_v53, %v4879_v19  ;;  %v14837_v44 = vcombine.high %v4876_v8, %v4880_v42  ;;  %v4883_v24 = vld [vmem:[%s13312_s21 + $0x250] sm:$0xff]  ;;  %v4884_v57 = vld [vmem:[%s13312_s21 + $0x258] sm:$0xff]  ;;  %v14845_v17 = vcombine.low %v4875_v53, %v4879_v19 }
 0x663   : > { %v14847_v28 = vcombine.low %v4876_v8, %v4880_v42 }
 0x664   : > { %17112 = vst [vmem:[#allocation72_spill] sm:$0xff] %v14835_v49  ;;  %17113 = vst [vmem:[#allocation73_spill] sm:$0xff] %v14837_v44 }
 0x665   : > { %5672 = vmatpush1.bf16.msra.mxu0 %v14813_v18  ;;  %5713 = vmatpush1.bf16.msra.mxu1 %v14815_v0  ;;  %v4887_v18 = vld [vmem:[%s13312_s21 + $0x270] sm:$0xff]  ;;  %v4888_v0 = vld [vmem:[%s13312_s21 + $0x278] sm:$0xff]  ;;  %17114 = vst [vmem:[#allocation74_spill] sm:$0xff] %v14845_v17  ;;  %17115 = vst [vmem:[#allocation75_spill] sm:$0xff] %v14847_v28 }
 0x666   : > { %5673 = vmatprep.subr.bf16.mxu0 %v14819_v50  ;;  %5714 = vmatprep.subr.bf16.mxu1 %v14821_v33  ;;  %v14851_v45 = vcombine.high %v4883_v24, %v4887_v18  ;;  %v14853_v26 = vcombine.high %v4884_v57, %v4888_v0  ;;  %v4891_v33 = vld [vmem:[%s13312_s21 + $0x290] sm:$0xff]  ;;  %v4892_v50 = vld [vmem:[%s13312_s21 + $0x298] sm:$0xff]  ;;  %v14861_v8 = vcombine.low %v4883_v24, %v4887_v18 }
 0x667   : > { %v14863_v53 = vcombine.low %v4884_v57, %v4888_v0 }
 0x668   : > { %17116 = vst [vmem:[#allocation76_spill] sm:$0xff] %v14851_v45  ;;  %17117 = vst [vmem:[#allocation77_spill] sm:$0xff] %v14853_v26 }
 0x669   : > { %5674 = vmatpush1.bf16.msra.mxu0 %v14829_v10  ;;  %5715 = vmatpush1.bf16.msra.mxu1 %v14831_v39  ;;  %v4895_v10 = vld [vmem:[%s13312_s21 + $0x2b0] sm:$0xff]  ;;  %v4896_v39 = vld [vmem:[%s13312_s21 + $0x2b8] sm:$0xff]  ;;  %17118 = vst [vmem:[#allocation78_spill] sm:$0xff] %v14861_v8  ;;  %17119 = vst [vmem:[#allocation79_spill] sm:$0xff] %v14863_v53 }
 0x66a   : > { %5675 = vmatprep.subr.bf16.mxu0 %v14835_v49  ;;  %5716 = vmatprep.subr.bf16.mxu1 %v14837_v44  ;;  %v14867_v19 = vcombine.high %v4891_v33, %v4895_v10  ;;  %v14869_v42 = vcombine.high %v4892_v50, %v4896_v39  ;;  %v4899_v44 = vld [vmem:[%s13312_s21 + $0x2d0] sm:$0xff]  ;;  %v4900_v49 = vld [vmem:[%s13312_s21 + $0x2d8] sm:$0xff]  ;;  %v14877_v57 = vcombine.low %v4891_v33, %v4895_v10 }
 0x66b   : > { %v14879_v24 = vcombine.low %v4892_v50, %v4896_v39 }
 0x66c   : > { %17120 = vst [vmem:[#allocation80_spill] sm:$0xff] %v14867_v19  ;;  %17121 = vst [vmem:[#allocation81_spill] sm:$0xff] %v14869_v42 }
 0x66d   : > { %5676 = vmatpush1.bf16.msra.mxu0 %v14845_v17  ;;  %5717 = vmatpush1.bf16.msra.mxu1 %v14847_v28  ;;  %v4903_v17 = vld [vmem:[%s13312_s21 + $0x2f0] sm:$0xff]  ;;  %v4904_v28 = vld [vmem:[%s13312_s21 + $0x2f8] sm:$0xff]  ;;  %17122 = vst [vmem:[#allocation82_spill] sm:$0xff] %v14877_v57  ;;  %17123 = vst [vmem:[#allocation83_spill] sm:$0xff] %v14879_v24 }
 0x66e   : > { %5677 = vmatprep.subr.bf16.mxu0 %v14851_v45  ;;  %5718 = vmatprep.subr.bf16.mxu1 %v14853_v26  ;;  %v14883_v18 = vcombine.high %v4899_v44, %v4903_v17  ;;  %v14885_v0 = vcombine.high %v4900_v49, %v4904_v28  ;;  %v4907_v26 = vld [vmem:[%s13312_s21 + $0x310] sm:$0xff]  ;;  %v4908_v45 = vld [vmem:[%s13312_s21 + $0x318] sm:$0xff]  ;;  %v14893_v50 = vcombine.low %v4899_v44, %v4903_v17 }
 0x66f   : > { %v14895_v33 = vcombine.low %v4900_v49, %v4904_v28 }
 0x670   : > { %17124 = vst [vmem:[#allocation84_spill] sm:$0xff] %v14883_v18  ;;  %17125 = vst [vmem:[#allocation85_spill] sm:$0xff] %v14885_v0 }
 0x671   : > { %5678 = vmatpush1.bf16.msra.mxu0 %v14861_v8  ;;  %5719 = vmatpush1.bf16.msra.mxu1 %v14863_v53  ;;  %v4911_v8 = vld [vmem:[%s13312_s21 + $0x330] sm:$0xff]  ;;  %v4912_v53 = vld [vmem:[%s13312_s21 + $0x338] sm:$0xff]  ;;  %17126 = vst [vmem:[#allocation86_spill] sm:$0xff] %v14893_v50  ;;  %17127 = vst [vmem:[#allocation87_spill] sm:$0xff] %v14895_v33 }
 0x672   : > { %5679 = vmatprep.subr.bf16.mxu0 %v14867_v19  ;;  %5720 = vmatprep.subr.bf16.mxu1 %v14869_v42  ;;  %v14899_v10 = vcombine.high %v4907_v26, %v4911_v8  ;;  %v14901_v39 = vcombine.high %v4908_v45, %v4912_v53  ;;  %v4915_v42 = vld [vmem:[%s13312_s21 + $0x350] sm:$0xff]  ;;  %v4916_v19 = vld [vmem:[%s13312_s21 + $0x358] sm:$0xff]  ;;  %v14909_v49 = vcombine.low %v4907_v26, %v4911_v8 }
 0x673   : > { %v14911_v44 = vcombine.low %v4908_v45, %v4912_v53 }
 0x674   : > { %17128 = vst [vmem:[#allocation88_spill] sm:$0xff] %v14899_v10  ;;  %17129 = vst [vmem:[#allocation89_spill] sm:$0xff] %v14901_v39 }
 0x675   : > { %5680 = vmatpush1.bf16.msra.mxu0 %v14877_v57  ;;  %5721 = vmatpush1.bf16.msra.mxu1 %v14879_v24  ;;  %v4919_v57 = vld [vmem:[%s13312_s21 + $0x370] sm:$0xff]  ;;  %v4920_v24 = vld [vmem:[%s13312_s21 + $0x378] sm:$0xff] }
 0x676   : > { %5681 = vmatprep.subr.bf16.mxu0 %v14883_v18  ;;  %5722 = vmatprep.subr.bf16.mxu1 %v14885_v0  ;;  %v14915_v17 = vcombine.high %v4915_v42, %v4919_v57  ;;  %v14917_v28 = vcombine.high %v4916_v19, %v4920_v24  ;;  %v4923_v0 = vld [vmem:[%s13312_s21 + $0x390] sm:$0xff]  ;;  %v4924_v18 = vld [vmem:[%s13312_s21 + $0x398] sm:$0xff]  ;;  %v14925_v45 = vcombine.low %v4915_v42, %v4919_v57 }
 0x677   : > { %v14927_v26 = vcombine.low %v4916_v19, %v4920_v24  ;;  %v14949_v24 = vcombine.high %v4932_v21, %v4936_v7 }
 0x678   : > { %17130 = vst [vmem:[#allocation90_spill] sm:$0xff] %v14917_v28  ;;  %17131 = vst [vmem:[#allocation91_spill] sm:$0xff] %v14925_v45 }
 0x679   : > { %5682 = vmatpush1.bf16.msra.mxu0 %v14893_v50  ;;  %5723 = vmatpush1.bf16.msra.mxu1 %v14895_v33  ;;  %v4927_v50 = vld [vmem:[%s13312_s21 + $0x3b0] sm:$0xff]  ;;  %v4928_v33 = vld [vmem:[%s13312_s21 + $0x3b8] sm:$0xff] }
 0x67a   : > { %5683 = vmatprep.subr.bf16.mxu0 %v14899_v10  ;;  %5724 = vmatprep.subr.bf16.mxu1 %v14901_v39  ;;  %v14931_v8 = vcombine.high %v4923_v0, %v4927_v50  ;;  %v14933_v53 = vcombine.high %v4924_v18, %v4928_v33  ;;  %v4931_v39 = vld [vmem:[%s13312_s21 + $0x3d0] sm:$0xff]  ;;  %v14941_v42 = vcombine.low %v4923_v0, %v4927_v50 }
 0x67b   : > { %v4935_v10 = vld [vmem:[%s13312_s21 + $0x3f0] sm:$0xff]  ;;  %v14943_v19 = vcombine.low %v4924_v18, %v4928_v33 }
 0x67c   : > { %v14947_v57 = vcombine.high %v4931_v39, %v4935_v10  ;;  %v4802_v0 = vld [vmem:[#allocation3 + $0x98] sm:$0xff] }
 0x67d   : > { %5684 = vmatpush1.bf16.msra.mxu0 %v14909_v49  ;;  %5725 = vmatpush1.bf16.msra.mxu1 %v14911_v44 }
 0x67e   : > { %5685 = vmatprep.subr.bf16.mxu0 %v14915_v17  ;;  %5726 = vmatprep.subr.bf16.mxu1 %v14917_v28  ;;  %v14953_v28 = vcombine.low %v4931_v39, %v4935_v10 }
 0x681   : > { %5686 = vmatpush1.bf16.msra.mxu0 %v14925_v45  ;;  %5727 = vmatpush1.bf16.msra.mxu1 %v14927_v26  ;;  %v14955_v45 = vcombine.low %v4932_v21, %v4936_v7  ;;  %v4801_v7 = vld [vmem:[#allocation3 + $0x90] sm:$0xff]  ;;  %v4800_v21 = vld [vmem:[#allocation3 + $0x88] sm:$0xff] }
 0x682   : > { %5687 = vmatprep.subr.bf16.mxu0 %v14931_v8  ;;  %5728 = vmatprep.subr.bf16.mxu1 %v14933_v53 }
 0x685   : > { %5688 = vmatpush1.bf16.msra.mxu0 %v14941_v42  ;;  %5729 = vmatpush1.bf16.msra.mxu1 %v14943_v19 }
 0x686   : > { %5689 = vmatprep.subr.bf16.mxu0 %v14947_v57  ;;  %5730 = vmatprep.subr.bf16.mxu1 %v14949_v24 }
 0x689   : > { %5690 = vmatpush1.bf16.msra.mxu0 %v14953_v28  ;;  %5731 = vmatpush1.bf16.msra.mxu1 %v14955_v45 }
 0x68a   : > { %6577 = vmatprep.subr.bf16.mxu0 %v14442_v55  ;;  %6618 = vmatprep.subr.bf16.mxu1 %v14449_v35  ;;  %v17133_v55 = vld [vmem:[#allocation17_spill] sm:$0xff]  ;;  %v17135_v35 = vld [vmem:[#allocation20_spill] sm:$0xff] }
 0x68c   : > { %5692 = vmatmul.mubr.bf16.vlgmr.msra.gmra.mrb[20].mxu0 %v14719_v43  ;;  %5733 = vmatmul.mubr.bf16.vlgmr.msra.gmra.mrb[20].mxu1 %v14719_v43  ;;  %v4799_v43 = vld [vmem:[#allocation3 + $0x80] sm:$0xff] }
 0x68d   : > { %6578 = vmatpush1.bf16.msra.mxu0 %v14440_v5  ;;  %6619 = vmatpush1.bf16.msra.mxu1 %v14447_v34  ;;  %v17132_v5 = vld [vmem:[#allocation19_spill] sm:$0xff]  ;;  %v17134_v34 = vld [vmem:[#allocation18_spill] sm:$0xff] }
 0x68e   : > { %6579 = vmatprep.subr.bf16.mxu0 %v14451_v40  ;;  %6620 = vmatprep.subr.bf16.mxu1 %v14457_v11  ;;  %v17136_v40 = vld [vmem:[#allocation23_spill] sm:$0xff]  ;;  %v17137_v11 = vld [vmem:[#allocation21_spill] sm:$0xff] }
 0x691   : > { %6580 = vmatpush1.bf16.msra.mxu0 %v14464_v38  ;;  %6621 = vmatpush1.bf16.msra.mxu1 %v14468_v54  ;;  %v17138_v38 = vld [vmem:[#allocation22_spill] sm:$0xff]  ;;  %v17139_v54 = vld [vmem:[#allocation24_spill] sm:$0xff] }
 0x692   : > { %6581 = vmatprep.subr.bf16.mxu0 %v14470_v23  ;;  %6622 = vmatprep.subr.bf16.mxu1 %v14473_v56  ;;  %v17140_v23 = vld [vmem:[#allocation27_spill] sm:$0xff]  ;;  %v17141_v56 = vld [vmem:[#allocation25_spill] sm:$0xff] }
 0x695   : > { %6582 = vmatpush1.bf16.msra.mxu0 %v14480_v36  ;;  %6623 = vmatpush1.bf16.msra.mxu1 %v14484_v4  ;;  %v17142_v36 = vld [vmem:[#allocation26_spill] sm:$0xff]  ;;  %v17143_v4 = vld [vmem:[#allocation28_spill] sm:$0xff] }
 0x696   : > { %6583 = vmatprep.subr.bf16.mxu0 %v14486_v20  ;;  %6624 = vmatprep.subr.bf16.mxu1 %v14489_v41  ;;  %v17144_v20 = vld [vmem:[#allocation31_spill] sm:$0xff]  ;;  %v17145_v41 = vld [vmem:[#allocation29_spill] sm:$0xff] }
 0x699   : > { %6584 = vmatpush1.bf16.msra.mxu0 %v14496_v51  ;;  %6625 = vmatpush1.bf16.msra.mxu1 %v14500_v52  ;;  %v17146_v51 = vld [vmem:[#allocation30_spill] sm:$0xff]  ;;  %v17147_v52 = vld [vmem:[#allocation33_spill] sm:$0xff] }
 0x69a   : > { %6585 = vmatprep.subr.bf16.mxu0 %v14502_v60  ;;  %6626 = vmatprep.subr.bf16.mxu1 %v14505_v62  ;;  %v17148_v60 = vld [vmem:[#allocation35_spill] sm:$0xff]  ;;  %v17149_v62 = vld [vmem:[#allocation32_spill] sm:$0xff] }
 0x69d   : > { %6586 = vmatpush1.bf16.msra.mxu0 %v14512_v48  ;;  %6627 = vmatpush1.bf16.msra.mxu1 %v14516_v12  ;;  %v17150_v48 = vld [vmem:[#allocation34_spill] sm:$0xff]  ;;  %v17151_v12 = vld [vmem:[#allocation36_spill] sm:$0xff] }
 0x69e   : > { %6587 = vmatprep.subr.bf16.mxu0 %v14518_v15  ;;  %6628 = vmatprep.subr.bf16.mxu1 %v14521_v16  ;;  %v17152_v15 = vld [vmem:[#allocation37_spill] sm:$0xff]  ;;  %v17153_v16 = vld [vmem:[#allocation38_spill] sm:$0xff] }
 0x6a1   : > { %6588 = vmatpush1.bf16.msra.mxu0 %v14528_v25  ;;  %6629 = vmatpush1.bf16.msra.mxu1 %v14532_v13  ;;  %v17154_v25 = vld [vmem:[#allocation40_spill] sm:$0xff]  ;;  %v17155_v13 = vld [vmem:[#allocation39_spill] sm:$0xff] }
 0x6a2   : > { %6589 = vmatprep.subr.bf16.mxu0 %v14534_v29  ;;  %6630 = vmatprep.subr.bf16.mxu1 %v14537_v30  ;;  %v17156_v29 = vld [vmem:[#allocation41_spill] sm:$0xff]  ;;  %v17157_v30 = vld [vmem:[#allocation42_spill] sm:$0xff] }
 0x6a5   : > { %6590 = vmatpush1.bf16.msra.mxu0 %v14544_v59  ;;  %6631 = vmatpush1.bf16.msra.mxu1 %v14548_v1  ;;  %v17158_v59 = vld [vmem:[#allocation43_spill] sm:$0xff]  ;;  %v17159_v1 = vld [vmem:[#allocation44_spill] sm:$0xff] }
 0x6a6   : > { %6591 = vmatprep.subr.bf16.mxu0 %v14550_v2  ;;  %6632 = vmatprep.subr.bf16.mxu1 %v14553_v14  ;;  %v17160_v2 = vld [vmem:[#allocation45_spill] sm:$0xff] }
 0x6a9   : > { %6592 = vmatpush1.bf16.msra.mxu0 %v14556_v27  ;;  %6633 = vmatpush1.bf16.msra.mxu1 %v14560_v58 }
 0x6aa   : > { %6593 = vmatprep.subr.bf16.mxu0 %v14567_v46  ;;  %6634 = vmatprep.subr.bf16.mxu1 %v14576_v31 }
 0x6ad   : > { %6594 = vmatpush1.bf16.msra.mxu0 %v14570_v22  ;;  %6635 = vmatpush1.bf16.msra.mxu1 %v14574_v3 }
 0x6ae   : > { %6595 = vmatprep.subr.bf16.mxu0 %v14583_v61  ;;  %6636 = vmatprep.subr.bf16.mxu1 %v17132_v5 }
 0x6b1   : > { %6596 = vmatpush1.bf16.msra.mxu0 %v17133_v55  ;;  %6637 = vmatpush1.bf16.msra.mxu1 %v17134_v34 }
 0x6b2   : > { %6597 = vmatprep.subr.bf16.mxu0 %v17135_v35  ;;  %6638 = vmatprep.subr.bf16.mxu1 %v17136_v40 }
 0x6b5   : > { %6598 = vmatpush1.bf16.msra.mxu0 %v17137_v11  ;;  %6639 = vmatpush1.bf16.msra.mxu1 %v17138_v38 }
 0x6b6   : > { %6599 = vmatprep.subr.bf16.mxu0 %v17139_v54  ;;  %6640 = vmatprep.subr.bf16.mxu1 %v17140_v23 }
 0x6b9   : > { %6600 = vmatpush1.bf16.msra.mxu0 %v17141_v56  ;;  %6641 = vmatpush1.bf16.msra.mxu1 %v17142_v36 }
 0x6ba   : > { %6601 = vmatprep.subr.bf16.mxu0 %v17143_v4  ;;  %6642 = vmatprep.subr.bf16.mxu1 %v17144_v20  ;;  %v4803_v4 = vld [vmem:[#allocation3 + $0xa0] sm:$0xff]  ;;  %v4805_v20 = vld [vmem:[#allocation3 + $0xb0] sm:$0xff] }
 0x6bd   : > { %6602 = vmatpush1.bf16.msra.mxu0 %v17145_v41  ;;  %6643 = vmatpush1.bf16.msra.mxu1 %v17146_v51  ;;  %v4804_v41 = vld [vmem:[#allocation3 + $0xa8] sm:$0xff]  ;;  %v4806_v51 = vld [vmem:[#allocation3 + $0xb8] sm:$0xff] }
 0x6be   : > { %6603 = vmatprep.subr.bf16.mxu0 %v17147_v52  ;;  %6644 = vmatprep.subr.bf16.mxu1 %v17148_v60 }
 0x6c1   : > { %6604 = vmatpush1.bf16.msra.mxu0 %v17149_v62  ;;  %6645 = vmatpush1.bf16.msra.mxu1 %v17150_v48 }
 0x6c2   : > { %6605 = vmatprep.subr.bf16.mxu0 %v17151_v12  ;;  %6646 = vmatprep.subr.bf16.mxu1 %v17152_v15 }
 0x6c5   : > { %6606 = vmatpush1.bf16.msra.mxu0 %v17153_v16  ;;  %6647 = vmatpush1.bf16.msra.mxu1 %v17154_v25 }
 0x6c6   : > { %6607 = vmatprep.subr.bf16.mxu0 %v17155_v13  ;;  %6648 = vmatprep.subr.bf16.mxu1 %v17156_v29 }
 0x6c9   : > { %6608 = vmatpush1.bf16.msra.mxu0 %v17157_v30  ;;  %6649 = vmatpush1.bf16.msra.mxu1 %v17158_v59 }
 0x6ca   : > { %6659 = vmatprep.subr.bf16.mxu0 %v17159_v1  ;;  %6700 = vmatprep.subr.bf16.mxu1 %v17160_v2 }
 0x71f   : > { %v5611_v14 = vpop.f32.mrb[16].mxu0  ;;  %v5652_v27 = vpop.f32.mrb[16].mxu1 }
 0x720   : > { %v5613_v58 = vpop.f32.mrb[17].mxu0  ;;  %v5654_v46 = vpop.f32.mrb[17].mxu1  ;;  %v5741_v18 = vadd.f32 %v5611_v14, %v4799_v43  ;;  %v5743_v50 = vadd.f32 %v5652_v27, %v4801_v7 }
 0x721   : > { %v5615_v22 = vpop.f32.mrb[18].mxu0  ;;  %v5656_v3 = vpop.f32.mrb[18].mxu1  ;;  %v5742_v33 = vadd.f32 %v5613_v58, %v4800_v21  ;;  %v5744_v10 = vadd.f32 %v5654_v46, %v4802_v0 }
 0x722   : > { %v5616_v31 = vpop.f32.mrb[19].mxu0  ;;  %v5657_v61 = vpop.f32.mrb[19].mxu1  ;;  %v11697_v39 = vmul.f32 -1.442695, %v5741_v18  ;;  %v11699_v5 = vmul.f32 -1.442695, %v5743_v50 }
 0x723   : > { %v11698_v55 = vmul.f32 -1.442695, %v5742_v33  ;;  %v11700_v34 = vmul.f32 -1.442695, %v5744_v10 }
 0x724   : > { %12611 = vpow2.f32 %v11697_v39 }
 0x725   : > { %12613 = vpow2.f32 %v11699_v5 }
 0x726   : > { %12615 = vpow2.f32 %v11698_v55 }
 0x727   : > { %12617 = vpow2.f32 %v11700_v34 }
 0x72e   : > { %v12612_v35 = vpop.eup %12611 }
 0x72f   : > { %v12614_v40 = vpop.eup %12613  ;;  %v5767_v54 = vadd.f32 1.0, %v12612_v35 }
 0x730   : > { %v12616_v11 = vpop.eup %12615  ;;  %v5769_v23 = vadd.f32 1.0, %v12614_v40 }
 0x731   : > { %v12618_v38 = vpop.eup %12617  ;;  %v5768_v56 = vadd.f32 1.0, %v12616_v11  ;;  %12619 = vrcp.f32 %v5767_v54  ;;  %v17161_v11 = vld [vmem:[#allocation46_spill] sm:$0xff]  ;;  %v17163_v54 = vld [vmem:[#allocation48_spill] sm:$0xff] }
 0x732   : > { %v5770_v36 = vadd.f32 1.0, %v12618_v38  ;;  %12621 = vrcp.f32 %v5769_v23  ;;  %v17162_v38 = vld [vmem:[#allocation47_spill] sm:$0xff]  ;;  %v17164_v23 = vld [vmem:[#allocation49_spill] sm:$0xff] }
 0x733   : > { %12623 = vrcp.f32 %v5768_v56  ;;  %v17165_v56 = vld [vmem:[#allocation50_spill] sm:$0xff] }
 0x734   : > { %12625 = vrcp.f32 %v5770_v36  ;;  %v17166_v36 = vld [vmem:[#allocation51_spill] sm:$0xff] }
 0x73b   : > { %v12620_v14 = vpop.eup %12619 }
 0x73c   : > { %v12622_v27 = vpop.eup %12621 }
 0x73d   : > { %v12624_v58 = vpop.eup %12623  ;;  %v5787_v31 = vmul.f32 %v12622_v27, %v14709_v63  ;;  %v17190_v27 = vld [vmem:[#allocation75_spill] sm:$0xff] }
 0x73e   : > { %v12626_v46 = vpop.eup %12625 }
 0x73f   : > { %v5788_v7 = vmul.f32 %v12626_v46, %v14711_v32  ;;  %v17192_v46 = vld [vmem:[#allocation77_spill] sm:$0xff] }
 0x75f   : > { %v5693_v52 = vpop.f32.mrb[20].mxu0  ;;  %v5734_v60 = vpop.f32.mrb[20].mxu1 }
 0x760   : > { %v5745_v62 = vadd.f32 %v5693_v52, %v4803_v4  ;;  %v5747_v48 = vadd.f32 %v5734_v60, %v4805_v20  ;;  %v5695_v12 = vpop.f32.mrb[21].mxu0  ;;  %v5736_v15 = vpop.f32.mrb[21].mxu1  ;;  %v17169_v4 = vld [vmem:[#allocation54_spill] sm:$0xff]  ;;  %v17172_v20 = vld [vmem:[#allocation57_spill] sm:$0xff]  ;;  %v17175_v52 = vld [vmem:[#allocation60_spill] sm:$0xff] }
 0x761   : > { %v5746_v16 = vadd.f32 %v5695_v12, %v4804_v41  ;;  %v5748_v25 = vadd.f32 %v5736_v15, %v4806_v51  ;;  %v5697_v13 = vpop.f32.mrb[22].mxu0  ;;  %v5738_v29 = vpop.f32.mrb[22].mxu1  ;;  %v17173_v41 = vld [vmem:[#allocation58_spill] sm:$0xff]  ;;  %v17174_v51 = vld [vmem:[#allocation59_spill] sm:$0xff]  ;;  %v17176_v60 = vld [vmem:[#allocation61_spill] sm:$0xff] }
 0x762   : > { %v11701_v30 = vmul.f32 -1.442695, %v5745_v62  ;;  %12627 = vtanh.f32 %v5747_v48  ;;  %v5698_v59 = vpop.f32.mrb[23].mxu0  ;;  %v5739_v1 = vpop.f32.mrb[23].mxu1  ;;  %v17177_v62 = vld [vmem:[#allocation62_spill] sm:$0xff]  ;;  %v17178_v48 = vld [vmem:[#allocation63_spill] sm:$0xff] }
 0x763   : > { %v11702_v2 = vmul.f32 -1.442695, %v5746_v16  ;;  %12629 = vtanh.f32 %v5748_v25  ;;  %v17179_v12 = vld [vmem:[#allocation64_spill] sm:$0xff]  ;;  %v17180_v15 = vld [vmem:[#allocation65_spill] sm:$0xff]  ;;  %v17181_v16 = vld [vmem:[#allocation66_spill] sm:$0xff] }
 0x764   : > { %12631 = vpow2.f32 %v11701_v30  ;;  %v17182_v25 = vld [vmem:[#allocation67_spill] sm:$0xff]  ;;  %v17183_v13 = vld [vmem:[#allocation68_spill] sm:$0xff]  ;;  %v17184_v29 = vld [vmem:[#allocation69_spill] sm:$0xff] }
 0x765   : > { %12633 = vpow2.f32 %v11702_v2  ;;  %v17185_v30 = vld [vmem:[#allocation70_spill] sm:$0xff]  ;;  %v17186_v59 = vld [vmem:[#allocation71_spill] sm:$0xff]  ;;  %v17187_v1 = vld [vmem:[#allocation72_spill] sm:$0xff] }
 0x766   : > { %v17188_v2 = vld [vmem:[#allocation73_spill] sm:$0xff] }
 0x76c   : > { %v12628_v22 = vpop.eup %12627 }
 0x76d   : > { %v12630_v3 = vpop.eup %12629  ;;  %v5789_v61 = vmul.f32 %v12628_v22, %v12620_v14  ;;  %v17189_v14 = vld [vmem:[#allocation74_spill] sm:$0xff] }
 0x76e   : > { %v12632_v43 = vpop.eup %12631  ;;  %v5790_v21 = vmul.f32 %v12630_v3, %v12624_v58  ;;  %v17191_v58 = vld [vmem:[#allocation76_spill] sm:$0xff]  ;;  %v17193_v22 = vld [vmem:[#allocation78_spill] sm:$0xff]  ;;  %v17194_v3 = vld [vmem:[#allocation79_spill] sm:$0xff] }
 0x76f   : > { %v12634_v18 = vpop.eup %12633  ;;  %v5771_v0 = vadd.f32 1.0, %v12632_v43  ;;  %v15031_v50 = vadd.f32 %v5789_v61, %v5787_v31  ;;  %v17195_v31 = vld [vmem:[#allocation80_spill] sm:$0xff]  ;;  %v17196_v61 = vld [vmem:[#allocation81_spill] sm:$0xff]  ;;  %v17197_v43 = vld [vmem:[#allocation82_spill] sm:$0xff] }
 0x770   : > { %v5772_v33 = vadd.f32 1.0, %v12634_v18  ;;  %v15033_v10 = vadd.f32 %v5790_v21, %v5788_v7  ;;  %v17198_v7 = vld [vmem:[#allocation83_spill] sm:$0xff]  ;;  %v17199_v21 = vld [vmem:[#allocation84_spill] sm:$0xff]  ;;  %v17200_v18 = vld [vmem:[#allocation85_spill] sm:$0xff] }
 0x771   : > { %12635 = vrcp.f32 %v5771_v0  ;;  %v17201_v0 = vld [vmem:[#allocation86_spill] sm:$0xff] }
 0x772   : > { %12637 = vtanh.f32 %v15031_v50 }
 0x773   : > { %12639 = vrcp.f32 %v5772_v33  ;;  %v17202_v33 = vld [vmem:[#allocation87_spill] sm:$0xff] }
 0x774   : > { %12641 = vtanh.f32 %v15033_v10 }
 0x77b   : > { %v12636_v39 = vpop.eup %12635 }
 0x77c   : > { %v12638_v63 = vpop.eup %12637 }
 0x77d   : > { %v12640_v5 = vpop.eup %12639  ;;  %v5795_v55 = vmul.f32 %v12638_v63, %v12636_v39  ;;  %v17203_v39 = vld [vmem:[#allocation88_spill] sm:$0xff]  ;;  %v17204_v63 = vld [vmem:[#allocation89_spill] sm:$0xff] }
 0x77e   : > { %v12642_v34 = vpop.eup %12641 }
 0x77f   : > { %v5796_v32 = vmul.f32 %v12642_v34, %v12640_v5  ;;  %5797 = vst [vmem:[#allocation2 + $0x20] sm:$0xff] %v5795_v55  ;;  %v15037_v40 = vpack.c.bf16 %v5795_v55, %v5795_v55  ;;  %v17205_v5 = vld [vmem:[#allocation90_spill] sm:$0xff]  ;;  %v17206_v55 = vld [vmem:[#allocation91_spill] sm:$0xff]  ;;  %v6822_v34 = vld [vmem:[%s13312_s21 + $0x68] sm:$0xff] }
 0x781   : > { %5798 = vst [vmem:[#allocation2 + $0x28] sm:$0xff] %v5796_v32  ;;  %v5808_v35 = vpack.c.bf16 %v5796_v32, %v5796_v32  ;;  %v6825_v32 = vld [vmem:[%s13312_s21 + $0x80] sm:$0xff] }
 0x783   : > { %6609 = vmatprep.mubr.bf16.mxu0 %v5808_v35  ;;  %6650 = vmatprep.mubr.bf16.mxu1 %v5808_v35 }
 0x784   : > { %6610 = vmatmul.mubr.bf16.vlgmr.msra.gmra.mrb[24].mxu0 %v15037_v40  ;;  %6651 = vmatmul.mubr.bf16.vlgmr.msra.gmra.mrb[24].mxu1 %v15037_v40 }
 0x785   : > { %6660 = vmatpush1.bf16.msra.mxu0 %v14699_v37  ;;  %6701 = vmatpush1.bf16.msra.mxu1 %v14701_v6  ;;  %v17167_v37 = vld [vmem:[#allocation52_spill] sm:$0xff]  ;;  %v17168_v6 = vld [vmem:[#allocation53_spill] sm:$0xff] }
 0x786   : > { %6691 = vmatprep.mubr.bf16.mxu0 %v5808_v35  ;;  %6732 = vmatprep.mubr.bf16.mxu1 %v5808_v35 }
 0x787   : > { %6661 = vmatprep.subr.bf16.mxu0 %v14722_v47  ;;  %6702 = vmatprep.subr.bf16.mxu1 %v14724_v9  ;;  %v17170_v47 = vld [vmem:[#allocation55_spill] sm:$0xff]  ;;  %v17171_v9 = vld [vmem:[#allocation56_spill] sm:$0xff] }
 0x789   : > { %6662 = vmatpush1.bf16.msra.mxu0 %v17161_v11  ;;  %6703 = vmatpush1.bf16.msra.mxu1 %v17162_v38  ;;  %v6826_v11 = vld [vmem:[%s13312_s21 + $0x88] sm:$0xff] }
 0x78a   : > { %6663 = vmatprep.subr.bf16.mxu0 %v17163_v54  ;;  %6704 = vmatprep.subr.bf16.mxu1 %v17164_v23  ;;  %v6830_v38 = vld [vmem:[%s13312_s21 + $0xa8] sm:$0xff] }
 0x78d   : > { %6664 = vmatpush1.bf16.msra.mxu0 %v17165_v56  ;;  %6705 = vmatpush1.bf16.msra.mxu1 %v17166_v36  ;;  %v15141_v36 = vcombine.high %v6826_v11, %v6830_v38 }
 0x78e   : > { %6665 = vmatprep.subr.bf16.mxu0 %v17167_v37  ;;  %6706 = vmatprep.subr.bf16.mxu1 %v17168_v6  ;;  %v6833_v37 = vld [vmem:[%s13312_s21 + $0xc0] sm:$0xff] }
 0x78f   : > { %v6837_v6 = vld [vmem:[%s13312_s21 + $0xe0] sm:$0xff] }
 0x791   : > { %6666 = vmatpush1.bf16.msra.mxu0 %v17169_v4  ;;  %6707 = vmatpush1.bf16.msra.mxu1 %v17170_v47  ;;  %v6834_v4 = vld [vmem:[%s13312_s21 + $0xc8] sm:$0xff] }
 0x792   : > { %6667 = vmatprep.subr.bf16.mxu0 %v17171_v9  ;;  %6708 = vmatprep.subr.bf16.mxu1 %v17172_v20  ;;  %v6838_v47 = vld [vmem:[%s13312_s21 + $0xe8] sm:$0xff]  ;;  %v15152_v20 = vcombine.low %v6826_v11, %v6830_v38  ;;  %v6881_v11 = vld [vmem:[%s13312_s21 + $0x240] sm:$0xff] }
 0x793   : > { %v6885_v38 = vld [vmem:[%s13312_s21 + $0x260] sm:$0xff] }
 0x795   : > { %6668 = vmatpush1.bf16.msra.mxu0 %v17173_v41  ;;  %6709 = vmatpush1.bf16.msra.mxu1 %v17174_v51  ;;  %v15154_v41 = vcombine.high %v6833_v37, %v6837_v6  ;;  %v15157_v51 = vcombine.high %v6834_v4, %v6838_v47 }
 0x796   : > { %6669 = vmatprep.subr.bf16.mxu0 %v17175_v52  ;;  %6710 = vmatprep.subr.bf16.mxu1 %v17176_v60  ;;  %v6841_v52 = vld [vmem:[%s13312_s21 + $0x100] sm:$0xff] }
 0x797   : > { %v6845_v60 = vld [vmem:[%s13312_s21 + $0x120] sm:$0xff] }
 0x799   : > { %6670 = vmatpush1.bf16.msra.mxu0 %v17177_v62  ;;  %6711 = vmatpush1.bf16.msra.mxu1 %v17178_v48  ;;  %v6842_v62 = vld [vmem:[%s13312_s21 + $0x108] sm:$0xff] }
 0x79a   : > { %6671 = vmatprep.subr.bf16.mxu0 %v17179_v12  ;;  %6712 = vmatprep.subr.bf16.mxu1 %v17180_v15  ;;  %v6846_v48 = vld [vmem:[%s13312_s21 + $0x128] sm:$0xff]  ;;  %v15164_v12 = vcombine.low %v6833_v37, %v6837_v6  ;;  %v15168_v15 = vcombine.low %v6834_v4, %v6838_v47  ;;  %v15251_v6 = vcombine.high %v6881_v11, %v6885_v38 }
 0x79b   : > { %v6882_v37 = vld [vmem:[%s13312_s21 + $0x248] sm:$0xff]  ;;  %v15255_v47 = vcombine.low %v6881_v11, %v6885_v38 }
 0x79c   : > { %v6886_v4 = vld [vmem:[%s13312_s21 + $0x268] sm:$0xff] }
 0x79d   : > { %6672 = vmatpush1.bf16.msra.mxu0 %v17181_v16  ;;  %6713 = vmatpush1.bf16.msra.mxu1 %v17182_v25  ;;  %v15170_v16 = vcombine.high %v6841_v52, %v6845_v60  ;;  %v15173_v25 = vcombine.high %v6842_v62, %v6846_v48  ;;  %17207 = vst [vmem:[#allocation19_spill] sm:$0xff] %v15255_v47  ;;  %v6906_v11 = vld [vmem:[%s13312_s21 + $0x308] sm:$0xff] }
 0x79e   : > { %6673 = vmatprep.subr.bf16.mxu0 %v17183_v13  ;;  %6714 = vmatprep.subr.bf16.mxu1 %v17184_v29  ;;  %v6849_v13 = vld [vmem:[%s13312_s21 + $0x140] sm:$0xff] }
 0x79f   : > { %v6853_v29 = vld [vmem:[%s13312_s21 + $0x160] sm:$0xff] }
 0x7a1   : > { %6674 = vmatpush1.bf16.msra.mxu0 %v17185_v30  ;;  %6715 = vmatpush1.bf16.msra.mxu1 %v17186_v59  ;;  %v6850_v30 = vld [vmem:[%s13312_s21 + $0x148] sm:$0xff] }
 0x7a2   : > { %6675 = vmatprep.subr.bf16.mxu0 %v17187_v1  ;;  %6716 = vmatprep.subr.bf16.mxu1 %v17188_v2  ;;  %v6854_v59 = vld [vmem:[%s13312_s21 + $0x168] sm:$0xff]  ;;  %v15180_v1 = vcombine.low %v6841_v52, %v6845_v60  ;;  %v15184_v2 = vcombine.low %v6842_v62, %v6846_v48  ;;  %v15257_v52 = vcombine.low %v6882_v37, %v6886_v4  ;;  %v6889_v62 = vld [vmem:[%s13312_s21 + $0x280] sm:$0xff] }
 0x7a3   : > { %v15259_v60 = vcombine.high %v6882_v37, %v6886_v4  ;;  %v6893_v48 = vld [vmem:[%s13312_s21 + $0x2a0] sm:$0xff]  ;;  %v6910_v37 = vld [vmem:[%s13312_s21 + $0x328] sm:$0xff] }
 0x7a4   : > { %17208 = vst [vmem:[#allocation17_spill] sm:$0xff] %v15257_v52 }
 0x7a5   : > { %6676 = vmatpush1.bf16.msra.mxu0 %v17189_v14  ;;  %6717 = vmatpush1.bf16.msra.mxu1 %v17190_v27  ;;  %v15186_v14 = vcombine.high %v6849_v13, %v6853_v29  ;;  %v15189_v27 = vcombine.high %v6850_v30, %v6854_v59  ;;  %17209 = vst [vmem:[#allocation18_spill] sm:$0xff] %v15259_v60 }
 0x7a6   : > { %6677 = vmatprep.subr.bf16.mxu0 %v17191_v58  ;;  %6718 = vmatprep.subr.bf16.mxu1 %v17192_v46  ;;  %v6857_v58 = vld [vmem:[%s13312_s21 + $0x180] sm:$0xff] }
 0x7a7   : > { %v6861_v46 = vld [vmem:[%s13312_s21 + $0x1a0] sm:$0xff] }
 0x7a9   : > { %6678 = vmatpush1.bf16.msra.mxu0 %v17193_v22  ;;  %6719 = vmatpush1.bf16.msra.mxu1 %v17194_v3  ;;  %v6858_v22 = vld [vmem:[%s13312_s21 + $0x188] sm:$0xff] }
 0x7aa   : > { %6679 = vmatprep.subr.bf16.mxu0 %v17195_v31  ;;  %6720 = vmatprep.subr.bf16.mxu1 %v17196_v61  ;;  %v6862_v3 = vld [vmem:[%s13312_s21 + $0x1a8] sm:$0xff]  ;;  %v15196_v31 = vcombine.low %v6849_v13, %v6853_v29  ;;  %v15200_v61 = vcombine.low %v6850_v30, %v6854_v59  ;;  %v15267_v29 = vcombine.high %v6889_v62, %v6893_v48 }
 0x7ab   : > { %v6890_v13 = vld [vmem:[%s13312_s21 + $0x288] sm:$0xff]  ;;  %v15271_v59 = vcombine.low %v6889_v62, %v6893_v48  ;;  %v15305_v62 = vcombine.low %v6906_v11, %v6910_v37  ;;  %v15307_v48 = vcombine.high %v6906_v11, %v6910_v37 }
 0x7ac   : > { %17210 = vst [vmem:[#allocation20_spill] sm:$0xff] %v15267_v29  ;;  %v6894_v30 = vld [vmem:[%s13312_s21 + $0x2a8] sm:$0xff] }
 0x7ad   : > { %6680 = vmatpush1.bf16.msra.mxu0 %v17197_v43  ;;  %6721 = vmatpush1.bf16.msra.mxu1 %v17198_v7  ;;  %v15202_v43 = vcombine.high %v6857_v58, %v6861_v46  ;;  %v15205_v7 = vcombine.high %v6858_v22, %v6862_v3  ;;  %17211 = vst [vmem:[#allocation23_spill] sm:$0xff] %v15271_v59  ;;  %17220 = vst [vmem:[#allocation29_spill] sm:$0xff] %v15305_v62 }
 0x7ae   : > { %6681 = vmatprep.subr.bf16.mxu0 %v17199_v21  ;;  %6722 = vmatprep.subr.bf16.mxu1 %v17200_v18  ;;  %v6865_v21 = vld [vmem:[%s13312_s21 + $0x1c0] sm:$0xff]  ;;  %17221 = vst [vmem:[#allocation30_spill] sm:$0xff] %v15307_v48 }
 0x7af   : > { %v6869_v18 = vld [vmem:[%s13312_s21 + $0x1e0] sm:$0xff] }
 0x7b1   : > { %6682 = vmatpush1.bf16.msra.mxu0 %v17201_v0  ;;  %6723 = vmatpush1.bf16.msra.mxu1 %v17202_v33  ;;  %v6866_v0 = vld [vmem:[%s13312_s21 + $0x1c8] sm:$0xff] }
 0x7b2   : > { %6683 = vmatprep.subr.bf16.mxu0 %v17203_v39  ;;  %6724 = vmatprep.subr.bf16.mxu1 %v17204_v63  ;;  %v6870_v33 = vld [vmem:[%s13312_s21 + $0x1e8] sm:$0xff]  ;;  %v15212_v39 = vcombine.low %v6857_v58, %v6861_v46  ;;  %v15216_v63 = vcombine.low %v6858_v22, %v6862_v3  ;;  %v15273_v58 = vcombine.low %v6890_v13, %v6894_v30  ;;  %v6897_v22 = vld [vmem:[%s13312_s21 + $0x2c0] sm:$0xff] }
 0x7b3   : > { %v15275_v46 = vcombine.high %v6890_v13, %v6894_v30  ;;  %v6901_v3 = vld [vmem:[%s13312_s21 + $0x2e0] sm:$0xff] }
 0x7b4   : > { %17212 = vst [vmem:[#allocation21_spill] sm:$0xff] %v15273_v58  ;;  %v6913_v13 = vld [vmem:[%s13312_s21 + $0x340] sm:$0xff] }
 0x7b5   : > { %6684 = vmatpush1.bf16.msra.mxu0 %v14909_v49  ;;  %6725 = vmatpush1.bf16.msra.mxu1 %v14911_v44  ;;  %v6809_v49 = vld [vmem:[%s13312_s21] sm:$0xff]  ;;  %17213 = vst [vmem:[#allocation22_spill] sm:$0xff] %v15275_v46 }
 0x7b6   : > { %6685 = vmatprep.subr.bf16.mxu0 %v14915_v17  ;;  %6726 = vmatprep.subr.bf16.mxu1 %v17205_v5  ;;  %v6813_v44 = vld [vmem:[%s13312_s21 + $0x20] sm:$0xff]  ;;  %v6810_v17 = vld [vmem:[%s13312_s21 + $0x8] sm:$0xff]  ;;  %v15218_v5 = vcombine.high %v6865_v21, %v6869_v18 }
 0x7b7   : > { %v6917_v30 = vld [vmem:[%s13312_s21 + $0x360] sm:$0xff] }
 0x7b9   : > { %6686 = vmatpush1.bf16.msra.mxu0 %v17206_v55  ;;  %6727 = vmatpush1.bf16.msra.mxu1 %v14927_v26  ;;  %v15108_v26 = vcombine.low %v6809_v49, %v6813_v44  ;;  %v15221_v55 = vcombine.high %v6866_v0, %v6870_v33 }
 0x7ba   : > { %6687 = vmatprep.subr.bf16.mxu0 %v14931_v8  ;;  %6728 = vmatprep.subr.bf16.mxu1 %v14933_v53  ;;  %v15110_v8 = vcombine.high %v6809_v49, %v6813_v44  ;;  %v6814_v53 = vld [vmem:[%s13312_s21 + $0x28] sm:$0xff]  ;;  %v15224_v49 = vcombine.low %v6865_v21, %v6869_v18  ;;  %v15228_v44 = vcombine.low %v6866_v0, %v6870_v33 }
 0x7bb   : > { %v6898_v21 = vld [vmem:[%s13312_s21 + $0x2c8] sm:$0xff]  ;;  %v15283_v18 = vcombine.high %v6897_v22, %v6901_v3  ;;  %v15287_v33 = vcombine.low %v6897_v22, %v6901_v3  ;;  %v15315_v3 = vcombine.low %v6913_v13, %v6917_v30 }
 0x7bc   : > { %v6902_v0 = vld [vmem:[%s13312_s21 + $0x2e8] sm:$0xff] }
 0x7bd   : > { %6688 = vmatpush1.bf16.msra.mxu0 %v14941_v42  ;;  %6729 = vmatpush1.bf16.msra.mxu1 %v14943_v19  ;;  %v6821_v42 = vld [vmem:[%s13312_s21 + $0x60] sm:$0xff]  ;;  %v15115_v19 = vcombine.low %v6810_v17, %v6814_v53  ;;  %17214 = vst [vmem:[#allocation24_spill] sm:$0xff] %v15283_v18  ;;  %17215 = vst [vmem:[#allocation27_spill] sm:$0xff] %v15287_v33  ;;  %v6914_v22 = vld [vmem:[%s13312_s21 + $0x348] sm:$0xff] }
 0x7be   : > { %6689 = vmatprep.subr.bf16.mxu0 %v14947_v57  ;;  %6730 = vmatprep.subr.bf16.mxu1 %v14949_v24  ;;  %v6818_v24 = vld [vmem:[%s13312_s21 + $0x48] sm:$0xff]  ;;  %17222 = vst [vmem:[#allocation33_spill] sm:$0xff] %v15315_v3 }
 0x7bf   : > { %v15125_v35 = vcombine.high %v6818_v24, %v6822_v34  ;;  %v15136_v23 = vcombine.low %v6818_v24, %v6822_v34  ;;  %v6878_v34 = vld [vmem:[%s13312_s21 + $0x228] sm:$0xff] }
 0x7c1   : > { %6690 = vmatpush1.bf16.msra.mxu0 %v14953_v28  ;;  %6731 = vmatpush1.bf16.msra.mxu1 %v14955_v45  ;;  %v6817_v28 = vld [vmem:[%s13312_s21 + $0x40] sm:$0xff]  ;;  %v15117_v45 = vcombine.high %v6810_v17, %v6814_v53 }
 0x7c2   : > { %v15119_v57 = vcombine.high %v6817_v28, %v6821_v42  ;;  %7577 = vmatprep.subr.bf16.mxu0 %v15110_v8  ;;  %v15132_v54 = vcombine.low %v6817_v28, %v6821_v42  ;;  %v6873_v17 = vld [vmem:[%s13312_s21 + $0x200] sm:$0xff]  ;;  %v6874_v42 = vld [vmem:[%s13312_s21 + $0x208] sm:$0xff] }
 0x7c3   : > { %7618 = vmatprep.subr.bf16.mxu1 %v15117_v45  ;;  %v6877_v53 = vld [vmem:[%s13312_s21 + $0x220] sm:$0xff] }
 0x7c4   : > { %6692 = vmatmul.mubr.bf16.vlgmr.msra.gmra.mrb[28].mxu0 %v15037_v40  ;;  %6733 = vmatmul.mubr.bf16.vlgmr.msra.gmra.mrb[28].mxu1 %v15037_v40  ;;  %v6829_v40 = vld [vmem:[%s13312_s21 + $0xa0] sm:$0xff]  ;;  %v15235_v28 = vcombine.high %v6873_v17, %v6877_v53  ;;  %v15238_v24 = vcombine.low %v6873_v17, %v6877_v53  ;;  %v15289_v17 = vcombine.low %v6898_v21, %v6902_v0 }
 0x7c5   : > { %7578 = vmatpush1.bf16.msra.mxu0 %v15108_v26  ;;  %7619 = vmatpush1.bf16.msra.mxu1 %v15115_v19  ;;  %v15138_v56 = vcombine.high %v6825_v32, %v6829_v40  ;;  %v15148_v9 = vcombine.low %v6825_v32, %v6829_v40  ;;  %v15242_v32 = vcombine.low %v6874_v42, %v6878_v34 }
 0x7c6   : > { %7579 = vmatprep.subr.bf16.mxu0 %v15119_v57  ;;  %7620 = vmatprep.subr.bf16.mxu1 %v15125_v35  ;;  %v15244_v40 = vcombine.high %v6874_v42, %v6878_v34  ;;  %17216 = vst [vmem:[#allocation25_spill] sm:$0xff] %v15289_v17  ;;  %v15291_v53 = vcombine.high %v6898_v21, %v6902_v0  ;;  %v6905_v42 = vld [vmem:[%s13312_s21 + $0x300] sm:$0xff]  ;;  %v6918_v0 = vld [vmem:[%s13312_s21 + $0x368] sm:$0xff] }
 0x7c7   : > { %v6909_v34 = vld [vmem:[%s13312_s21 + $0x320] sm:$0xff]  ;;  %v15317_v21 = vcombine.high %v6913_v13, %v6917_v30  ;;  %v15323_v11 = vcombine.low %v6914_v22, %v6918_v0  ;;  %v15325_v37 = vcombine.high %v6914_v22, %v6918_v0  ;;  %v6934_v22 = vld [vmem:[%s13312_s21 + $0x3e8] sm:$0xff] }
 0x7c8   : > { %17217 = vst [vmem:[#allocation26_spill] sm:$0xff] %v15291_v53  ;;  %v15299_v38 = vcombine.high %v6905_v42, %v6909_v34  ;;  %v15303_v4 = vcombine.low %v6905_v42, %v6909_v34  ;;  %v6921_v42 = vld [vmem:[%s13312_s21 + $0x380] sm:$0xff] }
 0x7c9   : > { %7580 = vmatpush1.bf16.msra.mxu0 %v15132_v54  ;;  %7621 = vmatpush1.bf16.msra.mxu1 %v15136_v23  ;;  %17223 = vst [vmem:[#allocation35_spill] sm:$0xff] %v15317_v21  ;;  %v6925_v34 = vld [vmem:[%s13312_s21 + $0x3a0] sm:$0xff]  ;;  %17224 = vst [vmem:[#allocation32_spill] sm:$0xff] %v15323_v11 }
 0x7ca   : > { %7581 = vmatprep.subr.bf16.mxu0 %v15138_v56  ;;  %7622 = vmatprep.subr.bf16.mxu1 %v15141_v36  ;;  %17218 = vst [vmem:[#allocation28_spill] sm:$0xff] %v15299_v38  ;;  %17219 = vst [vmem:[#allocation31_spill] sm:$0xff] %v15303_v4  ;;  %v6933_v30 = vld [vmem:[%s13312_s21 + $0x3e0] sm:$0xff] }
 0x7cb   : > { %17225 = vst [vmem:[#allocation34_spill] sm:$0xff] %v15325_v37 }
 0x7cd   : > { %7582 = vmatpush1.bf16.msra.mxu0 %v15148_v9  ;;  %7623 = vmatpush1.bf16.msra.mxu1 %v15152_v20 }
 0x7ce   : > { %7583 = vmatprep.subr.bf16.mxu0 %v15154_v41  ;;  %7624 = vmatprep.subr.bf16.mxu1 %v15157_v51 }
 0x7d1   : > { %7584 = vmatpush1.bf16.msra.mxu0 %v15164_v12  ;;  %7625 = vmatpush1.bf16.msra.mxu1 %v15168_v15 }
 0x7d2   : > { %7585 = vmatprep.subr.bf16.mxu0 %v15170_v16  ;;  %7626 = vmatprep.subr.bf16.mxu1 %v15173_v25 }
 0x7d5   : > { %7586 = vmatpush1.bf16.msra.mxu0 %v15180_v1  ;;  %7627 = vmatpush1.bf16.msra.mxu1 %v15184_v2 }
 0x7d6   : > { %7587 = vmatprep.subr.bf16.mxu0 %v15186_v14  ;;  %7628 = vmatprep.subr.bf16.mxu1 %v15189_v27 }
 0x7d9   : > { %7588 = vmatpush1.bf16.msra.mxu0 %v15196_v31  ;;  %7629 = vmatpush1.bf16.msra.mxu1 %v15200_v61 }
 0x7da   : > { %7589 = vmatprep.subr.bf16.mxu0 %v15202_v43  ;;  %7630 = vmatprep.subr.bf16.mxu1 %v15205_v7 }
 0x7dd   : > { %7590 = vmatpush1.bf16.msra.mxu0 %v15212_v39  ;;  %7631 = vmatpush1.bf16.msra.mxu1 %v15216_v63 }
 0x7de   : > { %7591 = vmatprep.subr.bf16.mxu0 %v15218_v5  ;;  %7632 = vmatprep.subr.bf16.mxu1 %v15221_v55 }
 0x7e1   : > { %7592 = vmatpush1.bf16.msra.mxu0 %v15224_v49  ;;  %7633 = vmatpush1.bf16.msra.mxu1 %v15228_v44 }
 0x7e2   : > { %7593 = vmatprep.subr.bf16.mxu0 %v15235_v28  ;;  %7634 = vmatprep.subr.bf16.mxu1 %v15244_v40 }
 0x7e5   : > { %7594 = vmatpush1.bf16.msra.mxu0 %v15238_v24  ;;  %7635 = vmatpush1.bf16.msra.mxu1 %v15242_v32 }
 0x7e6   : > { %7595 = vmatprep.subr.bf16.mxu0 %v15251_v6  ;;  %7636 = vmatprep.subr.bf16.mxu1 %v15259_v60 }
 0x7e9   : > { %7596 = vmatpush1.bf16.msra.mxu0 %v15255_v47  ;;  %7637 = vmatpush1.bf16.msra.mxu1 %v15257_v52 }
 0x7ea   : > { %7597 = vmatprep.subr.bf16.mxu0 %v15267_v29  ;;  %7638 = vmatprep.subr.bf16.mxu1 %v15275_v46 }
 0x7ed   : > { %7598 = vmatpush1.bf16.msra.mxu0 %v15271_v59  ;;  %7639 = vmatpush1.bf16.msra.mxu1 %v15273_v58  ;;  %v5802_v58 = vld [vmem:[#allocation3 + $0xd8] sm:$0xff] }
 0x7ee   : > { %7599 = vmatprep.subr.bf16.mxu0 %v15283_v18  ;;  %7640 = vmatprep.subr.bf16.mxu1 %v15291_v53  ;;  %v5799_v18 = vld [vmem:[#allocation3 + $0xc0] sm:$0xff] }
 0x7f1   : > { %7600 = vmatpush1.bf16.msra.mxu0 %v15287_v33  ;;  %7641 = vmatpush1.bf16.msra.mxu1 %v15289_v17  ;;  %v6929_v17 = vld [vmem:[%s13312_s21 + $0x3c0] sm:$0xff]  ;;  %v15338_v33 = vcombine.low %v6921_v42, %v6925_v34 }
 0x7f2   : > { %7601 = vmatprep.subr.bf16.mxu0 %v15299_v38  ;;  %7642 = vmatprep.subr.bf16.mxu1 %v15307_v48  ;;  %v6922_v48 = vld [vmem:[%s13312_s21 + $0x388] sm:$0xff]  ;;  %v15343_v0 = vcombine.high %v6929_v17, %v6933_v30 }
 0x7f3   : > { %v6926_v38 = vld [vmem:[%s13312_s21 + $0x3a8] sm:$0xff]  ;;  %17228 = vst [vmem:[#allocation38_spill] sm:$0xff] %v15338_v33 }
 0x7f4   : > { %v15333_v13 = vcombine.high %v6922_v48, %v6926_v38  ;;  %17229 = vst [vmem:[#allocation40_spill] sm:$0xff] %v15343_v0 }
 0x7f5   : > { %7602 = vmatpush1.bf16.msra.mxu0 %v15303_v4  ;;  %7643 = vmatpush1.bf16.msra.mxu1 %v15305_v62  ;;  %v15327_v4 = vcombine.high %v6921_v42, %v6925_v34  ;;  %v6930_v62 = vld [vmem:[%s13312_s21 + $0x3c8] sm:$0xff]  ;;  %v15352_v42 = vcombine.low %v6929_v17, %v6933_v30 }
 0x7f6   : > { %7603 = vmatprep.subr.bf16.mxu0 %v15317_v21  ;;  %17227 = vst [vmem:[#allocation37_spill] sm:$0xff] %v15333_v13  ;;  %7644 = vmatprep.subr.bf16.mxu1 %v15325_v37  ;;  %v15346_v21 = vcombine.low %v6922_v48, %v6926_v38  ;;  %v15349_v37 = vcombine.high %v6930_v62, %v6934_v22  ;;  %v6811_v38 = vld [vmem:[%s13312_s21 + $0x10] sm:$0xff] }
 0x7f7   : > { %17226 = vst [vmem:[#allocation36_spill] sm:$0xff] %v15327_v4  ;;  %17232 = vst [vmem:[#allocation42_spill] sm:$0xff] %v15352_v42  ;;  %v15356_v34 = vcombine.low %v6930_v62, %v6934_v22  ;;  %v6815_v48 = vld [vmem:[%s13312_s21 + $0x30] sm:$0xff] }
 0x7f8   : > { %17230 = vst [vmem:[#allocation39_spill] sm:$0xff] %v15346_v21  ;;  %17231 = vst [vmem:[#allocation41_spill] sm:$0xff] %v15349_v37  ;;  %v15367_v17 = vcombine.low %v6811_v38, %v6815_v48 }
 0x7f9   : > { %7604 = vmatpush1.bf16.msra.mxu0 %v15315_v3  ;;  %7645 = vmatpush1.bf16.msra.mxu1 %v15323_v11  ;;  %17233 = vst [vmem:[#allocation43_spill] sm:$0xff] %v15356_v34  ;;  %v6816_v11 = vld [vmem:[%s13312_s21 + $0x38] sm:$0xff] }
 0x7fa   : > { %7605 = vmatprep.subr.bf16.mxu0 %v15327_v4  ;;  %7646 = vmatprep.subr.bf16.mxu1 %v15333_v13  ;;  %v6812_v4 = vld [vmem:[%s13312_s21 + $0x18] sm:$0xff]  ;;  %v15363_v13 = vcombine.high %v6811_v38, %v6815_v48  ;;  %v5800_v38 = vld [vmem:[#allocation3 + $0xc8] sm:$0xff] }
 0x7fb   : > { %v15369_v30 = vcombine.low %v6812_v4, %v6816_v11 }
 0x7fc   : > { %17234 = vst [vmem:[#allocation44_spill] sm:$0xff] %v15363_v13 }
 0x7fd   : > { %7606 = vmatpush1.bf16.msra.mxu0 %v15338_v33  ;;  %7647 = vmatpush1.bf16.msra.mxu1 %v15346_v21 }
 0x7fe   : > { %7607 = vmatprep.subr.bf16.mxu0 %v15343_v0  ;;  %7648 = vmatprep.subr.bf16.mxu1 %v15349_v37  ;;  %v15371_v0 = vcombine.high %v6812_v4, %v6816_v11 }
 0x800   : > { %17235 = vst [vmem:[#allocation45_spill] sm:$0xff] %v15371_v0 }
 0x801   : > { %7608 = vmatpush1.bf16.msra.mxu0 %v15352_v42  ;;  %7649 = vmatpush1.bf16.msra.mxu1 %v15356_v34  ;;  %v5801_v34 = vld [vmem:[#allocation3 + $0xd0] sm:$0xff] }
 0x802   : > { %7659 = vmatprep.subr.bf16.mxu0 %v15363_v13  ;;  %7700 = vmatprep.subr.bf16.mxu1 %v15371_v0 }
 0x857   : > { %v6611_v62 = vpop.f32.mrb[24].mxu0  ;;  %v6652_v22 = vpop.f32.mrb[24].mxu1 }
 0x858   : > { %v6613_v42 = vpop.f32.mrb[25].mxu0  ;;  %v6654_v37 = vpop.f32.mrb[25].mxu1  ;;  %v6741_v48 = vadd.f32 %v6611_v62, %v5799_v18  ;;  %v6743_v59 = vadd.f32 %v6652_v22, %v5801_v34  ;;  %v5803_v62 = vld [vmem:[#allocation3 + $0xe0] sm:$0xff]  ;;  %v5805_v34 = vld [vmem:[#allocation3 + $0xf0] sm:$0xff] }
 0x859   : > { %v6615_v21 = vpop.f32.mrb[26].mxu0  ;;  %v6656_v33 = vpop.f32.mrb[26].mxu1  ;;  %v6742_v4 = vadd.f32 %v6613_v42, %v5800_v38  ;;  %v6744_v11 = vadd.f32 %v6654_v37, %v5802_v58  ;;  %v5804_v58 = vld [vmem:[#allocation3 + $0xe8] sm:$0xff]  ;;  %v5806_v37 = vld [vmem:[#allocation3 + $0xf8] sm:$0xff] }
 0x85a   : > { %v6616_v3 = vpop.f32.mrb[27].mxu0  ;;  %v6657_v53 = vpop.f32.mrb[27].mxu1  ;;  %v11831_v46 = vmul.f32 -1.442695, %v6741_v48  ;;  %v11833_v13 = vmul.f32 -1.442695, %v6743_v59 }
 0x85b   : > { %v11832_v29 = vmul.f32 -1.442695, %v6742_v4  ;;  %v11834_v0 = vmul.f32 -1.442695, %v6744_v11 }
 0x85c   : > { %12643 = vpow2.f32 %v11831_v46 }
 0x85d   : > { %12645 = vpow2.f32 %v11833_v13 }
 0x85e   : > { %12647 = vpow2.f32 %v11832_v29 }
 0x85f   : > { %12649 = vpow2.f32 %v11834_v0 }
 0x866   : > { %v12644_v21 = vpop.eup %12643 }
 0x867   : > { %v12646_v33 = vpop.eup %12645  ;;  %v6767_v52 = vadd.f32 1.0, %v12644_v21 }
 0x868   : > { %v12648_v3 = vpop.eup %12647  ;;  %v6769_v47 = vadd.f32 1.0, %v12646_v33 }
 0x869   : > { %v12650_v53 = vpop.eup %12649  ;;  %v6768_v60 = vadd.f32 1.0, %v12648_v3  ;;  %12651 = vrcp.f32 %v6767_v52 }
 0x86a   : > { %v6770_v18 = vadd.f32 1.0, %v12650_v53  ;;  %12653 = vrcp.f32 %v6769_v47 }
 0x86b   : > { %12655 = vrcp.f32 %v6768_v60 }
 0x86c   : > { %12657 = vrcp.f32 %v6770_v18 }
 0x873   : > { %v12652_v47 = vpop.eup %12651 }
 0x874   : > { %v12654_v3 = vpop.eup %12653 }
 0x875   : > { %v12656_v60 = vpop.eup %12655  ;;  %v6787_v18 = vmul.f32 %v12654_v3, %v15031_v50 }
 0x876   : > { %v12658_v53 = vpop.eup %12657 }
 0x897   : > { %v6693_v59 = vpop.f32.mrb[28].mxu0  ;;  %v6734_v42 = vpop.f32.mrb[28].mxu1 }
 0x898   : > { %v6745_v46 = vadd.f32 %v6693_v59, %v5803_v62  ;;  %v6747_v29 = vadd.f32 %v6734_v42, %v5805_v34  ;;  %v6695_v13 = vpop.f32.mrb[29].mxu0  ;;  %v6736_v0 = vpop.f32.mrb[29].mxu1  ;;  %v6788_v59 = vmul.f32 %v12658_v53, %v15033_v10  ;;  %v6827_v53 = vld [vmem:[%s13312_s21 + $0x90] sm:$0xff] }
 0x899   : > { %v6746_v22 = vadd.f32 %v6695_v13, %v5804_v58  ;;  %v6748_v38 = vadd.f32 %v6736_v0, %v5806_v37  ;;  %v6697_v48 = vpop.f32.mrb[30].mxu0  ;;  %v6738_v4 = vpop.f32.mrb[30].mxu1 }
 0x89a   : > { %v11835_v11 = vmul.f32 -1.442695, %v6745_v46  ;;  %12659 = vtanh.f32 %v6747_v29  ;;  %v6698_v21 = vpop.f32.mrb[31].mxu0  ;;  %v6739_v33 = vpop.f32.mrb[31].mxu1 }
 0x89b   : > { %v11836_v52 = vmul.f32 -1.442695, %v6746_v22  ;;  %12661 = vtanh.f32 %v6748_v38  ;;  %v6819_v21 = vld [vmem:[%s13312_s21 + $0x50] sm:$0xff] }
 0x89c   : > { %12663 = vpow2.f32 %v11835_v11  ;;  %v6823_v33 = vld [vmem:[%s13312_s21 + $0x70] sm:$0xff] }
 0x89d   : > { %12665 = vpow2.f32 %v11836_v52  ;;  %v6820_v52 = vld [vmem:[%s13312_s21 + $0x58] sm:$0xff] }
 0x8a4   : > { %v12660_v62 = vpop.eup %12659 }
 0x8a5   : > { %v12662_v34 = vpop.eup %12661  ;;  %v6789_v58 = vmul.f32 %v12660_v62, %v12652_v47  ;;  %v6824_v47 = vld [vmem:[%s13312_s21 + $0x78] sm:$0xff]  ;;  %v15390_v62 = vcombine.high %v6819_v21, %v6823_v33 }
 0x8a6   : > { %v12664_v37 = vpop.eup %12663  ;;  %v6790_v42 = vmul.f32 %v12662_v34, %v12656_v60  ;;  %v15392_v34 = vcombine.high %v6820_v52, %v6824_v47 }
 0x8a7   : > { %v12666_v46 = vpop.eup %12665  ;;  %v6771_v29 = vadd.f32 1.0, %v12664_v37  ;;  %v15377_v13 = vadd.f32 %v6789_v58, %v6787_v18  ;;  %v6831_v18 = vld [vmem:[%s13312_s21 + $0xb0] sm:$0xff]  ;;  %v6828_v58 = vld [vmem:[%s13312_s21 + $0x98] sm:$0xff] }
 0x8a8   : > { %v6772_v0 = vadd.f32 1.0, %v12666_v46  ;;  %v15379_v22 = vadd.f32 %v6790_v42, %v6788_v59  ;;  %v6832_v37 = vld [vmem:[%s13312_s21 + $0xb8] sm:$0xff]  ;;  %v15401_v59 = vcombine.low %v6819_v21, %v6823_v33  ;;  %v15403_v42 = vcombine.low %v6820_v52, %v6824_v47  ;;  %v6843_v33 = vld [vmem:[%s13312_s21 + $0x110] sm:$0xff] }
 0x8a9   : > { %12667 = vrcp.f32 %v6771_v29  ;;  %v15405_v46 = vcombine.high %v6827_v53, %v6831_v18  ;;  %v15407_v29 = vcombine.high %v6828_v58, %v6832_v37  ;;  %v6847_v52 = vld [vmem:[%s13312_s21 + $0x130] sm:$0xff]  ;;  %v6844_v47 = vld [vmem:[%s13312_s21 + $0x118] sm:$0xff] }
 0x8aa   : > { %12669 = vtanh.f32 %v15377_v13  ;;  %17236 = vst [vmem:[#allocation46_spill] sm:$0xff] %v15401_v59  ;;  %17237 = vst [vmem:[#allocation47_spill] sm:$0xff] %v15403_v42 }
 0x8ab   : > { %12671 = vrcp.f32 %v6772_v0  ;;  %17238 = vst [vmem:[#allocation48_spill] sm:$0xff] %v15405_v46  ;;  %17239 = vst [vmem:[#allocation49_spill] sm:$0xff] %v15407_v29  ;;  %v6835_v0 = vld [vmem:[%s13312_s21 + $0xd0] sm:$0xff] }
 0x8ac   : > { %12673 = vtanh.f32 %v15379_v22 }
 0x8b3   : > { %v12668_v50 = vpop.eup %12667 }
 0x8b4   : > { %v12670_v10 = vpop.eup %12669 }
 0x8b5   : > { %v12672_v38 = vpop.eup %12671  ;;  %v6795_v48 = vmul.f32 %v12670_v10, %v12668_v50  ;;  %v6839_v50 = vld [vmem:[%s13312_s21 + $0xf0] sm:$0xff]  ;;  %v6836_v10 = vld [vmem:[%s13312_s21 + $0xd8] sm:$0xff] }
 0x8b6   : > { %v12674_v4 = vpop.eup %12673 }
 0x8b7   : > { %v6796_v11 = vmul.f32 %v12674_v4, %v12672_v38  ;;  %6797 = vst [vmem:[#allocation2 + $0x30] sm:$0xff] %v6795_v48  ;;  %v15387_v60 = vpack.c.bf16 %v6795_v48, %v6795_v48  ;;  %v6840_v38 = vld [vmem:[%s13312_s21 + $0xf8] sm:$0xff]  ;;  %v15417_v48 = vcombine.low %v6827_v53, %v6831_v18  ;;  %v15419_v4 = vcombine.low %v6828_v58, %v6832_v37 }
 0x8b8   : > { %v15425_v21 = vcombine.high %v6836_v10, %v6840_v38  ;;  %v15433_v53 = vcombine.low %v6835_v0, %v6839_v50  ;;  %v15435_v18 = vcombine.low %v6836_v10, %v6840_v38  ;;  %v15439_v58 = vcombine.high %v6843_v33, %v6847_v52 }
 0x8b9   : > { %6798 = vst [vmem:[#allocation2 + $0x38] sm:$0xff] %v6796_v11  ;;  %v6808_v3 = vpack.c.bf16 %v6796_v11, %v6796_v11  ;;  %17240 = vst [vmem:[#allocation50_spill] sm:$0xff] %v15417_v48  ;;  %v15423_v11 = vcombine.high %v6835_v0, %v6839_v50  ;;  %v15449_v0 = vcombine.low %v6843_v33, %v6847_v52 }
 0x8ba   : > { %17241 = vst [vmem:[#allocation51_spill] sm:$0xff] %v15419_v4  ;;  %17243 = vst [vmem:[#allocation53_spill] sm:$0xff] %v15425_v21 }
 0x8bb   : > { %7609 = vmatprep.mubr.bf16.mxu0 %v6808_v3  ;;  %7650 = vmatprep.mubr.bf16.mxu1 %v6808_v3  ;;  %17242 = vst [vmem:[#allocation52_spill] sm:$0xff] %v15423_v11  ;;  %17244 = vst [vmem:[#allocation54_spill] sm:$0xff] %v15433_v53 }
 0x8bc   : > { %7610 = vmatmul.mubr.bf16.vlgmr.msra.gmra.mrb[32].mxu0 %v15387_v60  ;;  %7651 = vmatmul.mubr.bf16.vlgmr.msra.gmra.mrb[32].mxu1 %v15387_v60  ;;  %17245 = vst [vmem:[#allocation55_spill] sm:$0xff] %v15435_v18  ;;  %17246 = vst [vmem:[#allocation56_spill] sm:$0xff] %v15439_v58 }
 0x8bd   : > { %7660 = vmatpush1.bf16.msra.mxu0 %v15367_v17  ;;  %7701 = vmatpush1.bf16.msra.mxu1 %v15369_v30  ;;  %17248 = vst [vmem:[#allocation58_spill] sm:$0xff] %v15449_v0 }
 0x8be   : > { %7691 = vmatprep.mubr.bf16.mxu0 %v6808_v3  ;;  %7732 = vmatprep.mubr.bf16.mxu1 %v6808_v3  ;;  %v6848_v3 = vld [vmem:[%s13312_s21 + $0x138] sm:$0xff] }
 0x8bf   : > { %7661 = vmatprep.subr.bf16.mxu0 %v15390_v62  ;;  %7702 = vmatprep.subr.bf16.mxu1 %v15392_v34  ;;  %v15441_v37 = vcombine.high %v6844_v47, %v6848_v3  ;;  %v15451_v50 = vcombine.low %v6844_v47, %v6848_v3 }
 0x8c1   : > { %7662 = vmatpush1.bf16.msra.mxu0 %v15401_v59  ;;  %7703 = vmatpush1.bf16.msra.mxu1 %v15403_v42  ;;  %17247 = vst [vmem:[#allocation57_spill] sm:$0xff] %v15441_v37  ;;  %17249 = vst [vmem:[#allocation59_spill] sm:$0xff] %v15451_v50  ;;  %v6932_v42 = vld [vmem:[%s13312_s21 + $0x3d8] sm:$0xff] }
 0x8c2   : > { %7663 = vmatprep.subr.bf16.mxu0 %v15405_v46  ;;  %7704 = vmatprep.subr.bf16.mxu1 %v15407_v29  ;;  %v6851_v29 = vld [vmem:[%s13312_s21 + $0x150] sm:$0xff]  ;;  %v6852_v46 = vld [vmem:[%s13312_s21 + $0x158] sm:$0xff] }
 0x8c3   : > { %v6936_v59 = vld [vmem:[%s13312_s21 + $0x3f8] sm:$0xff] }
 0x8c5   : > { %7664 = vmatpush1.bf16.msra.mxu0 %v15417_v48  ;;  %7705 = vmatpush1.bf16.msra.mxu1 %v15419_v4  ;;  %v6855_v48 = vld [vmem:[%s13312_s21 + $0x170] sm:$0xff]  ;;  %v6856_v4 = vld [vmem:[%s13312_s21 + $0x178] sm:$0xff] }
 0x8c6   : > { %7665 = vmatprep.subr.bf16.mxu0 %v15423_v11  ;;  %7706 = vmatprep.subr.bf16.mxu1 %v15425_v21  ;;  %v15455_v10 = vcombine.high %v6851_v29, %v6855_v48  ;;  %v15457_v38 = vcombine.high %v6852_v46, %v6856_v4  ;;  %v6859_v21 = vld [vmem:[%s13312_s21 + $0x190] sm:$0xff]  ;;  %v6860_v11 = vld [vmem:[%s13312_s21 + $0x198] sm:$0xff]  ;;  %v15465_v33 = vcombine.low %v6851_v29, %v6855_v48 }
 0x8c7   : > { %v15467_v52 = vcombine.low %v6852_v46, %v6856_v4 }
 0x8c8   : > { %17250 = vst [vmem:[#allocation60_spill] sm:$0xff] %v15455_v10  ;;  %17251 = vst [vmem:[#allocation61_spill] sm:$0xff] %v15457_v38 }
 0x8c9   : > { %7666 = vmatpush1.bf16.msra.mxu0 %v15433_v53  ;;  %7707 = vmatpush1.bf16.msra.mxu1 %v15435_v18  ;;  %v6863_v53 = vld [vmem:[%s13312_s21 + $0x1b0] sm:$0xff]  ;;  %v6864_v18 = vld [vmem:[%s13312_s21 + $0x1b8] sm:$0xff]  ;;  %17252 = vst [vmem:[#allocation62_spill] sm:$0xff] %v15465_v33  ;;  %17253 = vst [vmem:[#allocation63_spill] sm:$0xff] %v15467_v52 }
 0x8ca   : > { %7667 = vmatprep.subr.bf16.mxu0 %v15439_v58  ;;  %7708 = vmatprep.subr.bf16.mxu1 %v15441_v37  ;;  %v15471_v47 = vcombine.high %v6859_v21, %v6863_v53  ;;  %v15473_v3 = vcombine.high %v6860_v11, %v6864_v18  ;;  %v6867_v37 = vld [vmem:[%s13312_s21 + $0x1d0] sm:$0xff]  ;;  %v6868_v58 = vld [vmem:[%s13312_s21 + $0x1d8] sm:$0xff]  ;;  %v15481_v46 = vcombine.low %v6859_v21, %v6863_v53 }
 0x8cb   : > { %v15483_v29 = vcombine.low %v6860_v11, %v6864_v18 }
 0x8cc   : > { %17254 = vst [vmem:[#allocation64_spill] sm:$0xff] %v15471_v47  ;;  %17255 = vst [vmem:[#allocation65_spill] sm:$0xff] %v15473_v3 }
 0x8cd   : > { %7668 = vmatpush1.bf16.msra.mxu0 %v15449_v0  ;;  %7709 = vmatpush1.bf16.msra.mxu1 %v15451_v50  ;;  %v6871_v0 = vld [vmem:[%s13312_s21 + $0x1f0] sm:$0xff]  ;;  %v6872_v50 = vld [vmem:[%s13312_s21 + $0x1f8] sm:$0xff]  ;;  %17256 = vst [vmem:[#allocation66_spill] sm:$0xff] %v15481_v46  ;;  %17257 = vst [vmem:[#allocation67_spill] sm:$0xff] %v15483_v29 }
 0x8ce   : > { %7669 = vmatprep.subr.bf16.mxu0 %v15455_v10  ;;  %7710 = vmatprep.subr.bf16.mxu1 %v15457_v38  ;;  %v15487_v48 = vcombine.high %v6867_v37, %v6871_v0  ;;  %v15489_v4 = vcombine.high %v6868_v58, %v6872_v50  ;;  %v6875_v38 = vld [vmem:[%s13312_s21 + $0x210] sm:$0xff]  ;;  %v6876_v10 = vld [vmem:[%s13312_s21 + $0x218] sm:$0xff]  ;;  %v15497_v11 = vcombine.low %v6867_v37, %v6871_v0 }
 0x8cf   : > { %v15499_v21 = vcombine.low %v6868_v58, %v6872_v50 }
 0x8d0   : > { %17258 = vst [vmem:[#allocation68_spill] sm:$0xff] %v15487_v48  ;;  %17259 = vst [vmem:[#allocation69_spill] sm:$0xff] %v15489_v4 }
 0x8d1   : > { %7670 = vmatpush1.bf16.msra.mxu0 %v15465_v33  ;;  %7711 = vmatpush1.bf16.msra.mxu1 %v15467_v52  ;;  %v6879_v33 = vld [vmem:[%s13312_s21 + $0x230] sm:$0xff]  ;;  %v6880_v52 = vld [vmem:[%s13312_s21 + $0x238] sm:$0xff]  ;;  %17260 = vst [vmem:[#allocation70_spill] sm:$0xff] %v15497_v11  ;;  %17261 = vst [vmem:[#allocation71_spill] sm:$0xff] %v15499_v21 }
 0x8d2   : > { %7671 = vmatprep.subr.bf16.mxu0 %v15471_v47  ;;  %7712 = vmatprep.subr.bf16.mxu1 %v15473_v3  ;;  %v15503_v53 = vcombine.high %v6875_v38, %v6879_v33  ;;  %v15505_v18 = vcombine.high %v6876_v10, %v6880_v52  ;;  %v6883_v3 = vld [vmem:[%s13312_s21 + $0x250] sm:$0xff]  ;;  %v6884_v47 = vld [vmem:[%s13312_s21 + $0x258] sm:$0xff]  ;;  %v15513_v58 = vcombine.low %v6875_v38, %v6879_v33 }
 0x8d3   : > { %v15515_v37 = vcombine.low %v6876_v10, %v6880_v52 }
 0x8d4   : > { %17262 = vst [vmem:[#allocation72_spill] sm:$0xff] %v15503_v53  ;;  %17263 = vst [vmem:[#allocation73_spill] sm:$0xff] %v15505_v18 }
 0x8d5   : > { %7672 = vmatpush1.bf16.msra.mxu0 %v15481_v46  ;;  %7713 = vmatpush1.bf16.msra.mxu1 %v15483_v29  ;;  %v6887_v46 = vld [vmem:[%s13312_s21 + $0x270] sm:$0xff]  ;;  %v6888_v29 = vld [vmem:[%s13312_s21 + $0x278] sm:$0xff]  ;;  %17264 = vst [vmem:[#allocation74_spill] sm:$0xff] %v15513_v58  ;;  %17265 = vst [vmem:[#allocation75_spill] sm:$0xff] %v15515_v37 }
 0x8d6   : > { %7673 = vmatprep.subr.bf16.mxu0 %v15487_v48  ;;  %7714 = vmatprep.subr.bf16.mxu1 %v15489_v4  ;;  %v15519_v0 = vcombine.high %v6883_v3, %v6887_v46  ;;  %v15521_v50 = vcombine.high %v6884_v47, %v6888_v29  ;;  %v6891_v4 = vld [vmem:[%s13312_s21 + $0x290] sm:$0xff]  ;;  %v6892_v48 = vld [vmem:[%s13312_s21 + $0x298] sm:$0xff]  ;;  %v15529_v10 = vcombine.low %v6883_v3, %v6887_v46 }
 0x8d7   : > { %v15531_v38 = vcombine.low %v6884_v47, %v6888_v29 }
 0x8d8   : > { %17266 = vst [vmem:[#allocation76_spill] sm:$0xff] %v15519_v0  ;;  %17267 = vst [vmem:[#allocation77_spill] sm:$0xff] %v15521_v50 }
 0x8d9   : > { %7674 = vmatpush1.bf16.msra.mxu0 %v15497_v11  ;;  %7715 = vmatpush1.bf16.msra.mxu1 %v15499_v21  ;;  %v6895_v11 = vld [vmem:[%s13312_s21 + $0x2b0] sm:$0xff]  ;;  %v6896_v21 = vld [vmem:[%s13312_s21 + $0x2b8] sm:$0xff]  ;;  %17268 = vst [vmem:[#allocation78_spill] sm:$0xff] %v15529_v10  ;;  %17269 = vst [vmem:[#allocation79_spill] sm:$0xff] %v15531_v38 }
 0x8da   : > { %7675 = vmatprep.subr.bf16.mxu0 %v15503_v53  ;;  %7716 = vmatprep.subr.bf16.mxu1 %v15505_v18  ;;  %v15535_v33 = vcombine.high %v6891_v4, %v6895_v11  ;;  %v15537_v52 = vcombine.high %v6892_v48, %v6896_v21  ;;  %v6899_v18 = vld [vmem:[%s13312_s21 + $0x2d0] sm:$0xff]  ;;  %v6900_v53 = vld [vmem:[%s13312_s21 + $0x2d8] sm:$0xff]  ;;  %v15545_v47 = vcombine.low %v6891_v4, %v6895_v11 }
 0x8db   : > { %v15547_v3 = vcombine.low %v6892_v48, %v6896_v21 }
 0x8dc   : > { %17270 = vst [vmem:[#allocation80_spill] sm:$0xff] %v15535_v33  ;;  %17271 = vst [vmem:[#allocation81_spill] sm:$0xff] %v15537_v52 }
 0x8dd   : > { %7676 = vmatpush1.bf16.msra.mxu0 %v15513_v58  ;;  %7717 = vmatpush1.bf16.msra.mxu1 %v15515_v37  ;;  %v6903_v58 = vld [vmem:[%s13312_s21 + $0x2f0] sm:$0xff]  ;;  %v6904_v37 = vld [vmem:[%s13312_s21 + $0x2f8] sm:$0xff]  ;;  %17272 = vst [vmem:[#allocation82_spill] sm:$0xff] %v15545_v47  ;;  %17273 = vst [vmem:[#allocation83_spill] sm:$0xff] %v15547_v3 }
 0x8de   : > { %7677 = vmatprep.subr.bf16.mxu0 %v15519_v0  ;;  %7718 = vmatprep.subr.bf16.mxu1 %v15521_v50  ;;  %v15551_v46 = vcombine.high %v6899_v18, %v6903_v58  ;;  %v15553_v29 = vcombine.high %v6900_v53, %v6904_v37  ;;  %v6907_v50 = vld [vmem:[%s13312_s21 + $0x310] sm:$0xff]  ;;  %v6908_v0 = vld [vmem:[%s13312_s21 + $0x318] sm:$0xff]  ;;  %v15561_v48 = vcombine.low %v6899_v18, %v6903_v58 }
 0x8df   : > { %v15563_v4 = vcombine.low %v6900_v53, %v6904_v37 }
 0x8e0   : > { %17274 = vst [vmem:[#allocation84_spill] sm:$0xff] %v15551_v46  ;;  %17275 = vst [vmem:[#allocation85_spill] sm:$0xff] %v15553_v29 }
 0x8e1   : > { %7678 = vmatpush1.bf16.msra.mxu0 %v15529_v10  ;;  %7719 = vmatpush1.bf16.msra.mxu1 %v15531_v38  ;;  %v6911_v10 = vld [vmem:[%s13312_s21 + $0x330] sm:$0xff]  ;;  %v6912_v38 = vld [vmem:[%s13312_s21 + $0x338] sm:$0xff]  ;;  %17276 = vst [vmem:[#allocation86_spill] sm:$0xff] %v15561_v48  ;;  %17277 = vst [vmem:[#allocation87_spill] sm:$0xff] %v15563_v4 }
 0x8e2   : > { %7679 = vmatprep.subr.bf16.mxu0 %v15535_v33  ;;  %7720 = vmatprep.subr.bf16.mxu1 %v15537_v52  ;;  %v15567_v11 = vcombine.high %v6907_v50, %v6911_v10  ;;  %v15569_v21 = vcombine.high %v6908_v0, %v6912_v38  ;;  %v6915_v52 = vld [vmem:[%s13312_s21 + $0x350] sm:$0xff]  ;;  %v6916_v33 = vld [vmem:[%s13312_s21 + $0x358] sm:$0xff]  ;;  %v15577_v53 = vcombine.low %v6907_v50, %v6911_v10 }
 0x8e3   : > { %v15579_v18 = vcombine.low %v6908_v0, %v6912_v38 }
 0x8e4   : > { %17278 = vst [vmem:[#allocation88_spill] sm:$0xff] %v15567_v11  ;;  %17279 = vst [vmem:[#allocation89_spill] sm:$0xff] %v15569_v21 }
 0x8e5   : > { %7680 = vmatpush1.bf16.msra.mxu0 %v15545_v47  ;;  %7721 = vmatpush1.bf16.msra.mxu1 %v15547_v3  ;;  %v6919_v47 = vld [vmem:[%s13312_s21 + $0x370] sm:$0xff]  ;;  %v6920_v3 = vld [vmem:[%s13312_s21 + $0x378] sm:$0xff] }
 0x8e6   : > { %7681 = vmatprep.subr.bf16.mxu0 %v15551_v46  ;;  %7722 = vmatprep.subr.bf16.mxu1 %v15553_v29  ;;  %v15583_v58 = vcombine.high %v6915_v52, %v6919_v47  ;;  %v15585_v37 = vcombine.high %v6916_v33, %v6920_v3  ;;  %v6923_v29 = vld [vmem:[%s13312_s21 + $0x390] sm:$0xff]  ;;  %v6924_v46 = vld [vmem:[%s13312_s21 + $0x398] sm:$0xff]  ;;  %v15593_v0 = vcombine.low %v6915_v52, %v6919_v47 }
 0x8e7   : > { %v15595_v50 = vcombine.low %v6916_v33, %v6920_v3  ;;  %v15617_v3 = vcombine.high %v6932_v42, %v6936_v59 }
 0x8e8   : > { %17280 = vst [vmem:[#allocation90_spill] sm:$0xff] %v15585_v37  ;;  %17281 = vst [vmem:[#allocation91_spill] sm:$0xff] %v15593_v0 }
 0x8e9   : > { %7682 = vmatpush1.bf16.msra.mxu0 %v15561_v48  ;;  %7723 = vmatpush1.bf16.msra.mxu1 %v15563_v4  ;;  %v6927_v48 = vld [vmem:[%s13312_s21 + $0x3b0] sm:$0xff]  ;;  %v6928_v4 = vld [vmem:[%s13312_s21 + $0x3b8] sm:$0xff] }
 0x8ea   : > { %7683 = vmatprep.subr.bf16.mxu0 %v15567_v11  ;;  %7724 = vmatprep.subr.bf16.mxu1 %v15569_v21  ;;  %v15599_v10 = vcombine.high %v6923_v29, %v6927_v48  ;;  %v15601_v38 = vcombine.high %v6924_v46, %v6928_v4  ;;  %v6931_v21 = vld [vmem:[%s13312_s21 + $0x3d0] sm:$0xff]  ;;  %v15609_v52 = vcombine.low %v6923_v29, %v6927_v48 }
 0x8eb   : > { %v6935_v11 = vld [vmem:[%s13312_s21 + $0x3f0] sm:$0xff]  ;;  %v15611_v33 = vcombine.low %v6924_v46, %v6928_v4 }
 0x8ec   : > { %v15615_v47 = vcombine.high %v6931_v21, %v6935_v11  ;;  %v6802_v29 = vld [vmem:[#allocation3 + $0x118] sm:$0xff] }
 0x8ed   : > { %7684 = vmatpush1.bf16.msra.mxu0 %v15577_v53  ;;  %7725 = vmatpush1.bf16.msra.mxu1 %v15579_v18 }
 0x8ee   : > { %7685 = vmatprep.subr.bf16.mxu0 %v15583_v58  ;;  %7726 = vmatprep.subr.bf16.mxu1 %v15585_v37  ;;  %v15621_v37 = vcombine.low %v6931_v21, %v6935_v11 }
 0x8f1   : > { %7686 = vmatpush1.bf16.msra.mxu0 %v15593_v0  ;;  %7727 = vmatpush1.bf16.msra.mxu1 %v15595_v50  ;;  %v15623_v0 = vcombine.low %v6932_v42, %v6936_v59  ;;  %v6801_v59 = vld [vmem:[#allocation3 + $0x110] sm:$0xff]  ;;  %v6800_v42 = vld [vmem:[#allocation3 + $0x108] sm:$0xff] }
 0x8f2   : > { %7687 = vmatprep.subr.bf16.mxu0 %v15599_v10  ;;  %7728 = vmatprep.subr.bf16.mxu1 %v15601_v38 }
 0x8f5   : > { %7688 = vmatpush1.bf16.msra.mxu0 %v15609_v52  ;;  %7729 = vmatpush1.bf16.msra.mxu1 %v15611_v33 }
 0x8f6   : > { %7689 = vmatprep.subr.bf16.mxu0 %v15615_v47  ;;  %7730 = vmatprep.subr.bf16.mxu1 %v15617_v3 }
 0x8f9   : > { %7690 = vmatpush1.bf16.msra.mxu0 %v15621_v37  ;;  %7731 = vmatpush1.bf16.msra.mxu1 %v15623_v0 }
 0x8fa   : > { %8577 = vmatprep.subr.bf16.mxu0 %v15110_v8  ;;  %8618 = vmatprep.subr.bf16.mxu1 %v15117_v45  ;;  %v17283_v8 = vld [vmem:[#allocation19_spill] sm:$0xff]  ;;  %v17285_v45 = vld [vmem:[#allocation20_spill] sm:$0xff] }
 0x8fc   : > { %7692 = vmatmul.mubr.bf16.vlgmr.msra.gmra.mrb[36].mxu0 %v15387_v60  ;;  %7733 = vmatmul.mubr.bf16.vlgmr.msra.gmra.mrb[36].mxu1 %v15387_v60  ;;  %v6799_v60 = vld [vmem:[#allocation3 + $0x100] sm:$0xff] }
 0x8fd   : > { %8578 = vmatpush1.bf16.msra.mxu0 %v15108_v26  ;;  %8619 = vmatpush1.bf16.msra.mxu1 %v15115_v19  ;;  %v17282_v26 = vld [vmem:[#allocation18_spill] sm:$0xff]  ;;  %v17284_v19 = vld [vmem:[#allocation17_spill] sm:$0xff] }
 0x8fe   : > { %8579 = vmatprep.subr.bf16.mxu0 %v15119_v57  ;;  %8620 = vmatprep.subr.bf16.mxu1 %v15125_v35  ;;  %v17286_v57 = vld [vmem:[#allocation22_spill] sm:$0xff]  ;;  %v17287_v35 = vld [vmem:[#allocation23_spill] sm:$0xff] }
 0x901   : > { %8580 = vmatpush1.bf16.msra.mxu0 %v15132_v54  ;;  %8621 = vmatpush1.bf16.msra.mxu1 %v15136_v23  ;;  %v17288_v54 = vld [vmem:[#allocation21_spill] sm:$0xff]  ;;  %v17289_v23 = vld [vmem:[#allocation24_spill] sm:$0xff] }
 0x902   : > { %8581 = vmatprep.subr.bf16.mxu0 %v15138_v56  ;;  %8622 = vmatprep.subr.bf16.mxu1 %v15141_v36  ;;  %v17290_v56 = vld [vmem:[#allocation26_spill] sm:$0xff]  ;;  %v17291_v36 = vld [vmem:[#allocation27_spill] sm:$0xff] }
 0x905   : > { %8582 = vmatpush1.bf16.msra.mxu0 %v15148_v9  ;;  %8623 = vmatpush1.bf16.msra.mxu1 %v15152_v20  ;;  %v17292_v9 = vld [vmem:[#allocation25_spill] sm:$0xff]  ;;  %v17293_v20 = vld [vmem:[#allocation28_spill] sm:$0xff] }
 0x906   : > { %8583 = vmatprep.subr.bf16.mxu0 %v15154_v41  ;;  %8624 = vmatprep.subr.bf16.mxu1 %v15157_v51  ;;  %v17294_v41 = vld [vmem:[#allocation30_spill] sm:$0xff]  ;;  %v17295_v51 = vld [vmem:[#allocation31_spill] sm:$0xff] }
 0x909   : > { %8584 = vmatpush1.bf16.msra.mxu0 %v15164_v12  ;;  %8625 = vmatpush1.bf16.msra.mxu1 %v15168_v15  ;;  %v17296_v12 = vld [vmem:[#allocation29_spill] sm:$0xff]  ;;  %v17297_v15 = vld [vmem:[#allocation35_spill] sm:$0xff] }
 0x90a   : > { %8585 = vmatprep.subr.bf16.mxu0 %v15170_v16  ;;  %8626 = vmatprep.subr.bf16.mxu1 %v15173_v25  ;;  %v17298_v16 = vld [vmem:[#allocation34_spill] sm:$0xff]  ;;  %v17299_v25 = vld [vmem:[#allocation33_spill] sm:$0xff] }
 0x90d   : > { %8586 = vmatpush1.bf16.msra.mxu0 %v15180_v1  ;;  %8627 = vmatpush1.bf16.msra.mxu1 %v15184_v2  ;;  %v17300_v1 = vld [vmem:[#allocation32_spill] sm:$0xff] }
 0x90e   : > { %8587 = vmatprep.subr.bf16.mxu0 %v15186_v14  ;;  %8628 = vmatprep.subr.bf16.mxu1 %v15189_v27  ;;  %v17301_v2 = vld [vmem:[#allocation36_spill] sm:$0xff]  ;;  %v17302_v14 = vld [vmem:[#allocation37_spill] sm:$0xff]  ;;  %v17303_v27 = vld [vmem:[#allocation38_spill] sm:$0xff] }
 0x911   : > { %8588 = vmatpush1.bf16.msra.mxu0 %v15196_v31  ;;  %8629 = vmatpush1.bf16.msra.mxu1 %v15200_v61  ;;  %v17304_v31 = vld [vmem:[#allocation39_spill] sm:$0xff]  ;;  %v17305_v61 = vld [vmem:[#allocation40_spill] sm:$0xff] }
 0x912   : > { %8589 = vmatprep.subr.bf16.mxu0 %v15202_v43  ;;  %8630 = vmatprep.subr.bf16.mxu1 %v15205_v7  ;;  %v17306_v43 = vld [vmem:[#allocation41_spill] sm:$0xff]  ;;  %v17307_v7 = vld [vmem:[#allocation42_spill] sm:$0xff] }
 0x915   : > { %8590 = vmatpush1.bf16.msra.mxu0 %v15212_v39  ;;  %8631 = vmatpush1.bf16.msra.mxu1 %v15216_v63  ;;  %v17308_v39 = vld [vmem:[#allocation43_spill] sm:$0xff]  ;;  %v17309_v63 = vld [vmem:[#allocation44_spill] sm:$0xff] }
 0x916   : > { %8591 = vmatprep.subr.bf16.mxu0 %v15218_v5  ;;  %8632 = vmatprep.subr.bf16.mxu1 %v15221_v55  ;;  %v17310_v5 = vld [vmem:[#allocation45_spill] sm:$0xff] }
 0x919   : > { %8592 = vmatpush1.bf16.msra.mxu0 %v15224_v49  ;;  %8633 = vmatpush1.bf16.msra.mxu1 %v15228_v44 }
 0x91a   : > { %8593 = vmatprep.subr.bf16.mxu0 %v15235_v28  ;;  %8634 = vmatprep.subr.bf16.mxu1 %v15244_v40 }
 0x91d   : > { %8594 = vmatpush1.bf16.msra.mxu0 %v15238_v24  ;;  %8635 = vmatpush1.bf16.msra.mxu1 %v15242_v32 }
 0x91e   : > { %8595 = vmatprep.subr.bf16.mxu0 %v15251_v6  ;;  %8636 = vmatprep.subr.bf16.mxu1 %v17282_v26 }
 0x921   : > { %8596 = vmatpush1.bf16.msra.mxu0 %v17283_v8  ;;  %8637 = vmatpush1.bf16.msra.mxu1 %v17284_v19 }
 0x922   : > { %8597 = vmatprep.subr.bf16.mxu0 %v17285_v45  ;;  %8638 = vmatprep.subr.bf16.mxu1 %v17286_v57 }
 0x925   : > { %8598 = vmatpush1.bf16.msra.mxu0 %v17287_v35  ;;  %8639 = vmatpush1.bf16.msra.mxu1 %v17288_v54 }
 0x926   : > { %8599 = vmatprep.subr.bf16.mxu0 %v17289_v23  ;;  %8640 = vmatprep.subr.bf16.mxu1 %v17290_v56 }
 0x929   : > { %8600 = vmatpush1.bf16.msra.mxu0 %v17291_v36  ;;  %8641 = vmatpush1.bf16.msra.mxu1 %v17292_v9 }
 0x92a   : > { %8601 = vmatprep.subr.bf16.mxu0 %v17293_v20  ;;  %8642 = vmatprep.subr.bf16.mxu1 %v17294_v41  ;;  %v6803_v20 = vld [vmem:[#allocation3 + $0x120] sm:$0xff]  ;;  %v6805_v41 = vld [vmem:[#allocation3 + $0x130] sm:$0xff] }
 0x92d   : > { %8602 = vmatpush1.bf16.msra.mxu0 %v17295_v51  ;;  %8643 = vmatpush1.bf16.msra.mxu1 %v17296_v12  ;;  %v6804_v51 = vld [vmem:[#allocation3 + $0x128] sm:$0xff]  ;;  %v6806_v12 = vld [vmem:[#allocation3 + $0x138] sm:$0xff] }
 0x92e   : > { %8603 = vmatprep.subr.bf16.mxu0 %v17297_v15  ;;  %8644 = vmatprep.subr.bf16.mxu1 %v17298_v16 }
 0x931   : > { %8604 = vmatpush1.bf16.msra.mxu0 %v17299_v25  ;;  %8645 = vmatpush1.bf16.msra.mxu1 %v17300_v1 }
 0x932   : > { %8605 = vmatprep.subr.bf16.mxu0 %v17301_v2  ;;  %8646 = vmatprep.subr.bf16.mxu1 %v17302_v14 }
 0x935   : > { %8606 = vmatpush1.bf16.msra.mxu0 %v17303_v27  ;;  %8647 = vmatpush1.bf16.msra.mxu1 %v17304_v31 }
 0x936   : > { %8607 = vmatprep.subr.bf16.mxu0 %v17305_v61  ;;  %8648 = vmatprep.subr.bf16.mxu1 %v17306_v43 }
 0x939   : > { %8608 = vmatpush1.bf16.msra.mxu0 %v17307_v7  ;;  %8649 = vmatpush1.bf16.msra.mxu1 %v17308_v39 }
 0x93a   : > { %8659 = vmatprep.subr.bf16.mxu0 %v17309_v63  ;;  %8700 = vmatprep.subr.bf16.mxu1 %v17310_v5 }
 0x98f   : > { %v7611_v55 = vpop.f32.mrb[32].mxu0  ;;  %v7652_v49 = vpop.f32.mrb[32].mxu1 }
 0x990   : > { %v7613_v44 = vpop.f32.mrb[33].mxu0  ;;  %v7654_v28 = vpop.f32.mrb[33].mxu1  ;;  %v7741_v46 = vadd.f32 %v7611_v55, %v6799_v60  ;;  %v7743_v48 = vadd.f32 %v7652_v49, %v6801_v59 }
 0x991   : > { %v7615_v24 = vpop.f32.mrb[34].mxu0  ;;  %v7656_v32 = vpop.f32.mrb[34].mxu1  ;;  %v7742_v4 = vadd.f32 %v7613_v44, %v6800_v42  ;;  %v7744_v11 = vadd.f32 %v7654_v28, %v6802_v29 }
 0x992   : > { %v7616_v40 = vpop.f32.mrb[35].mxu0  ;;  %v7657_v6 = vpop.f32.mrb[35].mxu1  ;;  %v11965_v21 = vmul.f32 -1.442695, %v7741_v46  ;;  %v11967_v26 = vmul.f32 -1.442695, %v7743_v48 }
 0x993   : > { %v11966_v8 = vmul.f32 -1.442695, %v7742_v4  ;;  %v11968_v19 = vmul.f32 -1.442695, %v7744_v11 }
 0x994   : > { %12675 = vpow2.f32 %v11965_v21 }
 0x995   : > { %12677 = vpow2.f32 %v11967_v26 }
 0x996   : > { %12679 = vpow2.f32 %v11966_v8 }
 0x997   : > { %12681 = vpow2.f32 %v11968_v19 }
 0x99e   : > { %v12676_v45 = vpop.eup %12675 }
 0x99f   : > { %v12678_v57 = vpop.eup %12677  ;;  %v7767_v23 = vadd.f32 1.0, %v12676_v45 }
 0x9a0   : > { %v12680_v35 = vpop.eup %12679  ;;  %v7769_v56 = vadd.f32 1.0, %v12678_v57 }
 0x9a1   : > { %v12682_v54 = vpop.eup %12681  ;;  %v7768_v36 = vadd.f32 1.0, %v12680_v35  ;;  %12683 = vrcp.f32 %v7767_v23  ;;  %v17311_v35 = vld [vmem:[#allocation46_spill] sm:$0xff]  ;;  %v17313_v23 = vld [vmem:[#allocation48_spill] sm:$0xff] }
 0x9a2   : > { %v7770_v9 = vadd.f32 1.0, %v12682_v54  ;;  %12685 = vrcp.f32 %v7769_v56  ;;  %v17312_v54 = vld [vmem:[#allocation47_spill] sm:$0xff]  ;;  %v17314_v56 = vld [vmem:[#allocation49_spill] sm:$0xff] }
 0x9a3   : > { %12687 = vrcp.f32 %v7768_v36  ;;  %v17315_v36 = vld [vmem:[#allocation50_spill] sm:$0xff] }
 0x9a4   : > { %12689 = vrcp.f32 %v7770_v9  ;;  %v17316_v9 = vld [vmem:[#allocation51_spill] sm:$0xff] }
 0x9ab   : > { %v12684_v55 = vpop.eup %12683 }
 0x9ac   : > { %v12686_v49 = vpop.eup %12685 }
 0x9ad   : > { %v12688_v44 = vpop.eup %12687  ;;  %v7787_v40 = vmul.f32 %v12686_v49, %v15377_v13  ;;  %v17340_v49 = vld [vmem:[#allocation75_spill] sm:$0xff] }
 0x9ae   : > { %v12690_v28 = vpop.eup %12689 }
 0x9af   : > { %v7788_v59 = vmul.f32 %v12690_v28, %v15379_v22  ;;  %v17342_v28 = vld [vmem:[#allocation77_spill] sm:$0xff] }
 0x9cf   : > { %v7693_v15 = vpop.f32.mrb[36].mxu0  ;;  %v7734_v16 = vpop.f32.mrb[36].mxu1 }
 0x9d0   : > { %v7745_v25 = vadd.f32 %v7693_v15, %v6803_v20  ;;  %v7747_v1 = vadd.f32 %v7734_v16, %v6805_v41  ;;  %v7695_v2 = vpop.f32.mrb[37].mxu0  ;;  %v7736_v14 = vpop.f32.mrb[37].mxu1  ;;  %v17319_v20 = vld [vmem:[#allocation54_spill] sm:$0xff]  ;;  %v17322_v41 = vld [vmem:[#allocation57_spill] sm:$0xff]  ;;  %v17325_v15 = vld [vmem:[#allocation60_spill] sm:$0xff] }
 0x9d1   : > { %v7746_v27 = vadd.f32 %v7695_v2, %v6804_v51  ;;  %v7748_v31 = vadd.f32 %v7736_v14, %v6806_v12  ;;  %v7697_v61 = vpop.f32.mrb[38].mxu0  ;;  %v7738_v43 = vpop.f32.mrb[38].mxu1  ;;  %v17323_v51 = vld [vmem:[#allocation58_spill] sm:$0xff]  ;;  %v17324_v12 = vld [vmem:[#allocation59_spill] sm:$0xff]  ;;  %v17326_v16 = vld [vmem:[#allocation61_spill] sm:$0xff] }
 0x9d2   : > { %v11969_v7 = vmul.f32 -1.442695, %v7745_v25  ;;  %12691 = vtanh.f32 %v7747_v1  ;;  %v7698_v39 = vpop.f32.mrb[39].mxu0  ;;  %v7739_v63 = vpop.f32.mrb[39].mxu1  ;;  %v17327_v25 = vld [vmem:[#allocation62_spill] sm:$0xff]  ;;  %v17328_v1 = vld [vmem:[#allocation63_spill] sm:$0xff] }
 0x9d3   : > { %v11970_v5 = vmul.f32 -1.442695, %v7746_v27  ;;  %12693 = vtanh.f32 %v7748_v31  ;;  %v17329_v2 = vld [vmem:[#allocation64_spill] sm:$0xff]  ;;  %v17330_v14 = vld [vmem:[#allocation65_spill] sm:$0xff]  ;;  %v17331_v27 = vld [vmem:[#allocation66_spill] sm:$0xff] }
 0x9d4   : > { %12695 = vpow2.f32 %v11969_v7  ;;  %v17332_v31 = vld [vmem:[#allocation67_spill] sm:$0xff]  ;;  %v17333_v61 = vld [vmem:[#allocation68_spill] sm:$0xff]  ;;  %v17334_v43 = vld [vmem:[#allocation69_spill] sm:$0xff] }
 0x9d5   : > { %12697 = vpow2.f32 %v11970_v5  ;;  %v17335_v7 = vld [vmem:[#allocation70_spill] sm:$0xff]  ;;  %v17336_v39 = vld [vmem:[#allocation71_spill] sm:$0xff]  ;;  %v17337_v63 = vld [vmem:[#allocation72_spill] sm:$0xff] }
 0x9d6   : > { %v17338_v5 = vld [vmem:[#allocation73_spill] sm:$0xff] }
 0x9dc   : > { %v12692_v24 = vpop.eup %12691 }
 0x9dd   : > { %v12694_v32 = vpop.eup %12693  ;;  %v7789_v6 = vmul.f32 %v12692_v24, %v12684_v55  ;;  %v17339_v55 = vld [vmem:[#allocation74_spill] sm:$0xff] }
 0x9de   : > { %v12696_v60 = vpop.eup %12695  ;;  %v7790_v42 = vmul.f32 %v12694_v32, %v12688_v44  ;;  %v17341_v44 = vld [vmem:[#allocation76_spill] sm:$0xff]  ;;  %v17343_v24 = vld [vmem:[#allocation78_spill] sm:$0xff]  ;;  %v17344_v32 = vld [vmem:[#allocation79_spill] sm:$0xff] }
 0x9df   : > { %v12698_v46 = vpop.eup %12697  ;;  %v7771_v29 = vadd.f32 1.0, %v12696_v60  ;;  %v15699_v48 = vadd.f32 %v7789_v6, %v7787_v40  ;;  %v17345_v40 = vld [vmem:[#allocation80_spill] sm:$0xff]  ;;  %v17346_v6 = vld [vmem:[#allocation81_spill] sm:$0xff]  ;;  %v17347_v60 = vld [vmem:[#allocation82_spill] sm:$0xff] }
 0x9e0   : > { %v7772_v4 = vadd.f32 1.0, %v12698_v46  ;;  %v15701_v11 = vadd.f32 %v7790_v42, %v7788_v59  ;;  %v17348_v59 = vld [vmem:[#allocation83_spill] sm:$0xff]  ;;  %v17349_v42 = vld [vmem:[#allocation84_spill] sm:$0xff]  ;;  %v17350_v46 = vld [vmem:[#allocation85_spill] sm:$0xff] }
 0x9e1   : > { %12699 = vrcp.f32 %v7771_v29  ;;  %v17351_v29 = vld [vmem:[#allocation86_spill] sm:$0xff] }
 0x9e2   : > { %12701 = vtanh.f32 %v15699_v48 }
 0x9e3   : > { %12703 = vrcp.f32 %v7772_v4  ;;  %v17352_v4 = vld [vmem:[#allocation87_spill] sm:$0xff] }
 0x9e4   : > { %12705 = vtanh.f32 %v15701_v11 }
 0x9eb   : > { %v12700_v21 = vpop.eup %12699 }
 0x9ec   : > { %v12702_v13 = vpop.eup %12701 }
 0x9ed   : > { %v12704_v26 = vpop.eup %12703  ;;  %v7795_v8 = vmul.f32 %v12702_v13, %v12700_v21  ;;  %v17353_v21 = vld [vmem:[#allocation88_spill] sm:$0xff]  ;;  %v17354_v13 = vld [vmem:[#allocation89_spill] sm:$0xff] }
 0x9ee   : > { %v12706_v19 = vpop.eup %12705 }
 0x9ef   : > { %v7796_v22 = vmul.f32 %v12706_v19, %v12704_v26  ;;  %7797 = vst [vmem:[#allocation2 + $0x40] sm:$0xff] %v7795_v8  ;;  %v15705_v57 = vpack.c.bf16 %v7795_v8, %v7795_v8  ;;  %v17355_v26 = vld [vmem:[#allocation90_spill] sm:$0xff]  ;;  %v17356_v8 = vld [vmem:[#allocation91_spill] sm:$0xff]  ;;  %v8822_v19 = vld [vmem:[%s13312_s21 + $0x68] sm:$0xff] }
 0x9f1   : > { %7798 = vst [vmem:[#allocation2 + $0x48] sm:$0xff] %v7796_v22  ;;  %v7808_v45 = vpack.c.bf16 %v7796_v22, %v7796_v22  ;;  %v8825_v22 = vld [vmem:[%s13312_s21 + $0x80] sm:$0xff] }
 0x9f3   : > { %8609 = vmatprep.mubr.bf16.mxu0 %v7808_v45  ;;  %8650 = vmatprep.mubr.bf16.mxu1 %v7808_v45 }
 0x9f4   : > { %8610 = vmatmul.mubr.bf16.vlgmr.msra.gmra.mrb[40].mxu0 %v15705_v57  ;;  %8651 = vmatmul.mubr.bf16.vlgmr.msra.gmra.mrb[40].mxu1 %v15705_v57 }
 0x9f5   : > { %8660 = vmatpush1.bf16.msra.mxu0 %v15367_v17  ;;  %8701 = vmatpush1.bf16.msra.mxu1 %v15369_v30  ;;  %v17317_v17 = vld [vmem:[#allocation52_spill] sm:$0xff]  ;;  %v17318_v30 = vld [vmem:[#allocation53_spill] sm:$0xff] }
 0x9f6   : > { %8691 = vmatprep.mubr.bf16.mxu0 %v7808_v45  ;;  %8732 = vmatprep.mubr.bf16.mxu1 %v7808_v45 }
 0x9f7   : > { %8661 = vmatprep.subr.bf16.mxu0 %v15390_v62  ;;  %8702 = vmatprep.subr.bf16.mxu1 %v15392_v34  ;;  %v17320_v62 = vld [vmem:[#allocation55_spill] sm:$0xff]  ;;  %v17321_v34 = vld [vmem:[#allocation56_spill] sm:$0xff] }
 0x9f9   : > { %8662 = vmatpush1.bf16.msra.mxu0 %v17311_v35  ;;  %8703 = vmatpush1.bf16.msra.mxu1 %v17312_v54  ;;  %v8826_v35 = vld [vmem:[%s13312_s21 + $0x88] sm:$0xff] }
 0x9fa   : > { %8663 = vmatprep.subr.bf16.mxu0 %v17313_v23  ;;  %8704 = vmatprep.subr.bf16.mxu1 %v17314_v56  ;;  %v8830_v54 = vld [vmem:[%s13312_s21 + $0xa8] sm:$0xff] }
 0x9fd   : > { %8664 = vmatpush1.bf16.msra.mxu0 %v17315_v36  ;;  %8705 = vmatpush1.bf16.msra.mxu1 %v17316_v9  ;;  %v15809_v9 = vcombine.high %v8826_v35, %v8830_v54 }
 0x9fe   : > { %8665 = vmatprep.subr.bf16.mxu0 %v17317_v17  ;;  %8706 = vmatprep.subr.bf16.mxu1 %v17318_v30  ;;  %v8833_v17 = vld [vmem:[%s13312_s21 + $0xc0] sm:$0xff] }
 0x9ff   : > { %v8837_v30 = vld [vmem:[%s13312_s21 + $0xe0] sm:$0xff] }
 0xa01   : > { %8666 = vmatpush1.bf16.msra.mxu0 %v17319_v20  ;;  %8707 = vmatpush1.bf16.msra.mxu1 %v17320_v62  ;;  %v8834_v20 = vld [vmem:[%s13312_s21 + $0xc8] sm:$0xff] }
 0xa02   : > { %8667 = vmatprep.subr.bf16.mxu0 %v17321_v34  ;;  %8708 = vmatprep.subr.bf16.mxu1 %v17322_v41  ;;  %v8838_v62 = vld [vmem:[%s13312_s21 + $0xe8] sm:$0xff]  ;;  %v15820_v41 = vcombine.low %v8826_v35, %v8830_v54  ;;  %v8881_v35 = vld [vmem:[%s13312_s21 + $0x240] sm:$0xff] }
 0xa03   : > { %v8885_v54 = vld [vmem:[%s13312_s21 + $0x260] sm:$0xff] }
 0xa05   : > { %8668 = vmatpush1.bf16.msra.mxu0 %v17323_v51  ;;  %8709 = vmatpush1.bf16.msra.mxu1 %v17324_v12  ;;  %v15822_v51 = vcombine.high %v8833_v17, %v8837_v30  ;;  %v15825_v12 = vcombine.high %v8834_v20, %v8838_v62 }
 0xa06   : > { %8669 = vmatprep.subr.bf16.mxu0 %v17325_v15  ;;  %8710 = vmatprep.subr.bf16.mxu1 %v17326_v16  ;;  %v8841_v15 = vld [vmem:[%s13312_s21 + $0x100] sm:$0xff] }
 0xa07   : > { %v8845_v16 = vld [vmem:[%s13312_s21 + $0x120] sm:$0xff] }
 0xa09   : > { %8670 = vmatpush1.bf16.msra.mxu0 %v17327_v25  ;;  %8711 = vmatpush1.bf16.msra.mxu1 %v17328_v1  ;;  %v8842_v25 = vld [vmem:[%s13312_s21 + $0x108] sm:$0xff] }
 0xa0a   : > { %8671 = vmatprep.subr.bf16.mxu0 %v17329_v2  ;;  %8712 = vmatprep.subr.bf16.mxu1 %v17330_v14  ;;  %v8846_v1 = vld [vmem:[%s13312_s21 + $0x128] sm:$0xff]  ;;  %v15832_v2 = vcombine.low %v8833_v17, %v8837_v30  ;;  %v15836_v14 = vcombine.low %v8834_v20, %v8838_v62  ;;  %v15919_v30 = vcombine.high %v8881_v35, %v8885_v54 }
 0xa0b   : > { %v8882_v17 = vld [vmem:[%s13312_s21 + $0x248] sm:$0xff]  ;;  %v15923_v62 = vcombine.low %v8881_v35, %v8885_v54 }
 0xa0c   : > { %v8886_v20 = vld [vmem:[%s13312_s21 + $0x268] sm:$0xff] }
 0xa0d   : > { %8672 = vmatpush1.bf16.msra.mxu0 %v17331_v27  ;;  %8713 = vmatpush1.bf16.msra.mxu1 %v17332_v31  ;;  %v15838_v27 = vcombine.high %v8841_v15, %v8845_v16  ;;  %v15841_v31 = vcombine.high %v8842_v25, %v8846_v1  ;;  %17357 = vst [vmem:[#allocation18_spill] sm:$0xff] %v15923_v62  ;;  %v8906_v35 = vld [vmem:[%s13312_s21 + $0x308] sm:$0xff] }
 0xa0e   : > { %8673 = vmatprep.subr.bf16.mxu0 %v17333_v61  ;;  %8714 = vmatprep.subr.bf16.mxu1 %v17334_v43  ;;  %v8849_v61 = vld [vmem:[%s13312_s21 + $0x140] sm:$0xff] }
 0xa0f   : > { %v8853_v43 = vld [vmem:[%s13312_s21 + $0x160] sm:$0xff] }
 0xa11   : > { %8674 = vmatpush1.bf16.msra.mxu0 %v17335_v7  ;;  %8715 = vmatpush1.bf16.msra.mxu1 %v17336_v39  ;;  %v8850_v7 = vld [vmem:[%s13312_s21 + $0x148] sm:$0xff] }
 0xa12   : > { %8675 = vmatprep.subr.bf16.mxu0 %v17337_v63  ;;  %8716 = vmatprep.subr.bf16.mxu1 %v17338_v5  ;;  %v8854_v39 = vld [vmem:[%s13312_s21 + $0x168] sm:$0xff]  ;;  %v15848_v63 = vcombine.low %v8841_v15, %v8845_v16  ;;  %v15852_v5 = vcombine.low %v8842_v25, %v8846_v1  ;;  %v15925_v15 = vcombine.low %v8882_v17, %v8886_v20  ;;  %v8889_v25 = vld [vmem:[%s13312_s21 + $0x280] sm:$0xff] }
 0xa13   : > { %v15927_v16 = vcombine.high %v8882_v17, %v8886_v20  ;;  %v8893_v1 = vld [vmem:[%s13312_s21 + $0x2a0] sm:$0xff]  ;;  %v8910_v17 = vld [vmem:[%s13312_s21 + $0x328] sm:$0xff] }
 0xa14   : > { %17358 = vst [vmem:[#allocation19_spill] sm:$0xff] %v15925_v15 }
 0xa15   : > { %8676 = vmatpush1.bf16.msra.mxu0 %v17339_v55  ;;  %8717 = vmatpush1.bf16.msra.mxu1 %v17340_v49  ;;  %v15854_v55 = vcombine.high %v8849_v61, %v8853_v43  ;;  %v15857_v49 = vcombine.high %v8850_v7, %v8854_v39  ;;  %17359 = vst [vmem:[#allocation17_spill] sm:$0xff] %v15927_v16 }
 0xa16   : > { %8677 = vmatprep.subr.bf16.mxu0 %v17341_v44  ;;  %8718 = vmatprep.subr.bf16.mxu1 %v17342_v28  ;;  %v8857_v44 = vld [vmem:[%s13312_s21 + $0x180] sm:$0xff] }
 0xa17   : > { %v8861_v28 = vld [vmem:[%s13312_s21 + $0x1a0] sm:$0xff] }
 0xa19   : > { %8678 = vmatpush1.bf16.msra.mxu0 %v17343_v24  ;;  %8719 = vmatpush1.bf16.msra.mxu1 %v17344_v32  ;;  %v8858_v24 = vld [vmem:[%s13312_s21 + $0x188] sm:$0xff] }
 0xa1a   : > { %8679 = vmatprep.subr.bf16.mxu0 %v17345_v40  ;;  %8720 = vmatprep.subr.bf16.mxu1 %v17346_v6  ;;  %v8862_v32 = vld [vmem:[%s13312_s21 + $0x1a8] sm:$0xff]  ;;  %v15864_v40 = vcombine.low %v8849_v61, %v8853_v43  ;;  %v15868_v6 = vcombine.low %v8850_v7, %v8854_v39  ;;  %v15935_v43 = vcombine.high %v8889_v25, %v8893_v1 }
 0xa1b   : > { %v8890_v61 = vld [vmem:[%s13312_s21 + $0x288] sm:$0xff]  ;;  %v15939_v39 = vcombine.low %v8889_v25, %v8893_v1  ;;  %v15973_v25 = vcombine.low %v8906_v35, %v8910_v17  ;;  %v15975_v1 = vcombine.high %v8906_v35, %v8910_v17 }
 0xa1c   : > { %17360 = vst [vmem:[#allocation20_spill] sm:$0xff] %v15935_v43  ;;  %v8894_v7 = vld [vmem:[%s13312_s21 + $0x2a8] sm:$0xff] }
 0xa1d   : > { %8680 = vmatpush1.bf16.msra.mxu0 %v17347_v60  ;;  %8721 = vmatpush1.bf16.msra.mxu1 %v17348_v59  ;;  %v15870_v60 = vcombine.high %v8857_v44, %v8861_v28  ;;  %v15873_v59 = vcombine.high %v8858_v24, %v8862_v32  ;;  %17361 = vst [vmem:[#allocation22_spill] sm:$0xff] %v15939_v39  ;;  %17370 = vst [vmem:[#allocation31_spill] sm:$0xff] %v15973_v25 }
 0xa1e   : > { %8681 = vmatprep.subr.bf16.mxu0 %v17349_v42  ;;  %8722 = vmatprep.subr.bf16.mxu1 %v17350_v46  ;;  %v8865_v42 = vld [vmem:[%s13312_s21 + $0x1c0] sm:$0xff]  ;;  %17371 = vst [vmem:[#allocation29_spill] sm:$0xff] %v15975_v1 }
 0xa1f   : > { %v8869_v46 = vld [vmem:[%s13312_s21 + $0x1e0] sm:$0xff] }
 0xa21   : > { %8682 = vmatpush1.bf16.msra.mxu0 %v17351_v29  ;;  %8723 = vmatpush1.bf16.msra.mxu1 %v17352_v4  ;;  %v8866_v29 = vld [vmem:[%s13312_s21 + $0x1c8] sm:$0xff] }
 0xa22   : > { %8683 = vmatprep.subr.bf16.mxu0 %v17353_v21  ;;  %8724 = vmatprep.subr.bf16.mxu1 %v17354_v13  ;;  %v8870_v4 = vld [vmem:[%s13312_s21 + $0x1e8] sm:$0xff]  ;;  %v15880_v21 = vcombine.low %v8857_v44, %v8861_v28  ;;  %v15884_v13 = vcombine.low %v8858_v24, %v8862_v32  ;;  %v15941_v44 = vcombine.low %v8890_v61, %v8894_v7  ;;  %v8897_v24 = vld [vmem:[%s13312_s21 + $0x2c0] sm:$0xff] }
 0xa23   : > { %v15943_v28 = vcombine.high %v8890_v61, %v8894_v7  ;;  %v8901_v32 = vld [vmem:[%s13312_s21 + $0x2e0] sm:$0xff] }
 0xa24   : > { %17362 = vst [vmem:[#allocation23_spill] sm:$0xff] %v15941_v44  ;;  %v8913_v61 = vld [vmem:[%s13312_s21 + $0x340] sm:$0xff] }
 0xa25   : > { %8684 = vmatpush1.bf16.msra.mxu0 %v15577_v53  ;;  %8725 = vmatpush1.bf16.msra.mxu1 %v15579_v18  ;;  %v8809_v53 = vld [vmem:[%s13312_s21] sm:$0xff]  ;;  %17363 = vst [vmem:[#allocation21_spill] sm:$0xff] %v15943_v28 }
 0xa26   : > { %8685 = vmatprep.subr.bf16.mxu0 %v15583_v58  ;;  %8726 = vmatprep.subr.bf16.mxu1 %v17355_v26  ;;  %v8813_v18 = vld [vmem:[%s13312_s21 + $0x20] sm:$0xff]  ;;  %v8810_v58 = vld [vmem:[%s13312_s21 + $0x8] sm:$0xff]  ;;  %v15886_v26 = vcombine.high %v8865_v42, %v8869_v46 }
 0xa27   : > { %v8917_v7 = vld [vmem:[%s13312_s21 + $0x360] sm:$0xff] }
 0xa29   : > { %8686 = vmatpush1.bf16.msra.mxu0 %v17356_v8  ;;  %8727 = vmatpush1.bf16.msra.mxu1 %v15595_v50  ;;  %v15776_v50 = vcombine.low %v8809_v53, %v8813_v18  ;;  %v15889_v8 = vcombine.high %v8866_v29, %v8870_v4 }
 0xa2a   : > { %8687 = vmatprep.subr.bf16.mxu0 %v15599_v10  ;;  %8728 = vmatprep.subr.bf16.mxu1 %v15601_v38  ;;  %v15778_v10 = vcombine.high %v8809_v53, %v8813_v18  ;;  %v8814_v38 = vld [vmem:[%s13312_s21 + $0x28] sm:$0xff]  ;;  %v15892_v53 = vcombine.low %v8865_v42, %v8869_v46  ;;  %v15896_v18 = vcombine.low %v8866_v29, %v8870_v4 }
 0xa2b   : > { %v8898_v42 = vld [vmem:[%s13312_s21 + $0x2c8] sm:$0xff]  ;;  %v15951_v46 = vcombine.high %v8897_v24, %v8901_v32  ;;  %v15955_v4 = vcombine.low %v8897_v24, %v8901_v32  ;;  %v15983_v32 = vcombine.low %v8913_v61, %v8917_v7 }
 0xa2c   : > { %v8902_v29 = vld [vmem:[%s13312_s21 + $0x2e8] sm:$0xff] }
 0xa2d   : > { %8688 = vmatpush1.bf16.msra.mxu0 %v15609_v52  ;;  %8729 = vmatpush1.bf16.msra.mxu1 %v15611_v33  ;;  %v8821_v52 = vld [vmem:[%s13312_s21 + $0x60] sm:$0xff]  ;;  %v15783_v33 = vcombine.low %v8810_v58, %v8814_v38  ;;  %17364 = vst [vmem:[#allocation24_spill] sm:$0xff] %v15951_v46  ;;  %17365 = vst [vmem:[#allocation26_spill] sm:$0xff] %v15955_v4  ;;  %v8914_v24 = vld [vmem:[%s13312_s21 + $0x348] sm:$0xff] }
 0xa2e   : > { %8689 = vmatprep.subr.bf16.mxu0 %v15615_v47  ;;  %8730 = vmatprep.subr.bf16.mxu1 %v15617_v3  ;;  %v8818_v3 = vld [vmem:[%s13312_s21 + $0x48] sm:$0xff]  ;;  %17372 = vst [vmem:[#allocation35_spill] sm:$0xff] %v15983_v32 }
 0xa2f   : > { %v15793_v45 = vcombine.high %v8818_v3, %v8822_v19  ;;  %v15804_v56 = vcombine.low %v8818_v3, %v8822_v19  ;;  %v8878_v19 = vld [vmem:[%s13312_s21 + $0x228] sm:$0xff] }
 0xa31   : > { %8690 = vmatpush1.bf16.msra.mxu0 %v15621_v37  ;;  %8731 = vmatpush1.bf16.msra.mxu1 %v15623_v0  ;;  %v8817_v37 = vld [vmem:[%s13312_s21 + $0x40] sm:$0xff]  ;;  %v15785_v0 = vcombine.high %v8810_v58, %v8814_v38 }
 0xa32   : > { %v15787_v47 = vcombine.high %v8817_v37, %v8821_v52  ;;  %9577 = vmatprep.subr.bf16.mxu0 %v15778_v10  ;;  %v15800_v23 = vcombine.low %v8817_v37, %v8821_v52  ;;  %v8873_v58 = vld [vmem:[%s13312_s21 + $0x200] sm:$0xff]  ;;  %v8874_v52 = vld [vmem:[%s13312_s21 + $0x208] sm:$0xff] }
 0xa33   : > { %9618 = vmatprep.subr.bf16.mxu1 %v15785_v0  ;;  %v8877_v38 = vld [vmem:[%s13312_s21 + $0x220] sm:$0xff] }
 0xa34   : > { %8692 = vmatmul.mubr.bf16.vlgmr.msra.gmra.mrb[44].mxu0 %v15705_v57  ;;  %8733 = vmatmul.mubr.bf16.vlgmr.msra.gmra.mrb[44].mxu1 %v15705_v57  ;;  %v8829_v57 = vld [vmem:[%s13312_s21 + $0xa0] sm:$0xff]  ;;  %v15903_v37 = vcombine.high %v8873_v58, %v8877_v38  ;;  %v15906_v3 = vcombine.low %v8873_v58, %v8877_v38  ;;  %v15957_v58 = vcombine.low %v8898_v42, %v8902_v29 }
 0xa35   : > { %9578 = vmatpush1.bf16.msra.mxu0 %v15776_v50  ;;  %9619 = vmatpush1.bf16.msra.mxu1 %v15783_v33  ;;  %v15806_v36 = vcombine.high %v8825_v22, %v8829_v57  ;;  %v15816_v34 = vcombine.low %v8825_v22, %v8829_v57  ;;  %v15910_v22 = vcombine.low %v8874_v52, %v8878_v19 }
 0xa36   : > { %9579 = vmatprep.subr.bf16.mxu0 %v15787_v47  ;;  %9620 = vmatprep.subr.bf16.mxu1 %v15793_v45  ;;  %v15912_v57 = vcombine.high %v8874_v52, %v8878_v19  ;;  %17366 = vst [vmem:[#allocation27_spill] sm:$0xff] %v15957_v58  ;;  %v15959_v38 = vcombine.high %v8898_v42, %v8902_v29  ;;  %v8905_v52 = vld [vmem:[%s13312_s21 + $0x300] sm:$0xff]  ;;  %v8918_v29 = vld [vmem:[%s13312_s21 + $0x368] sm:$0xff] }
 0xa37   : > { %v8909_v19 = vld [vmem:[%s13312_s21 + $0x320] sm:$0xff]  ;;  %v15985_v42 = vcombine.high %v8913_v61, %v8917_v7  ;;  %v15991_v35 = vcombine.low %v8914_v24, %v8918_v29  ;;  %v15993_v17 = vcombine.high %v8914_v24, %v8918_v29  ;;  %v8934_v24 = vld [vmem:[%s13312_s21 + $0x3e8] sm:$0xff] }
 0xa38   : > { %17367 = vst [vmem:[#allocation25_spill] sm:$0xff] %v15959_v38  ;;  %v15967_v54 = vcombine.high %v8905_v52, %v8909_v19  ;;  %v15971_v20 = vcombine.low %v8905_v52, %v8909_v19  ;;  %v8921_v52 = vld [vmem:[%s13312_s21 + $0x380] sm:$0xff] }
 0xa39   : > { %9580 = vmatpush1.bf16.msra.mxu0 %v15800_v23  ;;  %9621 = vmatpush1.bf16.msra.mxu1 %v15804_v56  ;;  %17373 = vst [vmem:[#allocation34_spill] sm:$0xff] %v15985_v42  ;;  %v8925_v19 = vld [vmem:[%s13312_s21 + $0x3a0] sm:$0xff]  ;;  %17374 = vst [vmem:[#allocation33_spill] sm:$0xff] %v15991_v35 }
 0xa3a   : > { %9581 = vmatprep.subr.bf16.mxu0 %v15806_v36  ;;  %9622 = vmatprep.subr.bf16.mxu1 %v15809_v9  ;;  %17368 = vst [vmem:[#allocation28_spill] sm:$0xff] %v15967_v54  ;;  %17369 = vst [vmem:[#allocation30_spill] sm:$0xff] %v15971_v20  ;;  %v8933_v7 = vld [vmem:[%s13312_s21 + $0x3e0] sm:$0xff] }
 0xa3b   : > { %17375 = vst [vmem:[#allocation32_spill] sm:$0xff] %v15993_v17 }
 0xa3d   : > { %9582 = vmatpush1.bf16.msra.mxu0 %v15816_v34  ;;  %9623 = vmatpush1.bf16.msra.mxu1 %v15820_v41 }
 0xa3e   : > { %9583 = vmatprep.subr.bf16.mxu0 %v15822_v51  ;;  %9624 = vmatprep.subr.bf16.mxu1 %v15825_v12 }
 0xa41   : > { %9584 = vmatpush1.bf16.msra.mxu0 %v15832_v2  ;;  %9625 = vmatpush1.bf16.msra.mxu1 %v15836_v14 }
 0xa42   : > { %9585 = vmatprep.subr.bf16.mxu0 %v15838_v27  ;;  %9626 = vmatprep.subr.bf16.mxu1 %v15841_v31 }
 0xa45   : > { %9586 = vmatpush1.bf16.msra.mxu0 %v15848_v63  ;;  %9627 = vmatpush1.bf16.msra.mxu1 %v15852_v5 }
 0xa46   : > { %9587 = vmatprep.subr.bf16.mxu0 %v15854_v55  ;;  %9628 = vmatprep.subr.bf16.mxu1 %v15857_v49 }
 0xa49   : > { %9588 = vmatpush1.bf16.msra.mxu0 %v15864_v40  ;;  %9629 = vmatpush1.bf16.msra.mxu1 %v15868_v6 }
 0xa4a   : > { %9589 = vmatprep.subr.bf16.mxu0 %v15870_v60  ;;  %9630 = vmatprep.subr.bf16.mxu1 %v15873_v59 }
 0xa4d   : > { %9590 = vmatpush1.bf16.msra.mxu0 %v15880_v21  ;;  %9631 = vmatpush1.bf16.msra.mxu1 %v15884_v13 }
 0xa4e   : > { %9591 = vmatprep.subr.bf16.mxu0 %v15886_v26  ;;  %9632 = vmatprep.subr.bf16.mxu1 %v15889_v8 }
 0xa51   : > { %9592 = vmatpush1.bf16.msra.mxu0 %v15892_v53  ;;  %9633 = vmatpush1.bf16.msra.mxu1 %v15896_v18 }
 0xa52   : > { %9593 = vmatprep.subr.bf16.mxu0 %v15903_v37  ;;  %9634 = vmatprep.subr.bf16.mxu1 %v15912_v57 }
 0xa55   : > { %9594 = vmatpush1.bf16.msra.mxu0 %v15906_v3  ;;  %9635 = vmatpush1.bf16.msra.mxu1 %v15910_v22 }
 0xa56   : > { %9595 = vmatprep.subr.bf16.mxu0 %v15919_v30  ;;  %9636 = vmatprep.subr.bf16.mxu1 %v15927_v16 }
 0xa59   : > { %9596 = vmatpush1.bf16.msra.mxu0 %v15923_v62  ;;  %9637 = vmatpush1.bf16.msra.mxu1 %v15925_v15 }
 0xa5a   : > { %9597 = vmatprep.subr.bf16.mxu0 %v15935_v43  ;;  %9638 = vmatprep.subr.bf16.mxu1 %v15943_v28 }
 0xa5d   : > { %9598 = vmatpush1.bf16.msra.mxu0 %v15939_v39  ;;  %9639 = vmatpush1.bf16.msra.mxu1 %v15941_v44  ;;  %v7802_v44 = vld [vmem:[#allocation3 + $0x158] sm:$0xff] }
 0xa5e   : > { %9599 = vmatprep.subr.bf16.mxu0 %v15951_v46  ;;  %9640 = vmatprep.subr.bf16.mxu1 %v15959_v38  ;;  %v7799_v46 = vld [vmem:[#allocation3 + $0x140] sm:$0xff] }
 0xa61   : > { %9600 = vmatpush1.bf16.msra.mxu0 %v15955_v4  ;;  %9641 = vmatpush1.bf16.msra.mxu1 %v15957_v58  ;;  %v8929_v58 = vld [vmem:[%s13312_s21 + $0x3c0] sm:$0xff]  ;;  %v16006_v4 = vcombine.low %v8921_v52, %v8925_v19 }
 0xa62   : > { %9601 = vmatprep.subr.bf16.mxu0 %v15967_v54  ;;  %9642 = vmatprep.subr.bf16.mxu1 %v15975_v1  ;;  %v8922_v1 = vld [vmem:[%s13312_s21 + $0x388] sm:$0xff]  ;;  %v16011_v29 = vcombine.high %v8929_v58, %v8933_v7 }
 0xa63   : > { %v8926_v54 = vld [vmem:[%s13312_s21 + $0x3a8] sm:$0xff]  ;;  %17378 = vst [vmem:[#allocation38_spill] sm:$0xff] %v16006_v4 }
 0xa64   : > { %v16001_v61 = vcombine.high %v8922_v1, %v8926_v54  ;;  %17379 = vst [vmem:[#allocation39_spill] sm:$0xff] %v16011_v29 }
 0xa65   : > { %9602 = vmatpush1.bf16.msra.mxu0 %v15971_v20  ;;  %9643 = vmatpush1.bf16.msra.mxu1 %v15973_v25  ;;  %v15995_v20 = vcombine.high %v8921_v52, %v8925_v19  ;;  %v8930_v25 = vld [vmem:[%s13312_s21 + $0x3c8] sm:$0xff]  ;;  %v16020_v52 = vcombine.low %v8929_v58, %v8933_v7 }
 0xa66   : > { %9603 = vmatprep.subr.bf16.mxu0 %v15985_v42  ;;  %17377 = vst [vmem:[#allocation37_spill] sm:$0xff] %v16001_v61  ;;  %9644 = vmatprep.subr.bf16.mxu1 %v15993_v17  ;;  %v16014_v42 = vcombine.low %v8922_v1, %v8926_v54  ;;  %v16017_v17 = vcombine.high %v8930_v25, %v8934_v24  ;;  %v8811_v54 = vld [vmem:[%s13312_s21 + $0x10] sm:$0xff] }
 0xa67   : > { %17376 = vst [vmem:[#allocation36_spill] sm:$0xff] %v15995_v20  ;;  %17382 = vst [vmem:[#allocation42_spill] sm:$0xff] %v16020_v52  ;;  %v16024_v19 = vcombine.low %v8930_v25, %v8934_v24  ;;  %v8815_v1 = vld [vmem:[%s13312_s21 + $0x30] sm:$0xff] }
 0xa68   : > { %17380 = vst [vmem:[#allocation40_spill] sm:$0xff] %v16014_v42  ;;  %17381 = vst [vmem:[#allocation41_spill] sm:$0xff] %v16017_v17  ;;  %v16035_v58 = vcombine.low %v8811_v54, %v8815_v1 }
 0xa69   : > { %9604 = vmatpush1.bf16.msra.mxu0 %v15983_v32  ;;  %9645 = vmatpush1.bf16.msra.mxu1 %v15991_v35  ;;  %17383 = vst [vmem:[#allocation43_spill] sm:$0xff] %v16024_v19  ;;  %v8816_v35 = vld [vmem:[%s13312_s21 + $0x38] sm:$0xff] }
 0xa6a   : > { %9605 = vmatprep.subr.bf16.mxu0 %v15995_v20  ;;  %9646 = vmatprep.subr.bf16.mxu1 %v16001_v61  ;;  %v8812_v20 = vld [vmem:[%s13312_s21 + $0x18] sm:$0xff]  ;;  %v16031_v61 = vcombine.high %v8811_v54, %v8815_v1  ;;  %v7800_v54 = vld [vmem:[#allocation3 + $0x148] sm:$0xff] }
 0xa6b   : > { %v16037_v7 = vcombine.low %v8812_v20, %v8816_v35 }
 0xa6c   : > { %17384 = vst [vmem:[#allocation44_spill] sm:$0xff] %v16031_v61 }
 0xa6d   : > { %9606 = vmatpush1.bf16.msra.mxu0 %v16006_v4  ;;  %9647 = vmatpush1.bf16.msra.mxu1 %v16014_v42 }
 0xa6e   : > { %9607 = vmatprep.subr.bf16.mxu0 %v16011_v29  ;;  %9648 = vmatprep.subr.bf16.mxu1 %v16017_v17  ;;  %v16039_v29 = vcombine.high %v8812_v20, %v8816_v35 }
 0xa70   : > { %17385 = vst [vmem:[#allocation45_spill] sm:$0xff] %v16039_v29 }
 0xa71   : > { %9608 = vmatpush1.bf16.msra.mxu0 %v16020_v52  ;;  %9649 = vmatpush1.bf16.msra.mxu1 %v16024_v19  ;;  %v7801_v19 = vld [vmem:[#allocation3 + $0x150] sm:$0xff] }
 0xa72   : > { %9659 = vmatprep.subr.bf16.mxu0 %v16031_v61  ;;  %9700 = vmatprep.subr.bf16.mxu1 %v16039_v29 }
 0xac7   : > { %v8611_v25 = vpop.f32.mrb[40].mxu0  ;;  %v8652_v24 = vpop.f32.mrb[40].mxu1 }
 0xac8   : > { %v8613_v52 = vpop.f32.mrb[41].mxu0  ;;  %v8654_v17 = vpop.f32.mrb[41].mxu1  ;;  %v8741_v1 = vadd.f32 %v8611_v25, %v7799_v46  ;;  %v8743_v39 = vadd.f32 %v8652_v24, %v7801_v19  ;;  %v7803_v25 = vld [vmem:[#allocation3 + $0x160] sm:$0xff]  ;;  %v7805_v19 = vld [vmem:[#allocation3 + $0x170] sm:$0xff] }
 0xac9   : > { %v8615_v42 = vpop.f32.mrb[42].mxu0  ;;  %v8656_v4 = vpop.f32.mrb[42].mxu1  ;;  %v8742_v20 = vadd.f32 %v8613_v52, %v7800_v54  ;;  %v8744_v35 = vadd.f32 %v8654_v17, %v7802_v44  ;;  %v7804_v44 = vld [vmem:[#allocation3 + $0x168] sm:$0xff]  ;;  %v7806_v17 = vld [vmem:[#allocation3 + $0x178] sm:$0xff] }
 0xaca   : > { %v8616_v32 = vpop.f32.mrb[43].mxu0  ;;  %v8657_v38 = vpop.f32.mrb[43].mxu1  ;;  %v12099_v28 = vmul.f32 -1.442695, %v8741_v1  ;;  %v12101_v61 = vmul.f32 -1.442695, %v8743_v39 }
 0xacb   : > { %v12100_v43 = vmul.f32 -1.442695, %v8742_v20  ;;  %v12102_v29 = vmul.f32 -1.442695, %v8744_v35 }
 0xacc   : > { %12707 = vpow2.f32 %v12099_v28 }
 0xacd   : > { %12709 = vpow2.f32 %v12101_v61 }
 0xace   : > { %12711 = vpow2.f32 %v12100_v43 }
 0xacf   : > { %12713 = vpow2.f32 %v12102_v29 }
 0xad6   : > { %v12708_v42 = vpop.eup %12707 }
 0xad7   : > { %v12710_v4 = vpop.eup %12709  ;;  %v8767_v15 = vadd.f32 1.0, %v12708_v42 }
 0xad8   : > { %v12712_v32 = vpop.eup %12711  ;;  %v8769_v62 = vadd.f32 1.0, %v12710_v4 }
 0xad9   : > { %v12714_v38 = vpop.eup %12713  ;;  %v8768_v16 = vadd.f32 1.0, %v12712_v32  ;;  %12715 = vrcp.f32 %v8767_v15 }
 0xada   : > { %v8770_v46 = vadd.f32 1.0, %v12714_v38  ;;  %12717 = vrcp.f32 %v8769_v62 }
 0xadb   : > { %12719 = vrcp.f32 %v8768_v16 }
 0xadc   : > { %12721 = vrcp.f32 %v8770_v46 }
 0xae3   : > { %v12716_v62 = vpop.eup %12715 }
 0xae4   : > { %v12718_v32 = vpop.eup %12717 }
 0xae5   : > { %v12720_v16 = vpop.eup %12719  ;;  %v8787_v46 = vmul.f32 %v12718_v32, %v15699_v48 }
 0xae6   : > { %v12722_v38 = vpop.eup %12721 }
 0xb07   : > { %v8693_v39 = vpop.f32.mrb[44].mxu0  ;;  %v8734_v52 = vpop.f32.mrb[44].mxu1 }
 0xb08   : > { %v8745_v28 = vadd.f32 %v8693_v39, %v7803_v25  ;;  %v8747_v43 = vadd.f32 %v8734_v52, %v7805_v19  ;;  %v8695_v61 = vpop.f32.mrb[45].mxu0  ;;  %v8736_v29 = vpop.f32.mrb[45].mxu1  ;;  %v8788_v39 = vmul.f32 %v12722_v38, %v15701_v11  ;;  %v8827_v38 = vld [vmem:[%s13312_s21 + $0x90] sm:$0xff] }
 0xb09   : > { %v8746_v24 = vadd.f32 %v8695_v61, %v7804_v44  ;;  %v8748_v54 = vadd.f32 %v8736_v29, %v7806_v17  ;;  %v8697_v1 = vpop.f32.mrb[46].mxu0  ;;  %v8738_v20 = vpop.f32.mrb[46].mxu1 }
 0xb0a   : > { %v12103_v35 = vmul.f32 -1.442695, %v8745_v28  ;;  %12723 = vtanh.f32 %v8747_v43  ;;  %v8698_v42 = vpop.f32.mrb[47].mxu0  ;;  %v8739_v4 = vpop.f32.mrb[47].mxu1 }
 0xb0b   : > { %v12104_v15 = vmul.f32 -1.442695, %v8746_v24  ;;  %12725 = vtanh.f32 %v8748_v54  ;;  %v8819_v42 = vld [vmem:[%s13312_s21 + $0x50] sm:$0xff] }
 0xb0c   : > { %12727 = vpow2.f32 %v12103_v35  ;;  %v8823_v4 = vld [vmem:[%s13312_s21 + $0x70] sm:$0xff] }
 0xb0d   : > { %12729 = vpow2.f32 %v12104_v15  ;;  %v8820_v15 = vld [vmem:[%s13312_s21 + $0x58] sm:$0xff] }
 0xb14   : > { %v12724_v25 = vpop.eup %12723 }
 0xb15   : > { %v12726_v19 = vpop.eup %12725  ;;  %v8789_v44 = vmul.f32 %v12724_v25, %v12716_v62  ;;  %v8824_v62 = vld [vmem:[%s13312_s21 + $0x78] sm:$0xff]  ;;  %v16058_v25 = vcombine.high %v8819_v42, %v8823_v4 }
 0xb16   : > { %v12728_v17 = vpop.eup %12727  ;;  %v8790_v52 = vmul.f32 %v12726_v19, %v12720_v16  ;;  %v16060_v19 = vcombine.high %v8820_v15, %v8824_v62 }
 0xb17   : > { %v12730_v28 = vpop.eup %12729  ;;  %v8771_v43 = vadd.f32 1.0, %v12728_v17  ;;  %v16045_v61 = vadd.f32 %v8789_v44, %v8787_v46  ;;  %v8831_v46 = vld [vmem:[%s13312_s21 + $0xb0] sm:$0xff]  ;;  %v8828_v44 = vld [vmem:[%s13312_s21 + $0x98] sm:$0xff] }
 0xb18   : > { %v8772_v29 = vadd.f32 1.0, %v12730_v28  ;;  %v16047_v24 = vadd.f32 %v8790_v52, %v8788_v39  ;;  %v8832_v17 = vld [vmem:[%s13312_s21 + $0xb8] sm:$0xff]  ;;  %v16069_v39 = vcombine.low %v8819_v42, %v8823_v4  ;;  %v16071_v52 = vcombine.low %v8820_v15, %v8824_v62  ;;  %v8843_v4 = vld [vmem:[%s13312_s21 + $0x110] sm:$0xff] }
 0xb19   : > { %12731 = vrcp.f32 %v8771_v43  ;;  %v16073_v28 = vcombine.high %v8827_v38, %v8831_v46  ;;  %v16075_v43 = vcombine.high %v8828_v44, %v8832_v17  ;;  %v8847_v15 = vld [vmem:[%s13312_s21 + $0x130] sm:$0xff]  ;;  %v8844_v62 = vld [vmem:[%s13312_s21 + $0x118] sm:$0xff] }
 0xb1a   : > { %12733 = vtanh.f32 %v16045_v61  ;;  %17386 = vst [vmem:[#allocation46_spill] sm:$0xff] %v16069_v39  ;;  %17387 = vst [vmem:[#allocation47_spill] sm:$0xff] %v16071_v52 }
 0xb1b   : > { %12735 = vrcp.f32 %v8772_v29  ;;  %17388 = vst [vmem:[#allocation48_spill] sm:$0xff] %v16073_v28  ;;  %17389 = vst [vmem:[#allocation49_spill] sm:$0xff] %v16075_v43  ;;  %v8835_v29 = vld [vmem:[%s13312_s21 + $0xd0] sm:$0xff] }
 0xb1c   : > { %12737 = vtanh.f32 %v16047_v24 }
 0xb23   : > { %v12732_v48 = vpop.eup %12731 }
 0xb24   : > { %v12734_v11 = vpop.eup %12733 }
 0xb25   : > { %v12736_v54 = vpop.eup %12735  ;;  %v8795_v1 = vmul.f32 %v12734_v11, %v12732_v48  ;;  %v8839_v48 = vld [vmem:[%s13312_s21 + $0xf0] sm:$0xff]  ;;  %v8836_v11 = vld [vmem:[%s13312_s21 + $0xd8] sm:$0xff] }
 0xb26   : > { %v12738_v20 = vpop.eup %12737 }
 0xb27   : > { %v8796_v35 = vmul.f32 %v12738_v20, %v12736_v54  ;;  %8797 = vst [vmem:[#allocation2 + $0x50] sm:$0xff] %v8795_v1  ;;  %v16055_v16 = vpack.c.bf16 %v8795_v1, %v8795_v1  ;;  %v8840_v54 = vld [vmem:[%s13312_s21 + $0xf8] sm:$0xff]  ;;  %v16085_v1 = vcombine.low %v8827_v38, %v8831_v46  ;;  %v16087_v20 = vcombine.low %v8828_v44, %v8832_v17 }
 0xb28   : > { %v16093_v42 = vcombine.high %v8836_v11, %v8840_v54  ;;  %v16101_v38 = vcombine.low %v8835_v29, %v8839_v48  ;;  %v16103_v46 = vcombine.low %v8836_v11, %v8840_v54  ;;  %v16107_v44 = vcombine.high %v8843_v4, %v8847_v15 }
 0xb29   : > { %8798 = vst [vmem:[#allocation2 + $0x58] sm:$0xff] %v8796_v35  ;;  %v8808_v32 = vpack.c.bf16 %v8796_v35, %v8796_v35  ;;  %17390 = vst [vmem:[#allocation50_spill] sm:$0xff] %v16085_v1  ;;  %v16091_v35 = vcombine.high %v8835_v29, %v8839_v48  ;;  %v16117_v29 = vcombine.low %v8843_v4, %v8847_v15 }
 0xb2a   : > { %17391 = vst [vmem:[#allocation51_spill] sm:$0xff] %v16087_v20  ;;  %17393 = vst [vmem:[#allocation53_spill] sm:$0xff] %v16093_v42 }
 0xb2b   : > { %9609 = vmatprep.mubr.bf16.mxu0 %v8808_v32  ;;  %9650 = vmatprep.mubr.bf16.mxu1 %v8808_v32  ;;  %17392 = vst [vmem:[#allocation52_spill] sm:$0xff] %v16091_v35  ;;  %17394 = vst [vmem:[#allocation54_spill] sm:$0xff] %v16101_v38 }
 0xb2c   : > { %9610 = vmatmul.mubr.bf16.vlgmr.msra.gmra.mrb[48].mxu0 %v16055_v16  ;;  %9651 = vmatmul.mubr.bf16.vlgmr.msra.gmra.mrb[48].mxu1 %v16055_v16  ;;  %17395 = vst [vmem:[#allocation55_spill] sm:$0xff] %v16103_v46  ;;  %17396 = vst [vmem:[#allocation56_spill] sm:$0xff] %v16107_v44 }
 0xb2d   : > { %9660 = vmatpush1.bf16.msra.mxu0 %v16035_v58  ;;  %9701 = vmatpush1.bf16.msra.mxu1 %v16037_v7  ;;  %17398 = vst [vmem:[#allocation58_spill] sm:$0xff] %v16117_v29 }
 0xb2e   : > { %9691 = vmatprep.mubr.bf16.mxu0 %v8808_v32  ;;  %9732 = vmatprep.mubr.bf16.mxu1 %v8808_v32  ;;  %v8848_v32 = vld [vmem:[%s13312_s21 + $0x138] sm:$0xff] }
 0xb2f   : > { %9661 = vmatprep.subr.bf16.mxu0 %v16058_v25  ;;  %9702 = vmatprep.subr.bf16.mxu1 %v16060_v19  ;;  %v16109_v17 = vcombine.high %v8844_v62, %v8848_v32  ;;  %v16119_v48 = vcombine.low %v8844_v62, %v8848_v32 }
 0xb31   : > { %9662 = vmatpush1.bf16.msra.mxu0 %v16069_v39  ;;  %9703 = vmatpush1.bf16.msra.mxu1 %v16071_v52  ;;  %17397 = vst [vmem:[#allocation57_spill] sm:$0xff] %v16109_v17  ;;  %17399 = vst [vmem:[#allocation59_spill] sm:$0xff] %v16119_v48  ;;  %v8932_v52 = vld [vmem:[%s13312_s21 + $0x3d8] sm:$0xff] }
 0xb32   : > { %9663 = vmatprep.subr.bf16.mxu0 %v16073_v28  ;;  %9704 = vmatprep.subr.bf16.mxu1 %v16075_v43  ;;  %v8851_v43 = vld [vmem:[%s13312_s21 + $0x150] sm:$0xff]  ;;  %v8852_v28 = vld [vmem:[%s13312_s21 + $0x158] sm:$0xff] }
 0xb33   : > { %v8936_v39 = vld [vmem:[%s13312_s21 + $0x3f8] sm:$0xff] }
 0xb35   : > { %9664 = vmatpush1.bf16.msra.mxu0 %v16085_v1  ;;  %9705 = vmatpush1.bf16.msra.mxu1 %v16087_v20  ;;  %v8855_v1 = vld [vmem:[%s13312_s21 + $0x170] sm:$0xff]  ;;  %v8856_v20 = vld [vmem:[%s13312_s21 + $0x178] sm:$0xff] }
 0xb36   : > { %9665 = vmatprep.subr.bf16.mxu0 %v16091_v35  ;;  %9706 = vmatprep.subr.bf16.mxu1 %v16093_v42  ;;  %v16123_v11 = vcombine.high %v8851_v43, %v8855_v1  ;;  %v16125_v54 = vcombine.high %v8852_v28, %v8856_v20  ;;  %v8859_v42 = vld [vmem:[%s13312_s21 + $0x190] sm:$0xff]  ;;  %v8860_v35 = vld [vmem:[%s13312_s21 + $0x198] sm:$0xff]  ;;  %v16133_v4 = vcombine.low %v8851_v43, %v8855_v1 }
 0xb37   : > { %v16135_v15 = vcombine.low %v8852_v28, %v8856_v20 }
 0xb38   : > { %17400 = vst [vmem:[#allocation60_spill] sm:$0xff] %v16123_v11  ;;  %17401 = vst [vmem:[#allocation61_spill] sm:$0xff] %v16125_v54 }
 0xb39   : > { %9666 = vmatpush1.bf16.msra.mxu0 %v16101_v38  ;;  %9707 = vmatpush1.bf16.msra.mxu1 %v16103_v46  ;;  %v8863_v38 = vld [vmem:[%s13312_s21 + $0x1b0] sm:$0xff]  ;;  %v8864_v46 = vld [vmem:[%s13312_s21 + $0x1b8] sm:$0xff]  ;;  %17402 = vst [vmem:[#allocation62_spill] sm:$0xff] %v16133_v4  ;;  %17403 = vst [vmem:[#allocation63_spill] sm:$0xff] %v16135_v15 }
 0xb3a   : > { %9667 = vmatprep.subr.bf16.mxu0 %v16107_v44  ;;  %9708 = vmatprep.subr.bf16.mxu1 %v16109_v17  ;;  %v16139_v62 = vcombine.high %v8859_v42, %v8863_v38  ;;  %v16141_v32 = vcombine.high %v8860_v35, %v8864_v46  ;;  %v8867_v17 = vld [vmem:[%s13312_s21 + $0x1d0] sm:$0xff]  ;;  %v8868_v44 = vld [vmem:[%s13312_s21 + $0x1d8] sm:$0xff]  ;;  %v16149_v28 = vcombine.low %v8859_v42, %v8863_v38 }
 0xb3b   : > { %v16151_v43 = vcombine.low %v8860_v35, %v8864_v46 }
 0xb3c   : > { %17404 = vst [vmem:[#allocation64_spill] sm:$0xff] %v16139_v62  ;;  %17405 = vst [vmem:[#allocation65_spill] sm:$0xff] %v16141_v32 }
 0xb3d   : > { %9668 = vmatpush1.bf16.msra.mxu0 %v16117_v29  ;;  %9709 = vmatpush1.bf16.msra.mxu1 %v16119_v48  ;;  %v8871_v29 = vld [vmem:[%s13312_s21 + $0x1f0] sm:$0xff]  ;;  %v8872_v48 = vld [vmem:[%s13312_s21 + $0x1f8] sm:$0xff]  ;;  %17406 = vst [vmem:[#allocation66_spill] sm:$0xff] %v16149_v28  ;;  %17407 = vst [vmem:[#allocation67_spill] sm:$0xff] %v16151_v43 }
 0xb3e   : > { %9669 = vmatprep.subr.bf16.mxu0 %v16123_v11  ;;  %9710 = vmatprep.subr.bf16.mxu1 %v16125_v54  ;;  %v16155_v1 = vcombine.high %v8867_v17, %v8871_v29  ;;  %v16157_v20 = vcombine.high %v8868_v44, %v8872_v48  ;;  %v8875_v54 = vld [vmem:[%s13312_s21 + $0x210] sm:$0xff]  ;;  %v8876_v11 = vld [vmem:[%s13312_s21 + $0x218] sm:$0xff]  ;;  %v16165_v35 = vcombine.low %v8867_v17, %v8871_v29 }
 0xb3f   : > { %v16167_v42 = vcombine.low %v8868_v44, %v8872_v48 }
 0xb40   : > { %17408 = vst [vmem:[#allocation68_spill] sm:$0xff] %v16155_v1  ;;  %17409 = vst [vmem:[#allocation69_spill] sm:$0xff] %v16157_v20 }
 0xb41   : > { %9670 = vmatpush1.bf16.msra.mxu0 %v16133_v4  ;;  %9711 = vmatpush1.bf16.msra.mxu1 %v16135_v15  ;;  %v8879_v4 = vld [vmem:[%s13312_s21 + $0x230] sm:$0xff]  ;;  %v8880_v15 = vld [vmem:[%s13312_s21 + $0x238] sm:$0xff]  ;;  %17410 = vst [vmem:[#allocation70_spill] sm:$0xff] %v16165_v35  ;;  %17411 = vst [vmem:[#allocation71_spill] sm:$0xff] %v16167_v42 }
 0xb42   : > { %9671 = vmatprep.subr.bf16.mxu0 %v16139_v62  ;;  %9712 = vmatprep.subr.bf16.mxu1 %v16141_v32  ;;  %v16171_v38 = vcombine.high %v8875_v54, %v8879_v4  ;;  %v16173_v46 = vcombine.high %v8876_v11, %v8880_v15  ;;  %v8883_v32 = vld [vmem:[%s13312_s21 + $0x250] sm:$0xff]  ;;  %v8884_v62 = vld [vmem:[%s13312_s21 + $0x258] sm:$0xff]  ;;  %v16181_v44 = vcombine.low %v8875_v54, %v8879_v4 }
 0xb43   : > { %v16183_v17 = vcombine.low %v8876_v11, %v8880_v15 }
 0xb44   : > { %17412 = vst [vmem:[#allocation72_spill] sm:$0xff] %v16171_v38  ;;  %17413 = vst [vmem:[#allocation73_spill] sm:$0xff] %v16173_v46 }
 0xb45   : > { %9672 = vmatpush1.bf16.msra.mxu0 %v16149_v28  ;;  %9713 = vmatpush1.bf16.msra.mxu1 %v16151_v43  ;;  %v8887_v28 = vld [vmem:[%s13312_s21 + $0x270] sm:$0xff]  ;;  %v8888_v43 = vld [vmem:[%s13312_s21 + $0x278] sm:$0xff]  ;;  %17414 = vst [vmem:[#allocation74_spill] sm:$0xff] %v16181_v44  ;;  %17415 = vst [vmem:[#allocation75_spill] sm:$0xff] %v16183_v17 }
 0xb46   : > { %9673 = vmatprep.subr.bf16.mxu0 %v16155_v1  ;;  %9714 = vmatprep.subr.bf16.mxu1 %v16157_v20  ;;  %v16187_v29 = vcombine.high %v8883_v32, %v8887_v28  ;;  %v16189_v48 = vcombine.high %v8884_v62, %v8888_v43  ;;  %v8891_v20 = vld [vmem:[%s13312_s21 + $0x290] sm:$0xff]  ;;  %v8892_v1 = vld [vmem:[%s13312_s21 + $0x298] sm:$0xff]  ;;  %v16197_v11 = vcombine.low %v8883_v32, %v8887_v28 }
 0xb47   : > { %v16199_v54 = vcombine.low %v8884_v62, %v8888_v43 }
 0xb48   : > { %17416 = vst [vmem:[#allocation76_spill] sm:$0xff] %v16187_v29  ;;  %17417 = vst [vmem:[#allocation77_spill] sm:$0xff] %v16189_v48 }
 0xb49   : > { %9674 = vmatpush1.bf16.msra.mxu0 %v16165_v35  ;;  %9715 = vmatpush1.bf16.msra.mxu1 %v16167_v42  ;;  %v8895_v35 = vld [vmem:[%s13312_s21 + $0x2b0] sm:$0xff]  ;;  %v8896_v42 = vld [vmem:[%s13312_s21 + $0x2b8] sm:$0xff]  ;;  %17418 = vst [vmem:[#allocation78_spill] sm:$0xff] %v16197_v11  ;;  %17419 = vst [vmem:[#allocation79_spill] sm:$0xff] %v16199_v54 }
 0xb4a   : > { %9675 = vmatprep.subr.bf16.mxu0 %v16171_v38  ;;  %9716 = vmatprep.subr.bf16.mxu1 %v16173_v46  ;;  %v16203_v4 = vcombine.high %v8891_v20, %v8895_v35  ;;  %v16205_v15 = vcombine.high %v8892_v1, %v8896_v42  ;;  %v8899_v46 = vld [vmem:[%s13312_s21 + $0x2d0] sm:$0xff]  ;;  %v8900_v38 = vld [vmem:[%s13312_s21 + $0x2d8] sm:$0xff]  ;;  %v16213_v62 = vcombine.low %v8891_v20, %v8895_v35 }
 0xb4b   : > { %v16215_v32 = vcombine.low %v8892_v1, %v8896_v42 }
 0xb4c   : > { %17420 = vst [vmem:[#allocation80_spill] sm:$0xff] %v16203_v4  ;;  %17421 = vst [vmem:[#allocation81_spill] sm:$0xff] %v16205_v15 }
 0xb4d   : > { %9676 = vmatpush1.bf16.msra.mxu0 %v16181_v44  ;;  %9717 = vmatpush1.bf16.msra.mxu1 %v16183_v17  ;;  %v8903_v44 = vld [vmem:[%s13312_s21 + $0x2f0] sm:$0xff]  ;;  %v8904_v17 = vld [vmem:[%s13312_s21 + $0x2f8] sm:$0xff]  ;;  %17422 = vst [vmem:[#allocation82_spill] sm:$0xff] %v16213_v62  ;;  %17423 = vst [vmem:[#allocation83_spill] sm:$0xff] %v16215_v32 }
 0xb4e   : > { %9677 = vmatprep.subr.bf16.mxu0 %v16187_v29  ;;  %9718 = vmatprep.subr.bf16.mxu1 %v16189_v48  ;;  %v16219_v28 = vcombine.high %v8899_v46, %v8903_v44  ;;  %v16221_v43 = vcombine.high %v8900_v38, %v8904_v17  ;;  %v8907_v48 = vld [vmem:[%s13312_s21 + $0x310] sm:$0xff]  ;;  %v8908_v29 = vld [vmem:[%s13312_s21 + $0x318] sm:$0xff]  ;;  %v16229_v1 = vcombine.low %v8899_v46, %v8903_v44 }
 0xb4f   : > { %v16231_v20 = vcombine.low %v8900_v38, %v8904_v17 }
 0xb50   : > { %17424 = vst [vmem:[#allocation84_spill] sm:$0xff] %v16219_v28  ;;  %17425 = vst [vmem:[#allocation85_spill] sm:$0xff] %v16221_v43 }
 0xb51   : > { %9678 = vmatpush1.bf16.msra.mxu0 %v16197_v11  ;;  %9719 = vmatpush1.bf16.msra.mxu1 %v16199_v54  ;;  %v8911_v11 = vld [vmem:[%s13312_s21 + $0x330] sm:$0xff]  ;;  %v8912_v54 = vld [vmem:[%s13312_s21 + $0x338] sm:$0xff]  ;;  %17426 = vst [vmem:[#allocation86_spill] sm:$0xff] %v16229_v1  ;;  %17427 = vst [vmem:[#allocation87_spill] sm:$0xff] %v16231_v20 }
 0xb52   : > { %9679 = vmatprep.subr.bf16.mxu0 %v16203_v4  ;;  %9720 = vmatprep.subr.bf16.mxu1 %v16205_v15  ;;  %v16235_v35 = vcombine.high %v8907_v48, %v8911_v11  ;;  %v16237_v42 = vcombine.high %v8908_v29, %v8912_v54  ;;  %v8915_v15 = vld [vmem:[%s13312_s21 + $0x350] sm:$0xff]  ;;  %v8916_v4 = vld [vmem:[%s13312_s21 + $0x358] sm:$0xff]  ;;  %v16245_v38 = vcombine.low %v8907_v48, %v8911_v11 }
 0xb53   : > { %v16247_v46 = vcombine.low %v8908_v29, %v8912_v54 }
 0xb54   : > { %17428 = vst [vmem:[#allocation88_spill] sm:$0xff] %v16235_v35  ;;  %17429 = vst [vmem:[#allocation89_spill] sm:$0xff] %v16237_v42 }
 0xb55   : > { %9680 = vmatpush1.bf16.msra.mxu0 %v16213_v62  ;;  %9721 = vmatpush1.bf16.msra.mxu1 %v16215_v32  ;;  %v8919_v62 = vld [vmem:[%s13312_s21 + $0x370] sm:$0xff]  ;;  %v8920_v32 = vld [vmem:[%s13312_s21 + $0x378] sm:$0xff] }
 0xb56   : > { %9681 = vmatprep.subr.bf16.mxu0 %v16219_v28  ;;  %9722 = vmatprep.subr.bf16.mxu1 %v16221_v43  ;;  %v16251_v44 = vcombine.high %v8915_v15, %v8919_v62  ;;  %v16253_v17 = vcombine.high %v8916_v4, %v8920_v32  ;;  %v8923_v43 = vld [vmem:[%s13312_s21 + $0x390] sm:$0xff]  ;;  %v8924_v28 = vld [vmem:[%s13312_s21 + $0x398] sm:$0xff]  ;;  %v16261_v29 = vcombine.low %v8915_v15, %v8919_v62 }
 0xb57   : > { %v16263_v48 = vcombine.low %v8916_v4, %v8920_v32  ;;  %v16285_v32 = vcombine.high %v8932_v52, %v8936_v39 }
 0xb58   : > { %17430 = vst [vmem:[#allocation90_spill] sm:$0xff] %v16253_v17  ;;  %17431 = vst [vmem:[#allocation91_spill] sm:$0xff] %v16261_v29 }
 0xb59   : > { %9682 = vmatpush1.bf16.msra.mxu0 %v16229_v1  ;;  %9723 = vmatpush1.bf16.msra.mxu1 %v16231_v20  ;;  %v8927_v1 = vld [vmem:[%s13312_s21 + $0x3b0] sm:$0xff]  ;;  %v8928_v20 = vld [vmem:[%s13312_s21 + $0x3b8] sm:$0xff] }
 0xb5a   : > { %9683 = vmatprep.subr.bf16.mxu0 %v16235_v35  ;;  %9724 = vmatprep.subr.bf16.mxu1 %v16237_v42  ;;  %v16267_v11 = vcombine.high %v8923_v43, %v8927_v1  ;;  %v16269_v54 = vcombine.high %v8924_v28, %v8928_v20  ;;  %v8931_v42 = vld [vmem:[%s13312_s21 + $0x3d0] sm:$0xff]  ;;  %v16277_v15 = vcombine.low %v8923_v43, %v8927_v1 }
 0xb5b   : > { %v8935_v35 = vld [vmem:[%s13312_s21 + $0x3f0] sm:$0xff]  ;;  %v16279_v4 = vcombine.low %v8924_v28, %v8928_v20 }
 0xb5c   : > { %v16283_v62 = vcombine.high %v8931_v42, %v8935_v35  ;;  %v8802_v43 = vld [vmem:[#allocation3 + $0x198] sm:$0xff] }
 0xb5d   : > { %9684 = vmatpush1.bf16.msra.mxu0 %v16245_v38  ;;  %9725 = vmatpush1.bf16.msra.mxu1 %v16247_v46 }
 0xb5e   : > { %9685 = vmatprep.subr.bf16.mxu0 %v16251_v44  ;;  %9726 = vmatprep.subr.bf16.mxu1 %v16253_v17  ;;  %v16289_v17 = vcombine.low %v8931_v42, %v8935_v35 }
 0xb61   : > { %9686 = vmatpush1.bf16.msra.mxu0 %v16261_v29  ;;  %9727 = vmatpush1.bf16.msra.mxu1 %v16263_v48  ;;  %v16291_v29 = vcombine.low %v8932_v52, %v8936_v39  ;;  %v8801_v39 = vld [vmem:[#allocation3 + $0x190] sm:$0xff]  ;;  %v8800_v52 = vld [vmem:[#allocation3 + $0x188] sm:$0xff] }
 0xb62   : > { %9687 = vmatprep.subr.bf16.mxu0 %v16267_v11  ;;  %9728 = vmatprep.subr.bf16.mxu1 %v16269_v54 }
 0xb65   : > { %9688 = vmatpush1.bf16.msra.mxu0 %v16277_v15  ;;  %9729 = vmatpush1.bf16.msra.mxu1 %v16279_v4 }
 0xb66   : > { %9689 = vmatprep.subr.bf16.mxu0 %v16283_v62  ;;  %9730 = vmatprep.subr.bf16.mxu1 %v16285_v32 }
 0xb69   : > { %9690 = vmatpush1.bf16.msra.mxu0 %v16289_v17  ;;  %9731 = vmatpush1.bf16.msra.mxu1 %v16291_v29 }
 0xb6a   : > { %10577 = vmatprep.subr.bf16.mxu0 %v15778_v10  ;;  %10618 = vmatprep.subr.bf16.mxu1 %v15785_v0  ;;  %v17433_v10 = vld [vmem:[#allocation18_spill] sm:$0xff]  ;;  %v17435_v0 = vld [vmem:[#allocation20_spill] sm:$0xff] }
 0xb6c   : > { %9692 = vmatmul.mubr.bf16.vlgmr.msra.gmra.mrb[52].mxu0 %v16055_v16  ;;  %9733 = vmatmul.mubr.bf16.vlgmr.msra.gmra.mrb[52].mxu1 %v16055_v16  ;;  %v8799_v16 = vld [vmem:[#allocation3 + $0x180] sm:$0xff] }
 0xb6d   : > { %10578 = vmatpush1.bf16.msra.mxu0 %v15776_v50  ;;  %10619 = vmatpush1.bf16.msra.mxu1 %v15783_v33  ;;  %v17432_v50 = vld [vmem:[#allocation17_spill] sm:$0xff]  ;;  %v17434_v33 = vld [vmem:[#allocation19_spill] sm:$0xff] }
 0xb6e   : > { %10579 = vmatprep.subr.bf16.mxu0 %v15787_v47  ;;  %10620 = vmatprep.subr.bf16.mxu1 %v15793_v45  ;;  %v17436_v47 = vld [vmem:[#allocation21_spill] sm:$0xff]  ;;  %v17437_v45 = vld [vmem:[#allocation22_spill] sm:$0xff] }
 0xb71   : > { %10580 = vmatpush1.bf16.msra.mxu0 %v15800_v23  ;;  %10621 = vmatpush1.bf16.msra.mxu1 %v15804_v56  ;;  %v17438_v23 = vld [vmem:[#allocation23_spill] sm:$0xff]  ;;  %v17439_v56 = vld [vmem:[#allocation24_spill] sm:$0xff] }
 0xb72   : > { %10581 = vmatprep.subr.bf16.mxu0 %v15806_v36  ;;  %10622 = vmatprep.subr.bf16.mxu1 %v15809_v9  ;;  %v17440_v36 = vld [vmem:[#allocation25_spill] sm:$0xff]  ;;  %v17441_v9 = vld [vmem:[#allocation26_spill] sm:$0xff] }
 0xb75   : > { %10582 = vmatpush1.bf16.msra.mxu0 %v15816_v34  ;;  %10623 = vmatpush1.bf16.msra.mxu1 %v15820_v41  ;;  %v17442_v34 = vld [vmem:[#allocation27_spill] sm:$0xff]  ;;  %v17443_v41 = vld [vmem:[#allocation28_spill] sm:$0xff] }
 0xb76   : > { %10583 = vmatprep.subr.bf16.mxu0 %v15822_v51  ;;  %10624 = vmatprep.subr.bf16.mxu1 %v15825_v12  ;;  %v17444_v51 = vld [vmem:[#allocation29_spill] sm:$0xff]  ;;  %v17445_v12 = vld [vmem:[#allocation30_spill] sm:$0xff] }
 0xb79   : > { %10584 = vmatpush1.bf16.msra.mxu0 %v15832_v2  ;;  %10625 = vmatpush1.bf16.msra.mxu1 %v15836_v14  ;;  %v17446_v2 = vld [vmem:[#allocation31_spill] sm:$0xff]  ;;  %v17447_v14 = vld [vmem:[#allocation34_spill] sm:$0xff] }
 0xb7a   : > { %10585 = vmatprep.subr.bf16.mxu0 %v15838_v27  ;;  %10626 = vmatprep.subr.bf16.mxu1 %v15841_v31  ;;  %v17448_v27 = vld [vmem:[#allocation32_spill] sm:$0xff]  ;;  %v17449_v31 = vld [vmem:[#allocation35_spill] sm:$0xff] }
 0xb7d   : > { %10586 = vmatpush1.bf16.msra.mxu0 %v15848_v63  ;;  %10627 = vmatpush1.bf16.msra.mxu1 %v15852_v5  ;;  %v17450_v63 = vld [vmem:[#allocation33_spill] sm:$0xff]  ;;  %v17451_v5 = vld [vmem:[#allocation36_spill] sm:$0xff] }
 0xb7e   : > { %10587 = vmatprep.subr.bf16.mxu0 %v15854_v55  ;;  %10628 = vmatprep.subr.bf16.mxu1 %v15857_v49  ;;  %v17452_v55 = vld [vmem:[#allocation37_spill] sm:$0xff]  ;;  %v17453_v49 = vld [vmem:[#allocation38_spill] sm:$0xff] }
 0xb81   : > { %10588 = vmatpush1.bf16.msra.mxu0 %v15864_v40  ;;  %10629 = vmatpush1.bf16.msra.mxu1 %v15868_v6  ;;  %v17454_v40 = vld [vmem:[#allocation40_spill] sm:$0xff]  ;;  %v17455_v6 = vld [vmem:[#allocation39_spill] sm:$0xff] }
 0xb82   : > { %10589 = vmatprep.subr.bf16.mxu0 %v15870_v60  ;;  %10630 = vmatprep.subr.bf16.mxu1 %v15873_v59  ;;  %v17456_v60 = vld [vmem:[#allocation41_spill] sm:$0xff]  ;;  %v17457_v59 = vld [vmem:[#allocation42_spill] sm:$0xff] }
 0xb85   : > { %10590 = vmatpush1.bf16.msra.mxu0 %v15880_v21  ;;  %10631 = vmatpush1.bf16.msra.mxu1 %v15884_v13  ;;  %v17458_v21 = vld [vmem:[#allocation43_spill] sm:$0xff]  ;;  %v17459_v13 = vld [vmem:[#allocation44_spill] sm:$0xff] }
 0xb86   : > { %10591 = vmatprep.subr.bf16.mxu0 %v15886_v26  ;;  %10632 = vmatprep.subr.bf16.mxu1 %v15889_v8  ;;  %v17460_v26 = vld [vmem:[#allocation45_spill] sm:$0xff] }
 0xb89   : > { %10592 = vmatpush1.bf16.msra.mxu0 %v15892_v53  ;;  %10633 = vmatpush1.bf16.msra.mxu1 %v15896_v18 }
 0xb8a   : > { %10593 = vmatprep.subr.bf16.mxu0 %v15903_v37  ;;  %10634 = vmatprep.subr.bf16.mxu1 %v15912_v57 }
 0xb8d   : > { %10594 = vmatpush1.bf16.msra.mxu0 %v15906_v3  ;;  %10635 = vmatpush1.bf16.msra.mxu1 %v15910_v22 }
 0xb8e   : > { %10595 = vmatprep.subr.bf16.mxu0 %v15919_v30  ;;  %10636 = vmatprep.subr.bf16.mxu1 %v17432_v50 }
 0xb91   : > { %10596 = vmatpush1.bf16.msra.mxu0 %v17433_v10  ;;  %10637 = vmatpush1.bf16.msra.mxu1 %v17434_v33 }
 0xb92   : > { %10597 = vmatprep.subr.bf16.mxu0 %v17435_v0  ;;  %10638 = vmatprep.subr.bf16.mxu1 %v17436_v47 }
 0xb95   : > { %10598 = vmatpush1.bf16.msra.mxu0 %v17437_v45  ;;  %10639 = vmatpush1.bf16.msra.mxu1 %v17438_v23 }
 0xb96   : > { %10599 = vmatprep.subr.bf16.mxu0 %v17439_v56  ;;  %10640 = vmatprep.subr.bf16.mxu1 %v17440_v36 }
 0xb99   : > { %10600 = vmatpush1.bf16.msra.mxu0 %v17441_v9  ;;  %10641 = vmatpush1.bf16.msra.mxu1 %v17442_v34 }
 0xb9a   : > { %10601 = vmatprep.subr.bf16.mxu0 %v17443_v41  ;;  %10642 = vmatprep.subr.bf16.mxu1 %v17444_v51  ;;  %v8803_v41 = vld [vmem:[#allocation3 + $0x1a0] sm:$0xff]  ;;  %v8805_v51 = vld [vmem:[#allocation3 + $0x1b0] sm:$0xff] }
 0xb9d   : > { %10602 = vmatpush1.bf16.msra.mxu0 %v17445_v12  ;;  %10643 = vmatpush1.bf16.msra.mxu1 %v17446_v2  ;;  %v8804_v12 = vld [vmem:[#allocation3 + $0x1a8] sm:$0xff]  ;;  %v8806_v2 = vld [vmem:[#allocation3 + $0x1b8] sm:$0xff] }
 0xb9e   : > { %10603 = vmatprep.subr.bf16.mxu0 %v17447_v14  ;;  %10644 = vmatprep.subr.bf16.mxu1 %v17448_v27 }
 0xba1   : > { %10604 = vmatpush1.bf16.msra.mxu0 %v17449_v31  ;;  %10645 = vmatpush1.bf16.msra.mxu1 %v17450_v63 }
 0xba2   : > { %10605 = vmatprep.subr.bf16.mxu0 %v17451_v5  ;;  %10646 = vmatprep.subr.bf16.mxu1 %v17452_v55 }
 0xba5   : > { %10606 = vmatpush1.bf16.msra.mxu0 %v17453_v49  ;;  %10647 = vmatpush1.bf16.msra.mxu1 %v17454_v40 }
 0xba6   : > { %10607 = vmatprep.subr.bf16.mxu0 %v17455_v6  ;;  %10648 = vmatprep.subr.bf16.mxu1 %v17456_v60 }
 0xba9   : > { %10608 = vmatpush1.bf16.msra.mxu0 %v17457_v59  ;;  %10649 = vmatpush1.bf16.msra.mxu1 %v17458_v21 }
 0xbaa   : > { %10659 = vmatprep.subr.bf16.mxu0 %v17459_v13  ;;  %10700 = vmatprep.subr.bf16.mxu1 %v17460_v26 }
 0xbff   : > { %v9611_v8 = vpop.f32.mrb[48].mxu0  ;;  %v9652_v53 = vpop.f32.mrb[48].mxu1 }
 0xc00   : > { %v9613_v18 = vpop.f32.mrb[49].mxu0  ;;  %v9654_v37 = vpop.f32.mrb[49].mxu1  ;;  %v9741_v28 = vadd.f32 %v9611_v8, %v8799_v16  ;;  %v9743_v1 = vadd.f32 %v9652_v53, %v8801_v39 }
 0xc01   : > { %v9615_v3 = vpop.f32.mrb[50].mxu0  ;;  %v9656_v22 = vpop.f32.mrb[50].mxu1  ;;  %v9742_v20 = vadd.f32 %v9613_v18, %v8800_v52  ;;  %v9744_v35 = vadd.f32 %v9654_v37, %v8802_v43 }
 0xc02   : > { %v9616_v57 = vpop.f32.mrb[51].mxu0  ;;  %v9657_v30 = vpop.f32.mrb[51].mxu1  ;;  %v12233_v42 = vmul.f32 -1.442695, %v9741_v28  ;;  %v12235_v50 = vmul.f32 -1.442695, %v9743_v1 }
 0xc03   : > { %v12234_v10 = vmul.f32 -1.442695, %v9742_v20  ;;  %v12236_v33 = vmul.f32 -1.442695, %v9744_v35 }
 0xc04   : > { %12739 = vpow2.f32 %v12233_v42 }
 0xc05   : > { %12741 = vpow2.f32 %v12235_v50 }
 0xc06   : > { %12743 = vpow2.f32 %v12234_v10 }
 0xc07   : > { %12745 = vpow2.f32 %v12236_v33 }
 0xc0e   : > { %v12740_v0 = vpop.eup %12739 }
 0xc0f   : > { %v12742_v47 = vpop.eup %12741  ;;  %v9767_v56 = vadd.f32 1.0, %v12740_v0 }
 0xc10   : > { %v12744_v45 = vpop.eup %12743  ;;  %v9769_v36 = vadd.f32 1.0, %v12742_v47 }
 0xc11   : > { %v12746_v23 = vpop.eup %12745  ;;  %v9768_v9 = vadd.f32 1.0, %v12744_v45  ;;  %12747 = vrcp.f32 %v9767_v56  ;;  %v17461_v45 = vld [vmem:[#allocation46_spill] sm:$0xff]  ;;  %v17463_v56 = vld [vmem:[#allocation48_spill] sm:$0xff] }
 0xc12   : > { %v9770_v34 = vadd.f32 1.0, %v12746_v23  ;;  %12749 = vrcp.f32 %v9769_v36  ;;  %v17462_v23 = vld [vmem:[#allocation47_spill] sm:$0xff]  ;;  %v17464_v36 = vld [vmem:[#allocation49_spill] sm:$0xff] }
 0xc13   : > { %12751 = vrcp.f32 %v9768_v9  ;;  %v17465_v9 = vld [vmem:[#allocation50_spill] sm:$0xff] }
 0xc14   : > { %12753 = vrcp.f32 %v9770_v34  ;;  %v17466_v34 = vld [vmem:[#allocation51_spill] sm:$0xff] }
 0xc1b   : > { %v12748_v8 = vpop.eup %12747 }
 0xc1c   : > { %v12750_v53 = vpop.eup %12749 }
 0xc1d   : > { %v12752_v18 = vpop.eup %12751  ;;  %v9787_v57 = vmul.f32 %v12750_v53, %v16045_v61  ;;  %v17490_v53 = vld [vmem:[#allocation75_spill] sm:$0xff] }
 0xc1e   : > { %v12754_v37 = vpop.eup %12753 }
 0xc1f   : > { %v9788_v39 = vmul.f32 %v12754_v37, %v16047_v24  ;;  %v17492_v37 = vld [vmem:[#allocation77_spill] sm:$0xff] }
 0xc3f   : > { %v9693_v14 = vpop.f32.mrb[52].mxu0  ;;  %v9734_v27 = vpop.f32.mrb[52].mxu1 }
 0xc40   : > { %v9745_v31 = vadd.f32 %v9693_v14, %v8803_v41  ;;  %v9747_v63 = vadd.f32 %v9734_v27, %v8805_v51  ;;  %v9695_v5 = vpop.f32.mrb[53].mxu0  ;;  %v9736_v55 = vpop.f32.mrb[53].mxu1  ;;  %v17469_v41 = vld [vmem:[#allocation54_spill] sm:$0xff]  ;;  %v17472_v51 = vld [vmem:[#allocation57_spill] sm:$0xff]  ;;  %v17475_v14 = vld [vmem:[#allocation60_spill] sm:$0xff] }
 0xc41   : > { %v9746_v49 = vadd.f32 %v9695_v5, %v8804_v12  ;;  %v9748_v40 = vadd.f32 %v9736_v55, %v8806_v2  ;;  %v9697_v6 = vpop.f32.mrb[54].mxu0  ;;  %v9738_v60 = vpop.f32.mrb[54].mxu1  ;;  %v17473_v12 = vld [vmem:[#allocation58_spill] sm:$0xff]  ;;  %v17474_v2 = vld [vmem:[#allocation59_spill] sm:$0xff]  ;;  %v17476_v27 = vld [vmem:[#allocation61_spill] sm:$0xff] }
 0xc42   : > { %v12237_v59 = vmul.f32 -1.442695, %v9745_v31  ;;  %12755 = vtanh.f32 %v9747_v63  ;;  %v9698_v21 = vpop.f32.mrb[55].mxu0  ;;  %v9739_v13 = vpop.f32.mrb[55].mxu1  ;;  %v17477_v31 = vld [vmem:[#allocation62_spill] sm:$0xff]  ;;  %v17478_v63 = vld [vmem:[#allocation63_spill] sm:$0xff] }
 0xc43   : > { %v12238_v26 = vmul.f32 -1.442695, %v9746_v49  ;;  %12757 = vtanh.f32 %v9748_v40  ;;  %v17479_v5 = vld [vmem:[#allocation64_spill] sm:$0xff]  ;;  %v17480_v55 = vld [vmem:[#allocation65_spill] sm:$0xff]  ;;  %v17481_v49 = vld [vmem:[#allocation66_spill] sm:$0xff] }
 0xc44   : > { %12759 = vpow2.f32 %v12237_v59  ;;  %v17482_v40 = vld [vmem:[#allocation67_spill] sm:$0xff]  ;;  %v17483_v6 = vld [vmem:[#allocation68_spill] sm:$0xff]  ;;  %v17484_v60 = vld [vmem:[#allocation69_spill] sm:$0xff] }
 0xc45   : > { %12761 = vpow2.f32 %v12238_v26  ;;  %v17485_v59 = vld [vmem:[#allocation70_spill] sm:$0xff]  ;;  %v17486_v21 = vld [vmem:[#allocation71_spill] sm:$0xff]  ;;  %v17487_v13 = vld [vmem:[#allocation72_spill] sm:$0xff] }
 0xc46   : > { %v17488_v26 = vld [vmem:[#allocation73_spill] sm:$0xff] }
 0xc4c   : > { %v12756_v3 = vpop.eup %12755 }
 0xc4d   : > { %v12758_v22 = vpop.eup %12757  ;;  %v9789_v30 = vmul.f32 %v12756_v3, %v12748_v8  ;;  %v17489_v8 = vld [vmem:[#allocation74_spill] sm:$0xff] }
 0xc4e   : > { %v12760_v16 = vpop.eup %12759  ;;  %v9790_v52 = vmul.f32 %v12758_v22, %v12752_v18  ;;  %v17491_v18 = vld [vmem:[#allocation76_spill] sm:$0xff]  ;;  %v17493_v3 = vld [vmem:[#allocation78_spill] sm:$0xff]  ;;  %v17494_v22 = vld [vmem:[#allocation79_spill] sm:$0xff] }
 0xc4f   : > { %v12762_v28 = vpop.eup %12761  ;;  %v9771_v43 = vadd.f32 1.0, %v12760_v16  ;;  %v16367_v1 = vadd.f32 %v9789_v30, %v9787_v57  ;;  %v17495_v57 = vld [vmem:[#allocation80_spill] sm:$0xff]  ;;  %v17496_v30 = vld [vmem:[#allocation81_spill] sm:$0xff]  ;;  %v17497_v16 = vld [vmem:[#allocation82_spill] sm:$0xff] }
 0xc50   : > { %v9772_v20 = vadd.f32 1.0, %v12762_v28  ;;  %v16369_v35 = vadd.f32 %v9790_v52, %v9788_v39  ;;  %v17498_v39 = vld [vmem:[#allocation83_spill] sm:$0xff]  ;;  %v17499_v52 = vld [vmem:[#allocation84_spill] sm:$0xff]  ;;  %v17500_v28 = vld [vmem:[#allocation85_spill] sm:$0xff] }
 0xc51   : > { %12763 = vrcp.f32 %v9771_v43  ;;  %v17501_v43 = vld [vmem:[#allocation86_spill] sm:$0xff] }
 0xc52   : > { %12765 = vtanh.f32 %v16367_v1 }
 0xc53   : > { %12767 = vrcp.f32 %v9772_v20  ;;  %v17502_v20 = vld [vmem:[#allocation87_spill] sm:$0xff] }
 0xc54   : > { %12769 = vtanh.f32 %v16369_v35 }
 0xc5b   : > { %v12764_v42 = vpop.eup %12763 }
 0xc5c   : > { %v12766_v61 = vpop.eup %12765 }
 0xc5d   : > { %v12768_v50 = vpop.eup %12767  ;;  %v9795_v10 = vmul.f32 %v12766_v61, %v12764_v42  ;;  %v17503_v42 = vld [vmem:[#allocation88_spill] sm:$0xff]  ;;  %v17504_v61 = vld [vmem:[#allocation89_spill] sm:$0xff] }
 0xc5e   : > { %v12770_v33 = vpop.eup %12769 }
 0xc5f   : > { %v9796_v24 = vmul.f32 %v12770_v33, %v12768_v50  ;;  %9797 = vst [vmem:[#allocation2 + $0x60] sm:$0xff] %v9795_v10  ;;  %v16373_v47 = vpack.c.bf16 %v9795_v10, %v9795_v10  ;;  %v17505_v50 = vld [vmem:[#allocation90_spill] sm:$0xff]  ;;  %v17506_v10 = vld [vmem:[#allocation91_spill] sm:$0xff] }
 0xc60   : > { %v9799_v33 = vld [vmem:[#allocation3 + $0x1c0] sm:$0xff] }
 0xc61   : > { %9798 = vst [vmem:[#allocation2 + $0x68] sm:$0xff] %v9796_v24  ;;  %v9808_v0 = vpack.c.bf16 %v9796_v24, %v9796_v24  ;;  %v9800_v24 = vld [vmem:[#allocation3 + $0x1c8] sm:$0xff] }
 0xc63   : > { %10609 = vmatprep.mubr.bf16.mxu0 %v9808_v0  ;;  %10650 = vmatprep.mubr.bf16.mxu1 %v9808_v0 }
 0xc64   : > { %10610 = vmatmul.mubr.bf16.vlgmr.msra.gmra.mrb[56].mxu0 %v16373_v47  ;;  %10651 = vmatmul.mubr.bf16.vlgmr.msra.gmra.mrb[56].mxu1 %v16373_v47 }
 0xc65   : > { %10660 = vmatpush1.bf16.msra.mxu0 %v16035_v58  ;;  %10701 = vmatpush1.bf16.msra.mxu1 %v16037_v7  ;;  %v17467_v58 = vld [vmem:[#allocation52_spill] sm:$0xff]  ;;  %v17468_v7 = vld [vmem:[#allocation53_spill] sm:$0xff] }
 0xc66   : > { %10691 = vmatprep.mubr.bf16.mxu0 %v9808_v0  ;;  %10732 = vmatprep.mubr.bf16.mxu1 %v9808_v0  ;;  %v9802_v0 = vld [vmem:[#allocation3 + $0x1d8] sm:$0xff] }
 0xc67   : > { %10661 = vmatprep.subr.bf16.mxu0 %v16058_v25  ;;  %10702 = vmatprep.subr.bf16.mxu1 %v16060_v19  ;;  %v17470_v25 = vld [vmem:[#allocation55_spill] sm:$0xff]  ;;  %v17471_v19 = vld [vmem:[#allocation56_spill] sm:$0xff] }
 0xc69   : > { %10662 = vmatpush1.bf16.msra.mxu0 %v17461_v45  ;;  %10703 = vmatpush1.bf16.msra.mxu1 %v17462_v23 }
 0xc6a   : > { %10663 = vmatprep.subr.bf16.mxu0 %v17463_v56  ;;  %10704 = vmatprep.subr.bf16.mxu1 %v17464_v36 }
 0xc6d   : > { %10664 = vmatpush1.bf16.msra.mxu0 %v17465_v9  ;;  %10705 = vmatpush1.bf16.msra.mxu1 %v17466_v34 }
 0xc6e   : > { %10665 = vmatprep.subr.bf16.mxu0 %v17467_v58  ;;  %10706 = vmatprep.subr.bf16.mxu1 %v17468_v7 }
 0xc71   : > { %10666 = vmatpush1.bf16.msra.mxu0 %v17469_v41  ;;  %10707 = vmatpush1.bf16.msra.mxu1 %v17470_v25 }
 0xc72   : > { %10667 = vmatprep.subr.bf16.mxu0 %v17471_v19  ;;  %10708 = vmatprep.subr.bf16.mxu1 %v17472_v51 }
 0xc75   : > { %10668 = vmatpush1.bf16.msra.mxu0 %v17473_v12  ;;  %10709 = vmatpush1.bf16.msra.mxu1 %v17474_v2  ;;  %v9803_v12 = vld [vmem:[#allocation3 + $0x1e0] sm:$0xff]  ;;  %v9805_v2 = vld [vmem:[#allocation3 + $0x1f0] sm:$0xff] }
 0xc76   : > { %10669 = vmatprep.subr.bf16.mxu0 %v17475_v14  ;;  %10710 = vmatprep.subr.bf16.mxu1 %v17476_v27  ;;  %v9804_v14 = vld [vmem:[#allocation3 + $0x1e8] sm:$0xff]  ;;  %v9806_v27 = vld [vmem:[#allocation3 + $0x1f8] sm:$0xff] }
 0xc79   : > { %10670 = vmatpush1.bf16.msra.mxu0 %v17477_v31  ;;  %10711 = vmatpush1.bf16.msra.mxu1 %v17478_v63 }
 0xc7a   : > { %10671 = vmatprep.subr.bf16.mxu0 %v17479_v5  ;;  %10712 = vmatprep.subr.bf16.mxu1 %v17480_v55 }
 0xc7d   : > { %10672 = vmatpush1.bf16.msra.mxu0 %v17481_v49  ;;  %10713 = vmatpush1.bf16.msra.mxu1 %v17482_v40 }
 0xc7e   : > { %10673 = vmatprep.subr.bf16.mxu0 %v17483_v6  ;;  %10714 = vmatprep.subr.bf16.mxu1 %v17484_v60 }
 0xc81   : > { %10674 = vmatpush1.bf16.msra.mxu0 %v17485_v59  ;;  %10715 = vmatpush1.bf16.msra.mxu1 %v17486_v21 }
 0xc82   : > { %10675 = vmatprep.subr.bf16.mxu0 %v17487_v13  ;;  %10716 = vmatprep.subr.bf16.mxu1 %v17488_v26 }
 0xc85   : > { %10676 = vmatpush1.bf16.msra.mxu0 %v17489_v8  ;;  %10717 = vmatpush1.bf16.msra.mxu1 %v17490_v53 }
 0xc86   : > { %10677 = vmatprep.subr.bf16.mxu0 %v17491_v18  ;;  %10718 = vmatprep.subr.bf16.mxu1 %v17492_v37 }
 0xc89   : > { %10678 = vmatpush1.bf16.msra.mxu0 %v17493_v3  ;;  %10719 = vmatpush1.bf16.msra.mxu1 %v17494_v22 }
 0xc8a   : > { %10679 = vmatprep.subr.bf16.mxu0 %v17495_v57  ;;  %10720 = vmatprep.subr.bf16.mxu1 %v17496_v30 }
 0xc8d   : > { %10680 = vmatpush1.bf16.msra.mxu0 %v17497_v16  ;;  %10721 = vmatpush1.bf16.msra.mxu1 %v17498_v39 }
 0xc8e   : > { %10681 = vmatprep.subr.bf16.mxu0 %v17499_v52  ;;  %10722 = vmatprep.subr.bf16.mxu1 %v17500_v28 }
 0xc91   : > { %10682 = vmatpush1.bf16.msra.mxu0 %v17501_v43  ;;  %10723 = vmatpush1.bf16.msra.mxu1 %v17502_v20 }
 0xc92   : > { %10683 = vmatprep.subr.bf16.mxu0 %v17503_v42  ;;  %10724 = vmatprep.subr.bf16.mxu1 %v17504_v61 }
 0xc95   : > { %10684 = vmatpush1.bf16.msra.mxu0 %v16245_v38  ;;  %10725 = vmatpush1.bf16.msra.mxu1 %v16247_v46 }
 0xc96   : > { %10685 = vmatprep.subr.bf16.mxu0 %v16251_v44  ;;  %10726 = vmatprep.subr.bf16.mxu1 %v17505_v50 }
 0xc99   : > { %10686 = vmatpush1.bf16.msra.mxu0 %v17506_v10  ;;  %10727 = vmatpush1.bf16.msra.mxu1 %v16263_v48 }
 0xc9a   : > { %10687 = vmatprep.subr.bf16.mxu0 %v16267_v11  ;;  %10728 = vmatprep.subr.bf16.mxu1 %v16269_v54 }
 0xc9d   : > { %10688 = vmatpush1.bf16.msra.mxu0 %v16277_v15  ;;  %10729 = vmatpush1.bf16.msra.mxu1 %v16279_v4 }
 0xc9e   : > { %10689 = vmatprep.subr.bf16.mxu0 %v16283_v62  ;;  %10730 = vmatprep.subr.bf16.mxu1 %v16285_v32  ;;  %v9801_v62 = vld [vmem:[#allocation3 + $0x1d0] sm:$0xff] }
 0xca1   : > { %10690 = vmatpush1.bf16.msra.mxu0 %v16289_v17  ;;  %10731 = vmatpush1.bf16.msra.mxu1 %v16291_v29 }
 0xca4   : > { %10692 = vmatmul.mubr.bf16.vlgmr.msra.gmra.mrb[60].mxu0 %v16373_v47  ;;  %10733 = vmatmul.mubr.bf16.vlgmr.msra.gmra.mrb[60].mxu1 %v16373_v47 }
 0xd37   : > { %v10611_v38 = vpop.f32.mrb[56].mxu0  ;;  %v10652_v46 = vpop.f32.mrb[56].mxu1 }
 0xd38   : > { %v10613_v44 = vpop.f32.mrb[57].mxu0  ;;  %v10654_v48 = vpop.f32.mrb[57].mxu1  ;;  %v10741_v32 = vadd.f32 %v10611_v38, %v9799_v33  ;;  %v10743_v17 = vadd.f32 %v10652_v46, %v9801_v62  ;;  %v10804_v33 = vld [vmem:[%s16574_s5 + $0x8] sm:$0xff] (!%p12373_p12)  ;;  %v10821_v62 = vld [vmem:[%s16574_s5 + $0x90] sm:$0xff] (!%p12373_p12) }
 0xd39   : > { %v10615_v11 = vpop.f32.mrb[58].mxu0  ;;  %v10656_v54 = vpop.f32.mrb[58].mxu1  ;;  %v10742_v45 = vadd.f32 %v10613_v44, %v9800_v24  ;;  %v10744_v29 = vadd.f32 %v10654_v48, %v9802_v0  ;;  %v10822_v24 = vld [vmem:[%s16574_s5 + $0x98] sm:$0xff] (!%p12373_p12) }
 0xd3a   : > { %v10616_v15 = vpop.f32.mrb[59].mxu0  ;;  %v10657_v4 = vpop.f32.mrb[59].mxu1  ;;  %v12367_v23 = vmul.f32 -1.442695, %v10741_v32  ;;  %v12369_v56 = vmul.f32 -1.442695, %v10743_v17  ;;  %v12420_v0 = vpack.c.bf16 (!%p12373_p12), %v10822_v24, %v10821_v62 }
 0xd3b   : > { %v12368_v36 = vmul.f32 -1.442695, %v10742_v45  ;;  %v12370_v47 = vmul.f32 -1.442695, %v10744_v29  ;;  %v10820_v54 = vld [vmem:[%s16574_s5 + $0x88] sm:$0xff] (!%p12373_p12)  ;;  %v10803_v15 = vld [vmem:[%s16574_s5] sm:$0xff] (!%p12373_p12) }
 0xd3c   : > { %12771 = vpow2.f32 %v12367_v23  ;;  %v12418_v32 = vpack.c.bf16 (!%p12373_p12), %v10804_v33, %v10803_v15  ;;  %v10805_v17 = vld [vmem:[%s16574_s5 + $0x10] sm:$0xff] (!%p12373_p12)  ;;  %v10806_v45 = vld [vmem:[%s16574_s5 + $0x18] sm:$0xff] (!%p12373_p12)  ;;  %v10823_v29 = vld [vmem:[%s16574_s5 + $0xa0] sm:$0xff] (!%p12373_p12) }
 0xd3d   : > { %12773 = vpow2.f32 %v12369_v56  ;;  %v10824_v23 = vld [vmem:[%s16574_s5 + $0xa8] sm:$0xff] (!%p12373_p12)  ;;  %v12422_v56 = vpack.c.bf16 (!%p12373_p12), %v10806_v45, %v10805_v17 }
 0xd3e   : > { %12775 = vpow2.f32 %v12368_v36  ;;  %v12424_v36 = vpack.c.bf16 (!%p12373_p12), %v10824_v23, %v10823_v29 }
 0xd3f   : > { %12777 = vpow2.f32 %v12370_v47  ;;  %v10807_v47 = vld [vmem:[%s16574_s5 + $0x20] sm:$0xff] (!%p12373_p12) }
 0xd46   : > { %v12772_v9 = vpop.eup %12771 }
 0xd47   : > { %v12774_v34 = vpop.eup %12773  ;;  %v10767_v41 = vadd.f32 1.0, %v12772_v9  ;;  %v10808_v9 = vld [vmem:[%s16574_s5 + $0x28] sm:$0xff] (!%p12373_p12) }
 0xd48   : > { %v12776_v58 = vpop.eup %12775  ;;  %v10769_v25 = vadd.f32 1.0, %v12774_v34  ;;  %v10825_v34 = vld [vmem:[%s16574_s5 + $0xb0] sm:$0xff] (!%p12373_p12) }
 0xd49   : > { %v12778_v7 = vpop.eup %12777  ;;  %v10768_v19 = vadd.f32 1.0, %v12776_v58  ;;  %12779 = vrcp.f32 %v10767_v41  ;;  %v10826_v58 = vld [vmem:[%s16574_s5 + $0xb8] sm:$0xff] (!%p12373_p12) }
 0xd4a   : > { %v10770_v51 = vadd.f32 1.0, %v12778_v7  ;;  %12781 = vrcp.f32 %v10769_v25  ;;  %v12426_v7 = vpack.c.bf16 (!%p12373_p12), %v10808_v9, %v10807_v47  ;;  %v12428_v41 = vpack.c.bf16 (!%p12373_p12), %v10826_v58, %v10825_v34  ;;  %v10809_v25 = vld [vmem:[%s16574_s5 + $0x30] sm:$0xff] (!%p12373_p12) }
 0xd4b   : > { %12783 = vrcp.f32 %v10768_v19  ;;  %v10810_v19 = vld [vmem:[%s16574_s5 + $0x38] sm:$0xff] (!%p12373_p12) }
 0xd4c   : > { %12785 = vrcp.f32 %v10770_v51  ;;  %v10827_v51 = vld [vmem:[%s16574_s5 + $0xc0] sm:$0xff] (!%p12373_p12) }
 0xd53   : > { %v12780_v18 = vpop.eup %12779 }
 0xd54   : > { %v12782_v37 = vpop.eup %12781 }
 0xd55   : > { %v12784_v3 = vpop.eup %12783  ;;  %v10787_v16 = vmul.f32 %v12782_v37, %v16367_v1 }
 0xd56   : > { %v12786_v22 = vpop.eup %12785 }
 0xd57   : > { %v10788_v28 = vmul.f32 %v12786_v22, %v16369_v35  ;;  %v10819_v35 = vld [vmem:[%s16574_s5 + $0x80] sm:$0xff] (!%p12373_p12)  ;;  %v10817_v22 = vld [vmem:[%s16574_s5 + $0x70] sm:$0xff] (!%p12373_p12) }
 0xd58   : > { %v12416_v4 = vpack.c.bf16 (!%p12373_p12), %v10820_v54, %v10819_v35 }
 0xd5a   : > { %12417 = vmatprep.subr.bf16.mxu0 (!%p12373_p12), %v12416_v4 }
 0xd5b   : > { %12419 = vmatpush3.bf16.msra.mxu0 (!%p12373_p12), %v12418_v32 }
 0xd5c   : > { %12421 = vmatprep.subr.bf16.mxu0 (!%p12373_p12), %v12420_v0 }
 0xd5f   : > { %12423 = vmatpush3.bf16.msra.mxu0 (!%p12373_p12), %v12422_v56 }
 0xd60   : > { %12425 = vmatprep.subr.bf16.mxu0 (!%p12373_p12), %v12424_v36 }
 0xd63   : > { %12427 = vmatpush3.bf16.msra.mxu0 (!%p12373_p12), %v12426_v7 }
 0xd64   : > { %12429 = vmatprep.subr.bf16.mxu0 (!%p12373_p12), %v12428_v41 }
 0xd77   : > { %v10693_v31 = vpop.f32.mrb[60].mxu0  ;;  %v10734_v63 = vpop.f32.mrb[60].mxu1 }
 0xd78   : > { %v10745_v5 = vadd.f32 %v10693_v31, %v9803_v12  ;;  %v10747_v55 = vadd.f32 %v10734_v63, %v9805_v2  ;;  %v10695_v49 = vpop.f32.mrb[61].mxu0  ;;  %v10736_v40 = vpop.f32.mrb[61].mxu1  ;;  %v10828_v12 = vld [vmem:[%s16574_s5 + $0xc8] sm:$0xff] (!%p12373_p12)  ;;  %v12430_v2 = vpack.c.bf16 (!%p12373_p12), %v10810_v19, %v10809_v25  ;;  %v10829_v63 = vld [vmem:[%s16574_s5 + $0xd0] sm:$0xff] (!%p12373_p12) }
 0xd79   : > { %v10746_v6 = vadd.f32 %v10695_v49, %v9804_v14  ;;  %v10748_v60 = vadd.f32 %v10736_v40, %v9806_v27  ;;  %v10697_v59 = vpop.f32.mrb[62].mxu0  ;;  %v10738_v21 = vpop.f32.mrb[62].mxu1  ;;  %v12432_v14 = vpack.c.bf16 (!%p12373_p12), %v10828_v12, %v10827_v51  ;;  %v10811_v27 = vld [vmem:[%s16574_s5 + $0x40] sm:$0xff] (!%p12373_p12)  ;;  %v10812_v31 = vld [vmem:[%s16574_s5 + $0x48] sm:$0xff] (!%p12373_p12)  ;;  %v10813_v40 = vld [vmem:[%s16574_s5 + $0x50] sm:$0xff] (!%p12373_p12) }
 0xd7a   : > { %v12371_v13 = vmul.f32 -1.442695, %v10745_v5  ;;  %12787 = vtanh.f32 %v10747_v55  ;;  %v10698_v26 = vpop.f32.mrb[63].mxu0  ;;  %v10739_v8 = vpop.f32.mrb[63].mxu1  ;;  %v10830_v5 = vld [vmem:[%s16574_s5 + $0xd8] sm:$0xff] (!%p12373_p12)  ;;  %12431 = vmatpush3.bf16.msra.mxu0 (!%p12373_p12), %v12430_v2  ;;  %v12434_v55 = vpack.c.bf16 (!%p12373_p12), %v10812_v31, %v10811_v27  ;;  %v10832_v59 = vld [vmem:[%s16574_s5 + $0xe8] sm:$0xff] (!%p12373_p12) }
 0xd7b   : > { %v12372_v53 = vmul.f32 -1.442695, %v10746_v6  ;;  %12789 = vtanh.f32 %v10748_v60  ;;  %12433 = vmatprep.subr.bf16.mxu0 (!%p12373_p12), %v12432_v14  ;;  %v12436_v49 = vpack.c.bf16 (!%p12373_p12), %v10830_v5, %v10829_v63  ;;  %v10814_v6 = vld [vmem:[%s16574_s5 + $0x58] sm:$0xff] (!%p12373_p12)  ;;  %v10831_v60 = vld [vmem:[%s16574_s5 + $0xe0] sm:$0xff] (!%p12373_p12)  ;;  %v10816_v8 = vld [vmem:[%s16574_s5 + $0x68] sm:$0xff] (!%p12373_p12) }
 0xd7c   : > { %12791 = vpow2.f32 %v12371_v13  ;;  %v12438_v21 = vpack.c.bf16 (!%p12373_p12), %v10814_v6, %v10813_v40  ;;  %v12440_v13 = vpack.c.bf16 (!%p12373_p12), %v10832_v59, %v10831_v60  ;;  %v10815_v26 = vld [vmem:[%s16574_s5 + $0x60] sm:$0xff] (!%p12373_p12) }
 0xd7d   : > { %12793 = vpow2.f32 %v12372_v53  ;;  %v10833_v53 = vld [vmem:[%s16574_s5 + $0xf0] sm:$0xff] (!%p12373_p12)  ;;  %v12442_v37 = vpack.c.bf16 (!%p12373_p12), %v10816_v8, %v10815_v26 }
 0xd7e   : > { %12435 = vmatpush3.bf16.msra.mxu0 (!%p12373_p12), %v12434_v55 }
 0xd7f   : > { %12437 = vmatprep.subr.bf16.mxu0 (!%p12373_p12), %v12436_v49 }
 0xd82   : > { %12439 = vmatpush3.bf16.msra.mxu0 (!%p12373_p12), %v12438_v21 }
 0xd83   : > { %12441 = vmatprep.subr.bf16.mxu0 (!%p12373_p12), %v12440_v13 }
 0xd84   : > { %v12788_v57 = vpop.eup %12787 }
 0xd85   : > { %v12790_v30 = vpop.eup %12789  ;;  %v10789_v39 = vmul.f32 %v12788_v57, %v12780_v18  ;;  %v10834_v18 = vld [vmem:[%s16574_s5 + $0xf8] sm:$0xff] (!%p12373_p12) }
 0xd86   : > { %v12792_v52 = vpop.eup %12791  ;;  %v10790_v43 = vmul.f32 %v12790_v30, %v12784_v3  ;;  %v12444_v3 = vpack.c.bf16 (!%p12373_p12), %v10834_v18, %v10833_v53  ;;  %v10818_v57 = vld [vmem:[%s16574_s5 + $0x78] sm:$0xff] (!%p12373_p12)  ;;  %12443 = vmatpush3.bf16.msra.mxu0 (!%p12373_p12), %v12442_v37 }
 0xd87   : > { %v12794_v20 = vpop.eup %12793  ;;  %v10771_v42 = vadd.f32 1.0, %v12792_v52  ;;  %v10791_v61 = vadd.f32 %v10789_v39, %v10787_v16  ;;  %v12446_v30 = vpack.c.bf16 (!%p12373_p12), %v10818_v57, %v10817_v22  ;;  %v12374_v39 = vld [vmem:[#allocation4] ss:$0 sm:$0xff] (!%p12373_p12) }
 0xd88   : > { %v10772_v50 = vadd.f32 1.0, %v12794_v20  ;;  %v10792_v10 = vadd.f32 %v10790_v43, %v10788_v28  ;;  %12445 = vmatprep.subr.bf16.mxu0 (!%p12373_p12), %v12444_v3 }
 0xd89   : > { %12795 = vrcp.f32 %v10771_v42 }
 0xd8a   : > { %12797 = vtanh.f32 %v10791_v61  ;;  %12447 = vmatpush3.bf16.msra.mxu0 (!%p12373_p12), %v12446_v30 }
 0xd8b   : > { %12799 = vrcp.f32 %v10772_v50 }
 0xd8c   : > { %12801 = vtanh.f32 %v10792_v10 }
 0xd93   : > { %v12796_v38 = vpop.eup %12795  ;;  %10802 = sbr.rel (%p12373_p12) target bundleno = 3726 (0xe8e), region = 76 }
 0xd94   : > { %v12798_v46 = vpop.eup %12797 }
 0xd95   : > { %v12800_v44 = vpop.eup %12799  ;;  %v16443_v48 = vmul.f32 %v12798_v46, %v12796_v38 }
 0xd96   : > { %v12802_v1 = vpop.eup %12801 }
 0xd97   : > { %10797 = vst [vmem:[#allocation2 + $0x70] sm:$0xff] %v16443_v48  ;;  %v10796_v11 = vmul.f32 %v12802_v1, %v12800_v44 }
 0xd99   : > { %10798 = vst [vmem:[#allocation2 + $0x78] sm:$0xff] %v10796_v11  ;;  %10906 = vmatprep.mubr.f32.mxu0 (!%p12373_p12), %v10796_v11 }
 0xd9a   : > { %10907 = vmatmul.mubr.f32.vlgmr.msra.gmra.mrb[0].mxu0 %v16443_v48 }
 0xe6d   : > { %v12413_v16 = vpop.f32.mrb[0].mxu0 }
 0xe6e   : > { %v12414_v52 = vpop.f32.mrb[1].mxu0 }
 0xe6f   : > { %v12415_v28 = vadd.f32 %v12414_v52, %v12413_v16 }
 0xe71   : > { %v10909_v43 = vadd.f32 %v12415_v28, %v12374_v39 }
 0xe73   : > { %v12375_v20 = vmul.f32 -1.442695, %v10909_v43 }
 0xe75   : > { %12803 = vpow2.f32 %v12375_v20 }
 0xe7f   : > { %v12804_v42 = vpop.eup %12803 }
 0xe80   : > { %v10915_v61 = vadd.f32 1.0, %v12804_v42 }
 0xe82   : > { %12805 = vrcp.f32 %v10915_v61 }
 0xe8c   : > { %v12806_v50 = vpop.eup %12805 }
 0xe8d   : > { %10919 = vst.msk [vmem:[%s16576_s7] sm:$0x3] %vm10918_vm0, %v12806_v50 }
 0xe8e PF: > { %s17507_s13 = sld [smem:[#allocation16_spill]]  ;;  %p23_p8 = scmp.ge.s32.totalorder %s13086_s10, 5  }
 0xe8f   : > { %s17508_s26 = smov %s12975_s27  ;;  %s17509_s27 = smov %s12979_s28 }
 0xe90   : > { %s17510_s28 = smov %s13196_s19  ;;  %s17511_s29 = smov %s12987_s30 }
 0xe91   : > { %s17512_s30 = smov %s12991_s8  ;;  %s17514_s9 = smov %s13086_s10 }
 0xe92   :  { %25 = sbr.rel (!%p23_p8) target bundleno = 12 (0xc), region = 125 }
 0xe94   : > { %s17513_s8 = smov %s17507_s13 }
 0xe99   :  { %10931 = vsyncpa [#allocation6], 1 }
 0xe9a   :  { %10933 = vsyncpa [#allocation6 + $0x1], 1 }
 0xe9b   :  { %10934 = vsyncpa [#allocation8], 1 }
 0xe9c   :  { %10936 = vsyncpa [#allocation8 + $0x1], 1 }
 0xe9d   :  { %10937 = vsyncpa [#allocation11], 1 }
 0xe9e   :  { %10939 = vsyncpa [#allocation11 + $0x1], 1 }

</bundles_post_ra>
